<compile_context>
chip_gen: v7x
topology: tpu7x:2x2x1
jax: 0.10.0
libtpu: 0.0.40
codegen_flags: <defaults>
</compile_context>

<pallas_src>
import jax
import jax.numpy as jnp
from jax.experimental import pallas as pl
from jax.experimental.pallas import tpu as pltpu

_SELU_ALPHA = 1.6732632423543772848170429916717
_SELU_SCALE = 1.0507009873554804934193349852946


def _round_up(v, m):
    return (v + m - 1) // m * m


def _selu(x):
    # Clamp the exp argument so the (always-evaluated) negative branch never
    # overflows; exp runs on the EUP slot, essentially free next to the MXU.
    neg = _SELU_ALPHA * (jnp.exp(jnp.minimum(x, 0.0)) - 1.0)
    return _SELU_SCALE * jnp.where(x > 0.0, x, neg)


def _decoder_kernel(x_ref, fcw_ref, fcb_ref, m1_ref, b1_ref, m2_ref, b2_ref,
                    m3_ref, b3_ref, o_ref):
    # All four stages stay in VMEM/vregs; only o_ref is written to HBM.
    h = jnp.dot(x_ref[...], fcw_ref[...], preferred_element_type=jnp.float32)
    h = _selu(h + fcb_ref[...])                      # (TB, 400)  == fc + SELU
    h = jnp.dot(h, m1_ref[...], preferred_element_type=jnp.float32)
    h = _selu(h + b1_ref[...])                       # (TB, 16*7*7)
    h = jnp.dot(h, m2_ref[...], preferred_element_type=jnp.float32)
    h = _selu(h + b2_ref[...])                       # (TB, 4*14*14)
    h = jnp.dot(h, m3_ref[...], preferred_element_type=jnp.float32)
    o_ref[...] = _selu(h + b3_ref[...])              # (TB, 1*28*28)


def _deconv_matrix(w, stride, padding, hin, win):
    """Dense matrix for ConvTranspose2d on a flattened NCHW image.

    w: (Cin, Cout, k, k) PyTorch ConvTranspose2d weight.
    Returns M of shape (Cin*Hin*Win, Cout*Hout*Wout) with
      M[(ci,iy,ix),(co,oy,ox)] = w[ci, co, oy - iy*s + p, ox - ix*s + p]
    when the kernel index is in range, else 0.  Batch-independent O(weights).
    """
    cin, cout, k, _ = w.shape
    hout = (hin - 1) * stride - 2 * padding + k
    wout = (win - 1) * stride - 2 * padding + k
    ky = jnp.arange(hout)[None, :] - jnp.arange(hin)[:, None] * stride + padding
    kx = jnp.arange(wout)[None, :] - jnp.arange(win)[:, None] * stride + padding
    vy = ((ky >= 0) & (ky < k)).astype(w.dtype)          # (hin, hout)
    vx = ((kx >= 0) & (kx < k)).astype(w.dtype)          # (win, wout)
    kyc = jnp.clip(ky, 0, k - 1)
    kxc = jnp.clip(kx, 0, k - 1)
    m = w[:, :, kyc, :]                                  # (cin,cout,hin,hout,k)
    m = m[:, :, :, :, kxc]                               # (cin,cout,hin,hout,win,wout)
    m = m * vy[None, None, :, :, None, None] * vx[None, None, None, None, :, :]
    m = m.transpose(0, 2, 4, 1, 3, 5).reshape(cin * hin * win,
                                              cout * hout * wout)
    return m, hout, wout


def decoder_forward(params, batch, *, block_batch=128):
    """batch: (N, 20) -> (N, 1, 28, 28), matching the PyTorch Decoder."""
    f32 = jnp.float32
    n = batch.shape[0]
    x = batch.astype(f32)

    fc_w = params["fc_w"].astype(f32)                    # (20, 400)
    fc_b = params["fc_b"].astype(f32).reshape(1, -1)

    m1, h1, w1 = _deconv_matrix(params["d1_w"].astype(f32), 1, 0, 5, 5)
    b1 = jnp.repeat(params["d1_b"].astype(f32), h1 * w1).reshape(1, -1)
    m2, h2, w2 = _deconv_matrix(params["d2_w"].astype(f32), 2, 1, h1, w1)
    b2 = jnp.repeat(params["d2_b"].astype(f32), h2 * w2).reshape(1, -1)
    m3, h3, w3 = _deconv_matrix(params["d3_w"].astype(f32), 2, 1, h2, w2)
    b3 = jnp.repeat(params["d3_b"].astype(f32), h3 * w3).reshape(1, -1)

    cout_last = params["d3_w"].shape[1]                  # 1
    k_fc, n_fc = fc_w.shape                              # 20, 400
    n1, n2, n3 = m1.shape[1], m2.shape[1], m3.shape[1]   # 784, 784, 784

    # Batch tiling: rows on sublanes, features (784) on lanes.  Tile capped at
    # 128 rows so double-buffered tiles + resident weights stay far below the
    # v7x 64 MiB VMEM budget.
    tb = min(block_batch, _round_up(n, 8))
    npad = _round_up(n, tb)
    if npad != n:
        x = jnp.pad(x, ((0, npad - n), (0, 0)))

    out = pl.pallas_call(
        _decoder_kernel,
        out_shape=jax.ShapeDtypeStruct((npad, n3), f32),
        grid_spec=pltpu.PrefetchScalarGridSpec(
            num_scalar_prefetch=0,
            grid=(npad // tb,),
            in_specs=[
                pl.BlockSpec((tb, k_fc), lambda i: (i, 0)),     # x tile
                pl.BlockSpec((k_fc, n_fc), lambda i: (0, 0)),   # fc weight
                pl.BlockSpec((1, n_fc), lambda i: (0, 0)),      # fc bias
                pl.BlockSpec((n_fc, n1), lambda i: (0, 0)),     # deconv1 matrix
                pl.BlockSpec((1, n1), lambda i: (0, 0)),
                pl.BlockSpec((n1, n2), lambda i: (0, 0)),       # deconv2 matrix
                pl.BlockSpec((1, n2), lambda i: (0, 0)),
                pl.BlockSpec((n2, n3), lambda i: (0, 0)),       # deconv3 matrix
                pl.BlockSpec((1, n3), lambda i: (0, 0)),
            ],
            out_specs=pl.BlockSpec((tb, n3), lambda i: (i, 0)),
        ),
        compiler_params=pltpu.CompilerParams(
            dimension_semantics=("parallel",),
            vmem_limit_bytes=48 * 1024 * 1024,
        ),
    )(x, fc_w, fc_b, m1, b1, m2, b2, m3, b3)

    return out[:n].reshape(n, cout_last, h3, w3)         # NCHW (N,1,28,28)


def init_params(key):
    ks = jax.random.split(key, 8)

    def u(k, shape, fan_in):
        bound = 1.0 / jnp.sqrt(float(fan_in))
        return jax.random.uniform(k, shape, jnp.float32, -bound, bound)

    return {
        # nn.Linear(20, 400): stored as (in, out) so y = x @ W + b
        "fc_w": u(ks[0], (20, 400), 20),
        "fc_b": u(ks[1], (400,), 20),
        # nn.ConvTranspose2d weight layout: (Cin, Cout, k, k)
        "d1_w": u(ks[2], (16, 16, 3, 3), 16 * 3 * 3),
        "d1_b": u(ks[3], (16,), 16 * 3 * 3),
        "d2_w": u(ks[4], (16, 4, 4, 4), 16 * 4 * 4),
        "d2_b": u(ks[5], (4,), 16 * 4 * 4),
        "d3_w": u(ks[6], (4, 1, 4, 4), 4 * 4 * 4),
        "d3_b": u(ks[7], (1,), 4 * 4 * 4),
    }


if __name__ == "__main__":
    key = jax.random.PRNGKey(0)
    pkey, xkey = jax.random.split(key)
    params = init_params(pkey)
    batch = jax.random.normal(xkey, (2, 20), jnp.float32)
    out = jax.jit(decoder_forward)(params, batch)
    out = jax.block_until_ready(out)
    assert out.shape == (2, 1, 28, 28), out.shape
    assert jnp.all(jnp.isfinite(out))
    print("KERNEL_OK")
</pallas_src>

<mosaic_0001>
module attributes {stable_mosaic.version = 11 : i64} {
  func.func @_decoder_kernel(%arg0: i32, %arg1: memref<8x20xf32, #tpu.memory_space<vmem>>, %arg2: memref<20x400xf32, #tpu.memory_space<vmem>>, %arg3: memref<1x400xf32, #tpu.memory_space<vmem>>, %arg4: memref<400x784xf32, #tpu.memory_space<vmem>>, %arg5: memref<1x784xf32, #tpu.memory_space<vmem>>, %arg6: memref<784x784xf32, #tpu.memory_space<vmem>>, %arg7: memref<1x784xf32, #tpu.memory_space<vmem>>, %arg8: memref<784x784xf32, #tpu.memory_space<vmem>>, %arg9: memref<1x784xf32, #tpu.memory_space<vmem>>, %arg10: memref<8x784xf32, #tpu.memory_space<vmem>>) attributes {dimension_semantics = [#tpu.dimension_semantics<parallel>], iteration_bounds = array<i64: 1>, scalar_prefetch = 0 : i64, scratch_operands = 0 : i64, tpu.core_type = #tpu.core_type<tc>, window_params = [{transform_indices = @transform_0, window_bounds = array<i64: 8, 20>}, {pipeline_mode = #tpu.pipeline_mode<synchronous>, transform_indices = @transform_1, window_bounds = array<i64: 20, 400>}, {pipeline_mode = #tpu.pipeline_mode<synchronous>, transform_indices = @transform_2, window_bounds = array<i64: 1, 400>}, {pipeline_mode = #tpu.pipeline_mode<synchronous>, transform_indices = @transform_3, window_bounds = array<i64: 400, 784>}, {pipeline_mode = #tpu.pipeline_mode<synchronous>, transform_indices = @transform_4, window_bounds = array<i64: 1, 784>}, {pipeline_mode = #tpu.pipeline_mode<synchronous>, transform_indices = @transform_5, window_bounds = array<i64: 784, 784>}, {pipeline_mode = #tpu.pipeline_mode<synchronous>, transform_indices = @transform_6, window_bounds = array<i64: 1, 784>}, {pipeline_mode = #tpu.pipeline_mode<synchronous>, transform_indices = @transform_7, window_bounds = array<i64: 784, 784>}, {pipeline_mode = #tpu.pipeline_mode<synchronous>, transform_indices = @transform_8, window_bounds = array<i64: 1, 784>}, {transform_indices = @transform_9, window_bounds = array<i64: 8, 784>}]} {
    %c0 = arith.constant 0 : index
    %c0_0 = arith.constant 0 : index
    %0 = vector.load %arg1[%c0, %c0_0] : memref<8x20xf32, #tpu.memory_space<vmem>>, vector<8x20xf32>
    %c0_1 = arith.constant 0 : index
    %c0_2 = arith.constant 0 : index
    %1 = vector.load %arg2[%c0_1, %c0_2] : memref<20x400xf32, #tpu.memory_space<vmem>>, vector<20x400xf32>
    %cst = arith.constant dense<0.000000e+00> : vector<8x400xf32>
    %2 = tpu.matmul %0, %1, %cst {dimension_numbers = #tpu.dot_dimension_numbers<[1], [0], [0], [1], [0, 0, 1, 1], [], []>} : vector<8x20xf32>, vector<20x400xf32>, vector<8x400xf32> -> vector<8x400xf32>
    %c0_3 = arith.constant 0 : index
    %c0_4 = arith.constant 0 : index
    %3 = vector.load %arg3[%c0_3, %c0_4] : memref<1x400xf32, #tpu.memory_space<vmem>>, vector<1x400xf32>
    %4 = vector.broadcast %3 : vector<1x400xf32> to vector<8x400xf32>
    %5 = arith.addf %2, %4 : vector<8x400xf32>
    %cst_5 = arith.constant 0.000000e+00 : f32
    %6 = vector.broadcast %cst_5 : f32 to vector<8x400xf32>
    %7 = arith.minimumf %5, %6 : vector<8x400xf32>
    %8 = math.exp %7 : vector<8x400xf32>
    %cst_6 = arith.constant 1.000000e+00 : f32
    %9 = vector.broadcast %cst_6 : f32 to vector<8x400xf32>
    %10 = arith.subf %8, %9 : vector<8x400xf32>
    %cst_7 = arith.constant 1.67326319 : f32
    %11 = vector.broadcast %cst_7 : f32 to vector<8x400xf32>
    %12 = arith.mulf %11, %10 : vector<8x400xf32>
    %cst_8 = arith.constant 0.000000e+00 : f32
    %13 = vector.broadcast %cst_8 : f32 to vector<8x400xf32>
    %14 = arith.cmpf ogt, %5, %13 : vector<8x400xf32>
    %15 = arith.select %14, %5, %12 : vector<8x400xi1>, vector<8x400xf32>
    %cst_9 = arith.constant 1.05070102 : f32
    %16 = vector.broadcast %cst_9 : f32 to vector<8x400xf32>
    %17 = arith.mulf %16, %15 : vector<8x400xf32>
    %c0_10 = arith.constant 0 : index
    %c0_11 = arith.constant 0 : index
    %18 = vector.load %arg4[%c0_10, %c0_11] : memref<400x784xf32, #tpu.memory_space<vmem>>, vector<400x784xf32>
    %cst_12 = arith.constant dense<0.000000e+00> : vector<8x784xf32>
    %19 = tpu.matmul %17, %18, %cst_12 {dimension_numbers = #tpu.dot_dimension_numbers<[1], [0], [0], [1], [0, 0, 1, 1], [], []>} : vector<8x400xf32>, vector<400x784xf32>, vector<8x784xf32> -> vector<8x784xf32>
    %c0_13 = arith.constant 0 : index
    %c0_14 = arith.constant 0 : index
    %20 = vector.load %arg5[%c0_13, %c0_14] : memref<1x784xf32, #tpu.memory_space<vmem>>, vector<1x784xf32>
    %21 = vector.broadcast %20 : vector<1x784xf32> to vector<8x784xf32>
    %22 = arith.addf %19, %21 : vector<8x784xf32>
    %cst_15 = arith.constant 0.000000e+00 : f32
    %23 = vector.broadcast %cst_15 : f32 to vector<8x784xf32>
    %24 = arith.minimumf %22, %23 : vector<8x784xf32>
    %25 = math.exp %24 : vector<8x784xf32>
    %cst_16 = arith.constant 1.000000e+00 : f32
    %26 = vector.broadcast %cst_16 : f32 to vector<8x784xf32>
    %27 = arith.subf %25, %26 : vector<8x784xf32>
    %cst_17 = arith.constant 1.67326319 : f32
    %28 = vector.broadcast %cst_17 : f32 to vector<8x784xf32>
    %29 = arith.mulf %28, %27 : vector<8x784xf32>
    %cst_18 = arith.constant 0.000000e+00 : f32
    %30 = vector.broadcast %cst_18 : f32 to vector<8x784xf32>
    %31 = arith.cmpf ogt, %22, %30 : vector<8x784xf32>
    %32 = arith.select %31, %22, %29 : vector<8x784xi1>, vector<8x784xf32>
    %cst_19 = arith.constant 1.05070102 : f32
    %33 = vector.broadcast %cst_19 : f32 to vector<8x784xf32>
    %34 = arith.mulf %33, %32 : vector<8x784xf32>
    %c0_20 = arith.constant 0 : index
    %c0_21 = arith.constant 0 : index
    %35 = vector.load %arg6[%c0_20, %c0_21] : memref<784x784xf32, #tpu.memory_space<vmem>>, vector<784x784xf32>
    %cst_22 = arith.constant dense<0.000000e+00> : vector<8x784xf32>
    %36 = tpu.matmul %34, %35, %cst_22 {dimension_numbers = #tpu.dot_dimension_numbers<[1], [0], [0], [1], [0, 0, 1, 1], [], []>} : vector<8x784xf32>, vector<784x784xf32>, vector<8x784xf32> -> vector<8x784xf32>
    %c0_23 = arith.constant 0 : index
    %c0_24 = arith.constant 0 : index
    %37 = vector.load %arg7[%c0_23, %c0_24] : memref<1x784xf32, #tpu.memory_space<vmem>>, vector<1x784xf32>
    %38 = vector.broadcast %37 : vector<1x784xf32> to vector<8x784xf32>
    %39 = arith.addf %36, %38 : vector<8x784xf32>
    %cst_25 = arith.constant 0.000000e+00 : f32
    %40 = vector.broadcast %cst_25 : f32 to vector<8x784xf32>
    %41 = arith.minimumf %39, %40 : vector<8x784xf32>
    %42 = math.exp %41 : vector<8x784xf32>
    %cst_26 = arith.constant 1.000000e+00 : f32
    %43 = vector.broadcast %cst_26 : f32 to vector<8x784xf32>
    %44 = arith.subf %42, %43 : vector<8x784xf32>
    %cst_27 = arith.constant 1.67326319 : f32
    %45 = vector.broadcast %cst_27 : f32 to vector<8x784xf32>
    %46 = arith.mulf %45, %44 : vector<8x784xf32>
    %cst_28 = arith.constant 0.000000e+00 : f32
    %47 = vector.broadcast %cst_28 : f32 to vector<8x784xf32>
    %48 = arith.cmpf ogt, %39, %47 : vector<8x784xf32>
    %49 = arith.select %48, %39, %46 : vector<8x784xi1>, vector<8x784xf32>
    %cst_29 = arith.constant 1.05070102 : f32
    %50 = vector.broadcast %cst_29 : f32 to vector<8x784xf32>
    %51 = arith.mulf %50, %49 : vector<8x784xf32>
    %c0_30 = arith.constant 0 : index
    %c0_31 = arith.constant 0 : index
    %52 = vector.load %arg8[%c0_30, %c0_31] : memref<784x784xf32, #tpu.memory_space<vmem>>, vector<784x784xf32>
    %cst_32 = arith.constant dense<0.000000e+00> : vector<8x784xf32>
    %53 = tpu.matmul %51, %52, %cst_32 {dimension_numbers = #tpu.dot_dimension_numbers<[1], [0], [0], [1], [0, 0, 1, 1], [], []>} : vector<8x784xf32>, vector<784x784xf32>, vector<8x784xf32> -> vector<8x784xf32>
    %c0_33 = arith.constant 0 : index
    %c0_34 = arith.constant 0 : index
    %54 = vector.load %arg9[%c0_33, %c0_34] : memref<1x784xf32, #tpu.memory_space<vmem>>, vector<1x784xf32>
    %55 = vector.broadcast %54 : vector<1x784xf32> to vector<8x784xf32>
    %56 = arith.addf %53, %55 : vector<8x784xf32>
    %cst_35 = arith.constant 0.000000e+00 : f32
    %57 = vector.broadcast %cst_35 : f32 to vector<8x784xf32>
    %58 = arith.minimumf %56, %57 : vector<8x784xf32>
    %59 = math.exp %58 : vector<8x784xf32>
    %cst_36 = arith.constant 1.000000e+00 : f32
    %60 = vector.broadcast %cst_36 : f32 to vector<8x784xf32>
    %61 = arith.subf %59, %60 : vector<8x784xf32>
    %cst_37 = arith.constant 1.67326319 : f32
    %62 = vector.broadcast %cst_37 : f32 to vector<8x784xf32>
    %63 = arith.mulf %62, %61 : vector<8x784xf32>
    %cst_38 = arith.constant 0.000000e+00 : f32
    %64 = vector.broadcast %cst_38 : f32 to vector<8x784xf32>
    %65 = arith.cmpf ogt, %56, %64 : vector<8x784xf32>
    %66 = arith.select %65, %56, %63 : vector<8x784xi1>, vector<8x784xf32>
    %cst_39 = arith.constant 1.05070102 : f32
    %67 = vector.broadcast %cst_39 : f32 to vector<8x784xf32>
    %68 = arith.mulf %67, %66 : vector<8x784xf32>
    %c0_40 = arith.constant 0 : index
    %c0_41 = arith.constant 0 : index
    %69 = vector.load %arg10[%c0_40, %c0_41] : memref<8x784xf32, #tpu.memory_space<vmem>>, vector<8x784xf32>
    tpu.vector_store %arg10[%c0_40, %c0_41], %68 {strides = array<i32>} : memref<8x784xf32, #tpu.memory_space<vmem>>, vector<8x784xf32>,
    return
  }
  func.func @transform_0(%arg0: i32) -> (i32, i32) {
    %c0_i32 = arith.constant 0 : i32
    %c0_i32_0 = arith.constant 0 : i32
    return %arg0, %c0_i32 : i32, i32
  }
  func.func @transform_1(%arg0: i32) -> (i32, i32) {
    %c0_i32 = arith.constant 0 : i32
    %c0_i32_0 = arith.constant 0 : i32
    %c0_i32_1 = arith.constant 0 : i32
    return %c0_i32, %c0_i32_0 : i32, i32
  }
  func.func @transform_2(%arg0: i32) -> (i32, i32) {
    %c0_i32 = arith.constant 0 : i32
    %c0_i32_0 = arith.constant 0 : i32
    %c0_i32_1 = arith.constant 0 : i32
    return %c0_i32, %c0_i32_0 : i32, i32
  }
  func.func @transform_3(%arg0: i32) -> (i32, i32) {
    %c0_i32 = arith.constant 0 : i32
    %c0_i32_0 = arith.constant 0 : i32
    %c0_i32_1 = arith.constant 0 : i32
    return %c0_i32, %c0_i32_0 : i32, i32
  }
  func.func @transform_4(%arg0: i32) -> (i32, i32) {
    %c0_i32 = arith.constant 0 : i32
    %c0_i32_0 = arith.constant 0 : i32
    %c0_i32_1 = arith.constant 0 : i32
    return %c0_i32, %c0_i32_0 : i32, i32
  }
  func.func @transform_5(%arg0: i32) -> (i32, i32) {
    %c0_i32 = arith.constant 0 : i32
    %c0_i32_0 = arith.constant 0 : i32
    %c0_i32_1 = arith.constant 0 : i32
    return %c0_i32, %c0_i32_0 : i32, i32
  }
  func.func @transform_6(%arg0: i32) -> (i32, i32) {
    %c0_i32 = arith.constant 0 : i32
    %c0_i32_0 = arith.constant 0 : i32
    %c0_i32_1 = arith.constant 0 : i32
    return %c0_i32, %c0_i32_0 : i32, i32
  }
  func.func @transform_7(%arg0: i32) -> (i32, i32) {
    %c0_i32 = arith.constant 0 : i32
    %c0_i32_0 = arith.constant 0 : i32
    %c0_i32_1 = arith.constant 0 : i32
    return %c0_i32, %c0_i32_0 : i32, i32
  }
  func.func @transform_8(%arg0: i32) -> (i32, i32) {
    %c0_i32 = arith.constant 0 : i32
    %c0_i32_0 = arith.constant 0 : i32
    %c0_i32_1 = arith.constant 0 : i32
    return %c0_i32, %c0_i32_0 : i32, i32
  }
  func.func @transform_9(%arg0: i32) -> (i32, i32) {
    %c0_i32 = arith.constant 0 : i32
    %c0_i32_0 = arith.constant 0 : i32
    return %arg0, %c0_i32 : i32, i32
  }
}

</mosaic_0001>

<bundles_post_ra>
// kernel: decoder_forward.1
= control target key start
LH: loop header
LB: loop body
LE: loop exit
PB: predicated region body
PF: predicated region fallthrough
CT: control target
= control target key end

     0   :  { %v7273_v3 = vmov 0.0   ;;  %vm71_vm0 = vcmask 1043456   ;;  %vm67_vm1 = vcmask 162816   ;;  %vm645_vm5 = vcmask 130048   ;;  %s12854_s1 = inlined_call_operand.vmem [shape: f32[20,400], index: 1, kind: input, shape index: {}]   ;;  %s12855_s3 = inlined_call_operand.vmem [shape: f32[400,784], index: 3, kind: input, shape index: {}]   ;;  %s12856_s0 = inlined_call_operand.vmem [shape: f32[8,20], index: 0, kind: input, shape index: {}]   ;;  %s12857_s2 = inlined_call_operand.vmem [shape: f32[1,400], index: 2, kind: input, shape index: {}]   ;;  %s12858_s5 = inlined_call_operand.vmem [shape: f32[784,784], index: 5, kind: input, shape index: {}]   ;;  %s12859_s4 = inlined_call_operand.vmem [shape: f32[1,784], index: 4, kind: input, shape index: {}]   ;;  %s12860_s7 = inlined_call_operand.vmem [shape: f32[784,784], index: 7, kind: input, shape index: {}]   ;;  %s12861_s6 = inlined_call_operand.vmem [shape: f32[1,784], index: 6, kind: input, shape index: {}]   ;;  %s12862_s8 = inlined_call_operand.vmem [shape: f32[1,784], index: 8, kind: input, shape index: {}]   ;;  %s12863_s9 = inlined_call_operand.vmem [shape: f32[8,784], index: 9, kind: output, shape index: {}]  }
   0x1   :  { %v34_v0 = vld [vmem:[%s12854_s1 + $0x8] sm:$0xff]  ;;  %v33_v2 = vld [vmem:[%s12854_s1] sm:$0xff]  ;;  %148 = vmatprep.mubr.f32.mxu1 %v7273_v3  ;;  %v36_v8 = vld [vmem:[%s12854_s1 + $0x18] sm:$0xff]  ;;  %vm7275_vm14 = vmmov 0  }
   0x2   :  { %v38_v1 = vld [vmem:[%s12854_s1 + $0x28] sm:$0xff]  ;;  %v37_v5 = vld [vmem:[%s12854_s1 + $0x20] sm:$0xff]  ;;  %v40_v9 = vld [vmem:[%s12854_s1 + $0x38] sm:$0xff] }
   0x3   :  { %v5418_v4 = vpack.c.bf16 %v38_v1, %v34_v0  ;;  %v5420_v6 = vpack.c.bf16 %v37_v5, %v33_v2  ;;  %v42_v7 = vld [vmem:[%s12854_s1 + $0x48] sm:$0xf]  ;;  %v35_v10 = vld [vmem:[%s12854_s1 + $0x10] sm:$0xff]  ;;  %v266_v13 = vld [vmem:[%s12855_s3 + $0x40] sm:$0xff]  ;;  %v5422_v15 = vpack.c.bf16 %v40_v9, %v36_v8 }
   0x4   :  { %v39_v11 = vld [vmem:[%s12854_s1 + $0x30] sm:$0xff]  ;;  %v259_v12 = vld [vmem:[%s12855_s3 + $0x8] sm:$0xff]  ;;  %v41_v14 = vld [vmem:[%s12854_s1 + $0x40] sm:$0xf] }
   0x5   :  { %5419 = vmatprep.subr.bf16.mxu1 %v5418_v4  ;;  %v5426_v16 = vpack.c.bf16 %v266_v13, %v259_v12  ;;  %v258_v17 = vld [vmem:[%s12855_s3] sm:$0xff]  ;;  %v5424_v19 = vpack.c.bf16 %v39_v11, %v35_v10  ;;  %v44_v20 = vld [vmem:[%s12854_s1 + $0x58] sm:$0xf]  ;;  %v280_v25 = vld [vmem:[%s12855_s3 + $0xb0] sm:$0xff] }
   0x6   :  { %5421 = vmatpush1.bf16.msra.mxu1 %v5420_v6  ;;  %v32_v18 = vld [vmem:[%s12856_s0] sm:$0xff]  ;;  %v265_v21 = vld [vmem:[%s12855_s3 + $0x38] sm:$0xff]  ;;  %v268_v26 = vld [vmem:[%s12855_s3 + $0x50] sm:$0xff] }
   0x7   :  { %5110 = vmatprep.subr.msk.mxu1 %vm71_vm0, %v42_v7  ;;  %5427 = vmatprep.subr.bf16.mxu0 %v5426_v16  ;;  %v261_v22 = vld [vmem:[%s12855_s3 + $0x18] sm:$0xff]  ;;  %v5428_v23 = vpack.c.bf16 %v265_v21, %v258_v17  ;;  %v260_v27 = vld [vmem:[%s12855_s3 + $0x10] sm:$0xff]  ;;  %v267_v28 = vld [vmem:[%s12855_s3 + $0x48] sm:$0xff] }
   0x8   :  { %v273_v24 = vld [vmem:[%s12855_s3 + $0x78] sm:$0xff]  ;;  %v275_v30 = vld [vmem:[%s12855_s3 + $0x88] sm:$0xff]  ;;  %v272_v31 = vld [vmem:[%s12855_s3 + $0x70] sm:$0xff]  ;;  %v5526_v37 = vpack.c.bf16 %v268_v26, %v261_v22  ;;  %v5528_v38 = vpack.c.bf16 %v267_v28, %v260_v27 }
   0x9   :  { %v5430_v29 = vpack.c.bf16 %v280_v25, %v273_v24  ;;  %v279_v32 = vld [vmem:[%s12855_s3 + $0xa8] sm:$0xff]  ;;  %v282_v33 = vld [vmem:[%s12855_s3 + $0xc0] sm:$0xff]  ;;  %v43_v36 = vld [vmem:[%s12854_s1 + $0x50] sm:$0xf]  ;;  %5429 = vmatpush1.bf16.msra.mxu0 %v5428_v23 }
   0xa   :  { %5111 = vmatpush1.msk.msra.mxu1 %vm71_vm0, %v41_v14  ;;  %v287_v34 = vld [vmem:[%s12855_s3 + $0xe8] sm:$0xff]  ;;  %v294_v35 = vld [vmem:[%s12855_s3 + $0x120] sm:$0xff]  ;;  %v5432_v39 = vpack.c.bf16 %v279_v32, %v272_v31  ;;  %v281_v41 = vld [vmem:[%s12855_s3 + $0xb8] sm:$0xff]  ;;  %v5530_v42 = vpack.c.bf16 %v282_v33, %v275_v30 }
   0xb   :  { %5112 = vmatmul.mubr.msk.f32.vlgmr.msra.gmra.mrb[0].mxu1 %vm67_vm1, %v32_v18  ;;  %5423 = vmatprep.subr.bf16.mxu1 %v5422_v15  ;;  %v274_v40 = vld [vmem:[%s12855_s3 + $0x80] sm:$0xff]  ;;  %v5434_v43 = vpack.c.bf16 %v294_v35, %v287_v34  ;;  %v289_v44 = vld [vmem:[%s12855_s3 + $0xf8] sm:$0xff]  ;;  %v296_v47 = vld [vmem:[%s12855_s3 + $0x130] sm:$0xff] }
   0xc   :  { %5425 = vmatpush1.bf16.msra.mxu1 %v5424_v19  ;;  %219 = vmatprep.mubr.f32.mxu1 %v7273_v3  ;;  %v286_v45 = vld [vmem:[%s12855_s3 + $0xe0] sm:$0xff]  ;;  %v293_v46 = vld [vmem:[%s12855_s3 + $0x118] sm:$0xff]  ;;  %v308_v49 = vld [vmem:[%s12855_s3 + $0x190] sm:$0xff]  ;;  %v5532_v50 = vpack.c.bf16 %v281_v41, %v274_v40  ;;  %v5534_v54 = vpack.c.bf16 %v296_v47, %v289_v44 }
   0xd   :  { %5113 = vmatprep.subr.msk.mxu1 %vm71_vm0, %v44_v20  ;;  %5431 = vmatprep.subr.bf16.mxu0 %v5430_v29  ;;  %v301_v48 = vld [vmem:[%s12855_s3 + $0x158] sm:$0xff]  ;;  %v5436_v51 = vpack.c.bf16 %v293_v46, %v286_v45  ;;  %v288_v52 = vld [vmem:[%s12855_s3 + $0xf0] sm:$0xff]  ;;  %v295_v53 = vld [vmem:[%s12855_s3 + $0x128] sm:$0xff] }
   0xe   :  { %5433 = vmatpush1.bf16.msra.mxu0 %v5432_v39  ;;  %v5438_v55 = vpack.c.bf16 %v308_v49, %v301_v48  ;;  %v303_v56 = vld [vmem:[%s12855_s3 + $0x168] sm:$0xff]  ;;  %v300_v57 = vld [vmem:[%s12855_s3 + $0x150] sm:$0xff]  ;;  %v310_v59 = vld [vmem:[%s12855_s3 + $0x1a0] sm:$0xff]  ;;  %v5536_v62 = vpack.c.bf16 %v295_v53, %v288_v52 }
   0xf   :  { %5435 = vmatprep.subr.bf16.mxu0 %v5434_v43  ;;  %v307_v58 = vld [vmem:[%s12855_s3 + $0x188] sm:$0xff]  ;;  %v322_v61 = vld [vmem:[%s12855_s3 + $0x200] sm:$0xff]  ;;  %v309_v1 = vld [vmem:[%s12855_s3 + $0x198] sm:$0xff]  ;;  %v5538_v2 = vpack.c.bf16 %v310_v59, %v303_v56 }
  0x10   :  { %5114 = vmatpush1.msk.msra.mxu1 %vm71_vm0, %v43_v36  ;;  %v315_v60 = vld [vmem:[%s12855_s3 + $0x1c8] sm:$0xff]  ;;  %v5440_v63 = vpack.c.bf16 %v307_v58, %v300_v57  ;;  %v302_v0 = vld [vmem:[%s12855_s3 + $0x160] sm:$0xff]  ;;  %v317_v5 = vld [vmem:[%s12855_s3 + $0x1d8] sm:$0xff] }
  0x11   :  { %5115 = vmatmul.mubr.msk.f32.vlgmr.msra.gmra.mrb[2].mxu1 %vm67_vm1, %v32_v18  ;;  %5527 = vmatprep.subr.bf16.mxu1 %v5526_v37  ;;  %v5442_v4 = vpack.c.bf16 %v322_v61, %v315_v60  ;;  %v314_v6 = vld [vmem:[%s12855_s3 + $0x1c0] sm:$0xff]  ;;  %v321_v7 = vld [vmem:[%s12855_s3 + $0x1f8] sm:$0xff]  ;;  %v324_v8 = vld [vmem:[%s12855_s3 + $0x210] sm:$0xff]  ;;  %v5540_v11 = vpack.c.bf16 %v309_v1, %v302_v0 }
  0x12   :  { %5529 = vmatpush1.bf16.msra.mxu1 %v5528_v38  ;;  %5437 = vmatpush1.bf16.msra.mxu0 %v5436_v51  ;;  %v329_v9 = vld [vmem:[%s12855_s3 + $0x238] sm:$0xff]  ;;  %v336_v10 = vld [vmem:[%s12855_s3 + $0x270] sm:$0xff]  ;;  %v5444_v12 = vpack.c.bf16 %v321_v7, %v314_v6  ;;  %v323_v14 = vld [vmem:[%s12855_s3 + $0x208] sm:$0xff]  ;;  %v5542_v15 = vpack.c.bf16 %v324_v8, %v317_v5 }
  0x13   :  { %5531 = vmatprep.subr.bf16.mxu1 %v5530_v42  ;;  %5439 = vmatprep.subr.bf16.mxu0 %v5438_v55  ;;  %v316_v13 = vld [vmem:[%s12855_s3 + $0x1d0] sm:$0xff]  ;;  %v5446_v16 = vpack.c.bf16 %v336_v10, %v329_v9  ;;  %v331_v17 = vld [vmem:[%s12855_s3 + $0x248] sm:$0xff]  ;;  %v338_v20 = vld [vmem:[%s12855_s3 + $0x280] sm:$0xff] }
  0x14   :  { %v328_v18 = vld [vmem:[%s12855_s3 + $0x230] sm:$0xff]  ;;  %v335_v19 = vld [vmem:[%s12855_s3 + $0x268] sm:$0xff]  ;;  %v350_v22 = vld [vmem:[%s12855_s3 + $0x2e0] sm:$0xff]  ;;  %v5544_v23 = vpack.c.bf16 %v323_v14, %v316_v13  ;;  %v5546_v27 = vpack.c.bf16 %v338_v20, %v331_v17 }
  0x15   :  { %v343_v21 = vld [vmem:[%s12855_s3 + $0x2a8] sm:$0xff]  ;;  %v5448_v24 = vpack.c.bf16 %v335_v19, %v328_v18  ;;  %v330_v25 = vld [vmem:[%s12855_s3 + $0x240] sm:$0xff]  ;;  %v337_v26 = vld [vmem:[%s12855_s3 + $0x278] sm:$0xff] }
  0x16   :  { %5533 = vmatpush1.bf16.msra.mxu1 %v5532_v50  ;;  %5441 = vmatpush1.bf16.msra.mxu0 %v5440_v63  ;;  %v5450_v28 = vpack.c.bf16 %v350_v22, %v343_v21  ;;  %v345_v29 = vld [vmem:[%s12855_s3 + $0x2b8] sm:$0xff]  ;;  %v342_v30 = vld [vmem:[%s12855_s3 + $0x2a0] sm:$0xff]  ;;  %v352_v32 = vld [vmem:[%s12855_s3 + $0x2f0] sm:$0xff]  ;;  %v5548_v35 = vpack.c.bf16 %v337_v26, %v330_v25 }
  0x17   :  { %5535 = vmatprep.subr.bf16.mxu1 %v5534_v54  ;;  %5443 = vmatprep.subr.bf16.mxu0 %v5442_v4  ;;  %v349_v31 = vld [vmem:[%s12855_s3 + $0x2d8] sm:$0xff]  ;;  %v364_v34 = vld [vmem:[%s12855_s3 + $0x350] sm:$0xff]  ;;  %v351_v38 = vld [vmem:[%s12855_s3 + $0x2e8] sm:$0xff]  ;;  %v5550_v39 = vpack.c.bf16 %v352_v32, %v345_v29 }
  0x18   :  { %v357_v33 = vld [vmem:[%s12855_s3 + $0x318] sm:$0xff]  ;;  %v5452_v36 = vpack.c.bf16 %v349_v31, %v342_v30  ;;  %v344_v37 = vld [vmem:[%s12855_s3 + $0x2b0] sm:$0xff]  ;;  %v359_v41 = vld [vmem:[%s12855_s3 + $0x328] sm:$0xff] }
  0x19   :  { %v5454_v40 = vpack.c.bf16 %v364_v34, %v357_v33  ;;  %v356_v42 = vld [vmem:[%s12855_s3 + $0x310] sm:$0xff]  ;;  %v363_v43 = vld [vmem:[%s12855_s3 + $0x348] sm:$0xff]  ;;  %v366_v44 = vld [vmem:[%s12855_s3 + $0x360] sm:$0xff]  ;;  %v5552_v47 = vpack.c.bf16 %v351_v38, %v344_v37 }
  0x1a   :  { %5537 = vmatpush1.bf16.msra.mxu1 %v5536_v62  ;;  %5445 = vmatpush1.bf16.msra.mxu0 %v5444_v12  ;;  %v371_v45 = vld [vmem:[%s12855_s3 + $0x388] sm:$0xff]  ;;  %v378_v46 = vld [vmem:[%s12855_s3 + $0x3c0] sm:$0xff]  ;;  %v5456_v48 = vpack.c.bf16 %v363_v43, %v356_v42  ;;  %v365_v50 = vld [vmem:[%s12855_s3 + $0x358] sm:$0xff]  ;;  %v5554_v51 = vpack.c.bf16 %v366_v44, %v359_v41 }
  0x1b   :  { %5539 = vmatprep.subr.bf16.mxu1 %v5538_v2  ;;  %5447 = vmatprep.subr.bf16.mxu0 %v5446_v16  ;;  %v358_v49 = vld [vmem:[%s12855_s3 + $0x320] sm:$0xff]  ;;  %v5458_v52 = vpack.c.bf16 %v378_v46, %v371_v45  ;;  %v373_v53 = vld [vmem:[%s12855_s3 + $0x398] sm:$0xff]  ;;  %v380_v56 = vld [vmem:[%s12855_s3 + $0x3d0] sm:$0xff] }
  0x1c   :  { %v370_v54 = vld [vmem:[%s12855_s3 + $0x380] sm:$0xff]  ;;  %v377_v55 = vld [vmem:[%s12855_s3 + $0x3b8] sm:$0xff]  ;;  %v392_v58 = vld [vmem:[%s12855_s3 + $0x430] sm:$0xff]  ;;  %v5556_v59 = vpack.c.bf16 %v365_v50, %v358_v49  ;;  %v5558_v62 = vpack.c.bf16 %v380_v56, %v373_v53 }
  0x1d   :  { %v385_v57 = vld [vmem:[%s12855_s3 + $0x3f8] sm:$0xff]  ;;  %v5460_v60 = vpack.c.bf16 %v377_v55, %v370_v54  ;;  %v372_v61 = vld [vmem:[%s12855_s3 + $0x390] sm:$0xff]  ;;  %v379_v63 = vld [vmem:[%s12855_s3 + $0x3c8] sm:$0xff] }
  0x1e   :  { %5541 = vmatpush1.bf16.msra.mxu1 %v5540_v11  ;;  %5449 = vmatpush1.bf16.msra.mxu0 %v5448_v24  ;;  %v5462_v0 = vpack.c.bf16 %v392_v58, %v385_v57  ;;  %v384_v1 = vld [vmem:[%s12855_s3 + $0x3f0] sm:$0xff]  ;;  %v391_v2 = vld [vmem:[%s12855_s3 + $0x428] sm:$0xff]  ;;  %v394_v5 = vld [vmem:[%s12855_s3 + $0x440] sm:$0xff]  ;;  %v5560_v6 = vpack.c.bf16 %v379_v63, %v372_v61 }
  0x1f   :  { %5543 = vmatprep.subr.bf16.mxu1 %v5542_v15  ;;  %5451 = vmatprep.subr.bf16.mxu0 %v5450_v28  ;;  %v387_v4 = vld [vmem:[%s12855_s3 + $0x408] sm:$0xff]  ;;  %v5464_v7 = vpack.c.bf16 %v391_v2, %v384_v1  ;;  %v386_v9 = vld [vmem:[%s12855_s3 + $0x400] sm:$0xff]  ;;  %v393_v10 = vld [vmem:[%s12855_s3 + $0x438] sm:$0xff] }
  0x20   :  { %v5562_v8 = vpack.c.bf16 %v394_v5, %v387_v4  ;;  %v5564_v11 = vpack.c.bf16 %v393_v10, %v386_v9  ;;  %v399_v12 = vld [vmem:[%s12855_s3 + $0x468] sm:$0xff]  ;;  %v406_v13 = vld [vmem:[%s12855_s3 + $0x4a0] sm:$0xff]  ;;  %v401_v14 = vld [vmem:[%s12855_s3 + $0x478] sm:$0xff] }
  0x21   :  { %v5466_v15 = vpack.c.bf16 %v406_v13, %v399_v12  ;;  %v408_v16 = vld [vmem:[%s12855_s3 + $0x4b0] sm:$0xff]  ;;  %v398_v17 = vld [vmem:[%s12855_s3 + $0x460] sm:$0xff]  ;;  %v405_v18 = vld [vmem:[%s12855_s3 + $0x498] sm:$0xff] }
  0x22   :  { %5545 = vmatpush1.bf16.msra.mxu1 %v5544_v23  ;;  %5453 = vmatpush1.bf16.msra.mxu0 %v5452_v36  ;;  %v5566_v19 = vpack.c.bf16 %v408_v16, %v401_v14  ;;  %v5468_v20 = vpack.c.bf16 %v405_v18, %v398_v17  ;;  %v400_v21 = vld [vmem:[%s12855_s3 + $0x470] sm:$0xff]  ;;  %v407_v22 = vld [vmem:[%s12855_s3 + $0x4a8] sm:$0xff]  ;;  %v413_v24 = vld [vmem:[%s12855_s3 + $0x4d8] sm:$0xff] }
  0x23   :  { %5547 = vmatprep.subr.bf16.mxu1 %v5546_v27  ;;  %5455 = vmatprep.subr.bf16.mxu0 %v5454_v40  ;;  %v5568_v23 = vpack.c.bf16 %v407_v22, %v400_v21  ;;  %v420_v25 = vld [vmem:[%s12855_s3 + $0x510] sm:$0xff]  ;;  %v415_v26 = vld [vmem:[%s12855_s3 + $0x4e8] sm:$0xff]  ;;  %v422_v28 = vld [vmem:[%s12855_s3 + $0x520] sm:$0xff] }
  0x24   :  { %v5470_v27 = vpack.c.bf16 %v420_v25, %v413_v24  ;;  %v412_v29 = vld [vmem:[%s12855_s3 + $0x4d0] sm:$0xff]  ;;  %v419_v30 = vld [vmem:[%s12855_s3 + $0x508] sm:$0xff]  ;;  %v5570_v31 = vpack.c.bf16 %v422_v28, %v415_v26  ;;  %v414_v33 = vld [vmem:[%s12855_s3 + $0x4e0] sm:$0xff] }
  0x25   :  { %v5472_v32 = vpack.c.bf16 %v419_v30, %v412_v29  ;;  %v421_v34 = vld [vmem:[%s12855_s3 + $0x518] sm:$0xff]  ;;  %v427_v36 = vld [vmem:[%s12855_s3 + $0x548] sm:$0xff]  ;;  %v434_v37 = vld [vmem:[%s12855_s3 + $0x580] sm:$0xff] }
  0x26   :  { %5549 = vmatpush1.bf16.msra.mxu1 %v5548_v35  ;;  %5457 = vmatpush1.bf16.msra.mxu0 %v5456_v48  ;;  %v5572_v35 = vpack.c.bf16 %v421_v34, %v414_v33  ;;  %v429_v38 = vld [vmem:[%s12855_s3 + $0x558] sm:$0xff]  ;;  %v436_v40 = vld [vmem:[%s12855_s3 + $0x590] sm:$0xff]  ;;  %v426_v41 = vld [vmem:[%s12855_s3 + $0x540] sm:$0xff] }
  0x27   :  { %5551 = vmatprep.subr.bf16.mxu1 %v5550_v39  ;;  %5459 = vmatprep.subr.bf16.mxu0 %v5458_v52  ;;  %v5474_v39 = vpack.c.bf16 %v434_v37, %v427_v36  ;;  %v433_v42 = vld [vmem:[%s12855_s3 + $0x578] sm:$0xff]  ;;  %v5574_v43 = vpack.c.bf16 %v436_v40, %v429_v38  ;;  %v428_v45 = vld [vmem:[%s12855_s3 + $0x550] sm:$0xff]  ;;  %v435_v46 = vld [vmem:[%s12855_s3 + $0x588] sm:$0xff] }
  0x28   :  { %v5476_v44 = vpack.c.bf16 %v433_v42, %v426_v41  ;;  %v441_v48 = vld [vmem:[%s12855_s3 + $0x5b8] sm:$0xff]  ;;  %v448_v49 = vld [vmem:[%s12855_s3 + $0x5f0] sm:$0xff]  ;;  %v443_v50 = vld [vmem:[%s12855_s3 + $0x5c8] sm:$0xff] }
  0x29   :  { %v450_v52 = vld [vmem:[%s12855_s3 + $0x600] sm:$0xff]  ;;  %v440_v53 = vld [vmem:[%s12855_s3 + $0x5b0] sm:$0xff]  ;;  %v447_v54 = vld [vmem:[%s12855_s3 + $0x5e8] sm:$0xff] }
  0x2a   :  { %5553 = vmatpush1.bf16.msra.mxu1 %v5552_v47  ;;  %5461 = vmatpush1.bf16.msra.mxu0 %v5460_v60  ;;  %v5576_v47 = vpack.c.bf16 %v435_v46, %v428_v45  ;;  %v5578_v55 = vpack.c.bf16 %v450_v52, %v443_v50  ;;  %v5480_v56 = vpack.c.bf16 %v447_v54, %v440_v53  ;;  %v442_v57 = vld [vmem:[%s12855_s3 + $0x5c0] sm:$0xff]  ;;  %v449_v58 = vld [vmem:[%s12855_s3 + $0x5f8] sm:$0xff]  ;;  %v455_v60 = vld [vmem:[%s12855_s3 + $0x628] sm:$0xff] }
  0x2b   :  { %5555 = vmatprep.subr.bf16.mxu1 %v5554_v51  ;;  %5463 = vmatprep.subr.bf16.mxu0 %v5462_v0  ;;  %v5478_v51 = vpack.c.bf16 %v448_v49, %v441_v48  ;;  %v462_v61 = vld [vmem:[%s12855_s3 + $0x660] sm:$0xff]  ;;  %v464_v0 = vld [vmem:[%s12855_s3 + $0x670] sm:$0xff]  ;;  %v461_v2 = vld [vmem:[%s12855_s3 + $0x658] sm:$0xff] }
  0x2c   :  { %v5482_v63 = vpack.c.bf16 %v462_v61, %v455_v60  ;;  %v454_v1 = vld [vmem:[%s12855_s3 + $0x620] sm:$0xff]  ;;  %v469_v9 = vld [vmem:[%s12855_s3 + $0x698] sm:$0xff]  ;;  %v476_v10 = vld [vmem:[%s12855_s3 + $0x6d0] sm:$0xff] }
  0x2d   :  { %v5484_v5 = vpack.c.bf16 %v461_v2, %v454_v1  ;;  %v5486_v12 = vpack.c.bf16 %v476_v10, %v469_v9  ;;  %v478_v13 = vld [vmem:[%s12855_s3 + $0x6e0] sm:$0xff]  ;;  %v468_v14 = vld [vmem:[%s12855_s3 + $0x690] sm:$0xff]  ;;  %v483_v21 = vld [vmem:[%s12855_s3 + $0x708] sm:$0xff] }
  0x2e   :  { %5557 = vmatpush1.bf16.msra.mxu1 %v5556_v59  ;;  %5465 = vmatpush1.bf16.msra.mxu0 %v5464_v7  ;;  %v5580_v59 = vpack.c.bf16 %v449_v58, %v442_v57  ;;  %v463_v7 = vld [vmem:[%s12855_s3 + $0x668] sm:$0xff]  ;;  %v470_v18 = vld [vmem:[%s12855_s3 + $0x6a0] sm:$0xff]  ;;  %v492_v25 = vld [vmem:[%s12855_s3 + $0x750] sm:$0xff] }
  0x2f   :  { %5559 = vmatprep.subr.bf16.mxu1 %v5558_v62  ;;  %5467 = vmatprep.subr.bf16.mxu0 %v5466_v15  ;;  %v457_v62 = vld [vmem:[%s12855_s3 + $0x638] sm:$0xff]  ;;  %v475_v15 = vld [vmem:[%s12855_s3 + $0x6c8] sm:$0xff]  ;;  %v490_v22 = vld [vmem:[%s12855_s3 + $0x740] sm:$0xff] }
  0x30   :  { %v5582_v4 = vpack.c.bf16 %v464_v0, %v457_v62  ;;  %v5488_v17 = vpack.c.bf16 %v475_v15, %v468_v14  ;;  %v5490_v24 = vpack.c.bf16 %v490_v22, %v483_v21  ;;  %v45_v30 = vld [vmem:[%s12857_s2] sm:$0xf]  ;;  %v484_v57 = vld [vmem:[%s12855_s3 + $0x710] sm:$0xff]  ;;  %v491_v60 = vld [vmem:[%s12855_s3 + $0x748] sm:$0xff] }
  0x31   :  { %v497_v61 = vld [vmem:[%s12855_s3 + $0x778] sm:$0xff]  ;;  %v504_v62 = vld [vmem:[%s12855_s3 + $0x7b0] sm:$0xff]  ;;  %v499_v0 = vld [vmem:[%s12855_s3 + $0x788] sm:$0xff] }
  0x32   :  { %5561 = vmatpush1.bf16.msra.mxu1 %v5560_v6  ;;  %5469 = vmatpush1.bf16.msra.mxu0 %v5468_v20  ;;  %v456_v6 = vld [vmem:[%s12855_s3 + $0x630] sm:$0xff]  ;;  %v506_v1 = vld [vmem:[%s12855_s3 + $0x7c0] sm:$0xff]  ;;  %v503_v10 = vld [vmem:[%s12855_s3 + $0x7a8] sm:$0xff] }
  0x33   :  { %5563 = vmatprep.subr.bf16.mxu1 %v5562_v8  ;;  %5471 = vmatprep.subr.bf16.mxu0 %v5470_v27  ;;  %v5584_v8 = vpack.c.bf16 %v463_v7, %v456_v6  ;;  %v47_v27 = vlaneseq  ;;  %v5592_v7 = vpack.c.bf16 %v491_v60, %v484_v57  ;;  %v496_v9 = vld [vmem:[%s12855_s3 + $0x770] sm:$0xff]  ;;  %v5594_v14 = vpack.c.bf16 %v506_v1, %v499_v0  ;;  %v498_v15 = vld [vmem:[%s12855_s3 + $0x780] sm:$0xff]  ;;  %v555_v1 = vld [vmem:[%s12855_s3 + $0x948] sm:$0xff] }
  0x34   :  { %v5496_v22 = vpack.c.bf16 %v503_v10, %v496_v9  ;;  %v538_v57 = vld [vmem:[%s12855_s3 + $0x8c0] sm:$0xff]  ;;  %v560_v0 = vld [vmem:[%s12855_s3 + $0x970] sm:$0xff] }
  0x35   :  { %v7769_v28 = vshrl.u32 %v47_v27, 7 }
  0x36   :  { %5565 = vmatpush1.bf16.msra.mxu1 %v5564_v11  ;;  %5473 = vmatpush1.bf16.msra.mxu0 %v5472_v32  ;;  %v471_v11 = vld [vmem:[%s12855_s3 + $0x6a8] sm:$0xff] }
  0x37   :  { %5567 = vmatprep.subr.bf16.mxu1 %v5566_v19  ;;  %5475 = vmatprep.subr.bf16.mxu0 %v5474_v39  ;;  %v5586_v16 = vpack.c.bf16 %v478_v13, %v471_v11  ;;  %v477_v19 = vld [vmem:[%s12855_s3 + $0x6d8] sm:$0xff]  ;;  %v7772_v29 = vsub.s32 0, %v7769_v28  ;;  %v7787_v50 = vsub.s32 2, %v7769_v28 }
  0x38   :  { %v5588_v20 = vpack.c.bf16 %v477_v19, %v470_v18  ;;  %v518_v18 = vld [vmem:[%s12855_s3 + $0x820] sm:$0xff]  ;;  %v513_v19 = vld [vmem:[%s12855_s3 + $0x7f8] sm:$0xff] }
  0x39   :  { %v50_v32 = vrot.slane %v45_v30, %v7772_v29 }
  0x3a   :  { %5569 = vmatpush1.bf16.msra.mxu1 %v5568_v23  ;;  %5477 = vmatpush1.bf16.msra.mxu0 %v5476_v44  ;;  %v485_v23 = vld [vmem:[%s12855_s3 + $0x718] sm:$0xff] }
  0x3b   :  { %5571 = vmatprep.subr.bf16.mxu1 %v5570_v31  ;;  %5479 = vmatprep.subr.bf16.mxu0 %v5478_v51  ;;  %v5590_v26 = vpack.c.bf16 %v492_v25, %v485_v23  ;;  %v7778_v31 = vsub.s32 1, %v7769_v28  ;;  %v517_v25 = vld [vmem:[%s12855_s3 + $0x818] sm:$0xff] }
  0x3d   :  { %v54_v33 = vrot.slane %v45_v30, %v7778_v31 }
  0x3e   :  { %5573 = vmatpush1.bf16.msra.mxu1 %v5572_v35  ;;  %5481 = vmatpush1.bf16.msra.mxu0 %v5480_v56  ;;  %v7783_v35 = vsub.s32 3, %v7769_v28  ;;  %v489_v56 = vld [vmem:[%s12855_s3 + $0x738] sm:$0xff] }
  0x3f   :  { %5575 = vmatprep.subr.bf16.mxu1 %v5574_v43  ;;  %5483 = vmatprep.subr.bf16.mxu0 %v5482_v63 }
  0x40   :  { %v62_v41 = vrot.slane %v45_v30, %v7783_v35 }
  0x42   :  { %5577 = vmatpush1.bf16.msra.mxu1 %v5576_v47  ;;  %5485 = vmatpush1.bf16.msra.mxu0 %v5484_v5 }
  0x43   :  { %5579 = vmatprep.subr.bf16.mxu1 %v5578_v55  ;;  %5487 = vmatprep.subr.bf16.mxu0 %v5486_v12  ;;  %v482_v55 = vld [vmem:[%s12855_s3 + $0x700] sm:$0xff] }
  0x44   :  { %v5492_v6 = vpack.c.bf16 %v489_v56, %v482_v55 }
  0x46   :  { %5581 = vmatpush1.bf16.msra.mxu1 %v5580_v59  ;;  %5489 = vmatpush1.bf16.msra.mxu0 %v5488_v17  ;;  %v58_v59 = vrot.slane %v45_v30, %v7787_v50  ;;  %v511_v17 = vld [vmem:[%s12855_s3 + $0x7e8] sm:$0xff] }
  0x47   :  { %5583 = vmatprep.subr.bf16.mxu1 %v5582_v4  ;;  %5491 = vmatprep.subr.bf16.mxu0 %v5490_v24  ;;  %v510_v24 = vld [vmem:[%s12855_s3 + $0x7e0] sm:$0xff]  ;;  %v5498_v30 = vpack.c.bf16 %v518_v18, %v511_v17  ;;  %v569_v17 = vld [vmem:[%s12855_s3 + $0x9b8] sm:$0xff]  ;;  %v576_v18 = vld [vmem:[%s12855_s3 + $0x9f0] sm:$0xff] }
  0x4a   :  { %5585 = vmatpush1.bf16.msra.mxu1 %v5584_v8  ;;  %v5494_v8 = vpack.c.bf16 %v504_v62, %v497_v61  ;;  %v540_v61 = vld [vmem:[%s12855_s3 + $0x8d0] sm:$0xff]  ;;  %v547_v62 = vld [vmem:[%s12855_s3 + $0x908] sm:$0xff] }
  0x4b   :  { %5587 = vmatprep.subr.bf16.mxu1 %v5586_v16  ;;  %v505_v16 = vld [vmem:[%s12855_s3 + $0x7b8] sm:$0xff] }
  0x4c   :  { %v5596_v23 = vpack.c.bf16 %v505_v16, %v498_v15  ;;  %v567_v15 = vld [vmem:[%s12855_s3 + $0x9a8] sm:$0xff]  ;;  %v574_v16 = vld [vmem:[%s12855_s3 + $0x9e0] sm:$0xff] }
  0x4e   :  { %5589 = vmatpush1.bf16.msra.mxu1 %v5588_v20  ;;  %v520_v20 = vld [vmem:[%s12855_s3 + $0x830] sm:$0xff] }
  0x4f   :  { %5591 = vmatprep.subr.bf16.mxu1 %v5590_v26 }
  0xde   :  { %v150_v34 = vpop.f32.mrb[0].mxu1 }
  0xdf   :  { %v151_v36 = vadd.f32 %v150_v34, %v50_v32  ;;  %v152_v37 = vpop.f32.mrb[1].mxu1  ;;  %v5598_v32 = vpack.c.bf16 %v520_v20, %v513_v19  ;;  %v519_v34 = vld [vmem:[%s12855_s3 + $0x828] sm:$0xff] }
  0xe0   :  { %v153_v38 = vadd.f32 %v152_v37, %v54_v33  ;;  %v512_v33 = vld [vmem:[%s12855_s3 + $0x7f0] sm:$0xff] }
  0xe1   :  { %v226_v39 = vmin.f32 %v151_v36, 0.0  ;;  %vm246_vm2 = vcmp.gt.f32.partialorder %v151_v36, 0.0 }
  0xe2   :  { %v227_v40 = vmin.f32 %v153_v38, 0.0  ;;  %vm247_vm3 = vcmp.gt.f32.partialorder %v153_v38, 0.0 }
  0xe3   :  { %v230_v42 = vmul.f32 1.442695, %v226_v39  ;;  %v527_v39 = vld [vmem:[%s12855_s3 + $0x868] sm:$0xff] }
  0xe4   :  { %v232_v43 = vmul.f32 1.442695, %v227_v40  ;;  %v221_v44 = vpop.f32.mrb[2].mxu1  ;;  %v534_v40 = vld [vmem:[%s12855_s3 + $0x8a0] sm:$0xff] }
  0xe5   :  { %7222 = vpow2.f32 %v230_v42  ;;  %v223_v45 = vpop.f32.mrb[3].mxu1  ;;  %v7824_v12 = vadd.f32 %v221_v44, %v58_v59  ;;  %v5600_v42 = vpack.c.bf16 %v519_v34, %v512_v33  ;;  %v531_v44 = vld [vmem:[%s12855_s3 + $0x888] sm:$0xff]  ;;  %v590_v33 = vld [vmem:[%s12855_s3 + $0xa60] sm:$0xff] }
  0xe6   :  { %7224 = vpow2.f32 %v232_v43  ;;  %v224_v46 = vadd.f32 %v223_v45, %v62_v41  ;;  %v5500_v41 = vpack.c.bf16 %v517_v25, %v510_v24  ;;  %v524_v43 = vld [vmem:[%s12855_s3 + $0x850] sm:$0xff]  ;;  %v5614_v24 = vpack.c.bf16 %v576_v18, %v569_v17 }
  0xe7   :  { %v228_v26 = vmin.f32 %v7824_v12, 0.0  ;;  %v5504_v55 = vpack.c.bf16 %v531_v44, %v524_v43  ;;  %v568_v25 = vld [vmem:[%s12855_s3 + $0x9b0] sm:$0xff]  ;;  %v582_v43 = vld [vmem:[%s12855_s3 + $0xa20] sm:$0xff]  ;;  %v589_v44 = vld [vmem:[%s12855_s3 + $0xa58] sm:$0xff]  ;;  %vm248_vm6 = vcmp.gt.f32.partialorder %v7824_v12, 0.0 }
  0xe8   :  { %v229_v47 = vmin.f32 %v224_v46, 0.0  ;;  %vm249_vm4 = vcmp.gt.f32.partialorder %v224_v46, 0.0 }
  0xe9   :  { %v234_v45 = vmul.f32 1.442695, %v228_v26  ;;  %v575_v26 = vld [vmem:[%s12855_s3 + $0x9e8] sm:$0xff] }
  0xea   :  { %v236_v48 = vmul.f32 1.442695, %v229_v47  ;;  %v5602_v47 = vpack.c.bf16 %v534_v40, %v527_v39  ;;  %v580_v39 = vld [vmem:[%s12855_s3 + $0xa10] sm:$0xff]  ;;  %v587_v40 = vld [vmem:[%s12855_s3 + $0xa48] sm:$0xff] }
  0xec   :  { %7226 = vpow2.f32 %v236_v48  ;;  %v526_v48 = vld [vmem:[%s12855_s3 + $0x860] sm:$0xff] }
  0xed   :  { %7228 = vpow2.f32 %v234_v45  ;;  %v595_v45 = vld [vmem:[%s12855_s3 + $0xa88] sm:$0xff] }
  0xef   :  { %v7223_v49 = vpop.eup %7222 }
  0xf0   :  { %v7225_v51 = vpop.eup %7224  ;;  %v5116_v52 = vadd.f32 -1.0, %v7223_v49  ;;  %v533_v49 = vld [vmem:[%s12855_s3 + $0x898] sm:$0xff] }
  0xf1   :  { %v5117_v53 = vadd.f32 -1.0, %v7225_v51  ;;  %v539_v51 = vld [vmem:[%s12855_s3 + $0x8c8] sm:$0xff]  ;;  %v5604_v56 = vpack.c.bf16 %v533_v49, %v526_v48  ;;  %v597_v48 = vld [vmem:[%s12855_s3 + $0xa98] sm:$0xff]  ;;  %v604_v49 = vld [vmem:[%s12855_s3 + $0xad0] sm:$0xff] }
  0xf2   :  { %v242_v54 = vmul.f32 1.6732632, %v5116_v52  ;;  %v546_v52 = vld [vmem:[%s12855_s3 + $0x900] sm:$0xff] }
  0xf3   :  { %v243_v58 = vmul.f32 1.6732632, %v5117_v53  ;;  %v541_v53 = vld [vmem:[%s12855_s3 + $0x8d8] sm:$0xff]  ;;  %v5506_v59 = vpack.c.bf16 %v546_v52, %v539_v51  ;;  %v5520_v51 = vpack.c.bf16 %v587_v40, %v580_v39  ;;  %v5620_v52 = vpack.c.bf16 %v589_v44, %v582_v43  ;;  %v292_v39 = vld [vmem:[%s12855_s3 + $0x110] sm:$0xff]  ;;  %v418_v43 = vld [vmem:[%s12855_s3 + $0x500] sm:$0xff] }
  0xf4   :  { %v250_v63 = vsel %vm246_vm2, %v151_v36, %v242_v54  ;;  %v525_v36 = vld [vmem:[%s12855_s3 + $0x858] sm:$0xff]  ;;  %v548_v54 = vld [vmem:[%s12855_s3 + $0x910] sm:$0xff] }
  0xf5   :  { %v251_v2 = vsel %vm247_vm3, %v153_v38, %v243_v58  ;;  %v7822_v11 = vmul.f32 1.050701, %v250_v63  ;;  %v532_v38 = vld [vmem:[%s12855_s3 + $0x890] sm:$0xff]  ;;  %v545_v58 = vld [vmem:[%s12855_s3 + $0x8f8] sm:$0xff]  ;;  %v5606_v60 = vpack.c.bf16 %v548_v54, %v541_v53  ;;  %v594_v53 = vld [vmem:[%s12855_s3 + $0xa80] sm:$0xff] }
  0xf6   :  { %v7227_v4 = vpop.eup %7226  ;;  %v7814_v5 = vmul.f32 1.050701, %v251_v2  ;;  %v553_v63 = vld [vmem:[%s12855_s3 + $0x938] sm:$0xff]  ;;  %v562_v2 = vld [vmem:[%s12855_s3 + $0x980] sm:$0xff] }
  0xf7   :  { %v5119_v13 = vadd.f32 -1.0, %v7227_v4  ;;  %v5508_v4 = vpack.c.bf16 %v545_v58, %v538_v57  ;;  %v5510_v9 = vpack.c.bf16 %v560_v0, %v553_v63  ;;  %v5610_v10 = vpack.c.bf16 %v562_v2, %v555_v1  ;;  %v7229_v34 = vpop.eup %7228  ;;  %v601_v54 = vld [vmem:[%s12855_s3 + $0xab8] sm:$0xff]  ;;  %v596_v57 = vld [vmem:[%s12855_s3 + $0xa90] sm:$0xff]  ;;  %v603_v58 = vld [vmem:[%s12855_s3 + $0xac8] sm:$0xff] }
  0xf8   :  { %713 = vmatprep.mubr.f32.mxu0 %v7814_v5  ;;  %855 = vmatprep.mubr.f32.mxu1 %v7814_v5  ;;  %v383_v63 = vld [vmem:[%s12855_s3 + $0x3e8] sm:$0xff]  ;;  %v5524_v0 = vpack.c.bf16 %v601_v54, %v594_v53  ;;  %v5624_v1 = vpack.c.bf16 %v603_v58, %v596_v57  ;;  %v425_v44 = vld [vmem:[%s12855_s3 + $0x538] sm:$0xff] }
  0xf9   :  { %v245_v21 = vmul.f32 1.6732632, %v5119_v13  ;;  %714 = vmatmul.mubr.f32.vlgmr.msra.gmra.mrb[0].mxu0 %v7822_v11  ;;  %856 = vmatmul.mubr.f32.vlgmr.msra.gmra.mrb[4].mxu1 %v7822_v11  ;;  %v554_v13 = vld [vmem:[%s12855_s3 + $0x940] sm:$0xff]  ;;  %v313_v53 = vld [vmem:[%s12855_s3 + $0x1b8] sm:$0xff]  ;;  %v319_v54 = vld [vmem:[%s12855_s3 + $0x1e8] sm:$0xff] }
  0xfa   :  { %5493 = vmatpush1.bf16.msra.mxu0 %v5492_v6  ;;  %5593 = vmatpush1.bf16.msra.mxu1 %v5592_v7  ;;  %v5608_v6 = vpack.c.bf16 %v547_v62, %v540_v61  ;;  %v552_v7 = vld [vmem:[%s12855_s3 + $0x930] sm:$0xff]  ;;  %v270_v61 = vld [vmem:[%s12855_s3 + $0x60] sm:$0xff]  ;;  %v439_v57 = vld [vmem:[%s12855_s3 + $0x5a8] sm:$0xff] }
  0xfb   :  { %v253_v27 = vsel %vm249_vm4, %v224_v46, %v245_v21  ;;  %5495 = vmatprep.subr.bf16.mxu0 %v5494_v8  ;;  %5595 = vmatprep.subr.bf16.mxu1 %v5594_v14  ;;  %v5502_v46 = vpack.c.bf16 %v532_v38, %v525_v36  ;;  %v559_v8 = vld [vmem:[%s12855_s3 + $0x968] sm:$0xff]  ;;  %v561_v14 = vld [vmem:[%s12855_s3 + $0x978] sm:$0xff]  ;;  %v566_v21 = vld [vmem:[%s12855_s3 + $0x9a0] sm:$0xff]  ;;  %v5616_v38 = vpack.c.bf16 %v575_v26, %v568_v25 }
  0xfc   :  { %v7865_v37 = vmul.f32 1.050701, %v253_v27  ;;  %v5512_v19 = vpack.c.bf16 %v559_v8, %v552_v7  ;;  %v5612_v20 = vpack.c.bf16 %v561_v14, %v554_v13  ;;  %v581_v27 = vld [vmem:[%s12855_s3 + $0xa18] sm:$0xff]  ;;  %v376_v62 = vld [vmem:[%s12855_s3 + $0x3b0] sm:$0xff]  ;;  %v291_v25 = vld [vmem:[%s12855_s3 + $0x108] sm:$0xff] }
  0xfd   :  { %v269_v7 = vld [vmem:[%s12855_s3 + $0x58] sm:$0xff]  ;;  %v284_v14 = vld [vmem:[%s12855_s3 + $0xd0] sm:$0xff]  ;;  %v298_v26 = vld [vmem:[%s12855_s3 + $0x140] sm:$0xff] }
  0xfe   :  { %5497 = vmatpush1.bf16.msra.mxu0 %v5496_v22  ;;  %5597 = vmatpush1.bf16.msra.mxu1 %v5596_v23  ;;  %v573_v22 = vld [vmem:[%s12855_s3 + $0x9d8] sm:$0xff]  ;;  %v5514_v23 = vpack.c.bf16 %v574_v16, %v567_v15 }
  0xff   :  { %5499 = vmatprep.subr.bf16.mxu0 %v5498_v30  ;;  %5599 = vmatprep.subr.bf16.mxu1 %v5598_v32  ;;  %v588_v30 = vld [vmem:[%s12855_s3 + $0xa50] sm:$0xff]  ;;  %v583_v32 = vld [vmem:[%s12855_s3 + $0xa28] sm:$0xff]  ;;  %v5516_v36 = vpack.c.bf16 %v573_v22, %v566_v21  ;;  %v277_v13 = vld [vmem:[%s12855_s3 + $0x98] sm:$0xff] }
 0x100   :  { %5120 = vmatprep.mubr.msk.f32.mxu0 %vm645_vm5, %v7865_v37  ;;  %5121 = vmatprep.mubr.msk.f32.mxu1 %vm645_vm5, %v7865_v37  ;;  %v397_v15 = vld [vmem:[%s12855_s3 + $0x458] sm:$0xff]  ;;  %v278_v21 = vld [vmem:[%s12855_s3 + $0xa0] sm:$0xff]  ;;  %v5630_v22 = vpack.c.bf16 %v284_v14, %v277_v13  ;;  %v332_v13 = vld [vmem:[%s12855_s3 + $0x250] sm:$0xff] }
 0x101   :  { %v339_v14 = vld [vmem:[%s12855_s3 + $0x288] sm:$0xff] }
 0x102   :  { %5501 = vmatpush1.bf16.msra.mxu0 %v5500_v41  ;;  %5601 = vmatpush1.bf16.msra.mxu1 %v5600_v42  ;;  %v5518_v41 = vpack.c.bf16 %v588_v30, %v581_v27  ;;  %v5618_v42 = vpack.c.bf16 %v590_v33, %v583_v32  ;;  %v404_v27 = vld [vmem:[%s12855_s3 + $0x490] sm:$0xff]  ;;  %v411_v30 = vld [vmem:[%s12855_s3 + $0x4c8] sm:$0xff] }
 0x103   :  { %5503 = vmatprep.subr.bf16.mxu0 %v5502_v46  ;;  %5603 = vmatprep.subr.bf16.mxu1 %v5602_v47  ;;  %v5118_v46 = vadd.f32 -1.0, %v7229_v34  ;;  %v602_v47 = vld [vmem:[%s12855_s3 + $0xac0] sm:$0xff]  ;;  %v5634_v34 = vpack.c.bf16 %v298_v26, %v291_v25  ;;  %v5734_v40 = vpack.c.bf16 %v411_v30, %v404_v27  ;;  %v353_v26 = vld [vmem:[%s12855_s3 + $0x2f8] sm:$0xff]  ;;  %v348_v27 = vld [vmem:[%s12855_s3 + $0x2d0] sm:$0xff] }
 0x104   :  { %v346_v25 = vld [vmem:[%s12855_s3 + $0x2c0] sm:$0xff] }
 0x106   :  { %5505 = vmatpush1.bf16.msra.mxu0 %v5504_v55  ;;  %5605 = vmatpush1.bf16.msra.mxu1 %v5604_v56  ;;  %v5522_v55 = vpack.c.bf16 %v602_v47, %v595_v45  ;;  %v5622_v56 = vpack.c.bf16 %v604_v49, %v597_v48  ;;  %v304_v48 = vld [vmem:[%s12855_s3 + $0x170] sm:$0xff]  ;;  %v311_v49 = vld [vmem:[%s12855_s3 + $0x1a8] sm:$0xff] }
 0x107   :  { %5507 = vmatprep.subr.bf16.mxu0 %v5506_v59  ;;  %5607 = vmatprep.subr.bf16.mxu1 %v5606_v60  ;;  %v263_v59 = vld [vmem:[%s12855_s3 + $0x28] sm:$0xff]  ;;  %v244_v60 = vmul.f32 1.6732632, %v5118_v46  ;;  %v5640_v58 = vpack.c.bf16 %v311_v49, %v304_v48 }
 0x108   :  { %v5626_v2 = vpack.c.bf16 %v270_v61, %v263_v59  ;;  %v318_v61 = vld [vmem:[%s12855_s3 + $0x1e0] sm:$0xff] }
 0x109   :  { %v252_v8 = vsel %vm248_vm6, %v7824_v12, %v244_v60  ;;  %v390_v12 = vld [vmem:[%s12855_s3 + $0x420] sm:$0xff] }
 0x10a   :  { %5509 = vmatpush1.bf16.msra.mxu0 %v5508_v4  ;;  %5609 = vmatpush1.bf16.msra.mxu1 %v5608_v6  ;;  %v5726_v4 = vpack.c.bf16 %v383_v63, %v376_v62  ;;  %v262_v6 = vld [vmem:[%s12855_s3 + $0x20] sm:$0xff]  ;;  %v8050_v17 = vmul.f32 1.050701, %v252_v8  ;;  %v325_v62 = vld [vmem:[%s12855_s3 + $0x218] sm:$0xff]  ;;  %v320_v63 = vld [vmem:[%s12855_s3 + $0x1f0] sm:$0xff] }
 0x10b   :  { %5511 = vmatprep.subr.bf16.mxu0 %v5510_v9  ;;  %5611 = vmatprep.subr.bf16.mxu1 %v5610_v10  ;;  %v264_v9 = vld [vmem:[%s12855_s3 + $0x30] sm:$0xff]  ;;  %v271_v10 = vld [vmem:[%s12855_s3 + $0x68] sm:$0xff]  ;;  %v5628_v16 = vpack.c.bf16 %v269_v7, %v262_v6  ;;  %v446_v6 = vld [vmem:[%s12855_s3 + $0x5e0] sm:$0xff]  ;;  %v5644_v8 = vpack.c.bf16 %v325_v62, %v318_v61 }
 0x10c   :  { %v5728_v18 = vpack.c.bf16 %v271_v10, %v264_v9  ;;  %v453_v7 = vld [vmem:[%s12855_s3 + $0x618] sm:$0xff]  ;;  %v395_v61 = vld [vmem:[%s12855_s3 + $0x448] sm:$0xff]  ;;  %v502_v62 = vld [vmem:[%s12855_s3 + $0x7a0] sm:$0xff] }
 0x10e   :  { %5513 = vmatpush1.bf16.msra.mxu0 %v5512_v19  ;;  %5613 = vmatpush1.bf16.msra.mxu1 %v5612_v20  ;;  %v276_v19 = vld [vmem:[%s12855_s3 + $0x90] sm:$0xff]  ;;  %v283_v20 = vld [vmem:[%s12855_s3 + $0xc8] sm:$0xff] }
 0x10f   :  { %5515 = vmatprep.subr.bf16.mxu0 %v5514_v23  ;;  %5615 = vmatprep.subr.bf16.mxu1 %v5614_v24  ;;  %v5730_v23 = vpack.c.bf16 %v397_v15, %v390_v12  ;;  %v285_v24 = vld [vmem:[%s12855_s3 + $0xd8] sm:$0xff]  ;;  %v5632_v32 = vpack.c.bf16 %v283_v20, %v276_v19  ;;  %v334_v12 = vld [vmem:[%s12855_s3 + $0x260] sm:$0xff]  ;;  %v5746_v15 = vpack.c.bf16 %v453_v7, %v446_v6  ;;  %v460_v20 = vld [vmem:[%s12855_s3 + $0x650] sm:$0xff] }
 0x110   :  { %v5732_v33 = vpack.c.bf16 %v285_v24, %v278_v21  ;;  %v354_v19 = vld [vmem:[%s12855_s3 + $0x300] sm:$0xff]  ;;  %v467_v21 = vld [vmem:[%s12855_s3 + $0x688] sm:$0xff] }
 0x111   :  { %v5750_v30 = vpack.c.bf16 %v467_v21, %v460_v20  ;;  %v416_v20 = vld [vmem:[%s12855_s3 + $0x4f0] sm:$0xff]  ;;  %v423_v21 = vld [vmem:[%s12855_s3 + $0x528] sm:$0xff] }
 0x112   :  { %5517 = vmatpush1.bf16.msra.mxu0 %v5516_v36  ;;  %5617 = vmatpush1.bf16.msra.mxu1 %v5616_v38  ;;  %v290_v36 = vld [vmem:[%s12855_s3 + $0x100] sm:$0xff]  ;;  %v297_v38 = vld [vmem:[%s12855_s3 + $0x138] sm:$0xff] }
 0x113   :  { %5519 = vmatprep.subr.bf16.mxu0 %v5518_v41  ;;  %5619 = vmatprep.subr.bf16.mxu1 %v5618_v42  ;;  %v305_v41 = vld [vmem:[%s12855_s3 + $0x178] sm:$0xff]  ;;  %v312_v42 = vld [vmem:[%s12855_s3 + $0x1b0] sm:$0xff]  ;;  %v5636_v45 = vpack.c.bf16 %v297_v38, %v290_v36  ;;  %v474_v36 = vld [vmem:[%s12855_s3 + $0x6c0] sm:$0xff] }
 0x114   :  { %v5638_v47 = vpack.c.bf16 %v312_v42, %v305_v41  ;;  %v481_v38 = vld [vmem:[%s12855_s3 + $0x6f8] sm:$0xff]  ;;  %v360_v41 = vld [vmem:[%s12855_s3 + $0x330] sm:$0xff]  ;;  %v367_v42 = vld [vmem:[%s12855_s3 + $0x368] sm:$0xff] }
 0x115   :  { %v5656_v48 = vpack.c.bf16 %v367_v42, %v360_v41  ;;  %v444_v42 = vld [vmem:[%s12855_s3 + $0x5d0] sm:$0xff] }
 0x116   :  { %5521 = vmatpush1.bf16.msra.mxu0 %v5520_v51  ;;  %5621 = vmatpush1.bf16.msra.mxu1 %v5620_v52  ;;  %v306_v51 = vld [vmem:[%s12855_s3 + $0x180] sm:$0xff]  ;;  %v5738_v52 = vpack.c.bf16 %v425_v44, %v418_v43  ;;  %v5754_v44 = vpack.c.bf16 %v481_v38, %v474_v36  ;;  %v551_v36 = vld [vmem:[%s12855_s3 + $0x928] sm:$0xff]  ;;  %v445_v38 = vld [vmem:[%s12855_s3 + $0x5d8] sm:$0xff] }
 0x117   :  { %5523 = vmatprep.subr.bf16.mxu0 %v5522_v55  ;;  %5623 = vmatprep.subr.bf16.mxu1 %v5622_v56  ;;  %v326_v55 = vld [vmem:[%s12855_s3 + $0x220] sm:$0xff]  ;;  %v432_v56 = vld [vmem:[%s12855_s3 + $0x570] sm:$0xff]  ;;  %v5740_v59 = vpack.c.bf16 %v313_v53, %v306_v51  ;;  %v381_v53 = vld [vmem:[%s12855_s3 + $0x3d8] sm:$0xff] }
 0x118   :  { %v5642_v60 = vpack.c.bf16 %v326_v55, %v319_v54  ;;  %v362_v43 = vld [vmem:[%s12855_s3 + $0x340] sm:$0xff]  ;;  %v488_v54 = vld [vmem:[%s12855_s3 + $0x730] sm:$0xff]  ;;  %v495_v55 = vld [vmem:[%s12855_s3 + $0x768] sm:$0xff] }
 0x11a   :  { %5525 = vmatpush1.bf16.msra.mxu0 %v5524_v0  ;;  %5625 = vmatpush1.bf16.msra.mxu1 %v5624_v1  ;;  %v5742_v0 = vpack.c.bf16 %v439_v57, %v432_v56  ;;  %v327_v1 = vld [vmem:[%s12855_s3 + $0x228] sm:$0xff]  ;;  %v389_v56 = vld [vmem:[%s12855_s3 + $0x418] sm:$0xff]  ;;  %v396_v57 = vld [vmem:[%s12855_s3 + $0x450] sm:$0xff] }
 0x11b   :  { %5627 = vmatprep.subr.bf16.mxu0 %v5626_v2  ;;  %5727 = vmatprep.subr.bf16.mxu1 %v5726_v4  ;;  %v333_v2 = vld [vmem:[%s12855_s3 + $0x258] sm:$0xff]  ;;  %v340_v4 = vld [vmem:[%s12855_s3 + $0x290] sm:$0xff]  ;;  %v5744_v9 = vpack.c.bf16 %v327_v1, %v320_v63  ;;  %v7274_v63 = vmov 0.0|0.0  }
 0x11c   :  { %v5646_v10 = vpack.c.bf16 %v340_v4, %v333_v2  ;;  %v509_v1 = vld [vmem:[%s12855_s3 + $0x7d8] sm:$0xff]  ;;  %v403_v2 = vld [vmem:[%s12855_s3 + $0x488] sm:$0xff]  ;;  %v410_v4 = vld [vmem:[%s12855_s3 + $0x4c0] sm:$0xff] }
 0x11d   :  { %785 = vmatmul.mubr.f32.vlgmr.msra.gmra.mrb[0].mxu0 %v8050_v17  ;;  %927 = vmatmul.mubr.f32.vlgmr.msra.gmra.mrb[4].mxu1 %v8050_v17  ;;  %v5762_v7 = vpack.c.bf16 %v509_v1, %v502_v62  ;;  %v479_v62 = vld [vmem:[%s12855_s3 + $0x6e8] sm:$0xff]  ;;  %v593_v1 = vld [vmem:[%s12855_s3 + $0xa78] sm:$0xff] }
 0x11e   :  { %5629 = vmatpush1.bf16.msra.mxu0 %v5628_v16  ;;  %997 = vmatprep.mubr.f32.mxu0 %v7814_v5  ;;  %v341_v16 = vld [vmem:[%s12855_s3 + $0x298] sm:$0xff] }
 0x11f   :  { %5729 = vmatpush3.bf16.msra.mxu1 %v5728_v18  ;;  %1139 = vmatprep.mubr.f32.mxu1 %v7814_v5  ;;  %v299_v5 = vld [vmem:[%s12855_s3 + $0x148] sm:$0xff] }
 0x120   :  { %5631 = vmatprep.subr.bf16.mxu0 %v5630_v22  ;;  %5731 = vmatprep.subr.bf16.mxu1 %v5730_v23  ;;  %v5736_v46 = vpack.c.bf16 %v299_v5, %v292_v39  ;;  %v347_v18 = vld [vmem:[%s12855_s3 + $0x2c8] sm:$0xff]  ;;  %v5648_v22 = vpack.c.bf16 %v339_v14, %v332_v13  ;;  %v5748_v23 = vpack.c.bf16 %v341_v16, %v334_v12  ;;  %v516_v13 = vld [vmem:[%s12855_s3 + $0x810] sm:$0xff]  ;;  %v417_v12 = vld [vmem:[%s12855_s3 + $0x4f8] sm:$0xff] }
 0x121   :  { %v5650_v24 = vpack.c.bf16 %v354_v19, %v347_v18  ;;  %v5652_v39 = vpack.c.bf16 %v353_v26, %v346_v25  ;;  %v523_v14 = vld [vmem:[%s12855_s3 + $0x848] sm:$0xff]  ;;  %v438_v25 = vld [vmem:[%s12855_s3 + $0x5a0] sm:$0xff]  ;;  %v5672_v26 = vpack.c.bf16 %v423_v21, %v416_v20 }
 0x122   :  { %5633 = vmatpush1.bf16.msra.mxu0 %v5632_v32  ;;  %v355_v32 = vld [vmem:[%s12855_s3 + $0x308] sm:$0xff]  ;;  %v5765_v18 = vpack.c.bf16 %v523_v14, %v516_v13  ;;  %v600_v13 = vld [vmem:[%s12855_s3 + $0xab0] sm:$0xff] }
 0x123   :  { %5733 = vmatpush3.bf16.msra.mxu1 %v5732_v33  ;;  %5635 = vmatprep.subr.bf16.mxu0 %v5634_v34  ;;  %v361_v33 = vld [vmem:[%s12855_s3 + $0x338] sm:$0xff]  ;;  %v368_v34 = vld [vmem:[%s12855_s3 + $0x370] sm:$0xff]  ;;  %v607_v14 = vld [vmem:[%s12855_s3 + $0xae8] sm:$0xff] }
 0x124   :  { %5735 = vmatprep.subr.bf16.mxu1 %v5734_v40  ;;  %v5752_v40 = vpack.c.bf16 %v355_v32, %v348_v27  ;;  %v5654_v5 = vpack.c.bf16 %v368_v34, %v361_v33  ;;  %v430_v32 = vld [vmem:[%s12855_s3 + $0x560] sm:$0xff]  ;;  %v437_v33 = vld [vmem:[%s12855_s3 + $0x598] sm:$0xff]  ;;  %v544_v34 = vld [vmem:[%s12855_s3 + $0x8f0] sm:$0xff]  ;;  %v5783_v20 = vpack.c.bf16 %v607_v14, %v600_v13 }
 0x125   :  { %v556_v13 = vld [vmem:[%s12855_s3 + $0x950] sm:$0xff]  ;;  %v563_v14 = vld [vmem:[%s12855_s3 + $0x988] sm:$0xff] }
 0x126   :  { %5637 = vmatpush1.bf16.msra.mxu0 %v5636_v45  ;;  %v369_v45 = vld [vmem:[%s12855_s3 + $0x378] sm:$0xff] }
 0x127   :  { %5737 = vmatpush3.bf16.msra.mxu1 %v5736_v46  ;;  %5639 = vmatprep.subr.bf16.mxu0 %v5638_v47  ;;  %v375_v46 = vld [vmem:[%s12855_s3 + $0x3a8] sm:$0xff]  ;;  %v382_v47 = vld [vmem:[%s12855_s3 + $0x3e0] sm:$0xff]  ;;  %v5756_v49 = vpack.c.bf16 %v369_v45, %v362_v43  ;;  %v565_v45 = vld [vmem:[%s12855_s3 + $0x998] sm:$0xff] }
 0x128   :  { %5739 = vmatprep.subr.bf16.mxu1 %v5738_v52  ;;  %v5658_v51 = vpack.c.bf16 %v382_v47, %v375_v46  ;;  %v374_v52 = vld [vmem:[%s12855_s3 + $0x3a0] sm:$0xff]  ;;  %v451_v43 = vld [vmem:[%s12855_s3 + $0x608] sm:$0xff] }
 0x129   :  { %v459_v46 = vld [vmem:[%s12855_s3 + $0x648] sm:$0xff]  ;;  %v466_v47 = vld [vmem:[%s12855_s3 + $0x680] sm:$0xff] }
 0x12a   :  { %5641 = vmatpush1.bf16.msra.mxu0 %v5640_v58  ;;  %v5660_v58 = vpack.c.bf16 %v381_v53, %v374_v52  ;;  %v458_v52 = vld [vmem:[%s12855_s3 + $0x640] sm:$0xff]  ;;  %v465_v53 = vld [vmem:[%s12855_s3 + $0x678] sm:$0xff] }
 0x12b   :  { %5741 = vmatpush3.bf16.msra.mxu1 %v5740_v59  ;;  %5643 = vmatprep.subr.bf16.mxu0 %v5642_v60  ;;  %v5759_v59 = vpack.c.bf16 %v495_v55, %v488_v54  ;;  %v388_v60 = vld [vmem:[%s12855_s3 + $0x410] sm:$0xff]  ;;  %v579_v55 = vld [vmem:[%s12855_s3 + $0xa08] sm:$0xff] }
 0x12c   :  { %5743 = vmatprep.subr.bf16.mxu1 %v5742_v0  ;;  %v5662_v0 = vpack.c.bf16 %v396_v57, %v389_v56  ;;  %v5664_v6 = vpack.c.bf16 %v395_v61, %v388_v60  ;;  %v572_v54 = vld [vmem:[%s12855_s3 + $0x9d0] sm:$0xff]  ;;  %v473_v56 = vld [vmem:[%s12855_s3 + $0x6b8] sm:$0xff] }
 0x12d   :  { %v480_v57 = vld [vmem:[%s12855_s3 + $0x6f0] sm:$0xff] }
 0x12e   :  { %5645 = vmatpush1.bf16.msra.mxu0 %v5644_v8  ;;  %v5666_v8 = vpack.c.bf16 %v410_v4, %v403_v2  ;;  %v5686_v60 = vpack.c.bf16 %v480_v57, %v473_v56  ;;  %v472_v61 = vld [vmem:[%s12855_s3 + $0x6b0] sm:$0xff]  ;;  %v487_v2 = vld [vmem:[%s12855_s3 + $0x728] sm:$0xff]  ;;  %v494_v4 = vld [vmem:[%s12855_s3 + $0x760] sm:$0xff] }
 0x12f   :  { %5745 = vmatpush3.bf16.msra.mxu1 %v5744_v9  ;;  %5647 = vmatprep.subr.bf16.mxu0 %v5646_v10  ;;  %v402_v9 = vld [vmem:[%s12855_s3 + $0x480] sm:$0xff]  ;;  %v409_v10 = vld [vmem:[%s12855_s3 + $0x4b8] sm:$0xff]  ;;  %v1321_v57 = vld [vmem:[%s12858_s5 + $0x190] sm:$0xff] }
 0x130   :  { %5747 = vmatprep.subr.bf16.mxu1 %v5746_v15  ;;  %v424_v15 = vld [vmem:[%s12855_s3 + $0x530] sm:$0xff]  ;;  %v5668_v16 = vpack.c.bf16 %v409_v10, %v402_v9  ;;  %v486_v9 = vld [vmem:[%s12855_s3 + $0x720] sm:$0xff]  ;;  %v493_v10 = vld [vmem:[%s12855_s3 + $0x758] sm:$0xff] }
 0x131   :  { %v5670_v19 = vpack.c.bf16 %v424_v15, %v417_v12  ;;  %v501_v12 = vld [vmem:[%s12855_s3 + $0x798] sm:$0xff]  ;;  %v508_v15 = vld [vmem:[%s12855_s3 + $0x7d0] sm:$0xff] }
 0x132   :  { %5649 = vmatpush1.bf16.msra.mxu0 %v5648_v22  ;;  %v530_v22 = vld [vmem:[%s12855_s3 + $0x880] sm:$0xff]  ;;  %v5694_v21 = vpack.c.bf16 %v508_v15, %v501_v12  ;;  %v1314_v56 = vld [vmem:[%s12858_s5 + $0x158] sm:$0xff]  ;;  %v571_v12 = vld [vmem:[%s12855_s3 + $0x9c8] sm:$0xff] }
 0x133   :  { %5749 = vmatpush3.bf16.msra.mxu1 %v5748_v23  ;;  %5651 = vmatprep.subr.bf16.mxu0 %v5650_v24  ;;  %v537_v23 = vld [vmem:[%s12855_s3 + $0x8b8] sm:$0xff]  ;;  %v431_v24 = vld [vmem:[%s12855_s3 + $0x568] sm:$0xff] }
 0x134   :  { %5751 = vmatprep.subr.bf16.mxu1 %v5750_v30  ;;  %v5768_v27 = vpack.c.bf16 %v537_v23, %v530_v22  ;;  %v5674_v30 = vpack.c.bf16 %v438_v25, %v431_v24  ;;  %v500_v22 = vld [vmem:[%s12855_s3 + $0x790] sm:$0xff]  ;;  %v507_v23 = vld [vmem:[%s12855_s3 + $0x7c8] sm:$0xff]  ;;  %v522_v25 = vld [vmem:[%s12855_s3 + $0x840] sm:$0xff] }
 0x135   :  { %v515_v24 = vld [vmem:[%s12855_s3 + $0x808] sm:$0xff] }
 0x136   :  { %5653 = vmatpush1.bf16.msra.mxu0 %v5652_v39  ;;  %v452_v39 = vld [vmem:[%s12855_s3 + $0x610] sm:$0xff] }
 0x137   :  { %5753 = vmatpush3.bf16.msra.mxu1 %v5752_v40  ;;  %5655 = vmatprep.subr.bf16.mxu0 %v5654_v5  ;;  %v5676_v40 = vpack.c.bf16 %v437_v33, %v430_v32  ;;  %v5771_v5 = vpack.c.bf16 %v551_v36, %v544_v34  ;;  %v5678_v41 = vpack.c.bf16 %v452_v39, %v445_v38  ;;  %v1286_v32 = vld [vmem:[%s12858_s5 + $0x78] sm:$0xff]  ;;  %v1293_v33 = vld [vmem:[%s12858_s5 + $0xb0] sm:$0xff] }
 0x138   :  { %5755 = vmatprep.subr.bf16.mxu1 %v5754_v44  ;;  %v558_v44 = vld [vmem:[%s12855_s3 + $0x960] sm:$0xff]  ;;  %v5696_v34 = vpack.c.bf16 %v507_v23, %v500_v22  ;;  %v5698_v36 = vpack.c.bf16 %v522_v25, %v515_v24  ;;  %v521_v38 = vld [vmem:[%s12855_s3 + $0x838] sm:$0xff]  ;;  %v1349_v22 = vld [vmem:[%s12858_s5 + $0x270] sm:$0xff]  ;;  %v5712_v23 = vpack.c.bf16 %v563_v14, %v556_v13 }
 0x139   :  { %v529_v39 = vld [vmem:[%s12855_s3 + $0x878] sm:$0xff]  ;;  %v570_v25 = vld [vmem:[%s12855_s3 + $0x9c0] sm:$0xff]  ;;  %v1405_v14 = vld [vmem:[%s12858_s5 + $0x430] sm:$0xff] }
 0x13a   :  { %5657 = vmatpush1.bf16.msra.mxu0 %v5656_v48  ;;  %v5680_v48 = vpack.c.bf16 %v451_v43, %v444_v42  ;;  %v1292_v42 = vld [vmem:[%s12858_s5 + $0xa8] sm:$0xff]  ;;  %v1398_v13 = vld [vmem:[%s12858_s5 + $0x3f8] sm:$0xff] }
 0x13b   :  { %5757 = vmatpush3.bf16.msra.mxu1 %v5756_v49  ;;  %5659 = vmatprep.subr.bf16.mxu0 %v5658_v51  ;;  %v5774_v49 = vpack.c.bf16 %v565_v45, %v558_v44  ;;  %v5682_v51 = vpack.c.bf16 %v466_v47, %v459_v46  ;;  %v1300_v43 = vld [vmem:[%s12858_s5 + $0xe8] sm:$0xff]  ;;  %v1307_v44 = vld [vmem:[%s12858_s5 + $0x120] sm:$0xff]  ;;  %v528_v47 = vld [vmem:[%s12855_s3 + $0x870] sm:$0xff] }
 0x13c   :  { %5758 = vmatprep.subr.bf16.mxu1 %v7274_v63 }
 0x13e   :  { %1140 = vmatmul.mubr.f32.vlgmr.msra.gmra.mrb[6].mxu1 %v7822_v11  ;;  %5661 = vmatpush1.bf16.msra.mxu0 %v5660_v58  ;;  %v5684_v58 = vpack.c.bf16 %v465_v53, %v458_v52  ;;  %v550_v52 = vld [vmem:[%s12855_s3 + $0x920] sm:$0xff]  ;;  %v5793_v53 = vpack.c.bf16 %v1307_v44, %v1300_v43 }
 0x13f   :  { %5760 = vmatpush1.bf16.msra.mxu1 %v5759_v59  ;;  %5123 = vmatprep.mubr.msk.f32.mxu1 %vm645_vm5, %v7865_v37  ;;  %v5777_v59 = vpack.c.bf16 %v579_v55, %v572_v54  ;;  %v1299_v54 = vld [vmem:[%s12858_s5 + $0xe0] sm:$0xff]  ;;  %v1306_v55 = vld [vmem:[%s12858_s5 + $0x118] sm:$0xff] }
 0x140   :  { %5663 = vmatprep.subr.bf16.mxu0 %v5662_v0  ;;  %5761 = vmatprep.subr.bf16.mxu1 %v7274_v63  ;;  %v586_v0 = vld [vmem:[%s12855_s3 + $0xa40] sm:$0xff] }
 0x141   :  { %v606_v43 = vld [vmem:[%s12855_s3 + $0xae0] sm:$0xff] }
 0x142   :  { %5665 = vmatpush1.bf16.msra.mxu0 %v5664_v6  ;;  %v5688_v6 = vpack.c.bf16 %v479_v62, %v472_v61  ;;  %v549_v61 = vld [vmem:[%s12855_s3 + $0x918] sm:$0xff] }
 0x143   :  { %5763 = vmatpush1.bf16.msra.mxu1 %v5762_v7  ;;  %5667 = vmatprep.subr.bf16.mxu0 %v5666_v8  ;;  %v5780_v7 = vpack.c.bf16 %v593_v1, %v586_v0  ;;  %v5690_v8 = vpack.c.bf16 %v494_v4, %v487_v2  ;;  %v557_v62 = vld [vmem:[%s12855_s3 + $0x958] sm:$0xff]  ;;  %v5795_v0 = vpack.c.bf16 %v1306_v55, %v1299_v54  ;;  %v564_v1 = vld [vmem:[%s12855_s3 + $0x990] sm:$0xff] }
 0x144   :  { %5764 = vmatprep.subr.bf16.mxu1 %v7274_v63  ;;  %v5797_v2 = vpack.c.bf16 %v1321_v57, %v1314_v56  ;;  %v1313_v4 = vld [vmem:[%s12858_s5 + $0x150] sm:$0xff]  ;;  %v1274_v54 = vld [vmem:[%s12858_s5 + $0x18] sm:$0xff] }
 0x145   :  { %v1281_v56 = vld [vmem:[%s12858_s5 + $0x50] sm:$0xff] }
 0x146   :  { %5669 = vmatpush1.bf16.msra.mxu0 %v5668_v16  ;;  %v1272_v16 = vld [vmem:[%s12858_s5 + $0x8] sm:$0xff] }
 0x147   :  { %5766 = vmatpush1.bf16.msra.mxu1 %v5765_v18  ;;  %5671 = vmatprep.subr.bf16.mxu0 %v5670_v19  ;;  %v1279_v18 = vld [vmem:[%s12858_s5 + $0x40] sm:$0xff]  ;;  %v5692_v19 = vpack.c.bf16 %v493_v10, %v486_v9  ;;  %v5710_v10 = vpack.c.bf16 %v564_v1, %v557_v62  ;;  %v1273_v1 = vld [vmem:[%s12858_s5 + $0x10] sm:$0xff] }
 0x148   :  { %5767 = vmatprep.subr.bf16.mxu1 %v7274_v63 }
 0x14a   :  { %5673 = vmatpush1.bf16.msra.mxu0 %v5672_v26  ;;  %v5785_v26 = vpack.c.bf16 %v1279_v18, %v1272_v16  ;;  %v578_v16 = vld [vmem:[%s12855_s3 + $0xa00] sm:$0xff] }
 0x14b   :  { %5769 = vmatpush1.bf16.msra.mxu1 %v5768_v27  ;;  %5675 = vmatprep.subr.bf16.mxu0 %v5674_v30  ;;  %v1271_v27 = vld [vmem:[%s12858_s5] sm:$0xff]  ;;  %v1278_v30 = vld [vmem:[%s12858_s5 + $0x38] sm:$0xff]  ;;  %v5714_v24 = vpack.c.bf16 %v578_v16, %v571_v12 }
 0x14c   :  { %5770 = vmatprep.subr.bf16.mxu1 %v7274_v63  ;;  %v1287_v16 = vld [vmem:[%s12858_s5 + $0x80] sm:$0xff] }
 0x14e   :  { %5677 = vmatpush1.bf16.msra.mxu0 %v5676_v40  ;;  %v5787_v40 = vpack.c.bf16 %v1278_v30, %v1271_v27  ;;  %v585_v27 = vld [vmem:[%s12855_s3 + $0xa38] sm:$0xff] }
 0x14f   :  { %5772 = vmatpush1.bf16.msra.mxu1 %v5771_v5  ;;  %5679 = vmatprep.subr.bf16.mxu0 %v5678_v41  ;;  %v5789_v5 = vpack.c.bf16 %v1293_v33, %v1286_v32  ;;  %v1285_v41 = vld [vmem:[%s12858_s5 + $0x70] sm:$0xff] }
 0x150   :  { %5773 = vmatprep.subr.bf16.mxu1 %v7274_v63  ;;  %v592_v32 = vld [vmem:[%s12855_s3 + $0xa70] sm:$0xff] }
 0x152   :  { %5681 = vmatpush1.bf16.msra.mxu0 %v5680_v48  ;;  %v535_v48 = vld [vmem:[%s12855_s3 + $0x8a8] sm:$0xff] }
 0x153   :  { %5775 = vmatpush1.bf16.msra.mxu1 %v5774_v49  ;;  %5683 = vmatprep.subr.bf16.mxu0 %v5682_v51  ;;  %v543_v49 = vld [vmem:[%s12855_s3 + $0x8e8] sm:$0xff]  ;;  %v5791_v51 = vpack.c.bf16 %v1292_v42, %v1285_v41 }
 0x154   :  { %5776 = vmatprep.subr.bf16.mxu1 %v7274_v63  ;;  %v599_v41 = vld [vmem:[%s12855_s3 + $0xaa8] sm:$0xff] }
 0x156   :  { %5685 = vmatpush1.bf16.msra.mxu0 %v5684_v58  ;;  %v5704_v58 = vpack.c.bf16 %v535_v48, %v528_v47  ;;  %v1370_v47 = vld [vmem:[%s12858_s5 + $0x318] sm:$0xff]  ;;  %v1377_v48 = vld [vmem:[%s12858_s5 + $0x350] sm:$0xff] }
 0x157   :  { %5778 = vmatpush1.bf16.msra.mxu1 %v5777_v59  ;;  %5687 = vmatprep.subr.bf16.mxu0 %v5686_v60  ;;  %v5706_v59 = vpack.c.bf16 %v550_v52, %v543_v49  ;;  %v542_v60 = vld [vmem:[%s12855_s3 + $0x8e0] sm:$0xff]  ;;  %v5813_v57 = vpack.c.bf16 %v1377_v48, %v1370_v47  ;;  %v1425_v48 = vld [vmem:[%s12858_s5 + $0x4d0] sm:$0xff] }
 0x158   :  { %5779 = vmatprep.subr.bf16.mxu1 %v7274_v63  ;;  %v5708_v9 = vpack.c.bf16 %v549_v61, %v542_v60  ;;  %v598_v52 = vld [vmem:[%s12855_s3 + $0xaa0] sm:$0xff]  ;;  %v1384_v60 = vld [vmem:[%s12858_s5 + $0x388] sm:$0xff] }
 0x159   :  { %v1391_v61 = vld [vmem:[%s12858_s5 + $0x3c0] sm:$0xff] }
 0x15a   :  { %5689 = vmatpush1.bf16.msra.mxu0 %v5688_v6  ;;  %v1320_v6 = vld [vmem:[%s12858_s5 + $0x188] sm:$0xff] }
 0x15b   :  { %5781 = vmatpush1.bf16.msra.mxu1 %v5780_v7  ;;  %5691 = vmatprep.subr.bf16.mxu0 %v5690_v8  ;;  %v1328_v7 = vld [vmem:[%s12858_s5 + $0x1c8] sm:$0xff]  ;;  %v1335_v8 = vld [vmem:[%s12858_s5 + $0x200] sm:$0xff]  ;;  %v5799_v15 = vpack.c.bf16 %v1320_v6, %v1313_v4 }
 0x15c   :  { %5782 = vmatprep.subr.bf16.mxu1 %v7274_v63  ;;  %v5801_v18 = vpack.c.bf16 %v1335_v8, %v1328_v7  ;;  %v1288_v4 = vld [vmem:[%s12858_s5 + $0x88] sm:$0xff]  ;;  %v1295_v7 = vld [vmem:[%s12858_s5 + $0xc0] sm:$0xff]  ;;  %v5817_v8 = vpack.c.bf16 %v1391_v61, %v1384_v60 }
 0x15d   :  { %998 = vmatmul.mubr.f32.vlgmr.msra.gmra.mrb[2].mxu0 %v7822_v11  ;;  %v514_v11 = vld [vmem:[%s12855_s3 + $0x800] sm:$0xff] }
 0x15e   :  { %5693 = vmatpush1.bf16.msra.mxu0 %v5692_v19  ;;  %5122 = vmatprep.mubr.msk.f32.mxu0 %vm645_vm5, %v7865_v37  ;;  %v536_v37 = vld [vmem:[%s12855_s3 + $0x8b0] sm:$0xff]  ;;  %v5700_v45 = vpack.c.bf16 %v521_v38, %v514_v11  ;;  %v1327_v19 = vld [vmem:[%s12858_s5 + $0x1c0] sm:$0xff]  ;;  %v1356_v11 = vld [vmem:[%s12858_s5 + $0x2a8] sm:$0xff] }
 0x15f   :  { %5784 = vmatpush1.bf16.msra.mxu1 %v5783_v20  ;;  %5695 = vmatprep.subr.bf16.mxu0 %v5694_v21  ;;  %v5702_v46 = vpack.c.bf16 %v536_v37, %v529_v39  ;;  %v1334_v20 = vld [vmem:[%s12858_s5 + $0x1f8] sm:$0xff]  ;;  %v1363_v38 = vld [vmem:[%s12858_s5 + $0x2e0] sm:$0xff]  ;;  %v584_v37 = vld [vmem:[%s12855_s3 + $0xa30] sm:$0xff] }
 0x160   :  { %5786 = vmatprep.subr.bf16.mxu1 %v5785_v26  ;;  %v1342_v21 = vld [vmem:[%s12858_s5 + $0x238] sm:$0xff]  ;;  %v5803_v30 = vpack.c.bf16 %v1334_v20, %v1327_v19  ;;  %v5809_v44 = vpack.c.bf16 %v1363_v38, %v1356_v11  ;;  %v1411_v38 = vld [vmem:[%s12858_s5 + $0x460] sm:$0xff] }
 0x161   :  { %v577_v26 = vld [vmem:[%s12855_s3 + $0x9f8] sm:$0xff]  ;;  %v5805_v33 = vpack.c.bf16 %v1349_v22, %v1342_v21  ;;  %v1309_v21 = vld [vmem:[%s12858_s5 + $0x130] sm:$0xff]  ;;  %v5821_v22 = vpack.c.bf16 %v1405_v14, %v1398_v13  ;;  %v1439_v61 = vld [vmem:[%s12858_s5 + $0x540] sm:$0xff] }
 0x162   :  { %1210 = vmatmul.mubr.f32.vlgmr.msra.gmra.mrb[8].mxu1 %v8050_v17  ;;  %5697 = vmatpush1.bf16.msra.mxu0 %v5696_v34  ;;  %v1341_v34 = vld [vmem:[%s12858_s5 + $0x230] sm:$0xff]  ;;  %v5716_v39 = vpack.c.bf16 %v577_v26, %v570_v25  ;;  %v1302_v19 = vld [vmem:[%s12858_s5 + $0xf8] sm:$0xff]  ;;  %v1412_v25 = vld [vmem:[%s12858_s5 + $0x468] sm:$0xff] }
 0x163   :  { %5699 = vmatprep.subr.bf16.mxu0 %v5698_v36  ;;  %5788 = vmatpush1.bf16.msra.mxu1 %v5787_v40  ;;  %v1348_v36 = vld [vmem:[%s12858_s5 + $0x268] sm:$0xff]  ;;  %v5718_v40 = vpack.c.bf16 %v592_v32, %v585_v27  ;;  %v1419_v26 = vld [vmem:[%s12858_s5 + $0x4a0] sm:$0xff]  ;;  %v1301_v32 = vld [vmem:[%s12858_s5 + $0xf0] sm:$0xff] }
 0x164   :  { %5790 = vmatprep.subr.bf16.mxu1 %v5789_v5  ;;  %v591_v5 = vld [vmem:[%s12855_s3 + $0xa68] sm:$0xff]  ;;  %v5807_v42 = vpack.c.bf16 %v1348_v36, %v1341_v34  ;;  %v1323_v36 = vld [vmem:[%s12858_s5 + $0x1a0] sm:$0xff]  ;;  %v5825_v11 = vpack.c.bf16 %v1419_v26, %v1412_v25  ;;  %v1453_v14 = vld [vmem:[%s12858_s5 + $0x5b0] sm:$0xff] }
 0x165   :  { %v5720_v49 = vpack.c.bf16 %v591_v5, %v584_v37  ;;  %v1433_v37 = vld [vmem:[%s12858_s5 + $0x510] sm:$0xff]  ;;  %v1467_v26 = vld [vmem:[%s12858_s5 + $0x620] sm:$0xff] }
 0x166   :  { %5701 = vmatpush1.bf16.msra.mxu0 %v5700_v45  ;;  %v1355_v45 = vld [vmem:[%s12858_s5 + $0x2a0] sm:$0xff] }
 0x167   :  { %5703 = vmatprep.subr.bf16.mxu0 %v5702_v46  ;;  %5792 = vmatpush1.bf16.msra.mxu1 %v5791_v51  ;;  %v1362_v46 = vld [vmem:[%s12858_s5 + $0x2d8] sm:$0xff]  ;;  %v5722_v51 = vpack.c.bf16 %v606_v43, %v599_v41 }
 0x168   :  { %5794 = vmatprep.subr.bf16.mxu1 %v5793_v53  ;;  %v605_v53 = vld [vmem:[%s12855_s3 + $0xad8] sm:$0xff]  ;;  %v5811_v55 = vpack.c.bf16 %v1362_v46, %v1355_v45  ;;  %v1337_v46 = vld [vmem:[%s12858_s5 + $0x210] sm:$0xff] }
 0x169   :  { %v5724_v62 = vpack.c.bf16 %v605_v53, %v598_v52  ;;  %v1322_v43 = vld [vmem:[%s12858_s5 + $0x198] sm:$0xff]  ;;  %v1447_v52 = vld [vmem:[%s12858_s5 + $0x580] sm:$0xff] }
 0x16a   :  { %5705 = vmatpush1.bf16.msra.mxu0 %v5704_v58  ;;  %v1369_v58 = vld [vmem:[%s12858_s5 + $0x310] sm:$0xff] }
 0x16b   :  { %5707 = vmatprep.subr.bf16.mxu0 %v5706_v59  ;;  %5796 = vmatpush1.bf16.msra.mxu1 %v5795_v0  ;;  %v1376_v59 = vld [vmem:[%s12858_s5 + $0x348] sm:$0xff]  ;;  %v5981_v0 = vpack.c.bf16 %v1281_v56, %v1274_v54 }
 0x16c   :  { %5798 = vmatprep.subr.bf16.mxu1 %v5797_v2  ;;  %v1280_v2 = vld [vmem:[%s12858_s5 + $0x48] sm:$0xff]  ;;  %v5815_v6 = vpack.c.bf16 %v1376_v59, %v1369_v58  ;;  %v1351_v59 = vld [vmem:[%s12858_s5 + $0x280] sm:$0xff] }
 0x16d   :  { %v5983_v12 = vpack.c.bf16 %v1280_v2, %v1273_v1  ;;  %v1336_v56 = vld [vmem:[%s12858_s5 + $0x208] sm:$0xff]  ;;  %v1461_v1 = vld [vmem:[%s12858_s5 + $0x5f0] sm:$0xff] }
 0x16e   :  { %5709 = vmatpush1.bf16.msra.mxu0 %v5708_v9  ;;  %v1383_v9 = vld [vmem:[%s12858_s5 + $0x380] sm:$0xff] }
 0x16f   :  { %5711 = vmatprep.subr.bf16.mxu0 %v5710_v10  ;;  %5800 = vmatpush1.bf16.msra.mxu1 %v5799_v15  ;;  %v1390_v10 = vld [vmem:[%s12858_s5 + $0x3b8] sm:$0xff]  ;;  %v5985_v15 = vpack.c.bf16 %v1295_v7, %v1288_v4 }
 0x170   :  { %5802 = vmatprep.subr.bf16.mxu1 %v5801_v18  ;;  %v1294_v18 = vld [vmem:[%s12858_s5 + $0xb8] sm:$0xff]  ;;  %v5819_v20 = vpack.c.bf16 %v1390_v10, %v1383_v9  ;;  %v1365_v10 = vld [vmem:[%s12858_s5 + $0x2f0] sm:$0xff] }
 0x171   :  { %v5987_v27 = vpack.c.bf16 %v1294_v18, %v1287_v16  ;;  %v1350_v7 = vld [vmem:[%s12858_s5 + $0x278] sm:$0xff]  ;;  %v1475_v16 = vld [vmem:[%s12858_s5 + $0x660] sm:$0xff] }
 0x172   :  { %5713 = vmatpush1.bf16.msra.mxu0 %v5712_v23  ;;  %v1397_v23 = vld [vmem:[%s12858_s5 + $0x3f0] sm:$0xff] }
 0x173   :  { %5715 = vmatprep.subr.bf16.mxu0 %v5714_v24  ;;  %5804 = vmatpush1.bf16.msra.mxu1 %v5803_v30  ;;  %v1404_v24 = vld [vmem:[%s12858_s5 + $0x428] sm:$0xff]  ;;  %v5989_v30 = vpack.c.bf16 %v1309_v21, %v1302_v19 }
 0x174   :  { %5806 = vmatprep.subr.bf16.mxu1 %v5805_v33  ;;  %v1316_v33 = vld [vmem:[%s12858_s5 + $0x168] sm:$0xff]  ;;  %v5823_v34 = vpack.c.bf16 %v1404_v24, %v1397_v23  ;;  %v1379_v24 = vld [vmem:[%s12858_s5 + $0x360] sm:$0xff] }
 0x175   :  { %v5993_v41 = vpack.c.bf16 %v1323_v36, %v1316_v33  ;;  %v1364_v21 = vld [vmem:[%s12858_s5 + $0x2e8] sm:$0xff]  ;;  %v1378_v36 = vld [vmem:[%s12858_s5 + $0x358] sm:$0xff] }
 0x176   :  { %5717 = vmatpush1.bf16.msra.mxu0 %v5716_v39  ;;  %v1418_v39 = vld [vmem:[%s12858_s5 + $0x498] sm:$0xff] }
 0x177   :  { %5719 = vmatprep.subr.bf16.mxu0 %v5718_v40  ;;  %5808 = vmatpush1.bf16.msra.mxu1 %v5807_v42  ;;  %v1426_v40 = vld [vmem:[%s12858_s5 + $0x4d8] sm:$0xff]  ;;  %v1315_v42 = vld [vmem:[%s12858_s5 + $0x160] sm:$0xff]  ;;  %v5827_v45 = vpack.c.bf16 %v1418_v39, %v1411_v38  ;;  %v1393_v39 = vld [vmem:[%s12858_s5 + $0x3d0] sm:$0xff] }
 0x178   :  { %5810 = vmatprep.subr.bf16.mxu1 %v5809_v44  ;;  %v1330_v44 = vld [vmem:[%s12858_s5 + $0x1d8] sm:$0xff]  ;;  %v5829_v47 = vpack.c.bf16 %v1433_v37, %v1426_v40  ;;  %v5995_v53 = vpack.c.bf16 %v1322_v43, %v1315_v42  ;;  %v1481_v37 = vld [vmem:[%s12858_s5 + $0x690] sm:$0xff]  ;;  %v1503_v42 = vld [vmem:[%s12858_s5 + $0x740] sm:$0xff] }
 0x179   :  { %v5997_v54 = vpack.c.bf16 %v1337_v46, %v1330_v44  ;;  %v1392_v46 = vld [vmem:[%s12858_s5 + $0x3c8] sm:$0xff] }
 0x17a   :  { %5721 = vmatpush1.bf16.msra.mxu0 %v5720_v49  ;;  %v1432_v49 = vld [vmem:[%s12858_s5 + $0x508] sm:$0xff] }
 0x17b   :  { %5723 = vmatprep.subr.bf16.mxu0 %v5722_v51  ;;  %5812 = vmatpush1.bf16.msra.mxu1 %v5811_v55  ;;  %v1440_v51 = vld [vmem:[%s12858_s5 + $0x548] sm:$0xff]  ;;  %v1329_v55 = vld [vmem:[%s12858_s5 + $0x1d0] sm:$0xff]  ;;  %v5831_v58 = vpack.c.bf16 %v1432_v49, %v1425_v48  ;;  %v1407_v49 = vld [vmem:[%s12858_s5 + $0x440] sm:$0xff] }
 0x17c   :  { %5814 = vmatprep.subr.bf16.mxu1 %v5813_v57  ;;  %v1344_v57 = vld [vmem:[%s12858_s5 + $0x248] sm:$0xff]  ;;  %v5833_v60 = vpack.c.bf16 %v1447_v52, %v1440_v51  ;;  %v5999_v2 = vpack.c.bf16 %v1336_v56, %v1329_v55  ;;  %v1406_v55 = vld [vmem:[%s12858_s5 + $0x438] sm:$0xff] }
 0x17d   :  { %v6001_v4 = vpack.c.bf16 %v1351_v59, %v1344_v57  ;;  %v1400_v48 = vld [vmem:[%s12858_s5 + $0x408] sm:$0xff]  ;;  %v1414_v56 = vld [vmem:[%s12858_s5 + $0x478] sm:$0xff]  ;;  %v1421_v57 = vld [vmem:[%s12858_s5 + $0x4b0] sm:$0xff] }
 0x17e   :  { %5725 = vmatpush1.bf16.msra.mxu0 %v5724_v62  ;;  %v1446_v62 = vld [vmem:[%s12858_s5 + $0x578] sm:$0xff]  ;;  %v6021_v59 = vpack.c.bf16 %v1421_v57, %v1414_v56 }
 0x17f   :  { %5982 = vmatprep.subr.bf16.mxu0 %v5981_v0  ;;  %5816 = vmatpush1.bf16.msra.mxu1 %v5815_v6  ;;  %v1454_v0 = vld [vmem:[%s12858_s5 + $0x5b8] sm:$0xff]  ;;  %v1343_v6 = vld [vmem:[%s12858_s5 + $0x240] sm:$0xff]  ;;  %v5835_v9 = vpack.c.bf16 %v1446_v62, %v1439_v61  ;;  %v1420_v61 = vld [vmem:[%s12858_s5 + $0x4a8] sm:$0xff] }
 0x180   :  { %5818 = vmatprep.subr.bf16.mxu1 %v5817_v8  ;;  %v1358_v8 = vld [vmem:[%s12858_s5 + $0x2b8] sm:$0xff]  ;;  %v5837_v13 = vpack.c.bf16 %v1461_v1, %v1454_v0  ;;  %v6003_v18 = vpack.c.bf16 %v1350_v7, %v1343_v6  ;;  %v1428_v62 = vld [vmem:[%s12858_s5 + $0x4e8] sm:$0xff]  ;;  %v1435_v0 = vld [vmem:[%s12858_s5 + $0x520] sm:$0xff] }
 0x181   :  { %1069 = vmatmul.mubr.f32.vlgmr.msra.gmra.mrb[2].mxu0 %v8050_v17  ;;  %v1308_v17 = vld [vmem:[%s12858_s5 + $0x128] sm:$0xff]  ;;  %v6005_v19 = vpack.c.bf16 %v1365_v10, %v1358_v8  ;;  %v1434_v6 = vld [vmem:[%s12858_s5 + $0x518] sm:$0xff]  ;;  %v1449_v8 = vld [vmem:[%s12858_s5 + $0x590] sm:$0xff] }
 0x182   :  { %5984 = vmatpush1.bf16.msra.mxu0 %v5983_v12  ;;  %v5991_v5 = vpack.c.bf16 %v1308_v17, %v1301_v32  ;;  %v1460_v12 = vld [vmem:[%s12858_s5 + $0x5e8] sm:$0xff]  ;;  %v1489_v32 = vld [vmem:[%s12858_s5 + $0x6d0] sm:$0xff]  ;;  %v1442_v7 = vld [vmem:[%s12858_s5 + $0x558] sm:$0xff] }
 0x183   :  { %5986 = vmatprep.subr.bf16.mxu0 %v5985_v15  ;;  %5820 = vmatpush1.bf16.msra.mxu1 %v5819_v20  ;;  %v1468_v15 = vld [vmem:[%s12858_s5 + $0x628] sm:$0xff]  ;;  %v1357_v20 = vld [vmem:[%s12858_s5 + $0x2b0] sm:$0xff]  ;;  %v5839_v23 = vpack.c.bf16 %v1460_v12, %v1453_v14  ;;  %v6029_v10 = vpack.c.bf16 %v1449_v8, %v1442_v7 }
 0x184   :  { %5822 = vmatprep.subr.bf16.mxu1 %v5821_v22  ;;  %v1372_v22 = vld [vmem:[%s12858_s5 + $0x328] sm:$0xff]  ;;  %v5841_v25 = vpack.c.bf16 %v1475_v16, %v1468_v15  ;;  %v6007_v17 = vpack.c.bf16 %v1364_v21, %v1357_v20  ;;  %v1463_v15 = vld [vmem:[%s12858_s5 + $0x600] sm:$0xff]  ;;  %v1462_v20 = vld [vmem:[%s12858_s5 + $0x5f8] sm:$0xff] }
 0x185   :  { %v6009_v33 = vpack.c.bf16 %v1379_v24, %v1372_v22  ;;  %v1448_v14 = vld [vmem:[%s12858_s5 + $0x588] sm:$0xff]  ;;  %v1470_v21 = vld [vmem:[%s12858_s5 + $0x638] sm:$0xff]  ;;  %v1477_v22 = vld [vmem:[%s12858_s5 + $0x670] sm:$0xff] }
 0x186   :  { %5988 = vmatpush1.bf16.msra.mxu0 %v5987_v27  ;;  %v1474_v27 = vld [vmem:[%s12858_s5 + $0x658] sm:$0xff]  ;;  %v1456_v12 = vld [vmem:[%s12858_s5 + $0x5c8] sm:$0xff]  ;;  %v6037_v24 = vpack.c.bf16 %v1477_v22, %v1470_v21 }
 0x187   :  { %5990 = vmatprep.subr.bf16.mxu0 %v5989_v30  ;;  %5824 = vmatpush1.bf16.msra.mxu1 %v5823_v34  ;;  %v1482_v30 = vld [vmem:[%s12858_s5 + $0x698] sm:$0xff]  ;;  %v1371_v34 = vld [vmem:[%s12858_s5 + $0x320] sm:$0xff]  ;;  %v5843_v38 = vpack.c.bf16 %v1474_v27, %v1467_v26  ;;  %v1476_v26 = vld [vmem:[%s12858_s5 + $0x668] sm:$0xff] }
 0x188   :  { %5826 = vmatprep.subr.bf16.mxu1 %v5825_v11  ;;  %v1386_v11 = vld [vmem:[%s12858_s5 + $0x398] sm:$0xff]  ;;  %v5845_v40 = vpack.c.bf16 %v1489_v32, %v1482_v30  ;;  %v6011_v43 = vpack.c.bf16 %v1378_v36, %v1371_v34  ;;  %v1484_v27 = vld [vmem:[%s12858_s5 + $0x6a8] sm:$0xff]  ;;  %v1491_v30 = vld [vmem:[%s12858_s5 + $0x6e0] sm:$0xff] }
 0x189   :  { %v6013_v44 = vpack.c.bf16 %v1393_v39, %v1386_v11  ;;  %v1490_v34 = vld [vmem:[%s12858_s5 + $0x6d8] sm:$0xff]  ;;  %v1505_v11 = vld [vmem:[%s12858_s5 + $0x750] sm:$0xff]  ;;  %v1516_v21 = vld [vmem:[%s12858_s5 + $0x7a8] sm:$0xff] }
 0x18a   :  { %5992 = vmatpush1.bf16.msra.mxu0 %v5991_v5  ;;  %v1488_v5 = vld [vmem:[%s12858_s5 + $0x6c8] sm:$0xff]  ;;  %v1498_v36 = vld [vmem:[%s12858_s5 + $0x718] sm:$0xff] }
 0x18b   :  { %5994 = vmatprep.subr.bf16.mxu0 %v5993_v41  ;;  %5828 = vmatpush1.bf16.msra.mxu1 %v5827_v45  ;;  %v1496_v41 = vld [vmem:[%s12858_s5 + $0x708] sm:$0xff]  ;;  %v1385_v45 = vld [vmem:[%s12858_s5 + $0x390] sm:$0xff]  ;;  %v6045_v39 = vpack.c.bf16 %v1505_v11, %v1498_v36  ;;  %v1523_v11 = vld [vmem:[%s12858_s5 + $0x7e0] sm:$0xff] }
 0x18c   :  { %5830 = vmatprep.subr.bf16.mxu1 %v5829_v47  ;;  %v5847_v47 = vpack.c.bf16 %v1488_v5, %v1481_v37  ;;  %v5849_v51 = vpack.c.bf16 %v1503_v42, %v1496_v41  ;;  %v6015_v52 = vpack.c.bf16 %v1392_v46, %v1385_v45 }
 0x18e   :  { %5996 = vmatpush1.bf16.msra.mxu0 %v5995_v53  ;;  %v6017_v53 = vpack.c.bf16 %v1407_v49, %v1400_v48 }
 0x18f   :  { %5998 = vmatprep.subr.bf16.mxu0 %v5997_v54  ;;  %5832 = vmatpush1.bf16.msra.mxu1 %v5831_v58  ;;  %v1399_v54 = vld [vmem:[%s12858_s5 + $0x400] sm:$0xff] }
 0x190   :  { %5834 = vmatprep.subr.bf16.mxu1 %v5833_v60  ;;  %v6019_v58 = vpack.c.bf16 %v1406_v55, %v1399_v54  ;;  %v1413_v60 = vld [vmem:[%s12858_s5 + $0x470] sm:$0xff] }
 0x191   :  { %v6023_v1 = vpack.c.bf16 %v1420_v61, %v1413_v60 }
 0x192   :  { %6000 = vmatpush1.bf16.msra.mxu0 %v5999_v2  ;;  %v6025_v2 = vpack.c.bf16 %v1435_v0, %v1428_v62  ;;  %v1495_v0 = vld [vmem:[%s12858_s5 + $0x700] sm:$0xff] }
 0x193   :  { %6002 = vmatprep.subr.bf16.mxu0 %v6001_v4  ;;  %5836 = vmatpush1.bf16.msra.mxu1 %v5835_v9  ;;  %v1427_v4 = vld [vmem:[%s12858_s5 + $0x4e0] sm:$0xff] }
 0x194   :  { %5838 = vmatprep.subr.bf16.mxu1 %v5837_v13  ;;  %v6027_v9 = vpack.c.bf16 %v1434_v6, %v1427_v4  ;;  %v1441_v13 = vld [vmem:[%s12858_s5 + $0x550] sm:$0xff]  ;;  %v1504_v6 = vld [vmem:[%s12858_s5 + $0x748] sm:$0xff] }
 0x195   :  { %v6031_v16 = vpack.c.bf16 %v1448_v14, %v1441_v13  ;;  %v1497_v4 = vld [vmem:[%s12858_s5 + $0x710] sm:$0xff]  ;;  %v1512_v14 = vld [vmem:[%s12858_s5 + $0x788] sm:$0xff] }
 0x196   :  { %6004 = vmatpush1.bf16.msra.mxu0 %v6003_v18  ;;  %v6033_v18 = vpack.c.bf16 %v1463_v15, %v1456_v12  ;;  %v1517_v13 = vld [vmem:[%s12858_s5 + $0x7b0] sm:$0xff]  ;;  %v1519_v12 = vld [vmem:[%s12858_s5 + $0x7c0] sm:$0xff] }
 0x197   :  { %6006 = vmatprep.subr.bf16.mxu0 %v6005_v19  ;;  %5840 = vmatpush1.bf16.msra.mxu1 %v5839_v23  ;;  %v1455_v19 = vld [vmem:[%s12858_s5 + $0x5c0] sm:$0xff] }
 0x198   :  { %5842 = vmatprep.subr.bf16.mxu1 %v5841_v25  ;;  %v6035_v23 = vpack.c.bf16 %v1462_v20, %v1455_v19  ;;  %v1469_v25 = vld [vmem:[%s12858_s5 + $0x630] sm:$0xff]  ;;  %v6047_v19 = vpack.c.bf16 %v1504_v6, %v1497_v4  ;;  %v1558_v4 = vld [vmem:[%s12858_s5 + $0x8f8] sm:$0xff] }
 0x199   :  { %v6039_v32 = vpack.c.bf16 %v1476_v26, %v1469_v25  ;;  %v1509_v20 = vld [vmem:[%s12858_s5 + $0x770] sm:$0xff]  ;;  %v1524_v25 = vld [vmem:[%s12858_s5 + $0x7e8] sm:$0xff] }
 0x19a   :  { %6008 = vmatpush1.bf16.msra.mxu0 %v6007_v17  ;;  %v6041_v17 = vpack.c.bf16 %v1491_v30, %v1484_v27  ;;  %v6049_v27 = vpack.c.bf16 %v1519_v12, %v1512_v14  ;;  %v1531_v30 = vld [vmem:[%s12858_s5 + $0x820] sm:$0xff]  ;;  %v1568_v14 = vld [vmem:[%s12858_s5 + $0x948] sm:$0xff] }
 0x19b   :  { %6010 = vmatprep.subr.bf16.mxu0 %v6009_v33  ;;  %5844 = vmatpush1.bf16.msra.mxu1 %v5843_v38  ;;  %v1483_v33 = vld [vmem:[%s12858_s5 + $0x6a0] sm:$0xff] }
 0x19c   :  { %5846 = vmatprep.subr.bf16.mxu1 %v5845_v40  ;;  %v6043_v38 = vpack.c.bf16 %v1490_v34, %v1483_v33  ;;  %v8886_v40 = vld [vmem:[%s12859_s4] sm:$0x7f]  ;;  %v5855_v34 = vpack.c.bf16 %v1516_v21, %v1509_v20  ;;  %v1572_v20 = vld [vmem:[%s12858_s5 + $0x968] sm:$0xff] }
 0x19d   :  { %v613_v37 = vrot.slane %v8886_v40, %v7772_v29  ;;  %v617_v5 = vrot.slane %v8886_v40, %v7778_v31  ;;  %v625_v41 = vrot.slane %v8886_v40, %v7783_v35  ;;  %v1575_v12 = vld [vmem:[%s12858_s5 + $0x980] sm:$0xff] }
 0x19e   :  { %6012 = vmatpush1.bf16.msra.mxu0 %v6011_v43 }
 0x19f   :  { %6014 = vmatprep.subr.bf16.mxu0 %v6013_v44  ;;  %5848 = vmatpush1.bf16.msra.mxu1 %v5847_v47 }
 0x1a0   :  { %5850 = vmatprep.subr.bf16.mxu1 %v5849_v51 }
 0x1a2   :  { %6016 = vmatpush1.bf16.msra.mxu0 %v6015_v52 }
 0x1a3   :  { %6018 = vmatprep.subr.bf16.mxu0 %v6017_v53 }
 0x1a6   :  { %6020 = vmatpush1.bf16.msra.mxu0 %v6019_v58 }
 0x1a7   :  { %6022 = vmatprep.subr.bf16.mxu0 %v6021_v59 }
 0x1aa   :  { %6024 = vmatpush1.bf16.msra.mxu0 %v6023_v1 }
 0x1ab   :  { %6026 = vmatprep.subr.bf16.mxu0 %v6025_v2  ;;  %v1502_v2 = vld [vmem:[%s12858_s5 + $0x738] sm:$0xff] }
 0x1ae   :  { %6028 = vmatpush1.bf16.msra.mxu0 %v6027_v9  ;;  %v1510_v9 = vld [vmem:[%s12858_s5 + $0x778] sm:$0xff] }
 0x1af   :  { %6030 = vmatprep.subr.bf16.mxu0 %v6029_v10  ;;  %v5853_v26 = vpack.c.bf16 %v1517_v13, %v1510_v9  ;;  %v1560_v9 = vld [vmem:[%s12858_s5 + $0x908] sm:$0xff]  ;;  %v1573_v13 = vld [vmem:[%s12858_s5 + $0x970] sm:$0xff] }
 0x1b2   :  { %6032 = vmatpush1.bf16.msra.mxu0 %v6031_v16 }
 0x1b3   :  { %6034 = vmatprep.subr.bf16.mxu0 %v6033_v18  ;;  %v5851_v18 = vpack.c.bf16 %v1502_v2, %v1495_v0  ;;  %v1551_v2 = vld [vmem:[%s12858_s5 + $0x8c0] sm:$0xff] }
 0x1b6   :  { %6036 = vmatpush1.bf16.msra.mxu0 %v6035_v23  ;;  %v1511_v23 = vld [vmem:[%s12858_s5 + $0x780] sm:$0xff] }
 0x1b7   :  { %6038 = vmatprep.subr.bf16.mxu0 %v6037_v24  ;;  %v1518_v24 = vld [vmem:[%s12858_s5 + $0x7b8] sm:$0xff] }
 0x1b8   :  { %v6051_v36 = vpack.c.bf16 %v1518_v24, %v1511_v23  ;;  %v6065_v23 = vpack.c.bf16 %v1575_v12, %v1568_v14  ;;  %v1567_v24 = vld [vmem:[%s12858_s5 + $0x940] sm:$0xff] }
 0x1ba   :  { %6040 = vmatpush1.bf16.msra.mxu0 %v6039_v32  ;;  %v1526_v32 = vld [vmem:[%s12858_s5 + $0x7f8] sm:$0xff] }
 0x1bb   :  { %6042 = vmatprep.subr.bf16.mxu0 %v6041_v17  ;;  %v1533_v17 = vld [vmem:[%s12858_s5 + $0x830] sm:$0xff] }
 0x1be   :  { %6044 = vmatpush1.bf16.msra.mxu0 %v6043_v38  ;;  %v1530_v38 = vld [vmem:[%s12858_s5 + $0x818] sm:$0xff] }
 0x1bf   :  { %6046 = vmatprep.subr.bf16.mxu0 %v6045_v39  ;;  %v5857_v39 = vpack.c.bf16 %v1531_v30, %v1524_v25  ;;  %v1574_v25 = vld [vmem:[%s12858_s5 + $0x978] sm:$0xff] }
 0x1c0   :  { %v1582_v30 = vld [vmem:[%s12858_s5 + $0x9b8] sm:$0xff] }
 0x1f0   :  { %v786_v42 = vpop.f32.mrb[0].mxu0  ;;  %v8894_v43 = vpop.f32.mrb[4].mxu1 }
 0x1f1   :  { %v7159_v44 = vadd.f32 %v786_v42, %v613_v37  ;;  %v788_v45 = vpop.f32.mrb[1].mxu0  ;;  %v930_v46 = vpop.f32.mrb[5].mxu1  ;;  %v6053_v37 = vpack.c.bf16 %v1533_v17, %v1526_v32  ;;  %v1538_v42 = vld [vmem:[%s12858_s5 + $0x858] sm:$0xff]  ;;  %v1589_v32 = vld [vmem:[%s12858_s5 + $0x9f0] sm:$0xff] }
 0x1f2   :  { %v7160_v47 = vadd.f32 %v788_v45, %v617_v5  ;;  %v7162_v48 = vadd.f32 %v930_v46, %v625_v41  ;;  %v1525_v5 = vld [vmem:[%s12858_s5 + $0x7f0] sm:$0xff]  ;;  %v1532_v41 = vld [vmem:[%s12858_s5 + $0x828] sm:$0xff]  ;;  %v1547_v46 = vld [vmem:[%s12858_s5 + $0x8a0] sm:$0xff] }
 0x1f3   :  { %v1215_v49 = vmin.f32 %v7159_v44, 0.0  ;;  %vm1250_vm7 = vcmp.gt.f32.partialorder %v7159_v44, 0.0  ;;  %v1540_v45 = vld [vmem:[%s12858_s5 + $0x868] sm:$0xff] }
 0x1f4   :  { %v1216_v51 = vmin.f32 %v7160_v47, 0.0  ;;  %v1218_v52 = vmin.f32 %v7162_v48, 0.0  ;;  %vm1251_vm8 = vcmp.gt.f32.partialorder %v7160_v47, 0.0  ;;  %vm1253_vm9 = vcmp.gt.f32.partialorder %v7162_v48, 0.0 }
 0x1f5   :  { %v1222_v53 = vmul.f32 1.442695, %v1215_v49  ;;  %v6055_v49 = vpack.c.bf16 %v1532_v41, %v1525_v5  ;;  %v1588_v5 = vld [vmem:[%s12858_s5 + $0x9e8] sm:$0xff]  ;;  %v1594_v41 = vld [vmem:[%s12858_s5 + $0xa18] sm:$0xff] }
 0x1f6   :  { %v1224_v54 = vmul.f32 1.442695, %v1216_v51  ;;  %v1228_v55 = vmul.f32 1.442695, %v1218_v52  ;;  %v1537_v51 = vld [vmem:[%s12858_s5 + $0x850] sm:$0xff]  ;;  %v1544_v52 = vld [vmem:[%s12858_s5 + $0x888] sm:$0xff] }
 0x1f7   :  { %7230 = vpow2.f32 %v1222_v53  ;;  %v5863_v0 = vpack.c.bf16 %v1544_v52, %v1537_v51  ;;  %v621_v51 = vrot.slane %v8886_v40, %v7787_v50 }
 0x1f8   :  { %7232 = vpow2.f32 %v1224_v54 }
 0x1f9   :  { %7234 = vpow2.f32 %v1228_v55  ;;  %v6057_v55 = vpack.c.bf16 %v1547_v46, %v1540_v45  ;;  %v1603_v45 = vld [vmem:[%s12858_s5 + $0xa60] sm:$0xff] }
 0x201   :  { %v7231_v56 = vpop.eup %7230 }
 0x202   :  { %v5124_v57 = vadd.f32 -1.0, %v7231_v56  ;;  %v7233_v58 = vpop.eup %7232  ;;  %v1539_v56 = vld [vmem:[%s12858_s5 + $0x860] sm:$0xff] }
 0x203   :  { %v7235_v59 = vpop.eup %7234  ;;  %v5125_v61 = vadd.f32 -1.0, %v7233_v58  ;;  %v1552_v58 = vld [vmem:[%s12858_s5 + $0x8c8] sm:$0xff] }
 0x204   :  { %v1243_v60 = vmul.f32 1.6732632, %v5124_v57  ;;  %v5127_v62 = vadd.f32 -1.0, %v7235_v59  ;;  %v1546_v57 = vld [vmem:[%s12858_s5 + $0x898] sm:$0xff] }
 0x205   :  { %v1244_v1 = vmul.f32 1.6732632, %v5125_v61  ;;  %v1554_v61 = vld [vmem:[%s12858_s5 + $0x8d8] sm:$0xff] }
 0x206   :  { %v1257_v7 = vsel %vm1250_vm7, %v7159_v44, %v1243_v60  ;;  %v1246_v8 = vmul.f32 1.6732632, %v5127_v62  ;;  %v1545_v44 = vld [vmem:[%s12858_s5 + $0x890] sm:$0xff]  ;;  %v1559_v60 = vld [vmem:[%s12858_s5 + $0x900] sm:$0xff] }
 0x207   :  { %v1258_v10 = vsel %vm1251_vm8, %v7160_v47, %v1244_v1  ;;  %v8928_v22 = vmul.f32 1.050701, %v1257_v7  ;;  %v5861_v54 = vpack.c.bf16 %v1545_v44, %v1538_v42  ;;  %v1561_v62 = vld [vmem:[%s12858_s5 + $0x910] sm:$0xff]  ;;  %v6059_v1 = vpack.c.bf16 %v1546_v57, %v1539_v56  ;;  %v1596_v44 = vld [vmem:[%s12858_s5 + $0xa28] sm:$0xff]  ;;  %v1615_v57 = vld [vmem:[%s12858_s5 + $0xac0] sm:$0xff] }
 0x208   :  { %v8920_v15 = vmul.f32 1.050701, %v1258_v10  ;;  %v1260_v16 = vsel %vm1253_vm9, %v7162_v48, %v1246_v8  ;;  %v5859_v48 = vpack.c.bf16 %v1530_v38, %v1523_v11  ;;  %v5865_v6 = vpack.c.bf16 %v1559_v60, %v1552_v58  ;;  %v1553_v8 = vld [vmem:[%s12858_s5 + $0x8d0] sm:$0xff]  ;;  %v1566_v10 = vld [vmem:[%s12858_s5 + $0x938] sm:$0xff]  ;;  %v1608_v56 = vld [vmem:[%s12858_s5 + $0xa88] sm:$0xff] }
 0x209   :  { %v8950_v33 = vmul.f32 1.050701, %v1260_v16  ;;  %v6061_v7 = vpack.c.bf16 %v1561_v62, %v1554_v61  ;;  %v5867_v16 = vpack.c.bf16 %v1558_v4, %v1551_v2  ;;  %v5869_v21 = vpack.c.bf16 %v1573_v13, %v1566_v10  ;;  %v1586_v11 = vld [vmem:[%s12858_s5 + $0x9d8] sm:$0xff]  ;;  %v1601_v42 = vld [vmem:[%s12858_s5 + $0xa50] sm:$0xff]  ;;  %v1624_v10 = vld [vmem:[%s12858_s5 + $0xb08] sm:$0xff] }
 0x20a   :  { %2061 = vmatprep.mubr.f32.mxu1 %v8920_v15  ;;  %2345 = vmatprep.mubr.f32.mxu0 %v8920_v15  ;;  %v5877_v52 = vpack.c.bf16 %v1601_v42, %v1594_v41  ;;  %v1610_v58 = vld [vmem:[%s12858_s5 + $0xa98] sm:$0xff]  ;;  %v1617_v60 = vld [vmem:[%s12858_s5 + $0xad0] sm:$0xff]  ;;  %v9111_v2 = vadd.f32 %v8894_v43, %v621_v51  ;;  %v5881_v4 = vpack.c.bf16 %v1615_v57, %v1608_v56  ;;  %v1631_v13 = vld [vmem:[%s12858_s5 + $0xb40] sm:$0xff] }
 0x20b   :  { %2062 = vmatmul.mubr.f32.vlgmr.msra.gmra.mrb[10].mxu1 %v8928_v22  ;;  %2346 = vmatmul.mubr.f32.vlgmr.msra.gmra.mrb[4].mxu0 %v8928_v22  ;;  %v1629_v43 = vld [vmem:[%s12858_s5 + $0xb30] sm:$0xff]  ;;  %v1644_v41 = vld [vmem:[%s12858_s5 + $0xba8] sm:$0xff]  ;;  %v1650_v42 = vld [vmem:[%s12858_s5 + $0xbd8] sm:$0xff] }
 0x20c   :  { %5852 = vmatpush1.bf16.msra.mxu1 %v5851_v18  ;;  %6048 = vmatpush1.bf16.msra.mxu0 %v6047_v19  ;;  %v6063_v18 = vpack.c.bf16 %v1560_v9, %v1553_v8  ;;  %v1565_v19 = vld [vmem:[%s12858_s5 + $0x930] sm:$0xff]  ;;  %v1616_v8 = vld [vmem:[%s12858_s5 + $0xac8] sm:$0xff]  ;;  %v1622_v9 = vld [vmem:[%s12858_s5 + $0xaf8] sm:$0xff]  ;;  %vm1252_vm10 = vcmp.gt.f32.partialorder %v9111_v2, 0.0 }
 0x20d   :  { %2132 = vmatprep.mubr.f32.mxu1 %v8950_v33  ;;  %2416 = vmatprep.mubr.f32.mxu0 %v8950_v33  ;;  %v5871_v17 = vpack.c.bf16 %v1572_v20, %v1565_v19  ;;  %v1217_v19 = vmin.f32 %v9111_v2, 0.0  ;;  %v5885_v20 = vpack.c.bf16 %v1629_v43, %v1622_v9  ;;  %v1649_v51 = vld [vmem:[%s12858_s5 + $0xbd0] sm:$0xff]  ;;  %v1658_v56 = vld [vmem:[%s12858_s5 + $0xc18] sm:$0xff]  ;;  %v1664_v57 = vld [vmem:[%s12858_s5 + $0xc48] sm:$0xff] }
 0x20e   :  { %5854 = vmatprep.subr.bf16.mxu1 %v5853_v26  ;;  %6050 = vmatprep.subr.bf16.mxu0 %v6049_v27  ;;  %v1580_v26 = vld [vmem:[%s12858_s5 + $0x9a8] sm:$0xff]  ;;  %v1587_v27 = vld [vmem:[%s12858_s5 + $0x9e0] sm:$0xff] }
 0x20f   :  { %v5873_v38 = vpack.c.bf16 %v1587_v27, %v1580_v26  ;;  %v1643_v26 = vld [vmem:[%s12858_s5 + $0xba0] sm:$0xff]  ;;  %v1638_v27 = vld [vmem:[%s12858_s5 + $0xb78] sm:$0xff] }
 0x210   :  { %5856 = vmatpush1.bf16.msra.mxu1 %v5855_v34  ;;  %6052 = vmatpush1.bf16.msra.mxu0 %v6051_v36  ;;  %v6067_v34 = vpack.c.bf16 %v1574_v25, %v1567_v24  ;;  %v1579_v36 = vld [vmem:[%s12858_s5 + $0x9a0] sm:$0xff]  ;;  %v1630_v24 = vld [vmem:[%s12858_s5 + $0xb38] sm:$0xff]  ;;  %v1636_v25 = vld [vmem:[%s12858_s5 + $0xb68] sm:$0xff] }
 0x211   :  { %v5185_v47 = vpop.f32.mrb[6].mxu1  ;;  %5858 = vmatprep.subr.bf16.mxu1 %v5857_v39  ;;  %6054 = vmatprep.subr.bf16.mxu0 %v6053_v37  ;;  %v6069_v39 = vpack.c.bf16 %v1589_v32, %v1582_v30  ;;  %v1581_v37 = vld [vmem:[%s12858_s5 + $0x9b0] sm:$0xff]  ;;  %v5875_v46 = vpack.c.bf16 %v1586_v11, %v1579_v36  ;;  %v9157_v32 = vsub.s32 6, %v7769_v28  ;;  %v1635_v36 = vld [vmem:[%s12858_s5 + $0xb60] sm:$0xff]  ;;  %v1642_v11 = vld [vmem:[%s12858_s5 + $0xb98] sm:$0xff] }
 0x212   :  { %v5186_v53 = vpop.f32.mrb[7].mxu1  ;;  %v1645_v30 = vld [vmem:[%s12858_s5 + $0xbb0] sm:$0xff] }
 0x213   :  { %v8995_v59 = vadd.f32 %v5186_v53, %v5185_v47  ;;  %v6071_v47 = vpack.c.bf16 %v1588_v5, %v1581_v37  ;;  %v6073_v53 = vpack.c.bf16 %v1603_v45, %v1596_v44  ;;  %v6085_v37 = vpack.c.bf16 %v1645_v30, %v1638_v27  ;;  %v1637_v5 = vld [vmem:[%s12858_s5 + $0xb70] sm:$0xff]  ;;  %v1652_v45 = vld [vmem:[%s12858_s5 + $0xbe8] sm:$0xff]  ;;  %v1686_v27 = vld [vmem:[%s12858_s5 + $0xcf8] sm:$0xff] }
 0x214   :  { %5860 = vmatpush1.bf16.msra.mxu1 %v5859_v48  ;;  %6056 = vmatpush1.bf16.msra.mxu0 %v6055_v49  ;;  %v1593_v48 = vld [vmem:[%s12858_s5 + $0xa10] sm:$0xff]  ;;  %v1600_v49 = vld [vmem:[%s12858_s5 + $0xa48] sm:$0xff] }
 0x215   :  { %5862 = vmatprep.subr.bf16.mxu1 %v5861_v54  ;;  %6058 = vmatprep.subr.bf16.mxu0 %v6057_v55  ;;  %v1595_v54 = vld [vmem:[%s12858_s5 + $0xa20] sm:$0xff]  ;;  %v1602_v55 = vld [vmem:[%s12858_s5 + $0xa58] sm:$0xff]  ;;  %v5879_v61 = vpack.c.bf16 %v1600_v49, %v1593_v48  ;;  %v1657_v44 = vld [vmem:[%s12858_s5 + $0xc10] sm:$0xff]  ;;  %v5891_v48 = vpack.c.bf16 %v1642_v11, %v1635_v36  ;;  %v6087_v49 = vpack.c.bf16 %v1644_v41, %v1637_v5 }
 0x216   :  { %v6075_v62 = vpack.c.bf16 %v1602_v55, %v1595_v54  ;;  %v1651_v55 = vld [vmem:[%s12858_s5 + $0xbe0] sm:$0xff]  ;;  %v1692_v30 = vld [vmem:[%s12858_s5 + $0xd28] sm:$0xff]  ;;  %v1701_v36 = vld [vmem:[%s12858_s5 + $0xd70] sm:$0xff] }
 0x217   :  { %v1698_v5 = vld [vmem:[%s12858_s5 + $0xd58] sm:$0xff] }
 0x218   :  { %5864 = vmatpush1.bf16.msra.mxu1 %v5863_v0  ;;  %6060 = vmatpush1.bf16.msra.mxu0 %v6059_v1  ;;  %v1607_v0 = vld [vmem:[%s12858_s5 + $0xa80] sm:$0xff]  ;;  %v1614_v1 = vld [vmem:[%s12858_s5 + $0xab8] sm:$0xff] }
 0x219   :  { %5866 = vmatprep.subr.bf16.mxu1 %v5865_v6  ;;  %6062 = vmatprep.subr.bf16.mxu0 %v6061_v7  ;;  %v6077_v6 = vpack.c.bf16 %v1617_v60, %v1610_v58  ;;  %v1609_v7 = vld [vmem:[%s12858_s5 + $0xa90] sm:$0xff]  ;;  %v5883_v14 = vpack.c.bf16 %v1614_v1, %v1607_v0  ;;  %v1671_v58 = vld [vmem:[%s12858_s5 + $0xc80] sm:$0xff]  ;;  %v1666_v60 = vld [vmem:[%s12858_s5 + $0xc58] sm:$0xff] }
 0x21a   :  { %v6079_v12 = vpack.c.bf16 %v1616_v8, %v1609_v7  ;;  %v1670_v7 = vld [vmem:[%s12858_s5 + $0xc78] sm:$0xff]  ;;  %v5897_v43 = vpack.c.bf16 %v1671_v58, %v1664_v57  ;;  %v1707_v58 = vld [vmem:[%s12858_s5 + $0xda0] sm:$0xff] }
 0x21c   :  { %5868 = vmatpush1.bf16.msra.mxu1 %v5867_v16  ;;  %6064 = vmatpush1.bf16.msra.mxu0 %v6063_v18  ;;  %v1621_v16 = vld [vmem:[%s12858_s5 + $0xaf0] sm:$0xff]  ;;  %v1628_v18 = vld [vmem:[%s12858_s5 + $0xb28] sm:$0xff] }
 0x21d   :  { %5870 = vmatprep.subr.bf16.mxu1 %v5869_v21  ;;  %6066 = vmatprep.subr.bf16.mxu0 %v6065_v23  ;;  %v6081_v21 = vpack.c.bf16 %v1631_v13, %v1624_v10  ;;  %v1623_v23 = vld [vmem:[%s12858_s5 + $0xb00] sm:$0xff]  ;;  %v1665_v10 = vld [vmem:[%s12858_s5 + $0xc50] sm:$0xff]  ;;  %v1672_v13 = vld [vmem:[%s12858_s5 + $0xc88] sm:$0xff] }
 0x220   :  { %5872 = vmatpush1.bf16.msra.mxu1 %v5871_v17  ;;  %6068 = vmatpush1.bf16.msra.mxu0 %v6067_v34  ;;  %v5887_v17 = vpack.c.bf16 %v1628_v18, %v1621_v16  ;;  %v6083_v34 = vpack.c.bf16 %v1630_v24, %v1623_v23  ;;  %v1680_v16 = vld [vmem:[%s12858_s5 + $0xcc8] sm:$0xff]  ;;  %v1687_v18 = vld [vmem:[%s12858_s5 + $0xd00] sm:$0xff] }
 0x221   :  { %5874 = vmatprep.subr.bf16.mxu1 %v5873_v38  ;;  %6070 = vmatprep.subr.bf16.mxu0 %v6069_v39  ;;  %v1226_v38 = vmul.f32 1.442695, %v1217_v19  ;;  %v5889_v39 = vpack.c.bf16 %v1643_v26, %v1636_v25  ;;  %v1684_v23 = vld [vmem:[%s12858_s5 + $0xce8] sm:$0xff]  ;;  %v6097_v25 = vpack.c.bf16 %v1687_v18, %v1680_v16  ;;  %v1679_v26 = vld [vmem:[%s12858_s5 + $0xcc0] sm:$0xff]  ;;  %v1741_v18 = vld [vmem:[%s12858_s5 + $0xeb0] sm:$0xff] }
 0x223   :  { %7236 = vpow2.f32 %v1226_v38 }
 0x224   :  { %5876 = vmatpush1.bf16.msra.mxu1 %v5875_v46  ;;  %6072 = vmatpush1.bf16.msra.mxu0 %v6071_v47  ;;  %v1659_v46 = vld [vmem:[%s12858_s5 + $0xc20] sm:$0xff]  ;;  %v637_v47 = vrot.slane %v8886_v40, %v9157_v32 }
 0x225   :  { %5878 = vmatprep.subr.bf16.mxu1 %v5877_v52  ;;  %6074 = vmatprep.subr.bf16.mxu0 %v6073_v53  ;;  %v1656_v52 = vld [vmem:[%s12858_s5 + $0xc08] sm:$0xff]  ;;  %v5893_v53 = vpack.c.bf16 %v1657_v44, %v1650_v42  ;;  %v6089_v54 = vpack.c.bf16 %v1659_v46, %v1652_v45  ;;  %v1693_v44 = vld [vmem:[%s12858_s5 + $0xd30] sm:$0xff]  ;;  %v1706_v46 = vld [vmem:[%s12858_s5 + $0xd98] sm:$0xff] }
 0x226   :  { %v5895_v1 = vpack.c.bf16 %v1656_v52, %v1649_v51  ;;  %v1700_v45 = vld [vmem:[%s12858_s5 + $0xd68] sm:$0xff]  ;;  %v1715_v51 = vld [vmem:[%s12858_s5 + $0xde0] sm:$0xff] }
 0x228   :  { %5880 = vmatpush1.bf16.msra.mxu1 %v5879_v61  ;;  %6076 = vmatpush1.bf16.msra.mxu0 %v6075_v62  ;;  %v1673_v61 = vld [vmem:[%s12858_s5 + $0xc90] sm:$0xff]  ;;  %v1142_v62 = vadd.f32 %v8995_v59, %v637_v47 }
 0x229   :  { %5882 = vmatprep.subr.bf16.mxu1 %v5881_v4  ;;  %6078 = vmatprep.subr.bf16.mxu0 %v6077_v6  ;;  %v6091_v4 = vpack.c.bf16 %v1658_v56, %v1651_v55  ;;  %v1663_v6 = vld [vmem:[%s12858_s5 + $0xc40] sm:$0xff]  ;;  %v6093_v59 = vpack.c.bf16 %v1673_v61, %v1666_v60  ;;  %v1712_v55 = vld [vmem:[%s12858_s5 + $0xdc8] sm:$0xff]  ;;  %v1714_v60 = vld [vmem:[%s12858_s5 + $0xdd8] sm:$0xff] }
 0x22a   :  { %v5899_v19 = vpack.c.bf16 %v1670_v7, %v1663_v6  ;;  %v1720_v61 = vld [vmem:[%s12858_s5 + $0xe08] sm:$0xff]  ;;  %v6107_v7 = vpack.c.bf16 %v1714_v60, %v1707_v58 }
 0x22c   :  { %5884 = vmatpush1.bf16.msra.mxu1 %v5883_v14  ;;  %6080 = vmatpush1.bf16.msra.mxu0 %v6079_v12  ;;  %v1678_v14 = vld [vmem:[%s12858_s5 + $0xcb8] sm:$0xff]  ;;  %v1685_v12 = vld [vmem:[%s12858_s5 + $0xcf0] sm:$0xff] }
 0x22d   :  { %5886 = vmatprep.subr.bf16.mxu1 %v5885_v20  ;;  %6082 = vmatprep.subr.bf16.mxu0 %v6081_v21  ;;  %v6095_v20 = vpack.c.bf16 %v1672_v13, %v1665_v10  ;;  %v1677_v21 = vld [vmem:[%s12858_s5 + $0xcb0] sm:$0xff]  ;;  %v5901_v24 = vpack.c.bf16 %v1685_v12, %v1678_v14  ;;  %v7237_v11 = vpop.eup %7236  ;;  %v1728_v14 = vld [vmem:[%s12858_s5 + $0xe48] sm:$0xff]  ;;  %v1734_v12 = vld [vmem:[%s12858_s5 + $0xe78] sm:$0xff] }
 0x22e   :  { %v5903_v38 = vpack.c.bf16 %v1684_v23, %v1677_v21  ;;  %v5126_v47 = vadd.f32 -1.0, %v7237_v11  ;;  %v1721_v13 = vld [vmem:[%s12858_s5 + $0xe10] sm:$0xff]  ;;  %v1750_v11 = vld [vmem:[%s12858_s5 + $0xef8] sm:$0xff] }
 0x22f   :  { %v6111_v23 = vpack.c.bf16 %v1728_v14, %v1721_v13  ;;  %v1782_v13 = vld [vmem:[%s12858_s5 + $0xff8] sm:$0xff] }
 0x230   :  { %5888 = vmatpush1.bf16.msra.mxu1 %v5887_v17  ;;  %6084 = vmatpush1.bf16.msra.mxu0 %v6083_v34  ;;  %v1699_v17 = vld [vmem:[%s12858_s5 + $0xd60] sm:$0xff]  ;;  %v1694_v34 = vld [vmem:[%s12858_s5 + $0xd38] sm:$0xff] }
 0x231   :  { %5890 = vmatprep.subr.bf16.mxu1 %v5889_v39  ;;  %6086 = vmatprep.subr.bf16.mxu0 %v6085_v37  ;;  %v6099_v39 = vpack.c.bf16 %v1686_v27, %v1679_v26  ;;  %v1691_v37 = vld [vmem:[%s12858_s5 + $0xd20] sm:$0xff]  ;;  %v5905_v41 = vpack.c.bf16 %v1699_v17, %v1692_v30  ;;  %v6101_v42 = vpack.c.bf16 %v1701_v36, %v1694_v34  ;;  %v1742_v17 = vld [vmem:[%s12858_s5 + $0xeb8] sm:$0xff]  ;;  %v1748_v34 = vld [vmem:[%s12858_s5 + $0xee8] sm:$0xff] }
 0x232   :  { %v5907_v52 = vpack.c.bf16 %v1698_v5, %v1691_v37  ;;  %v5917_v26 = vpack.c.bf16 %v1741_v18, %v1734_v12  ;;  %v1735_v30 = vld [vmem:[%s12858_s5 + $0xe80] sm:$0xff]  ;;  %v1777_v18 = vld [vmem:[%s12858_s5 + $0xfd0] sm:$0xff] }
 0x233   :  { %v1755_v36 = vld [vmem:[%s12858_s5 + $0xf20] sm:$0xff]  ;;  %v6115_v37 = vpack.c.bf16 %v1742_v17, %v1735_v30  ;;  %v1789_v30 = vld [vmem:[%s12858_s5 + $0x1030] sm:$0xff]  ;;  %v1796_v17 = vld [vmem:[%s12858_s5 + $0x1068] sm:$0xff] }
 0x234   :  { %5892 = vmatpush1.bf16.msra.mxu1 %v5891_v48  ;;  %6088 = vmatpush1.bf16.msra.mxu0 %v6087_v49  ;;  %v1713_v48 = vld [vmem:[%s12858_s5 + $0xdd0] sm:$0xff]  ;;  %v1708_v49 = vld [vmem:[%s12858_s5 + $0xda8] sm:$0xff]  ;;  %v1747_v5 = vld [vmem:[%s12858_s5 + $0xee0] sm:$0xff] }
 0x235   :  { %v1211_v0 = vpop.f32.mrb[8].mxu1  ;;  %5894 = vmatprep.subr.bf16.mxu1 %v5893_v53  ;;  %6090 = vmatprep.subr.bf16.mxu0 %v6089_v54  ;;  %v6103_v53 = vpack.c.bf16 %v1700_v45, %v1693_v44  ;;  %v1705_v54 = vld [vmem:[%s12858_s5 + $0xd90] sm:$0xff]  ;;  %v5909_v56 = vpack.c.bf16 %v1713_v48, %v1706_v46  ;;  %v6105_v57 = vpack.c.bf16 %v1715_v51, %v1708_v49  ;;  %v1756_v46 = vld [vmem:[%s12858_s5 + $0xf28] sm:$0xff]  ;;  %v1762_v48 = vld [vmem:[%s12858_s5 + $0xf58] sm:$0xff] }
 0x236   :  { %v9216_v8 = vadd.f32 %v1211_v0, %v1142_v62  ;;  %v1213_v9 = vpop.f32.mrb[9].mxu1  ;;  %v1245_v62 = vmul.f32 1.6732632, %v5126_v47  ;;  %v1727_v0 = vld [vmem:[%s12858_s5 + $0xe40] sm:$0xff]  ;;  %v5911_v6 = vpack.c.bf16 %v1712_v55, %v1705_v54  ;;  %v1749_v45 = vld [vmem:[%s12858_s5 + $0xef0] sm:$0xff]  ;;  %v9375_v47 = vsub.s32 5, %v7769_v28 }
 0x237   :  { %v1719_v9 = vld [vmem:[%s12858_s5 + $0xe00] sm:$0xff]  ;;  %v1769_v49 = vld [vmem:[%s12858_s5 + $0xf90] sm:$0xff]  ;;  %v1764_v51 = vld [vmem:[%s12858_s5 + $0xf68] sm:$0xff]  ;;  %v6119_v54 = vpack.c.bf16 %v1756_v46, %v1749_v45 }
 0x238   :  { %5896 = vmatpush1.bf16.msra.mxu1 %v5895_v1  ;;  %6092 = vmatpush1.bf16.msra.mxu0 %v6091_v4  ;;  %v1722_v1 = vld [vmem:[%s12858_s5 + $0xe18] sm:$0xff]  ;;  %v1729_v4 = vld [vmem:[%s12858_s5 + $0xe50] sm:$0xff]  ;;  %v1259_v16 = vsel %vm1252_vm10, %v9111_v2, %v1245_v62  ;;  %v5925_v58 = vpack.c.bf16 %v1769_v49, %v1762_v48  ;;  %v1803_v46 = vld [vmem:[%s12858_s5 + $0x10a0] sm:$0xff]  ;;  %v9475_v49 = vsub.s32 4, %v7769_v28  ;;  %vm1256_vm13 = vcmp.gt.f32.partialorder %v9216_v8, 0.0 }
 0x239   :  { %5898 = vmatprep.subr.bf16.mxu1 %v5897_v43  ;;  %6094 = vmatprep.subr.bf16.mxu0 %v6093_v59  ;;  %v1726_v43 = vld [vmem:[%s12858_s5 + $0xe38] sm:$0xff]  ;;  %v5913_v59 = vpack.c.bf16 %v1727_v0, %v1720_v61  ;;  %v6109_v10 = vpack.c.bf16 %v1729_v4, %v1722_v1  ;;  %v1733_v2 = vld [vmem:[%s12858_s5 + $0xe70] sm:$0xff]  ;;  %v1763_v61 = vld [vmem:[%s12858_s5 + $0xf60] sm:$0xff] }
 0x23a   :  { %v5915_v21 = vpack.c.bf16 %v1726_v43, %v1719_v9  ;;  %v1761_v55 = vld [vmem:[%s12858_s5 + $0xf50] sm:$0xff]  ;;  %v1770_v62 = vld [vmem:[%s12858_s5 + $0xf98] sm:$0xff]  ;;  %v1776_v0 = vld [vmem:[%s12858_s5 + $0xfc8] sm:$0xff] }
 0x23b   :  { %v1783_v1 = vld [vmem:[%s12858_s5 + $0x1000] sm:$0xff]  ;;  %v1778_v4 = vld [vmem:[%s12858_s5 + $0xfd8] sm:$0xff]  ;;  %v1825_v28 = vld [vmem:[%s12858_s5 + $0x1150] sm:$0xff] }
 0x23c   :  { %5900 = vmatpush1.bf16.msra.mxu1 %v5899_v19  ;;  %6096 = vmatpush1.bf16.msra.mxu0 %v6095_v20  ;;  %v1736_v19 = vld [vmem:[%s12858_s5 + $0xe88] sm:$0xff]  ;;  %v1743_v20 = vld [vmem:[%s12858_s5 + $0xec0] sm:$0xff]  ;;  %v5929_v12 = vpack.c.bf16 %v1783_v1, %v1776_v0  ;;  %v1810_v48 = vld [vmem:[%s12858_s5 + $0x10d8] sm:$0xff]  ;;  %v629_v0 = vrot.slane %v8886_v40, %v9475_v49 }
 0x23d   :  { %5902 = vmatprep.subr.bf16.mxu1 %v5901_v24  ;;  %6098 = vmatprep.subr.bf16.mxu0 %v6097_v25  ;;  %v1740_v24 = vld [vmem:[%s12858_s5 + $0xea8] sm:$0xff]  ;;  %v9340_v25 = vmul.f32 1.050701, %v1259_v16  ;;  %v6113_v27 = vpack.c.bf16 %v1743_v20, %v1736_v19  ;;  %v1790_v20 = vld [vmem:[%s12858_s5 + $0x1038] sm:$0xff] }
 0x23e   :  { %v1784_v19 = vld [vmem:[%s12858_s5 + $0x1008] sm:$0xff] }
 0x240   :  { %5904 = vmatpush1.bf16.msra.mxu1 %v5903_v38  ;;  %6100 = vmatpush1.bf16.msra.mxu0 %v6099_v39  ;;  %v1757_v38 = vld [vmem:[%s12858_s5 + $0xf30] sm:$0xff]  ;;  %v5919_v39 = vpack.c.bf16 %v1740_v24, %v1733_v2  ;;  %v1799_v2 = vld [vmem:[%s12858_s5 + $0x1080] sm:$0xff] }
 0x241   :  { %5906 = vmatprep.subr.bf16.mxu1 %v5905_v41  ;;  %6102 = vmatprep.subr.bf16.mxu0 %v6101_v42  ;;  %v1754_v41 = vld [vmem:[%s12858_s5 + $0xf18] sm:$0xff]  ;;  %v5921_v42 = vpack.c.bf16 %v1755_v36, %v1748_v34  ;;  %v6117_v44 = vpack.c.bf16 %v1757_v38, %v1750_v11  ;;  %v1791_v38 = vld [vmem:[%s12858_s5 + $0x1040] sm:$0xff] }
 0x244   :  { %5908 = vmatpush1.bf16.msra.mxu1 %v5907_v52  ;;  %6104 = vmatpush1.bf16.msra.mxu0 %v6103_v53  ;;  %v1771_v52 = vld [vmem:[%s12858_s5 + $0xfa0] sm:$0xff]  ;;  %v5923_v53 = vpack.c.bf16 %v1754_v41, %v1747_v5  ;;  %v1806_v41 = vld [vmem:[%s12858_s5 + $0x10b8] sm:$0xff] }
 0x245   :  { %5910 = vmatprep.subr.bf16.mxu1 %v5909_v56  ;;  %6106 = vmatprep.subr.bf16.mxu0 %v6105_v57  ;;  %v1768_v56 = vld [vmem:[%s12858_s5 + $0xf88] sm:$0xff]  ;;  %v633_v57 = vrot.slane %v8886_v40, %v9375_v47  ;;  %v6121_v60 = vpack.c.bf16 %v1771_v52, %v1764_v51  ;;  %v1811_v5 = vld [vmem:[%s12858_s5 + $0x10e0] sm:$0xff] }
 0x246   :  { %v5927_v43 = vpack.c.bf16 %v1768_v56, %v1761_v55  ;;  %v1818_v55 = vld [vmem:[%s12858_s5 + $0x1118] sm:$0xff]  ;;  %v1820_v56 = vld [vmem:[%s12858_s5 + $0x1128] sm:$0xff]  ;;  %v1839_v40 = vld [vmem:[%s12858_s5 + $0x11c0] sm:$0xff] }
 0x247   :  { %v5941_v1 = vpack.c.bf16 %v1825_v28, %v1818_v55  ;;  %v1866_v28 = vld [vmem:[%s12858_s5 + $0x1298] sm:$0xff] }
 0x248   :  { %5912 = vmatpush1.bf16.msra.mxu1 %v5911_v6  ;;  %6108 = vmatpush1.bf16.msra.mxu0 %v6107_v7  ;;  %v1785_v6 = vld [vmem:[%s12858_s5 + $0x1010] sm:$0xff] }
 0x249   :  { %5914 = vmatprep.subr.bf16.mxu1 %v5913_v59  ;;  %6110 = vmatprep.subr.bf16.mxu0 %v6109_v10  ;;  %v6123_v59 = vpack.c.bf16 %v1770_v62, %v1763_v61  ;;  %v1775_v10 = vld [vmem:[%s12858_s5 + $0xfc0] sm:$0xff]  ;;  %v6125_v16 = vpack.c.bf16 %v1785_v6, %v1778_v4  ;;  %v1817_v61 = vld [vmem:[%s12858_s5 + $0x1110] sm:$0xff]  ;;  %v1824_v62 = vld [vmem:[%s12858_s5 + $0x1148] sm:$0xff] }
 0x24a   :  { %v1819_v6 = vld [vmem:[%s12858_s5 + $0x1120] sm:$0xff] }
 0x24b   :  { %2133 = vmatmul.mubr.f32.vlgmr.msra.gmra.mrb[10].mxu1 %v9340_v25  ;;  %2417 = vmatmul.mubr.f32.vlgmr.msra.gmra.mrb[4].mxu0 %v9340_v25 }
 0x24c   :  { %5916 = vmatpush1.bf16.msra.mxu1 %v5915_v21  ;;  %6112 = vmatpush1.bf16.msra.mxu0 %v6111_v23  ;;  %v1797_v21 = vld [vmem:[%s12858_s5 + $0x1070] sm:$0xff]  ;;  %v1792_v23 = vld [vmem:[%s12858_s5 + $0x1048] sm:$0xff] }
 0x24d   :  { %5918 = vmatprep.subr.bf16.mxu1 %v5917_v26  ;;  %6114 = vmatprep.subr.bf16.mxu0 %v6113_v27  ;;  %v5931_v26 = vpack.c.bf16 %v1782_v13, %v1775_v10  ;;  %v6127_v27 = vpack.c.bf16 %v1784_v19, %v1777_v18  ;;  %v5933_v36 = vpack.c.bf16 %v1797_v21, %v1790_v20  ;;  %v1841_v10 = vld [vmem:[%s12858_s5 + $0x11d0] sm:$0xff] }
 0x24e   :  { %v6129_v11 = vpack.c.bf16 %v1799_v2, %v1792_v23  ;;  %v5943_v13 = vpack.c.bf16 %v1824_v62, %v1817_v61  ;;  %v1838_v23 = vld [vmem:[%s12858_s5 + $0x11b8] sm:$0xff]  ;;  %v1833_v2 = vld [vmem:[%s12858_s5 + $0x1190] sm:$0xff]  ;;  %v1868_v61 = vld [vmem:[%s12858_s5 + $0x12a8] sm:$0xff] }
 0x24f   :  { %v1874_v62 = vld [vmem:[%s12858_s5 + $0x12d8] sm:$0xff] }
 0x250   :  { %5920 = vmatpush1.bf16.msra.mxu1 %v5919_v39  ;;  %6116 = vmatpush1.bf16.msra.mxu0 %v6115_v37  ;;  %v1798_v39 = vld [vmem:[%s12858_s5 + $0x1078] sm:$0xff]  ;;  %v1804_v37 = vld [vmem:[%s12858_s5 + $0x10a8] sm:$0xff] }
 0x251   :  { %5922 = vmatprep.subr.bf16.mxu1 %v5921_v42  ;;  %6118 = vmatprep.subr.bf16.mxu0 %v6117_v44  ;;  %v1813_v42 = vld [vmem:[%s12858_s5 + $0x10f0] sm:$0xff]  ;;  %v5935_v44 = vpack.c.bf16 %v1796_v17, %v1789_v30  ;;  %v6131_v45 = vpack.c.bf16 %v1798_v39, %v1791_v38  ;;  %v5937_v51 = vpack.c.bf16 %v1811_v5, %v1804_v37  ;;  %v1848_v30 = vld [vmem:[%s12858_s5 + $0x1208] sm:$0xff]  ;;  %v1855_v17 = vld [vmem:[%s12858_s5 + $0x1240] sm:$0xff] }
 0x252   :  { %v6133_v52 = vpack.c.bf16 %v1813_v42, %v1806_v41  ;;  %v1845_v38 = vld [vmem:[%s12858_s5 + $0x11f0] sm:$0xff]  ;;  %v1852_v39 = vld [vmem:[%s12858_s5 + $0x1228] sm:$0xff]  ;;  %v1847_v41 = vld [vmem:[%s12858_s5 + $0x1200] sm:$0xff] }
 0x253   :  { %v1854_v42 = vld [vmem:[%s12858_s5 + $0x1238] sm:$0xff] }
 0x254   :  { %v9415_v7 = vpop.f32.mrb[2].mxu0  ;;  %5924 = vmatpush1.bf16.msra.mxu1 %v5923_v53  ;;  %6120 = vmatpush1.bf16.msra.mxu0 %v6119_v54  ;;  %v1805_v53 = vld [vmem:[%s12858_s5 + $0x10b0] sm:$0xff]  ;;  %v1812_v54 = vld [vmem:[%s12858_s5 + $0x10e8] sm:$0xff]  ;;  %v6147_v55 = vpack.c.bf16 %v1854_v42, %v1847_v41 }
 0x255   :  { %v1072_v9 = vpop.f32.mrb[3].mxu0  ;;  %5926 = vmatprep.subr.bf16.mxu1 %v5925_v58  ;;  %6122 = vmatprep.subr.bf16.mxu0 %v6121_v60  ;;  %v5939_v58 = vpack.c.bf16 %v1810_v48, %v1803_v46  ;;  %v6135_v60 = vpack.c.bf16 %v1812_v54, %v1805_v53  ;;  %v9525_v19 = vadd.f32 %v9415_v7, %v629_v0  ;;  %v1846_v7 = vld [vmem:[%s12858_s5 + $0x11f8] sm:$0xff]  ;;  %v1867_v48 = vld [vmem:[%s12858_s5 + $0x12a0] sm:$0xff]  ;;  %v1881_v0 = vld [vmem:[%s12858_s5 + $0x1310] sm:$0xff] }
 0x256   :  { %v9423_v14 = vadd.f32 %v1072_v9, %v633_v57  ;;  %v1827_v57 = vld [vmem:[%s12858_s5 + $0x1160] sm:$0xff]  ;;  %v1826_v9 = vld [vmem:[%s12858_s5 + $0x1158] sm:$0xff]  ;;  %v6145_v46 = vpack.c.bf16 %v1855_v17, %v1848_v30  ;;  %v5951_v54 = vpack.c.bf16 %v1852_v39, %v1845_v38  ;;  %v1909_v38 = vld [vmem:[%s12858_s5 + $0x13f0] sm:$0xff] }
 0x257   :  { %v6137_v4 = vpack.c.bf16 %v1827_v57, %v1820_v56  ;;  %v1219_v37 = vmin.f32 %v9525_v19, 0.0  ;;  %v1904_v39 = vld [vmem:[%s12858_s5 + $0x13c8] sm:$0xff]  ;;  %v1901_v42 = vld [vmem:[%s12858_s5 + $0x13b0] sm:$0xff]  ;;  %vm1254_vm12 = vcmp.gt.f32.partialorder %v9525_v19, 0.0 }
 0x258   :  { %v1220_v24 = vmin.f32 %v9423_v14, 0.0  ;;  %5928 = vmatpush1.bf16.msra.mxu1 %v5927_v43  ;;  %6124 = vmatpush1.bf16.msra.mxu0 %v6123_v59  ;;  %v1832_v43 = vld [vmem:[%s12858_s5 + $0x1188] sm:$0xff]  ;;  %v1834_v59 = vld [vmem:[%s12858_s5 + $0x1198] sm:$0xff]  ;;  %vm1255_vm11 = vcmp.gt.f32.partialorder %v9423_v14, 0.0 }
 0x259   :  { %5930 = vmatprep.subr.bf16.mxu1 %v5929_v12  ;;  %6126 = vmatprep.subr.bf16.mxu0 %v6125_v16  ;;  %v6139_v12 = vpack.c.bf16 %v1826_v9, %v1819_v6  ;;  %v1831_v16 = vld [vmem:[%s12858_s5 + $0x1180] sm:$0xff]  ;;  %v5945_v20 = vpack.c.bf16 %v1839_v40, %v1832_v43  ;;  %v6141_v21 = vpack.c.bf16 %v1841_v10, %v1834_v59  ;;  %v1230_v56 = vmul.f32 1.442695, %v1219_v37  ;;  %v1873_v43 = vld [vmem:[%s12858_s5 + $0x12d0] sm:$0xff]  ;;  %v1880_v40 = vld [vmem:[%s12858_s5 + $0x1308] sm:$0xff] }
 0x25a   :  { %v1232_v34 = vmul.f32 1.442695, %v1220_v24  ;;  %v1840_v24 = vld [vmem:[%s12858_s5 + $0x11c8] sm:$0xff]  ;;  %v1221_v59 = vmin.f32 %v9216_v8, 0.0  ;;  %v5957_v10 = vpack.c.bf16 %v1881_v0, %v1874_v62  ;;  %v1911_v37 = vld [vmem:[%s12858_s5 + $0x1400] sm:$0xff]  ;;  %v1917_v0 = vld [vmem:[%s12858_s5 + $0x1430] sm:$0xff] }
 0x25c   :  { %7238 = vpow2.f32 %v1232_v34  ;;  %5932 = vmatpush1.bf16.msra.mxu1 %v5931_v26  ;;  %6128 = vmatpush1.bf16.msra.mxu0 %v6127_v27  ;;  %v1853_v27 = vld [vmem:[%s12858_s5 + $0x1230] sm:$0xff] }
 0x25d   :  { %5934 = vmatprep.subr.bf16.mxu1 %v5933_v36  ;;  %6130 = vmatprep.subr.bf16.mxu0 %v6129_v11  ;;  %v5947_v36 = vpack.c.bf16 %v1838_v23, %v1831_v16  ;;  %v6143_v11 = vpack.c.bf16 %v1840_v24, %v1833_v2  ;;  %v5949_v5 = vpack.c.bf16 %v1853_v27, %v1846_v7  ;;  %7240 = vpow2.f32 %v1230_v56  ;;  %v1882_v16 = vld [vmem:[%s12858_s5 + $0x1318] sm:$0xff]  ;;  %v1897_v23 = vld [vmem:[%s12858_s5 + $0x1390] sm:$0xff] }
 0x25e   :  { %v5959_v2 = vpack.c.bf16 %v1880_v40, %v1873_v43  ;;  %v1894_v7 = vld [vmem:[%s12858_s5 + $0x1378] sm:$0xff]  ;;  %v1234_v27 = vmul.f32 1.442695, %v1221_v59  ;;  %v1932_v43 = vld [vmem:[%s12858_s5 + $0x14a8] sm:$0xff]  ;;  %v1939_v40 = vld [vmem:[%s12858_s5 + $0x14e0] sm:$0xff] }
 0x260   :  { %5936 = vmatpush1.bf16.msra.mxu1 %v5935_v44  ;;  %6132 = vmatpush1.bf16.msra.mxu0 %v6131_v45  ;;  %v1860_v44 = vld [vmem:[%s12858_s5 + $0x1268] sm:$0xff]  ;;  %7242 = vpow2.f32 %v1234_v27 }
 0x261   :  { %5938 = vmatprep.subr.bf16.mxu1 %v5937_v51  ;;  %6134 = vmatprep.subr.bf16.mxu0 %v6133_v52  ;;  %v1862_v51 = vld [vmem:[%s12858_s5 + $0x1278] sm:$0xff]  ;;  %v1869_v52 = vld [vmem:[%s12858_s5 + $0x12b0] sm:$0xff]  ;;  %v5953_v57 = vpack.c.bf16 %v1867_v48, %v1860_v44  ;;  %v1908_v44 = vld [vmem:[%s12858_s5 + $0x13e8] sm:$0xff] }
 0x262   :  { %v1903_v48 = vld [vmem:[%s12858_s5 + $0x13c0] sm:$0xff]  ;;  %v5967_v56 = vpack.c.bf16 %v1908_v44, %v1901_v42  ;;  %v1410_v44 = vld [vmem:[%s12858_s5 + $0x458] sm:$0xff] }
 0x263   :  { %v1403_v42 = vld [vmem:[%s12858_s5 + $0x420] sm:$0xff] }
 0x264   :  { %5940 = vmatpush1.bf16.msra.mxu1 %v5939_v58  ;;  %6136 = vmatpush1.bf16.msra.mxu0 %v6135_v60  ;;  %v6149_v58 = vpack.c.bf16 %v1869_v52, %v1862_v51  ;;  %v1861_v60 = vld [vmem:[%s12858_s5 + $0x1270] sm:$0xff]  ;;  %v1910_v51 = vld [vmem:[%s12858_s5 + $0x13f8] sm:$0xff]  ;;  %v1916_v52 = vld [vmem:[%s12858_s5 + $0x1428] sm:$0xff] }
 0x265   :  { %5942 = vmatprep.subr.bf16.mxu1 %v5941_v1  ;;  %6138 = vmatprep.subr.bf16.mxu0 %v6137_v4  ;;  %v1876_v1 = vld [vmem:[%s12858_s5 + $0x12e8] sm:$0xff]  ;;  %v1883_v4 = vld [vmem:[%s12858_s5 + $0x1320] sm:$0xff]  ;;  %v6151_v9 = vpack.c.bf16 %v1868_v61, %v1861_v60  ;;  %v1922_v60 = vld [vmem:[%s12858_s5 + $0x1458] sm:$0xff] }
 0x266   :  { %v7239_v18 = vpop.eup %7238 }
 0x267   :  { %v5129_v26 = vadd.f32 -1.0, %v7239_v18  ;;  %v1888_v18 = vld [vmem:[%s12858_s5 + $0x1348] sm:$0xff] }
 0x268   :  { %5944 = vmatpush1.bf16.msra.mxu1 %v5943_v13  ;;  %6140 = vmatpush1.bf16.msra.mxu0 %v6139_v12  ;;  %v6153_v13 = vpack.c.bf16 %v1883_v4, %v1876_v1  ;;  %v1875_v12 = vld [vmem:[%s12858_s5 + $0x12e0] sm:$0xff]  ;;  %v1924_v1 = vld [vmem:[%s12858_s5 + $0x1468] sm:$0xff]  ;;  %v1930_v4 = vld [vmem:[%s12858_s5 + $0x1498] sm:$0xff] }
 0x269   :  { %v1248_v34 = vmul.f32 1.6732632, %v5129_v26  ;;  %5946 = vmatprep.subr.bf16.mxu1 %v5945_v20  ;;  %6142 = vmatprep.subr.bf16.mxu0 %v6141_v21  ;;  %v1895_v20 = vld [vmem:[%s12858_s5 + $0x1380] sm:$0xff]  ;;  %v1890_v21 = vld [vmem:[%s12858_s5 + $0x1358] sm:$0xff]  ;;  %v6155_v24 = vpack.c.bf16 %v1882_v16, %v1875_v12  ;;  %v1936_v12 = vld [vmem:[%s12858_s5 + $0x14c8] sm:$0xff] }
 0x26a   :  { %v1887_v26 = vld [vmem:[%s12858_s5 + $0x1340] sm:$0xff]  ;;  %v5961_v30 = vpack.c.bf16 %v1895_v20, %v1888_v18  ;;  %v6157_v17 = vpack.c.bf16 %v1897_v23, %v1890_v21  ;;  %v6169_v18 = vpack.c.bf16 %v1939_v40, %v1932_v43  ;;  %v1938_v21 = vld [vmem:[%s12858_s5 + $0x14d8] sm:$0xff]  ;;  %v1389_v23 = vld [vmem:[%s12858_s5 + $0x3b0] sm:$0xff] }
 0x26b   :  { %v1262_v45 = vsel %vm1255_vm11, %v9423_v14, %v1248_v34  ;;  %v1859_v14 = vld [vmem:[%s12858_s5 + $0x1260] sm:$0xff]  ;;  %v1889_v34 = vld [vmem:[%s12858_s5 + $0x1350] sm:$0xff]  ;;  %v1438_v40 = vld [vmem:[%s12858_s5 + $0x538] sm:$0xff] }
 0x26c   :  { %v9575_v53 = vmul.f32 1.050701, %v1262_v45  ;;  %5948 = vmatpush1.bf16.msra.mxu1 %v5947_v36  ;;  %6144 = vmatpush1.bf16.msra.mxu0 %v6143_v11  ;;  %v5955_v6 = vpack.c.bf16 %v1866_v28, %v1859_v14  ;;  %v1896_v36 = vld [vmem:[%s12858_s5 + $0x1388] sm:$0xff]  ;;  %v1902_v11 = vld [vmem:[%s12858_s5 + $0x13b8] sm:$0xff]  ;;  %v1925_v14 = vld [vmem:[%s12858_s5 + $0x1470] sm:$0xff]  ;;  %v7241_v28 = vpop.eup %7240 }
 0x26d   :  { %5950 = vmatprep.subr.bf16.mxu1 %v5949_v5  ;;  %6146 = vmatprep.subr.bf16.mxu0 %v6145_v46  ;;  %v5963_v5 = vpack.c.bf16 %v1894_v7, %v1887_v26  ;;  %v6159_v41 = vpack.c.bf16 %v1896_v36, %v1889_v34  ;;  %v5965_v45 = vpack.c.bf16 %v1909_v38, %v1902_v11  ;;  %v1931_v20 = vld [vmem:[%s12858_s5 + $0x14a0] sm:$0xff]  ;;  %v1396_v7 = vld [vmem:[%s12858_s5 + $0x3e8] sm:$0xff]  ;;  %v7243_v27 = vpop.eup %7242  ;;  %v1277_v34 = vld [vmem:[%s12858_s5 + $0x30] sm:$0xff] }
 0x26e   :  { %2203 = vmatprep.mubr.f32.mxu1 %v9575_v53  ;;  %2487 = vmatprep.mubr.f32.mxu0 %v9575_v53  ;;  %v6161_v46 = vpack.c.bf16 %v1911_v37, %v1904_v39  ;;  %v1951_v26 = vld [vmem:[%s12858_s5 + $0x1540] sm:$0xff]  ;;  %v6373_v11 = vpack.c.bf16 %v1396_v7, %v1389_v23  ;;  %v1950_v39 = vld [vmem:[%s12858_s5 + $0x1538] sm:$0xff]  ;;  %v1284_v37 = vld [vmem:[%s12858_s5 + $0x68] sm:$0xff] }
 0x26f   :  { %v1943_v38 = vld [vmem:[%s12858_s5 + $0x1500] sm:$0xff]  ;;  %v1290_v23 = vld [vmem:[%s12858_s5 + $0x98] sm:$0xff] }
 0x270   :  { %5952 = vmatpush1.bf16.msra.mxu1 %v5951_v54  ;;  %6148 = vmatpush1.bf16.msra.mxu0 %v6147_v55  ;;  %v1923_v54 = vld [vmem:[%s12858_s5 + $0x1460] sm:$0xff]  ;;  %v1918_v55 = vld [vmem:[%s12858_s5 + $0x1438] sm:$0xff] }
 0x271   :  { %5954 = vmatprep.subr.bf16.mxu1 %v5953_v57  ;;  %6150 = vmatprep.subr.bf16.mxu0 %v6149_v58  ;;  %v6163_v57 = vpack.c.bf16 %v1910_v51, %v1903_v48  ;;  %v1915_v58 = vld [vmem:[%s12858_s5 + $0x1420] sm:$0xff]  ;;  %v5969_v61 = vpack.c.bf16 %v1923_v54, %v1916_v52  ;;  %v6165_v62 = vpack.c.bf16 %v1925_v14, %v1918_v55  ;;  %v1298_v55 = vld [vmem:[%s12858_s5 + $0xd8] sm:$0xff] }
 0x272   :  { %v5971_v59 = vpack.c.bf16 %v1922_v60, %v1915_v58  ;;  %v5979_v48 = vpack.c.bf16 %v1950_v39, %v1943_v38  ;;  %v6377_v52 = vpack.c.bf16 %v1410_v44, %v1403_v42  ;;  %v1291_v54 = vld [vmem:[%s12858_s5 + $0xa0] sm:$0xff]  ;;  %v1945_v60 = vld [vmem:[%s12858_s5 + $0x1510] sm:$0xff]  ;;  %v1340_v38 = vld [vmem:[%s12858_s5 + $0x228] sm:$0xff] }
 0x273   :  { %v6379_v58 = vpack.c.bf16 %v1298_v55, %v1291_v54  ;;  %v1431_v43 = vld [vmem:[%s12858_s5 + $0x500] sm:$0xff]  ;;  %v1304_v39 = vld [vmem:[%s12858_s5 + $0x108] sm:$0xff]  ;;  %v1318_v54 = vld [vmem:[%s12858_s5 + $0x178] sm:$0xff] }
 0x274   :  { %5956 = vmatpush1.bf16.msra.mxu1 %v5955_v6  ;;  %6152 = vmatpush1.bf16.msra.mxu0 %v6151_v9  ;;  %v5128_v6 = vadd.f32 -1.0, %v7241_v28  ;;  %v1937_v9 = vld [vmem:[%s12858_s5 + $0x14d0] sm:$0xff] }
 0x275   :  { %5958 = vmatprep.subr.bf16.mxu1 %v5957_v10  ;;  %6154 = vmatprep.subr.bf16.mxu0 %v6153_v13  ;;  %v6167_v10 = vpack.c.bf16 %v1924_v1, %v1917_v0  ;;  %v1929_v13 = vld [vmem:[%s12858_s5 + $0x1490] sm:$0xff]  ;;  %v5973_v16 = vpack.c.bf16 %v1937_v9, %v1930_v4  ;;  %v1312_v1 = vld [vmem:[%s12858_s5 + $0x148] sm:$0xff]  ;;  %v1283_v9 = vld [vmem:[%s12858_s5 + $0x60] sm:$0xff] }
 0x276   :  { %v1305_v0 = vld [vmem:[%s12858_s5 + $0x110] sm:$0xff] }
 0x277   :  { %v1325_v55 = vld [vmem:[%s12858_s5 + $0x1b0] sm:$0xff] }
 0x278   :  { %5960 = vmatpush1.bf16.msra.mxu1 %v5959_v2  ;;  %6156 = vmatpush1.bf16.msra.mxu0 %v6155_v24  ;;  %v1247_v2 = vmul.f32 1.6732632, %v5128_v6  ;;  %v1944_v24 = vld [vmem:[%s12858_s5 + $0x1508] sm:$0xff] }
 0x279   :  { %5962 = vmatprep.subr.bf16.mxu1 %v5961_v30  ;;  %6158 = vmatprep.subr.bf16.mxu0 %v6157_v17  ;;  %v5975_v30 = vpack.c.bf16 %v1936_v12, %v1929_v13  ;;  %v6171_v17 = vpack.c.bf16 %v1938_v21, %v1931_v20  ;;  %v5977_v36 = vpack.c.bf16 %v1951_v26, %v1944_v24  ;;  %v1276_v6 = vld [vmem:[%s12858_s5 + $0x28] sm:$0xff]  ;;  %v1275_v12 = vld [vmem:[%s12858_s5 + $0x20] sm:$0xff]  ;;  %v1326_v21 = vld [vmem:[%s12858_s5 + $0x1b8] sm:$0xff] }
 0x27a   :  { %v6177_v13 = vpack.c.bf16 %v1283_v9, %v1276_v6  ;;  %v6385_v20 = vpack.c.bf16 %v1438_v40, %v1431_v43  ;;  %v1445_v24 = vld [vmem:[%s12858_s5 + $0x570] sm:$0xff]  ;;  %v1452_v26 = vld [vmem:[%s12858_s5 + $0x5a8] sm:$0xff]  ;;  %v1339_v6 = vld [vmem:[%s12858_s5 + $0x220] sm:$0xff] }
 0x27b   :  { %v1487_v9 = vld [vmem:[%s12858_s5 + $0x6c0] sm:$0xff]  ;;  %v1494_v43 = vld [vmem:[%s12858_s5 + $0x6f8] sm:$0xff] }
 0x27c   :  { %5964 = vmatpush1.bf16.msra.mxu1 %v5963_v5  ;;  %6160 = vmatpush1.bf16.msra.mxu0 %v6159_v41  ;;  %v5130_v5 = vadd.f32 -1.0, %v7243_v27  ;;  %v1261_v41 = vsel %vm1254_vm12, %v9525_v19, %v1247_v2  ;;  %v6375_v19 = vpack.c.bf16 %v1284_v37, %v1277_v34  ;;  %v1297_v2 = vld [vmem:[%s12858_s5 + $0xd0] sm:$0xff]  ;;  %v1296_v34 = vld [vmem:[%s12858_s5 + $0xc8] sm:$0xff]  ;;  %v1311_v37 = vld [vmem:[%s12858_s5 + $0x140] sm:$0xff] }
 0x27d   :  { %5966 = vmatprep.subr.bf16.mxu1 %v5965_v45  ;;  %6162 = vmatprep.subr.bf16.mxu0 %v6161_v46  ;;  %v1946_v45 = vld [vmem:[%s12858_s5 + $0x1518] sm:$0xff]  ;;  %v1953_v46 = vld [vmem:[%s12858_s5 + $0x1550] sm:$0xff]  ;;  %v9750_v51 = vmul.f32 1.050701, %v1261_v41 }
 0x27e   :  { %v1249_v14 = vmul.f32 1.6732632, %v5130_v5  ;;  %v6173_v28 = vpack.c.bf16 %v1953_v46, %v1946_v45  ;;  %v1459_v5 = vld [vmem:[%s12858_s5 + $0x5e0] sm:$0xff]  ;;  %v1466_v41 = vld [vmem:[%s12858_s5 + $0x618] sm:$0xff]  ;;  %v6185_v45 = vpack.c.bf16 %v1311_v37, %v1304_v39 }
 0x27f   :  { %v1303_v46 = vld [vmem:[%s12858_s5 + $0x100] sm:$0xff] }
 0x280   :  { %5968 = vmatpush1.bf16.msra.mxu1 %v5967_v56  ;;  %6164 = vmatpush1.bf16.msra.mxu0 %v6163_v57  ;;  %v1417_v56 = vld [vmem:[%s12858_s5 + $0x490] sm:$0xff]  ;;  %v1424_v57 = vld [vmem:[%s12858_s5 + $0x4c8] sm:$0xff]  ;;  %v1263_v4 = vsel %vm1256_vm13, %v9216_v8, %v1249_v14  ;;  %v1367_v39 = vld [vmem:[%s12858_s5 + $0x300] sm:$0xff] }
 0x281   :  { %5970 = vmatprep.subr.bf16.mxu1 %v5969_v61  ;;  %6166 = vmatprep.subr.bf16.mxu0 %v6165_v62  ;;  %v1952_v61 = vld [vmem:[%s12858_s5 + $0x1548] sm:$0xff]  ;;  %v6381_v62 = vpack.c.bf16 %v1424_v57, %v1417_v56  ;;  %v1473_v14 = vld [vmem:[%s12858_s5 + $0x650] sm:$0xff]  ;;  %v1627_v37 = vld [vmem:[%s12858_s5 + $0xb20] sm:$0xff] }
 0x282   :  { %v6175_v8 = vpack.c.bf16 %v1952_v61, %v1945_v60  ;;  %v1317_v60 = vld [vmem:[%s12858_s5 + $0x170] sm:$0xff]  ;;  %v1324_v61 = vld [vmem:[%s12858_s5 + $0x1a8] sm:$0xff] }
 0x283   :  { %v6191_v40 = vpack.c.bf16 %v1324_v61, %v1317_v60  ;;  %v1380_v60 = vld [vmem:[%s12858_s5 + $0x368] sm:$0xff]  ;;  %v1529_v61 = vld [vmem:[%s12858_s5 + $0x810] sm:$0xff] }
 0x284   :  { %5972 = vmatpush1.bf16.msra.mxu1 %v5971_v59  ;;  %6168 = vmatpush1.bf16.msra.mxu0 %v6167_v10  ;;  %v6383_v59 = vpack.c.bf16 %v1312_v1, %v1305_v0  ;;  %v9794_v10 = vmul.f32 1.050701, %v1263_v4  ;;  %v1368_v1 = vld [vmem:[%s12858_s5 + $0x308] sm:$0xff] }
 0x285   :  { %5974 = vmatprep.subr.bf16.mxu1 %v5973_v16  ;;  %6170 = vmatprep.subr.bf16.mxu0 %v6169_v18  ;;  %v1282_v16 = vld [vmem:[%s12858_s5 + $0x58] sm:$0xff]  ;;  %v1319_v18 = vld [vmem:[%s12858_s5 + $0x180] sm:$0xff]  ;;  %v1332_v4 = vld [vmem:[%s12858_s5 + $0x1e8] sm:$0xff] }
 0x286   :  { %v6179_v7 = vpack.c.bf16 %v1282_v16, %v1275_v12  ;;  %v6387_v27 = vpack.c.bf16 %v1326_v21, %v1319_v18  ;;  %v1338_v12 = vld [vmem:[%s12858_s5 + $0x218] sm:$0xff]  ;;  %v1375_v16 = vld [vmem:[%s12858_s5 + $0x340] sm:$0xff]  ;;  %v6401_v18 = vpack.c.bf16 %v1494_v43, %v1487_v9 }
 0x287   :  { %v1346_v21 = vld [vmem:[%s12858_s5 + $0x258] sm:$0xff] }
 0x288   :  { %5976 = vmatpush1.bf16.msra.mxu1 %v5975_v30  ;;  %6172 = vmatpush1.bf16.msra.mxu0 %v6171_v17  ;;  %v6181_v30 = vpack.c.bf16 %v1297_v2, %v1290_v23  ;;  %v1289_v17 = vld [vmem:[%s12858_s5 + $0x90] sm:$0xff]  ;;  %v1662_v9 = vld [vmem:[%s12858_s5 + $0xc38] sm:$0xff] }
 0x289   :  { %5978 = vmatprep.subr.bf16.mxu1 %v5977_v36  ;;  %6374 = vmatprep.subr.bf16.mxu0 %v6373_v11  ;;  %v1333_v36 = vld [vmem:[%s12858_s5 + $0x1f0] sm:$0xff]  ;;  %v6389_v11 = vpack.c.bf16 %v1452_v26, %v1445_v24  ;;  %v6183_v42 = vpack.c.bf16 %v1296_v34, %v1289_v17  ;;  %v1620_v24 = vld [vmem:[%s12858_s5 + $0xae8] sm:$0xff] }
 0x28a   :  { %v6391_v44 = vpack.c.bf16 %v1340_v38, %v1333_v36  ;;  %v1353_v23 = vld [vmem:[%s12858_s5 + $0x290] sm:$0xff]  ;;  %v1352_v17 = vld [vmem:[%s12858_s5 + $0x288] sm:$0xff] }
 0x28b   :  { %2204 = vmatmul.mubr.f32.vlgmr.msra.gmra.mrb[10].mxu1 %v9750_v51  ;;  %2488 = vmatmul.mubr.f32.vlgmr.msra.gmra.mrb[4].mxu0 %v9750_v51  ;;  %v1613_v2 = vld [vmem:[%s12858_s5 + $0xab0] sm:$0xff]  ;;  %v1360_v38 = vld [vmem:[%s12858_s5 + $0x2c8] sm:$0xff] }
 0x28c   :  { %5980 = vmatpush1.bf16.msra.mxu1 %v5979_v48  ;;  %6376 = vmatpush3.bf16.msra.mxu0 %v6375_v19  ;;  %v1310_v48 = vld [vmem:[%s12858_s5 + $0x138] sm:$0xff]  ;;  %v1347_v19 = vld [vmem:[%s12858_s5 + $0x260] sm:$0xff]  ;;  %v6405_v34 = vpack.c.bf16 %v1620_v24, %v1613_v2  ;;  %v1501_v36 = vld [vmem:[%s12858_s5 + $0x730] sm:$0xff] }
 0x28d   :  { %2913 = vmatprep.mubr.f32.mxu0 %v8920_v15  ;;  %6378 = vmatprep.subr.bf16.mxu0 %v6377_v52  ;;  %v6393_v52 = vpack.c.bf16 %v1466_v41, %v1459_v5  ;;  %v6187_v56 = vpack.c.bf16 %v1310_v48, %v1303_v46  ;;  %v1634_v5 = vld [vmem:[%s12858_s5 + $0xb58] sm:$0xff]  ;;  %v1515_v46 = vld [vmem:[%s12858_s5 + $0x7a0] sm:$0xff]  ;;  %v6201_v48 = vpack.c.bf16 %v1367_v39, %v1360_v38  ;;  %v1676_v2 = vld [vmem:[%s12858_s5 + $0xca8] sm:$0xff] }
 0x28e   :  { %2274 = vmatprep.mubr.f32.mxu1 %v7273_v3  ;;  %6174 = vmatprep.subr.bf16.mxu1 %v6173_v28  ;;  %v1480_v28 = vld [vmem:[%s12858_s5 + $0x688] sm:$0xff]  ;;  %v1423_v38 = vld [vmem:[%s12858_s5 + $0x4c0] sm:$0xff] }
 0x28f   :  { %v6397_v0 = vpack.c.bf16 %v1480_v28, %v1473_v14  ;;  %v1648_v14 = vld [vmem:[%s12858_s5 + $0xbc8] sm:$0xff]  ;;  %v1683_v39 = vld [vmem:[%s12858_s5 + $0xce0] sm:$0xff] }
 0x290   :  { %6380 = vmatpush3.bf16.msra.mxu0 %v6379_v58  ;;  %v6189_v58 = vpack.c.bf16 %v1325_v55, %v1318_v54  ;;  %v1381_v54 = vld [vmem:[%s12858_s5 + $0x370] sm:$0xff] }
 0x291   :  { %6382 = vmatprep.subr.bf16.mxu0 %v6381_v62  ;;  %v1361_v62 = vld [vmem:[%s12858_s5 + $0x2d0] sm:$0xff] }
 0x292   :  { %v1641_v55 = vld [vmem:[%s12858_s5 + $0xb90] sm:$0xff] }
 0x293   :  { %5131 = vmatmul.mubr.msk.f32.vlgmr.msra.gmra.mrb[10].mxu1 %vm645_vm5, %v9794_v10 }
 0x294   :  { %6176 = vmatpush1.bf16.msra.mxu1 %v6175_v8  ;;  %6384 = vmatpush3.bf16.msra.mxu0 %v6383_v59  ;;  %v6399_v8 = vpack.c.bf16 %v1368_v1, %v1361_v62  ;;  %v6193_v59 = vpack.c.bf16 %v1339_v6, %v1332_v4  ;;  %v6413_v62 = vpack.c.bf16 %v1648_v14, %v1641_v55  ;;  %v1388_v1 = vld [vmem:[%s12858_s5 + $0x3a8] sm:$0xff]  ;;  %v1395_v4 = vld [vmem:[%s12858_s5 + $0x3e0] sm:$0xff] }
 0x295   :  { %2558 = vmatprep.mubr.f32.mxu1 %v7273_v3  ;;  %6178 = vmatprep.subr.bf16.mxu1 %v6177_v13  ;;  %v1331_v13 = vld [vmem:[%s12858_s5 + $0x1e0] sm:$0xff]  ;;  %v1704_v55 = vld [vmem:[%s12858_s5 + $0xd88] sm:$0xff] }
 0x296   :  { %6386 = vmatprep.subr.bf16.mxu0 %v6385_v20  ;;  %v1382_v20 = vld [vmem:[%s12858_s5 + $0x378] sm:$0xff]  ;;  %v6195_v26 = vpack.c.bf16 %v1338_v12, %v1331_v13  ;;  %v1655_v6 = vld [vmem:[%s12858_s5 + $0xc00] sm:$0xff] }
 0x297   :  { %5132 = vmatmul.mubr.msk.f32.vlgmr.msra.gmra.mrb[12].mxu1 %vm645_vm5, %v9794_v10  ;;  %v1394_v13 = vld [vmem:[%s12858_s5 + $0x3d8] sm:$0xff]  ;;  %v1543_v12 = vld [vmem:[%s12858_s5 + $0x880] sm:$0xff] }
 0x298   :  { %6180 = vmatpush1.bf16.msra.mxu1 %v6179_v7  ;;  %2629 = vmatprep.mubr.f32.mxu1 %v8920_v15  ;;  %v1354_v15 = vld [vmem:[%s12858_s5 + $0x298] sm:$0xff]  ;;  %v6403_v7 = vpack.c.bf16 %v1382_v20, %v1375_v16  ;;  %v6417_v16 = vpack.c.bf16 %v1662_v9, %v1655_v6 }
 0x299   :  { %6388 = vmatpush3.bf16.msra.mxu0 %v6387_v27  ;;  %6182 = vmatprep.subr.bf16.mxu1 %v6181_v30  ;;  %v6395_v57 = vpack.c.bf16 %v1354_v15, %v1347_v19  ;;  %v6197_v27 = vpack.c.bf16 %v1353_v23, %v1346_v21  ;;  %v1345_v30 = vld [vmem:[%s12858_s5 + $0x250] sm:$0xff]  ;;  %v6409_v19 = vpack.c.bf16 %v1634_v5, %v1627_v37  ;;  %v1374_v15 = vld [vmem:[%s12858_s5 + $0x338] sm:$0xff] }
 0x29a   :  { %6390 = vmatprep.subr.bf16.mxu0 %v6389_v11  ;;  %v1508_v11 = vld [vmem:[%s12858_s5 + $0x768] sm:$0xff]  ;;  %v6199_v41 = vpack.c.bf16 %v1352_v17, %v1345_v30  ;;  %v1402_v20 = vld [vmem:[%s12858_s5 + $0x418] sm:$0xff]  ;;  %v1409_v21 = vld [vmem:[%s12858_s5 + $0x450] sm:$0xff] }
 0x29b   :  { %v1669_v23 = vld [vmem:[%s12858_s5 + $0xc70] sm:$0xff]  ;;  %v1408_v30 = vld [vmem:[%s12858_s5 + $0x448] sm:$0xff]  ;;  %v1690_v37 = vld [vmem:[%s12858_s5 + $0xd18] sm:$0xff] }
 0x29c   :  { %6184 = vmatpush1.bf16.msra.mxu1 %v6183_v42  ;;  %v6407_v42 = vpack.c.bf16 %v1508_v11, %v1501_v36  ;;  %v1557_v17 = vld [vmem:[%s12858_s5 + $0x8f0] sm:$0xff]  ;;  %v1564_v36 = vld [vmem:[%s12858_s5 + $0x928] sm:$0xff]  ;;  %v1718_v6 = vld [vmem:[%s12858_s5 + $0xdf8] sm:$0xff] }
 0x29d   :  { %6392 = vmatpush3.bf16.msra.mxu0 %v6391_v44  ;;  %6186 = vmatprep.subr.bf16.mxu1 %v6185_v45  ;;  %v1359_v44 = vld [vmem:[%s12858_s5 + $0x2c0] sm:$0xff]  ;;  %v1366_v45 = vld [vmem:[%s12858_s5 + $0x2f8] sm:$0xff]  ;;  %v1416_v11 = vld [vmem:[%s12858_s5 + $0x488] sm:$0xff] }
 0x29e   :  { %6394 = vmatprep.subr.bf16.mxu0 %v6393_v52  ;;  %v1522_v52 = vld [vmem:[%s12858_s5 + $0x7d8] sm:$0xff]  ;;  %v6203_v28 = vpack.c.bf16 %v1366_v45, %v1359_v44  ;;  %v1415_v44 = vld [vmem:[%s12858_s5 + $0x480] sm:$0xff] }
 0x29f   :  { %v1422_v45 = vld [vmem:[%s12858_s5 + $0x4b8] sm:$0xff] }
 0x2a0   :  { %6188 = vmatpush1.bf16.msra.mxu1 %v6187_v56  ;;  %v6411_v56 = vpack.c.bf16 %v1522_v52, %v1515_v46  ;;  %v1571_v46 = vld [vmem:[%s12858_s5 + $0x960] sm:$0xff]  ;;  %v1430_v52 = vld [vmem:[%s12858_s5 + $0x4f8] sm:$0xff]  ;;  %v6219_v14 = vpack.c.bf16 %v1422_v45, %v1415_v44 }
 0x2a1   :  { %6396 = vmatpush3.bf16.msra.mxu0 %v6395_v57  ;;  %6190 = vmatprep.subr.bf16.mxu1 %v6189_v58  ;;  %v6205_v57 = vpack.c.bf16 %v1381_v54, %v1374_v15  ;;  %v1373_v58 = vld [vmem:[%s12858_s5 + $0x330] sm:$0xff]  ;;  %v1739_v44 = vld [vmem:[%s12858_s5 + $0xea0] sm:$0xff] }
 0x2a2   :  { %6398 = vmatprep.subr.bf16.mxu0 %v6397_v0  ;;  %v1536_v0 = vld [vmem:[%s12858_s5 + $0x848] sm:$0xff]  ;;  %v6207_v43 = vpack.c.bf16 %v1380_v60, %v1373_v58  ;;  %v1437_v15 = vld [vmem:[%s12858_s5 + $0x530] sm:$0xff] }
 0x2a3   :  { %v1697_v54 = vld [vmem:[%s12858_s5 + $0xd50] sm:$0xff]  ;;  %v1436_v58 = vld [vmem:[%s12858_s5 + $0x528] sm:$0xff] }
 0x2a4   :  { %6192 = vmatpush1.bf16.msra.mxu1 %v6191_v40  ;;  %v6415_v40 = vpack.c.bf16 %v1536_v0, %v1529_v61  ;;  %v1585_v60 = vld [vmem:[%s12858_s5 + $0x9d0] sm:$0xff]  ;;  %v6429_v61 = vpack.c.bf16 %v1704_v55, %v1697_v54  ;;  %v1444_v0 = vld [vmem:[%s12858_s5 + $0x568] sm:$0xff] }
 0x2a5   :  { %6400 = vmatpush3.bf16.msra.mxu0 %v6399_v8  ;;  %6194 = vmatprep.subr.bf16.mxu1 %v6193_v59  ;;  %v6209_v8 = vpack.c.bf16 %v1395_v4, %v1388_v1  ;;  %v1387_v59 = vld [vmem:[%s12858_s5 + $0x3a0] sm:$0xff]  ;;  %v1872_v54 = vld [vmem:[%s12858_s5 + $0x12c8] sm:$0xff] }
 0x2a6   :  { %6402 = vmatprep.subr.bf16.mxu0 %v6401_v18  ;;  %v1550_v18 = vld [vmem:[%s12858_s5 + $0x8b8] sm:$0xff]  ;;  %v6211_v24 = vpack.c.bf16 %v1394_v13, %v1387_v59  ;;  %v1451_v1 = vld [vmem:[%s12858_s5 + $0x5a0] sm:$0xff] }
 0x2a7   :  { %v1711_v4 = vld [vmem:[%s12858_s5 + $0xdc0] sm:$0xff]  ;;  %v1450_v59 = vld [vmem:[%s12858_s5 + $0x598] sm:$0xff] }
 0x2a8   :  { %6196 = vmatpush1.bf16.msra.mxu1 %v6195_v26  ;;  %v6419_v26 = vpack.c.bf16 %v1550_v18, %v1543_v12  ;;  %v1599_v13 = vld [vmem:[%s12858_s5 + $0xa40] sm:$0xff]  ;;  %v6433_v12 = vpack.c.bf16 %v1718_v6, %v1711_v4  ;;  %v1458_v18 = vld [vmem:[%s12858_s5 + $0x5d8] sm:$0xff] }
 0x2a9   :  { %6404 = vmatpush3.bf16.msra.mxu0 %v6403_v7  ;;  %6198 = vmatprep.subr.bf16.mxu1 %v6197_v27  ;;  %v6213_v7 = vpack.c.bf16 %v1409_v21, %v1402_v20  ;;  %v1401_v27 = vld [vmem:[%s12858_s5 + $0x410] sm:$0xff]  ;;  %v1886_v4 = vld [vmem:[%s12858_s5 + $0x1338] sm:$0xff] }
 0x2aa   :  { %6406 = vmatprep.subr.bf16.mxu0 %v6405_v34  ;;  %v6421_v34 = vpack.c.bf16 %v1676_v2, %v1669_v23  ;;  %v6215_v5 = vpack.c.bf16 %v1408_v30, %v1401_v27  ;;  %v1465_v20 = vld [vmem:[%s12858_s5 + $0x610] sm:$0xff]  ;;  %v1844_v23 = vld [vmem:[%s12858_s5 + $0x11e8] sm:$0xff] }
 0x2ab   :  { %v1837_v21 = vld [vmem:[%s12858_s5 + $0x11b0] sm:$0xff]  ;;  %v1464_v27 = vld [vmem:[%s12858_s5 + $0x608] sm:$0xff] }
 0x2ac   :  { %6200 = vmatpush1.bf16.msra.mxu1 %v6199_v41  ;;  %2914 = vmatmul.mubr.f32.vlgmr.msra.gmra.mrb[6].mxu0 %v8928_v22  ;;  %v6423_v41 = vpack.c.bf16 %v1564_v36, %v1557_v17  ;;  %v6437_v30 = vpack.c.bf16 %v1844_v23, %v1837_v21  ;;  %v1725_v17 = vld [vmem:[%s12858_s5 + $0xe30] sm:$0xff]  ;;  %v1472_v36 = vld [vmem:[%s12858_s5 + $0x648] sm:$0xff] }
 0x2ad   :  { %6408 = vmatpush3.bf16.msra.mxu0 %v6407_v42  ;;  %2983 = vmatprep.mubr.f32.mxu0 %v8950_v33  ;;  %v6217_v42 = vpack.c.bf16 %v1423_v38, %v1416_v11  ;;  %v1479_v11 = vld [vmem:[%s12858_s5 + $0x680] sm:$0xff]  ;;  %v1900_v21 = vld [vmem:[%s12858_s5 + $0x13a8] sm:$0xff] }
 0x2ae   :  { %6202 = vmatprep.subr.bf16.mxu1 %v6201_v48  ;;  %6410 = vmatprep.subr.bf16.mxu0 %v6409_v19  ;;  %v6425_v48 = vpack.c.bf16 %v1690_v37, %v1683_v39  ;;  %v1578_v19 = vld [vmem:[%s12858_s5 + $0x998] sm:$0xff]  ;;  %v1851_v38 = vld [vmem:[%s12858_s5 + $0x1220] sm:$0xff]  ;;  %v6233_v45 = vpack.c.bf16 %v1479_v11, %v1472_v36 }
 0x2af   :  { %v1858_v39 = vld [vmem:[%s12858_s5 + $0x1258] sm:$0xff]  ;;  %v1535_v36 = vld [vmem:[%s12858_s5 + $0x840] sm:$0xff] }
 0x2b0   :  { %6204 = vmatpush1.bf16.msra.mxu1 %v6203_v28  ;;  %v6427_v28 = vpack.c.bf16 %v1578_v19, %v1571_v46  ;;  %v6441_v46 = vpack.c.bf16 %v1858_v39, %v1851_v38  ;;  %v1486_v19 = vld [vmem:[%s12858_s5 + $0x6b8] sm:$0xff]  ;;  %v1907_v11 = vld [vmem:[%s12858_s5 + $0x13e0] sm:$0xff] }
 0x2b1   :  { %6412 = vmatpush3.bf16.msra.mxu0 %v6411_v56  ;;  %6206 = vmatprep.subr.bf16.mxu1 %v6205_v57  ;;  %v6221_v56 = vpack.c.bf16 %v1437_v15, %v1430_v52  ;;  %v1429_v57 = vld [vmem:[%s12858_s5 + $0x4f0] sm:$0xff]  ;;  %v1914_v38 = vld [vmem:[%s12858_s5 + $0x1418] sm:$0xff] }
 0x2b2   :  { %6414 = vmatprep.subr.bf16.mxu0 %v6413_v62  ;;  %v1592_v62 = vld [vmem:[%s12858_s5 + $0xa08] sm:$0xff]  ;;  %v6223_v9 = vpack.c.bf16 %v1436_v58, %v1429_v57  ;;  %v1493_v52 = vld [vmem:[%s12858_s5 + $0x6f0] sm:$0xff] }
 0x2b3   :  { %v1865_v15 = vld [vmem:[%s12858_s5 + $0x1290] sm:$0xff]  ;;  %v1492_v57 = vld [vmem:[%s12858_s5 + $0x6e8] sm:$0xff] }
 0x2b4   :  { %6208 = vmatpush1.bf16.msra.mxu1 %v6207_v43  ;;  %v6431_v43 = vpack.c.bf16 %v1592_v62, %v1585_v60  ;;  %v1753_v58 = vld [vmem:[%s12858_s5 + $0xf10] sm:$0xff]  ;;  %v6445_v60 = vpack.c.bf16 %v1872_v54, %v1865_v15  ;;  %v1500_v62 = vld [vmem:[%s12858_s5 + $0x728] sm:$0xff] }
 0x2b5   :  { %6416 = vmatpush3.bf16.msra.mxu0 %v6415_v40  ;;  %6210 = vmatprep.subr.bf16.mxu1 %v6209_v8  ;;  %v6225_v40 = vpack.c.bf16 %v1451_v1, %v1444_v0  ;;  %v1443_v8 = vld [vmem:[%s12858_s5 + $0x560] sm:$0xff] }
 0x2b6   :  { %6418 = vmatprep.subr.bf16.mxu0 %v6417_v16  ;;  %v1606_v16 = vld [vmem:[%s12858_s5 + $0xa78] sm:$0xff]  ;;  %v6227_v2 = vpack.c.bf16 %v1450_v59, %v1443_v8  ;;  %v1507_v0 = vld [vmem:[%s12858_s5 + $0x760] sm:$0xff] }
 0x2b7   :  { %v1879_v1 = vld [vmem:[%s12858_s5 + $0x1300] sm:$0xff]  ;;  %v1506_v8 = vld [vmem:[%s12858_s5 + $0x758] sm:$0xff] }
 0x2b8   :  { %6212 = vmatpush1.bf16.msra.mxu1 %v6211_v24  ;;  %v6435_v24 = vpack.c.bf16 %v1606_v16, %v1599_v13  ;;  %v1767_v59 = vld [vmem:[%s12858_s5 + $0xf80] sm:$0xff]  ;;  %v6449_v13 = vpack.c.bf16 %v1886_v4, %v1879_v1  ;;  %v1514_v16 = vld [vmem:[%s12858_s5 + $0x798] sm:$0xff] }
 0x2b9   :  { %6420 = vmatpush3.bf16.msra.mxu0 %v6419_v26  ;;  %6214 = vmatprep.subr.bf16.mxu1 %v6213_v7  ;;  %v6229_v26 = vpack.c.bf16 %v1465_v20, %v1458_v18  ;;  %v1457_v7 = vld [vmem:[%s12858_s5 + $0x5d0] sm:$0xff] }
 0x2ba   :  { %6422 = vmatprep.subr.bf16.mxu0 %v6421_v34  ;;  %v1732_v34 = vld [vmem:[%s12858_s5 + $0xe68] sm:$0xff]  ;;  %v6231_v37 = vpack.c.bf16 %v1464_v27, %v1457_v7  ;;  %v1521_v18 = vld [vmem:[%s12858_s5 + $0x7d0] sm:$0xff] }
 0x2bb   :  { %v1893_v20 = vld [vmem:[%s12858_s5 + $0x1370] sm:$0xff]  ;;  %v1520_v7 = vld [vmem:[%s12858_s5 + $0x7c8] sm:$0xff] }
 0x2bc   :  { %6216 = vmatpush1.bf16.msra.mxu1 %v6215_v5  ;;  %v6439_v5 = vpack.c.bf16 %v1732_v34, %v1725_v17  ;;  %v1781_v27 = vld [vmem:[%s12858_s5 + $0xff0] sm:$0xff]  ;;  %v1788_v17 = vld [vmem:[%s12858_s5 + $0x1028] sm:$0xff] }
 0x2bd   :  { %6424 = vmatpush3.bf16.msra.mxu0 %v6423_v41  ;;  %6218 = vmatprep.subr.bf16.mxu1 %v6217_v42  ;;  %v1471_v41 = vld [vmem:[%s12858_s5 + $0x640] sm:$0xff]  ;;  %v1478_v42 = vld [vmem:[%s12858_s5 + $0x678] sm:$0xff]  ;;  %v1528_v34 = vld [vmem:[%s12858_s5 + $0x808] sm:$0xff] }
 0x2be   :  { %6426 = vmatprep.subr.bf16.mxu0 %v6425_v48  ;;  %v1746_v48 = vld [vmem:[%s12858_s5 + $0xed8] sm:$0xff]  ;;  %v6235_v55 = vpack.c.bf16 %v1478_v42, %v1471_v41  ;;  %v1795_v42 = vld [vmem:[%s12858_s5 + $0x1060] sm:$0xff] }
 0x2bf   :  { %v1534_v41 = vld [vmem:[%s12858_s5 + $0x838] sm:$0xff] }
 0x2c0   :  { %6220 = vmatpush1.bf16.msra.mxu1 %v6219_v14  ;;  %v6443_v14 = vpack.c.bf16 %v1746_v48, %v1739_v44  ;;  %v6457_v44 = vpack.c.bf16 %v1914_v38, %v1907_v11  ;;  %v1921_v48 = vld [vmem:[%s12858_s5 + $0x1450] sm:$0xff]  ;;  %v1583_v38 = vld [vmem:[%s12858_s5 + $0x9c0] sm:$0xff] }
 0x2c1   :  { %6428 = vmatpush3.bf16.msra.mxu0 %v6427_v28  ;;  %6222 = vmatprep.subr.bf16.mxu1 %v6221_v56  ;;  %v6237_v28 = vpack.c.bf16 %v1493_v52, %v1486_v19  ;;  %v1485_v56 = vld [vmem:[%s12858_s5 + $0x6b0] sm:$0xff]  ;;  %v1928_v19 = vld [vmem:[%s12858_s5 + $0x1488] sm:$0xff] }
 0x2c2   :  { %6430 = vmatprep.subr.bf16.mxu0 %v6429_v61  ;;  %v1760_v61 = vld [vmem:[%s12858_s5 + $0xf48] sm:$0xff]  ;;  %v6239_v6 = vpack.c.bf16 %v1492_v57, %v1485_v56  ;;  %v6461_v56 = vpack.c.bf16 %v1928_v19, %v1921_v48  ;;  %v1597_v19 = vld [vmem:[%s12858_s5 + $0xa30] sm:$0xff] }
 0x2c3   :  { %v1816_v57 = vld [vmem:[%s12858_s5 + $0x1108] sm:$0xff] }
 0x2c4   :  { %6224 = vmatpush1.bf16.msra.mxu1 %v6223_v9  ;;  %v6447_v9 = vpack.c.bf16 %v1760_v61, %v1753_v58  ;;  %v1556_v58 = vld [vmem:[%s12858_s5 + $0x8e8] sm:$0xff]  ;;  %v1935_v61 = vld [vmem:[%s12858_s5 + $0x14c0] sm:$0xff] }
 0x2c5   :  { %6432 = vmatpush3.bf16.msra.mxu0 %v6431_v43  ;;  %6226 = vmatprep.subr.bf16.mxu1 %v6225_v40  ;;  %v6241_v43 = vpack.c.bf16 %v1507_v0, %v1500_v62  ;;  %v1499_v40 = vld [vmem:[%s12858_s5 + $0x720] sm:$0xff]  ;;  %v1942_v62 = vld [vmem:[%s12858_s5 + $0x14f8] sm:$0xff] }
 0x2c6   :  { %6434 = vmatprep.subr.bf16.mxu0 %v6433_v12  ;;  %v1774_v12 = vld [vmem:[%s12858_s5 + $0xfb8] sm:$0xff]  ;;  %v6243_v23 = vpack.c.bf16 %v1506_v8, %v1499_v40  ;;  %v6465_v40 = vpack.c.bf16 %v1942_v62, %v1935_v61  ;;  %v1611_v62 = vld [vmem:[%s12858_s5 + $0xaa0] sm:$0xff] }
 0x2c7   :  { %v1830_v8 = vld [vmem:[%s12858_s5 + $0x1178] sm:$0xff] }
 0x2c8   :  { %6228 = vmatpush1.bf16.msra.mxu1 %v6227_v2  ;;  %v6451_v2 = vpack.c.bf16 %v1774_v12, %v1767_v59  ;;  %v1570_v59 = vld [vmem:[%s12858_s5 + $0x958] sm:$0xff]  ;;  %v3186_v12 = vld [vmem:[%s12860_s7 + $0x8] sm:$0xff] }
 0x2c9   :  { %6436 = vmatpush3.bf16.msra.mxu0 %v6435_v24  ;;  %6230 = vmatprep.subr.bf16.mxu1 %v6229_v26  ;;  %v6245_v24 = vpack.c.bf16 %v1521_v18, %v1514_v16  ;;  %v1513_v26 = vld [vmem:[%s12858_s5 + $0x790] sm:$0xff]  ;;  %v3193_v16 = vld [vmem:[%s12860_s7 + $0x40] sm:$0xff] }
 0x2ca   :  { %6438 = vmatprep.subr.bf16.mxu0 %v6437_v30  ;;  %v6453_v30 = vpack.c.bf16 %v1900_v21, %v1893_v20  ;;  %v6247_v39 = vpack.c.bf16 %v1520_v7, %v1513_v26  ;;  %v1591_v26 = vld [vmem:[%s12858_s5 + $0xa00] sm:$0xff]  ;;  %v6472_v7 = vpack.c.bf16 %v3193_v16, %v3186_v12  ;;  %v1625_v16 = vld [vmem:[%s12858_s5 + $0xb10] sm:$0xff] }
 0x2cc   :  { %6232 = vmatpush1.bf16.msra.mxu1 %v6231_v37  ;;  %2984 = vmatmul.mubr.f32.vlgmr.msra.gmra.mrb[8].mxu0 %v9340_v25  ;;  %v6455_v37 = vpack.c.bf16 %v1788_v17, %v1781_v27  ;;  %v3185_v27 = vld [vmem:[%s12860_s7] sm:$0xff]  ;;  %v3200_v17 = vld [vmem:[%s12860_s7 + $0x78] sm:$0xff] }
 0x2cd   :  { %6440 = vmatpush3.bf16.msra.mxu0 %v6439_v5  ;;  %3053 = vmatprep.mubr.f32.mxu0 %v9575_v53  ;;  %v6249_v5 = vpack.c.bf16 %v1535_v36, %v1528_v34  ;;  %v3207_v34 = vld [vmem:[%s12860_s7 + $0xb0] sm:$0xff] }
 0x2ce   :  { %6234 = vmatprep.subr.bf16.mxu1 %v6233_v45  ;;  %6442 = vmatprep.subr.bf16.mxu0 %v6441_v46  ;;  %v1542_v45 = vld [vmem:[%s12858_s5 + $0x878] sm:$0xff]  ;;  %v1549_v46 = vld [vmem:[%s12858_s5 + $0x8b0] sm:$0xff] }
 0x2cf   :  { %v6253_v54 = vpack.c.bf16 %v1549_v46, %v1542_v45  ;;  %v3221_v45 = vld [vmem:[%s12860_s7 + $0x120] sm:$0xff] }
 0x2d0   :  { %6236 = vmatpush1.bf16.msra.mxu1 %v6235_v55  ;;  %v1541_v55 = vld [vmem:[%s12858_s5 + $0x870] sm:$0xff] }
 0x2d1   :  { %6444 = vmatpush3.bf16.msra.mxu0 %v6443_v14  ;;  %6238 = vmatprep.subr.bf16.mxu1 %v6237_v28  ;;  %v1548_v14 = vld [vmem:[%s12858_s5 + $0x8a8] sm:$0xff]  ;;  %v1809_v28 = vld [vmem:[%s12858_s5 + $0x10d0] sm:$0xff] }
 0x2d2   :  { %6446 = vmatprep.subr.bf16.mxu0 %v6445_v60  ;;  %v1563_v60 = vld [vmem:[%s12858_s5 + $0x920] sm:$0xff]  ;;  %v6255_v0 = vpack.c.bf16 %v1548_v14, %v1541_v55  ;;  %v6463_v1 = vpack.c.bf16 %v1816_v57, %v1809_v28  ;;  %v3228_v57 = vld [vmem:[%s12860_s7 + $0x158] sm:$0xff] }
 0x2d3   :  { %v6257_v4 = vpack.c.bf16 %v1563_v60, %v1556_v58  ;;  %v1619_v55 = vld [vmem:[%s12858_s5 + $0xae0] sm:$0xff]  ;;  %v3235_v58 = vld [vmem:[%s12860_s7 + $0x190] sm:$0xff] }
 0x2d4   :  { %6240 = vmatpush1.bf16.msra.mxu1 %v6239_v6  ;;  %v1555_v6 = vld [vmem:[%s12858_s5 + $0x8e0] sm:$0xff] }
 0x2d5   :  { %6448 = vmatpush3.bf16.msra.mxu0 %v6447_v9  ;;  %6242 = vmatprep.subr.bf16.mxu1 %v6241_v43  ;;  %v1562_v9 = vld [vmem:[%s12858_s5 + $0x918] sm:$0xff]  ;;  %v1823_v43 = vld [vmem:[%s12858_s5 + $0x1140] sm:$0xff] }
 0x2d6   :  { %6450 = vmatprep.subr.bf16.mxu0 %v6449_v13  ;;  %v1577_v13 = vld [vmem:[%s12858_s5 + $0x990] sm:$0xff]  ;;  %v6259_v18 = vpack.c.bf16 %v1562_v9, %v1555_v6  ;;  %v6467_v20 = vpack.c.bf16 %v1830_v8, %v1823_v43  ;;  %v3213_v28 = vld [vmem:[%s12860_s7 + $0xe0] sm:$0xff]  ;;  %v6484_v9 = vpack.c.bf16 %v3235_v58, %v3228_v57  ;;  %v3242_v8 = vld [vmem:[%s12860_s7 + $0x1c8] sm:$0xff] }
 0x2d7   :  { %2630 = vmatmul.mubr.f32.vlgmr.msra.gmra.mrb[14].mxu1 %v8928_v22  ;;  %v1527_v22 = vld [vmem:[%s12858_s5 + $0x800] sm:$0xff]  ;;  %v6261_v21 = vpack.c.bf16 %v1577_v13, %v1570_v59  ;;  %v1633_v6 = vld [vmem:[%s12858_s5 + $0xb50] sm:$0xff] }
 0x2d8   :  { %6244 = vmatpush1.bf16.msra.mxu1 %v6243_v23  ;;  %2700 = vmatprep.mubr.f32.mxu1 %v8950_v33  ;;  %v1802_v33 = vld [vmem:[%s12858_s5 + $0x1098] sm:$0xff]  ;;  %v6251_v52 = vpack.c.bf16 %v1534_v41, %v1527_v22  ;;  %v1569_v23 = vld [vmem:[%s12858_s5 + $0x950] sm:$0xff]  ;;  %v6476_v41 = vpack.c.bf16 %v3207_v34, %v3200_v17  ;;  %v3249_v59 = vld [vmem:[%s12860_s7 + $0x200] sm:$0xff] }
 0x2d9   :  { %6452 = vmatpush3.bf16.msra.mxu0 %v6451_v2  ;;  %6246 = vmatprep.subr.bf16.mxu1 %v6245_v24  ;;  %v6459_v15 = vpack.c.bf16 %v1802_v33, %v1795_v42  ;;  %v1576_v2 = vld [vmem:[%s12858_s5 + $0x988] sm:$0xff]  ;;  %v1605_v22 = vld [vmem:[%s12858_s5 + $0xa70] sm:$0xff]  ;;  %v1639_v34 = vld [vmem:[%s12858_s5 + $0xb80] sm:$0xff] }
 0x2da   :  { %6454 = vmatprep.subr.bf16.mxu0 %v6453_v30  ;;  %v1584_v24 = vld [vmem:[%s12858_s5 + $0x9c8] sm:$0xff]  ;;  %v3192_v30 = vld [vmem:[%s12860_s7 + $0x38] sm:$0xff]  ;;  %v6263_v36 = vpack.c.bf16 %v1576_v2, %v1569_v23  ;;  %v3199_v42 = vld [vmem:[%s12860_s7 + $0x70] sm:$0xff]  ;;  %v6488_v2 = vpack.c.bf16 %v3249_v59, %v3242_v8 }
 0x2db   :  { %v6265_v11 = vpack.c.bf16 %v1591_v26, %v1584_v24  ;;  %v3214_v33 = vld [vmem:[%s12860_s7 + $0xe8] sm:$0xff]  ;;  %v3227_v43 = vld [vmem:[%s12860_s7 + $0x150] sm:$0xff]  ;;  %v1647_v23 = vld [vmem:[%s12858_s5 + $0xbc0] sm:$0xff] }
 0x2dc   :  { %6248 = vmatpush1.bf16.msra.mxu1 %v6247_v39  ;;  %v1590_v39 = vld [vmem:[%s12858_s5 + $0x9f8] sm:$0xff]  ;;  %v6480_v14 = vpack.c.bf16 %v3221_v45, %v3214_v33  ;;  %v3241_v24 = vld [vmem:[%s12860_s7 + $0x1c0] sm:$0xff]  ;;  %v1653_v45 = vld [vmem:[%s12858_s5 + $0xbf0] sm:$0xff] }
 0x2dd   :  { %6456 = vmatpush3.bf16.msra.mxu0 %v6455_v37  ;;  %6250 = vmatprep.subr.bf16.mxu1 %v6249_v5  ;;  %v1598_v37 = vld [vmem:[%s12858_s5 + $0xa38] sm:$0xff]  ;;  %v6474_v5 = vpack.c.bf16 %v3192_v30, %v3185_v27  ;;  %v6267_v46 = vpack.c.bf16 %v1590_v39, %v1583_v38  ;;  %v3263_v27 = vld [vmem:[%s12860_s7 + $0x270] sm:$0xff]  ;;  %v1667_v58 = vld [vmem:[%s12858_s5 + $0xc60] sm:$0xff] }
 0x2de   :  { %6458 = vmatprep.subr.bf16.mxu0 %v6457_v44  ;;  %v3206_v44 = vld [vmem:[%s12860_s7 + $0xa8] sm:$0xff]  ;;  %v6269_v48 = vpack.c.bf16 %v1605_v22, %v1598_v37  ;;  %v3248_v26 = vld [vmem:[%s12860_s7 + $0x1f8] sm:$0xff]  ;;  %v1661_v39 = vld [vmem:[%s12858_s5 + $0xc30] sm:$0xff] }
 0x2df   :  { %v6490_v38 = vpack.c.bf16 %v3248_v26, %v3241_v24  ;;  %v3262_v22 = vld [vmem:[%s12860_s7 + $0x268] sm:$0xff]  ;;  %v1681_v59 = vld [vmem:[%s12858_s5 + $0xcd0] sm:$0xff] }
 0x2e0   :  { %6252 = vmatpush1.bf16.msra.mxu1 %v6251_v52  ;;  %v1604_v52 = vld [vmem:[%s12858_s5 + $0xa68] sm:$0xff]  ;;  %v3319_v24 = vld [vmem:[%s12860_s7 + $0x430] sm:$0xff] }
 0x2e1   :  { %6460 = vmatpush3.bf16.msra.mxu0 %v6459_v15  ;;  %6254 = vmatprep.subr.bf16.mxu1 %v6253_v54  ;;  %v1612_v15 = vld [vmem:[%s12858_s5 + $0xaa8] sm:$0xff]  ;;  %v6478_v54 = vpack.c.bf16 %v3206_v44, %v3199_v42  ;;  %v6271_v60 = vpack.c.bf16 %v1604_v52, %v1597_v19  ;;  %v3277_v42 = vld [vmem:[%s12860_s7 + $0x2e0] sm:$0xff] }
 0x2e2   :  { %6462 = vmatprep.subr.bf16.mxu0 %v6461_v56  ;;  %v3220_v56 = vld [vmem:[%s12860_s7 + $0x118] sm:$0xff]  ;;  %v6273_v61 = vpack.c.bf16 %v1619_v55, %v1612_v15  ;;  %v1675_v52 = vld [vmem:[%s12858_s5 + $0xca0] sm:$0xff] }
 0x2e3   :  { %v3276_v55 = vld [vmem:[%s12860_s7 + $0x2d8] sm:$0xff] }
 0x2e4   :  { %6256 = vmatpush1.bf16.msra.mxu1 %v6255_v0  ;;  %v1618_v0 = vld [vmem:[%s12858_s5 + $0xad8] sm:$0xff] }
 0x2e5   :  { %6464 = vmatpush3.bf16.msra.mxu0 %v6463_v1  ;;  %6258 = vmatprep.subr.bf16.mxu1 %v6257_v4  ;;  %v1626_v1 = vld [vmem:[%s12858_s5 + $0xb18] sm:$0xff]  ;;  %v6482_v4 = vpack.c.bf16 %v3220_v56, %v3213_v28  ;;  %v6275_v13 = vpack.c.bf16 %v1618_v0, %v1611_v62  ;;  %v3291_v28 = vld [vmem:[%s12860_s7 + $0x350] sm:$0xff] }
 0x2e6   :  { %6466 = vmatprep.subr.bf16.mxu0 %v6465_v40  ;;  %v3234_v40 = vld [vmem:[%s12860_s7 + $0x188] sm:$0xff]  ;;  %v6277_v12 = vpack.c.bf16 %v1633_v6, %v1626_v1  ;;  %v1689_v0 = vld [vmem:[%s12858_s5 + $0xd10] sm:$0xff] }
 0x2e7   :  { %v3290_v6 = vld [vmem:[%s12860_s7 + $0x348] sm:$0xff] }
 0x2e8   :  { %6260 = vmatpush1.bf16.msra.mxu1 %v6259_v18  ;;  %v1632_v18 = vld [vmem:[%s12858_s5 + $0xb48] sm:$0xff] }
 0x2e9   :  { %6468 = vmatpush3.bf16.msra.mxu0 %v6467_v20  ;;  %6262 = vmatprep.subr.bf16.mxu1 %v6261_v21  ;;  %v1640_v20 = vld [vmem:[%s12858_s5 + $0xb88] sm:$0xff]  ;;  %v6486_v21 = vpack.c.bf16 %v3234_v40, %v3227_v43  ;;  %v6279_v30 = vpack.c.bf16 %v1632_v18, %v1625_v16  ;;  %v3305_v43 = vld [vmem:[%s12860_s7 + $0x3c0] sm:$0xff] }
 0x2ea   :  { %6473 = vmatprep.subr.bf16.mxu0 %v6472_v7  ;;  %v3256_v7 = vld [vmem:[%s12860_s7 + $0x238] sm:$0xff]  ;;  %v6281_v17 = vpack.c.bf16 %v1647_v23, %v1640_v20  ;;  %v1703_v18 = vld [vmem:[%s12858_s5 + $0xd80] sm:$0xff] }
 0x2eb   :  { %v6492_v37 = vpack.c.bf16 %v3263_v27, %v3256_v7  ;;  %v3304_v23 = vld [vmem:[%s12860_s7 + $0x3b8] sm:$0xff]  ;;  %v1695_v27 = vld [vmem:[%s12858_s5 + $0xd40] sm:$0xff] }
 0x2ec   :  { %6264 = vmatpush1.bf16.msra.mxu1 %v6263_v36  ;;  %3054 = vmatmul.mubr.f32.vlgmr.msra.gmra.mrb[10].mxu0 %v9750_v51  ;;  %v1646_v36 = vld [vmem:[%s12858_s5 + $0xbb8] sm:$0xff] }
 0x2ed   :  { %6266 = vmatprep.subr.bf16.mxu1 %v6265_v11  ;;  %6475 = vmatpush1.bf16.msra.mxu0 %v6474_v5  ;;  %v1654_v11 = vld [vmem:[%s12858_s5 + $0xbf8] sm:$0xff]  ;;  %v3255_v5 = vld [vmem:[%s12860_s7 + $0x230] sm:$0xff]  ;;  %v6283_v44 = vpack.c.bf16 %v1646_v36, %v1639_v34 }
 0x2ee   :  { %6477 = vmatprep.subr.bf16.mxu0 %v6476_v41  ;;  %v3270_v41 = vld [vmem:[%s12860_s7 + $0x2a8] sm:$0xff]  ;;  %v6285_v33 = vpack.c.bf16 %v1661_v39, %v1654_v11  ;;  %v6494_v19 = vpack.c.bf16 %v3262_v22, %v3255_v5  ;;  %v1717_v36 = vld [vmem:[%s12858_s5 + $0xdf0] sm:$0xff]  ;;  %v3333_v5 = vld [vmem:[%s12860_s7 + $0x4a0] sm:$0xff] }
 0x2ef   :  { %v6496_v15 = vpack.c.bf16 %v3277_v42, %v3270_v41  ;;  %v3318_v39 = vld [vmem:[%s12860_s7 + $0x428] sm:$0xff]  ;;  %v1709_v42 = vld [vmem:[%s12858_s5 + $0xdb0] sm:$0xff] }
 0x2f0   :  { %6268 = vmatpush1.bf16.msra.mxu1 %v6267_v46  ;;  %v1660_v46 = vld [vmem:[%s12858_s5 + $0xc28] sm:$0xff] }
 0x2f1   :  { %6270 = vmatprep.subr.bf16.mxu1 %v6269_v48  ;;  %6479 = vmatpush1.bf16.msra.mxu0 %v6478_v54  ;;  %v1668_v48 = vld [vmem:[%s12858_s5 + $0xc68] sm:$0xff]  ;;  %v3269_v54 = vld [vmem:[%s12860_s7 + $0x2a0] sm:$0xff]  ;;  %v6287_v56 = vpack.c.bf16 %v1660_v46, %v1653_v45 }
 0x2f2   :  { %6481 = vmatprep.subr.bf16.mxu0 %v6480_v14  ;;  %v3284_v14 = vld [vmem:[%s12860_s7 + $0x318] sm:$0xff]  ;;  %v6289_v57 = vpack.c.bf16 %v1675_v52, %v1668_v48  ;;  %v6498_v62 = vpack.c.bf16 %v3276_v55, %v3269_v54  ;;  %v1731_v46 = vld [vmem:[%s12858_s5 + $0xe60] sm:$0xff]  ;;  %v3347_v54 = vld [vmem:[%s12860_s7 + $0x510] sm:$0xff] }
 0x2f3   :  { %v6500_v1 = vpack.c.bf16 %v3291_v28, %v3284_v14  ;;  %v3332_v52 = vld [vmem:[%s12860_s7 + $0x498] sm:$0xff]  ;;  %v1723_v28 = vld [vmem:[%s12858_s5 + $0xe20] sm:$0xff] }
 0x2f4   :  { %6272 = vmatpush1.bf16.msra.mxu1 %v6271_v60  ;;  %v1674_v60 = vld [vmem:[%s12858_s5 + $0xc98] sm:$0xff] }
 0x2f5   :  { %6274 = vmatprep.subr.bf16.mxu1 %v6273_v61  ;;  %6483 = vmatpush1.bf16.msra.mxu0 %v6482_v4  ;;  %v1682_v61 = vld [vmem:[%s12858_s5 + $0xcd8] sm:$0xff]  ;;  %v3283_v4 = vld [vmem:[%s12860_s7 + $0x310] sm:$0xff]  ;;  %v6291_v40 = vpack.c.bf16 %v1674_v60, %v1667_v58 }
 0x2f6   :  { %6485 = vmatprep.subr.bf16.mxu0 %v6484_v9  ;;  %v3298_v9 = vld [vmem:[%s12860_s7 + $0x388] sm:$0xff]  ;;  %v6293_v8 = vpack.c.bf16 %v1689_v0, %v1682_v61  ;;  %v6502_v16 = vpack.c.bf16 %v3290_v6, %v3283_v4  ;;  %v1745_v60 = vld [vmem:[%s12858_s5 + $0xed0] sm:$0xff]  ;;  %v3361_v4 = vld [vmem:[%s12860_s7 + $0x580] sm:$0xff] }
 0x2f7   :  { %v6504_v20 = vpack.c.bf16 %v3305_v43, %v3298_v9  ;;  %v3346_v0 = vld [vmem:[%s12860_s7 + $0x508] sm:$0xff]  ;;  %v1737_v43 = vld [vmem:[%s12858_s5 + $0xe90] sm:$0xff] }
 0x2f8   :  { %6276 = vmatpush1.bf16.msra.mxu1 %v6275_v13  ;;  %v1688_v13 = vld [vmem:[%s12858_s5 + $0xd08] sm:$0xff] }
 0x2f9   :  { %6278 = vmatprep.subr.bf16.mxu1 %v6277_v12  ;;  %6487 = vmatpush1.bf16.msra.mxu0 %v6486_v21  ;;  %v1696_v12 = vld [vmem:[%s12858_s5 + $0xd48] sm:$0xff]  ;;  %v3297_v21 = vld [vmem:[%s12860_s7 + $0x380] sm:$0xff]  ;;  %v6295_v26 = vpack.c.bf16 %v1688_v13, %v1681_v59 }
 0x2fa   :  { %6489 = vmatprep.subr.bf16.mxu0 %v6488_v2  ;;  %v3312_v2 = vld [vmem:[%s12860_s7 + $0x3f8] sm:$0xff]  ;;  %v6297_v7 = vpack.c.bf16 %v1703_v18, %v1696_v12  ;;  %v6506_v34 = vpack.c.bf16 %v3304_v23, %v3297_v21  ;;  %v1759_v13 = vld [vmem:[%s12858_s5 + $0xf40] sm:$0xff]  ;;  %v3375_v21 = vld [vmem:[%s12860_s7 + $0x5f0] sm:$0xff] }
 0x2fb   :  { %v6508_v11 = vpack.c.bf16 %v3319_v24, %v3312_v2  ;;  %v3360_v18 = vld [vmem:[%s12860_s7 + $0x578] sm:$0xff]  ;;  %v1751_v24 = vld [vmem:[%s12858_s5 + $0xf00] sm:$0xff] }
 0x2fc   :  { %6280 = vmatpush1.bf16.msra.mxu1 %v6279_v30  ;;  %v1702_v30 = vld [vmem:[%s12858_s5 + $0xd78] sm:$0xff] }
 0x2fd   :  { %6282 = vmatprep.subr.bf16.mxu1 %v6281_v17  ;;  %6491 = vmatpush1.bf16.msra.mxu0 %v6490_v38  ;;  %v1710_v17 = vld [vmem:[%s12858_s5 + $0xdb8] sm:$0xff]  ;;  %v3311_v38 = vld [vmem:[%s12860_s7 + $0x3f0] sm:$0xff]  ;;  %v6299_v22 = vpack.c.bf16 %v1702_v30, %v1695_v27 }
 0x2fe   :  { %6493 = vmatprep.subr.bf16.mxu0 %v6492_v37  ;;  %v3326_v37 = vld [vmem:[%s12860_s7 + $0x468] sm:$0xff]  ;;  %v6301_v41 = vpack.c.bf16 %v1717_v36, %v1710_v17  ;;  %v6510_v45 = vpack.c.bf16 %v3318_v39, %v3311_v38  ;;  %v3367_v30 = vld [vmem:[%s12860_s7 + $0x5b0] sm:$0xff]  ;;  %v3389_v36 = vld [vmem:[%s12860_s7 + $0x660] sm:$0xff] }
 0x2ff   :  { %v6512_v48 = vpack.c.bf16 %v3333_v5, %v3326_v37  ;;  %v3374_v17 = vld [vmem:[%s12860_s7 + $0x5e8] sm:$0xff]  ;;  %v1765_v39 = vld [vmem:[%s12858_s5 + $0xf70] sm:$0xff] }
 0x300   :  { %6284 = vmatpush1.bf16.msra.mxu1 %v6283_v44  ;;  %v1716_v44 = vld [vmem:[%s12858_s5 + $0xde8] sm:$0xff] }
 0x301   :  { %6286 = vmatprep.subr.bf16.mxu1 %v6285_v33  ;;  %6495 = vmatpush1.bf16.msra.mxu0 %v6494_v19  ;;  %v1724_v33 = vld [vmem:[%s12858_s5 + $0xe28] sm:$0xff]  ;;  %v3325_v19 = vld [vmem:[%s12860_s7 + $0x460] sm:$0xff]  ;;  %v6303_v55 = vpack.c.bf16 %v1716_v44, %v1709_v42 }
 0x302   :  { %6497 = vmatprep.subr.bf16.mxu0 %v6496_v15  ;;  %v3340_v15 = vld [vmem:[%s12860_s7 + $0x4d8] sm:$0xff]  ;;  %v6305_v14 = vpack.c.bf16 %v1731_v46, %v1724_v33  ;;  %v6514_v58 = vpack.c.bf16 %v3332_v52, %v3325_v19  ;;  %v1772_v37 = vld [vmem:[%s12858_s5 + $0xfa8] sm:$0xff]  ;;  %v3381_v44 = vld [vmem:[%s12860_s7 + $0x620] sm:$0xff] }
 0x303   :  { %v6516_v61 = vpack.c.bf16 %v3347_v54, %v3340_v15  ;;  %v1780_v5 = vld [vmem:[%s12858_s5 + $0xfe8] sm:$0xff]  ;;  %v3388_v33 = vld [vmem:[%s12860_s7 + $0x658] sm:$0xff]  ;;  %v3403_v46 = vld [vmem:[%s12860_s7 + $0x6d0] sm:$0xff] }
 0x304   :  { %6288 = vmatpush1.bf16.msra.mxu1 %v6287_v56  ;;  %v1730_v56 = vld [vmem:[%s12858_s5 + $0xe58] sm:$0xff]  ;;  %v1779_v52 = vld [vmem:[%s12858_s5 + $0xfe0] sm:$0xff] }
 0x305   :  { %6290 = vmatprep.subr.bf16.mxu1 %v6289_v57  ;;  %6499 = vmatpush1.bf16.msra.mxu0 %v6498_v62  ;;  %v1738_v57 = vld [vmem:[%s12858_s5 + $0xe98] sm:$0xff]  ;;  %v3339_v62 = vld [vmem:[%s12860_s7 + $0x4d0] sm:$0xff]  ;;  %v6307_v6 = vpack.c.bf16 %v1730_v56, %v1723_v28 }
 0x306   :  { %6501 = vmatprep.subr.bf16.mxu0 %v6500_v1  ;;  %v3354_v1 = vld [vmem:[%s12860_s7 + $0x548] sm:$0xff]  ;;  %v6309_v9 = vpack.c.bf16 %v1745_v60, %v1738_v57  ;;  %v6518_v59 = vpack.c.bf16 %v3346_v0, %v3339_v62  ;;  %v1786_v15 = vld [vmem:[%s12858_s5 + $0x1018] sm:$0xff]  ;;  %v3395_v56 = vld [vmem:[%s12860_s7 + $0x690] sm:$0xff] }
 0x307   :  { %v6520_v12 = vpack.c.bf16 %v3361_v4, %v3354_v1  ;;  %v1794_v54 = vld [vmem:[%s12858_s5 + $0x1058] sm:$0xff]  ;;  %v3402_v57 = vld [vmem:[%s12860_s7 + $0x6c8] sm:$0xff]  ;;  %v3417_v60 = vld [vmem:[%s12860_s7 + $0x740] sm:$0xff] }
 0x308   :  { %6292 = vmatpush1.bf16.msra.mxu1 %v6291_v40  ;;  %v1744_v40 = vld [vmem:[%s12858_s5 + $0xec8] sm:$0xff]  ;;  %v1793_v0 = vld [vmem:[%s12858_s5 + $0x1050] sm:$0xff]  ;;  %v6534_v4 = vpack.c.bf16 %v3402_v57, %v3395_v56 }
 0x309   :  { %6294 = vmatprep.subr.bf16.mxu1 %v6293_v8  ;;  %6503 = vmatpush1.bf16.msra.mxu0 %v6502_v16  ;;  %v1752_v8 = vld [vmem:[%s12858_s5 + $0xf08] sm:$0xff]  ;;  %v3353_v16 = vld [vmem:[%s12860_s7 + $0x540] sm:$0xff]  ;;  %v6311_v23 = vpack.c.bf16 %v1744_v40, %v1737_v43  ;;  %v1913_v56 = vld [vmem:[%s12858_s5 + $0x1410] sm:$0xff] }
 0x30a   :  { %6505 = vmatprep.subr.bf16.mxu0 %v6504_v20  ;;  %v3368_v20 = vld [vmem:[%s12860_s7 + $0x5b8] sm:$0xff]  ;;  %v6313_v2 = vpack.c.bf16 %v1759_v13, %v1752_v8  ;;  %v1800_v1 = vld [vmem:[%s12858_s5 + $0x1088] sm:$0xff] }
 0x30b   :  { %v6524_v27 = vpack.c.bf16 %v3375_v21, %v3368_v20  ;;  %v6327_v40 = vpack.c.bf16 %v1800_v1, %v1793_v0  ;;  %v1814_v13 = vld [vmem:[%s12858_s5 + $0x10f8] sm:$0xff]  ;;  %v1821_v21 = vld [vmem:[%s12858_s5 + $0x1130] sm:$0xff]  ;;  %v1927_v0 = vld [vmem:[%s12858_s5 + $0x1480] sm:$0xff] }
 0x30c   :  { %6296 = vmatpush1.bf16.msra.mxu1 %v6295_v26  ;;  %v1766_v26 = vld [vmem:[%s12858_s5 + $0xf78] sm:$0xff] }
 0x30d   :  { %6298 = vmatprep.subr.bf16.mxu1 %v6297_v7  ;;  %6507 = vmatpush1.bf16.msra.mxu0 %v6506_v34  ;;  %v6522_v7 = vpack.c.bf16 %v3360_v18, %v3353_v16  ;;  %v3382_v34 = vld [vmem:[%s12860_s7 + $0x628] sm:$0xff]  ;;  %v1829_v16 = vld [vmem:[%s12858_s5 + $0x1170] sm:$0xff] }
 0x30e   :  { %6509 = vmatprep.subr.bf16.mxu0 %v6508_v11  ;;  %v6528_v42 = vpack.c.bf16 %v3389_v36, %v3382_v34  ;;  %v1849_v36 = vld [vmem:[%s12858_s5 + $0x1210] sm:$0xff] }
 0x310   :  { %6300 = vmatpush1.bf16.msra.mxu1 %v6299_v22  ;;  %v6526_v22 = vpack.c.bf16 %v3374_v17, %v3367_v30  ;;  %v1857_v30 = vld [vmem:[%s12858_s5 + $0x1250] sm:$0xff] }
 0x311   :  { %6302 = vmatprep.subr.bf16.mxu1 %v6301_v41  ;;  %6511 = vmatpush1.bf16.msra.mxu0 %v6510_v45  ;;  %v1787_v41 = vld [vmem:[%s12858_s5 + $0x1020] sm:$0xff]  ;;  %v3396_v45 = vld [vmem:[%s12860_s7 + $0x698] sm:$0xff] }
 0x312   :  { %6513 = vmatprep.subr.bf16.mxu0 %v6512_v48  ;;  %v6319_v48 = vpack.c.bf16 %v1772_v37, %v1765_v39  ;;  %v6321_v19 = vpack.c.bf16 %v1787_v41, %v1780_v5  ;;  %v6532_v28 = vpack.c.bf16 %v3403_v46, %v3396_v45  ;;  %v1871_v39 = vld [vmem:[%s12858_s5 + $0x12c0] sm:$0xff]  ;;  %v1870_v41 = vld [vmem:[%s12858_s5 + $0x12b8] sm:$0xff]  ;;  %v1877_v46 = vld [vmem:[%s12858_s5 + $0x12f0] sm:$0xff] }
 0x314   :  { %6304 = vmatpush1.bf16.msra.mxu1 %v6303_v55  ;;  %v6530_v55 = vpack.c.bf16 %v3388_v33, %v3381_v44  ;;  %v1885_v44 = vld [vmem:[%s12858_s5 + $0x1330] sm:$0xff] }
 0x315   :  { %6306 = vmatprep.subr.bf16.mxu1 %v6305_v14  ;;  %6515 = vmatpush1.bf16.msra.mxu0 %v6514_v58  ;;  %v1801_v14 = vld [vmem:[%s12858_s5 + $0x1090] sm:$0xff]  ;;  %v3410_v58 = vld [vmem:[%s12860_s7 + $0x708] sm:$0xff] }
 0x316   :  { %6517 = vmatprep.subr.bf16.mxu0 %v6516_v61  ;;  %v6323_v61 = vpack.c.bf16 %v1786_v15, %v1779_v52  ;;  %v6325_v62 = vpack.c.bf16 %v1801_v14, %v1794_v54  ;;  %v6536_v43 = vpack.c.bf16 %v3417_v60, %v3410_v58  ;;  %v1899_v52 = vld [vmem:[%s12858_s5 + $0x13a0] sm:$0xff]  ;;  %v1898_v14 = vld [vmem:[%s12858_s5 + $0x1398] sm:$0xff]  ;;  %v1905_v60 = vld [vmem:[%s12858_s5 + $0x13d0] sm:$0xff] }
 0x317   :  { %2701 = vmatmul.mubr.f32.vlgmr.msra.gmra.mrb[14].mxu1 %v9340_v25  ;;  %v1758_v25 = vld [vmem:[%s12858_s5 + $0xf38] sm:$0xff] }
 0x318   :  { %6308 = vmatpush1.bf16.msra.mxu1 %v6307_v6  ;;  %2771 = vmatprep.mubr.f32.mxu1 %v9575_v53  ;;  %v1773_v53 = vld [vmem:[%s12858_s5 + $0xfb0] sm:$0xff]  ;;  %v6315_v11 = vpack.c.bf16 %v1758_v25, %v1751_v24  ;;  %v1808_v6 = vld [vmem:[%s12858_s5 + $0x10c8] sm:$0xff]  ;;  %v1843_v24 = vld [vmem:[%s12858_s5 + $0x11e0] sm:$0xff] }
 0x319   :  { %6310 = vmatprep.subr.bf16.mxu1 %v6309_v9  ;;  %6519 = vmatpush1.bf16.msra.mxu0 %v6518_v59  ;;  %v6317_v38 = vpack.c.bf16 %v1773_v53, %v1766_v26  ;;  %v1815_v9 = vld [vmem:[%s12858_s5 + $0x1100] sm:$0xff]  ;;  %v1842_v53 = vld [vmem:[%s12858_s5 + $0x11d8] sm:$0xff] }
 0x31a   :  { %6521 = vmatprep.subr.bf16.mxu0 %v6520_v12  ;;  %v6329_v8 = vpack.c.bf16 %v1815_v9, %v1808_v6  ;;  %v1807_v59 = vld [vmem:[%s12858_s5 + $0x10c0] sm:$0xff]  ;;  %v1822_v12 = vld [vmem:[%s12858_s5 + $0x1138] sm:$0xff] }
 0x31b   :  { %v6331_v18 = vpack.c.bf16 %v1814_v13, %v1807_v59  ;;  %v6333_v20 = vpack.c.bf16 %v1829_v16, %v1822_v12  ;;  %v1919_v6 = vld [vmem:[%s12858_s5 + $0x1440] sm:$0xff]  ;;  %v1926_v9 = vld [vmem:[%s12858_s5 + $0x1478] sm:$0xff]  ;;  %v1933_v13 = vld [vmem:[%s12858_s5 + $0x14b0] sm:$0xff] }
 0x31c   :  { %6312 = vmatpush1.bf16.msra.mxu1 %v6311_v23  ;;  %v1828_v23 = vld [vmem:[%s12858_s5 + $0x1168] sm:$0xff] }
 0x31d   :  { %6314 = vmatprep.subr.bf16.mxu1 %v6313_v2  ;;  %6523 = vmatpush1.bf16.msra.mxu0 %v6522_v7  ;;  %v1836_v2 = vld [vmem:[%s12858_s5 + $0x11a8] sm:$0xff]  ;;  %v6335_v25 = vpack.c.bf16 %v1828_v23, %v1821_v21  ;;  %v1835_v7 = vld [vmem:[%s12858_s5 + $0x11a0] sm:$0xff] }
 0x31e   :  { %6525 = vmatprep.subr.bf16.mxu0 %v6524_v27  ;;  %v6337_v26 = vpack.c.bf16 %v1843_v24, %v1836_v2  ;;  %v1850_v27 = vld [vmem:[%s12858_s5 + $0x1218] sm:$0xff]  ;;  %v6339_v17 = vpack.c.bf16 %v1842_v53, %v1835_v7  ;;  %v1940_v12 = vld [vmem:[%s12858_s5 + $0x14e8] sm:$0xff]  ;;  %v1947_v23 = vld [vmem:[%s12858_s5 + $0x1520] sm:$0xff] }
 0x31f   :  { %v6341_v34 = vpack.c.bf16 %v1857_v30, %v1850_v27  ;;  %v1948_v16 = vld [vmem:[%s12858_s5 + $0x1528] sm:$0xff]  ;;  %v1954_v2 = vld [vmem:[%s12858_s5 + $0x1558] sm:$0xff]  ;;  %v3187_v30 = vld [vmem:[%s12860_s7 + $0x10] sm:$0xff] }
 0x320   :  { %6316 = vmatpush1.bf16.msra.mxu1 %v6315_v11  ;;  %v1856_v11 = vld [vmem:[%s12858_s5 + $0x1248] sm:$0xff]  ;;  %v6371_v24 = vpack.c.bf16 %v1954_v2, %v1947_v23  ;;  %v3188_v7 = vld [vmem:[%s12860_s7 + $0x18] sm:$0xff] }
 0x321   :  { %6318 = vmatprep.subr.bf16.mxu1 %v6317_v38  ;;  %6527 = vmatpush1.bf16.msra.mxu0 %v6526_v22  ;;  %v1864_v38 = vld [vmem:[%s12858_s5 + $0x1288] sm:$0xff]  ;;  %v6343_v37 = vpack.c.bf16 %v1856_v11, %v1849_v36  ;;  %v1863_v22 = vld [vmem:[%s12858_s5 + $0x1280] sm:$0xff] }
 0x322   :  { %6529 = vmatprep.subr.bf16.mxu0 %v6528_v42  ;;  %v6345_v5 = vpack.c.bf16 %v1871_v39, %v1864_v38  ;;  %v1878_v42 = vld [vmem:[%s12858_s5 + $0x12f8] sm:$0xff]  ;;  %v6347_v33 = vpack.c.bf16 %v1870_v41, %v1863_v22  ;;  %v3202_v36 = vld [vmem:[%s12860_s7 + $0x88] sm:$0xff]  ;;  %v3209_v11 = vld [vmem:[%s12860_s7 + $0xc0] sm:$0xff] }
 0x323   :  { %v6349_v45 = vpack.c.bf16 %v1885_v44, %v1878_v42  ;;  %v3208_v22 = vld [vmem:[%s12860_s7 + $0xb8] sm:$0xff]  ;;  %v10877_v41 = vld [vmem:[%s12861_s6] sm:$0x7f]  ;;  %v3223_v44 = vld [vmem:[%s12860_s7 + $0x130] sm:$0xff] }
 0x324   :  { %6320 = vmatpush1.bf16.msra.mxu1 %v6319_v48  ;;  %v1884_v48 = vld [vmem:[%s12858_s5 + $0x1328] sm:$0xff]  ;;  %v3216_v42 = vld [vmem:[%s12860_s7 + $0xf8] sm:$0xff] }
 0x325   :  { %6322 = vmatprep.subr.bf16.mxu1 %v6321_v19  ;;  %6531 = vmatpush1.bf16.msra.mxu0 %v6530_v55  ;;  %v1892_v19 = vld [vmem:[%s12858_s5 + $0x1368] sm:$0xff]  ;;  %v6351_v15 = vpack.c.bf16 %v1884_v48, %v1877_v46  ;;  %v1891_v55 = vld [vmem:[%s12858_s5 + $0x1360] sm:$0xff]  ;;  %v1966_v46 = vrot.slane %v10877_v41, %v7778_v31  ;;  %v1970_v48 = vrot.slane %v10877_v41, %v7787_v50 }
 0x326   :  { %6533 = vmatprep.subr.bf16.mxu0 %v6532_v28  ;;  %v6353_v54 = vpack.c.bf16 %v1899_v52, %v1892_v19  ;;  %v1906_v28 = vld [vmem:[%s12858_s5 + $0x13d8] sm:$0xff]  ;;  %v6355_v57 = vpack.c.bf16 %v1898_v14, %v1891_v55  ;;  %v6676_v19 = vpack.c.bf16 %v3223_v44, %v3216_v42  ;;  %v3215_v52 = vld [vmem:[%s12860_s7 + $0xf0] sm:$0xff]  ;;  %v3230_v55 = vld [vmem:[%s12860_s7 + $0x168] sm:$0xff] }
 0x327   :  { %v6357_v58 = vpack.c.bf16 %v1913_v56, %v1906_v28  ;;  %v3237_v14 = vld [vmem:[%s12860_s7 + $0x1a0] sm:$0xff]  ;;  %v3250_v23 = vld [vmem:[%s12860_s7 + $0x208] sm:$0xff] }
 0x328   :  { %6324 = vmatpush1.bf16.msra.mxu1 %v6323_v61  ;;  %v1912_v61 = vld [vmem:[%s12858_s5 + $0x1408] sm:$0xff] }
 0x329   :  { %6326 = vmatprep.subr.bf16.mxu1 %v6325_v62  ;;  %6535 = vmatpush1.bf16.msra.mxu0 %v6534_v4  ;;  %v1920_v62 = vld [vmem:[%s12858_s5 + $0x1448] sm:$0xff]  ;;  %v6359_v1 = vpack.c.bf16 %v1912_v61, %v1905_v60 }
 0x32a   :  { %6537 = vmatprep.subr.bf16.mxu0 %v6536_v43  ;;  %v6361_v4 = vpack.c.bf16 %v1927_v0, %v1920_v62  ;;  %v1934_v43 = vld [vmem:[%s12858_s5 + $0x14b8] sm:$0xff]  ;;  %v6680_v62 = vpack.c.bf16 %v3237_v14, %v3230_v55  ;;  %v3229_v0 = vld [vmem:[%s12860_s7 + $0x160] sm:$0xff]  ;;  %v3307_v55 = vld [vmem:[%s12860_s7 + $0x3d0] sm:$0xff] }
 0x32c   :  { %6328 = vmatpush1.bf16.msra.mxu1 %v6327_v40  ;;  %v1941_v40 = vld [vmem:[%s12858_s5 + $0x14f0] sm:$0xff] }
 0x32d   :  { %6330 = vmatprep.subr.bf16.mxu1 %v6329_v8  ;;  %v6363_v8 = vpack.c.bf16 %v1926_v9, %v1919_v6  ;;  %v6365_v59 = vpack.c.bf16 %v1941_v40, %v1934_v43  ;;  %v3244_v43 = vld [vmem:[%s12860_s7 + $0x1d8] sm:$0xff]  ;;  %v3251_v40 = vld [vmem:[%s12860_s7 + $0x210] sm:$0xff] }
 0x330   :  { %6332 = vmatpush1.bf16.msra.mxu1 %v6331_v18  ;;  %v1955_v18 = vld [vmem:[%s12858_s5 + $0x1560] sm:$0xff] }
 0x331   :  { %6334 = vmatprep.subr.bf16.mxu1 %v6333_v20  ;;  %v6367_v20 = vpack.c.bf16 %v1940_v12, %v1933_v13  ;;  %v6369_v21 = vpack.c.bf16 %v1955_v18, %v1948_v16 }
 0x334   :  { %6336 = vmatpush1.bf16.msra.mxu1 %v6335_v25  ;;  %v1949_v25 = vld [vmem:[%s12858_s5 + $0x1530] sm:$0xff] }
 0x335   :  { %6338 = vmatprep.subr.bf16.mxu1 %v6337_v26  ;;  %v1956_v26 = vld [vmem:[%s12858_s5 + $0x1568] sm:$0xff] }
 0x336   :  { %v6470_v53 = vpack.c.bf16 %v1956_v26, %v1949_v25  ;;  %v3265_v25 = vld [vmem:[%s12860_s7 + $0x280] sm:$0xff] }
 0x338   :  { %6340 = vmatpush1.bf16.msra.mxu1 %v6339_v17  ;;  %v3194_v17 = vld [vmem:[%s12860_s7 + $0x48] sm:$0xff] }
 0x339   :  { %6342 = vmatprep.subr.bf16.mxu1 %v6341_v34  ;;  %v6670_v39 = vpack.c.bf16 %v3194_v17, %v3187_v30  ;;  %v3272_v30 = vld [vmem:[%s12860_s7 + $0x2b8] sm:$0xff]  ;;  %v3279_v17 = vld [vmem:[%s12860_s7 + $0x2f0] sm:$0xff] }
 0x33c   :  { %6344 = vmatpush1.bf16.msra.mxu1 %v6343_v37  ;;  %v6672_v37 = vpack.c.bf16 %v3209_v11, %v3202_v36  ;;  %v6692_v36 = vpack.c.bf16 %v3279_v17, %v3272_v30  ;;  %v3271_v11 = vld [vmem:[%s12860_s7 + $0x2b0] sm:$0xff]  ;;  %v3328_v30 = vld [vmem:[%s12860_s7 + $0x478] sm:$0xff] }
 0x33d   :  { %6346 = vmatprep.subr.bf16.mxu1 %v6345_v5  ;;  %v3201_v5 = vld [vmem:[%s12860_s7 + $0x80] sm:$0xff]  ;;  %v3335_v17 = vld [vmem:[%s12860_s7 + $0x4b0] sm:$0xff] }
 0x340   :  { %6348 = vmatpush1.bf16.msra.mxu1 %v6347_v33  ;;  %v1962_v33 = vrot.slane %v10877_v41, %v7772_v29 }
 0x341   :  { %6350 = vmatprep.subr.bf16.mxu1 %v6349_v45  ;;  %v6674_v45 = vpack.c.bf16 %v3208_v22, %v3201_v5 }
 0x344   :  { %6352 = vmatpush1.bf16.msra.mxu1 %v6351_v15  ;;  %v1974_v15 = vrot.slane %v10877_v41, %v7783_v35 }
 0x345   :  { %6354 = vmatprep.subr.bf16.mxu1 %v6353_v54 }
 0x348   :  { %6356 = vmatpush1.bf16.msra.mxu1 %v6355_v57 }
 0x349   :  { %6358 = vmatprep.subr.bf16.mxu1 %v6357_v58 }
 0x34c   :  { %6360 = vmatpush1.bf16.msra.mxu1 %v6359_v1  ;;  %v3236_v1 = vld [vmem:[%s12860_s7 + $0x198] sm:$0xff] }
 0x34d   :  { %6362 = vmatprep.subr.bf16.mxu1 %v6361_v4  ;;  %v6682_v18 = vpack.c.bf16 %v3236_v1, %v3229_v0  ;;  %v3306_v1 = vld [vmem:[%s12860_s7 + $0x3c8] sm:$0xff] }
 0x350   :  { %6364 = vmatpush1.bf16.msra.mxu1 %v6363_v8 }
 0x351   :  { %6366 = vmatprep.subr.bf16.mxu1 %v6365_v59 }
 0x354   :  { %6368 = vmatpush1.bf16.msra.mxu1 %v6367_v20  ;;  %v6684_v20 = vpack.c.bf16 %v3251_v40, %v3244_v43  ;;  %v3423_v43 = vld [vmem:[%s12860_s7 + $0x770] sm:$0xff]  ;;  %v3321_v40 = vld [vmem:[%s12860_s7 + $0x440] sm:$0xff] }
 0x355   :  { %6370 = vmatprep.subr.bf16.mxu1 %v6369_v21  ;;  %v3243_v21 = vld [vmem:[%s12860_s7 + $0x1d0] sm:$0xff] }
 0x357   :  { %2772 = vmatmul.mubr.f32.vlgmr.msra.gmra.mrb[14].mxu1 %v9750_v51  ;;  %v3195_v51 = vld [vmem:[%s12860_s7 + $0x50] sm:$0xff] }
 0x358   :  { %6372 = vmatpush1.bf16.msra.mxu1 %v6371_v24  ;;  %2842 = vmatprep.mubr.f32.mxu1 %v7273_v3  ;;  %v6668_v27 = vpack.c.bf16 %v3195_v51, %v3188_v7  ;;  %v3258_v24 = vld [vmem:[%s12860_s7 + $0x248] sm:$0xff]  ;;  %v6686_v7 = vpack.c.bf16 %v3250_v23, %v3243_v21 }
 0x359   :  { %6469 = vmatprep.subr.bf16.mxu1 %v7274_v63  ;;  %v6688_v51 = vpack.c.bf16 %v3265_v25, %v3258_v24  ;;  %v3445_v24 = vld [vmem:[%s12860_s7 + $0x820] sm:$0xff] }
 0x35e   :  { %v2489_v34 = vpop.f32.mrb[4].mxu0 }
 0x35f   :  { %5133 = vmatmul.mubr.msk.f32.vlgmr.msra.gmra.mrb[14].mxu1 %vm645_vm5, %v9794_v10  ;;  %v2491_v38 = vpop.f32.mrb[5].mxu0  ;;  %v7167_v60 = vadd.f32 %v2489_v34, %v1970_v48  ;;  %v3292_v48 = vld [vmem:[%s12860_s7 + $0x358] sm:$0xff] }
 0x360   :  { %6471 = vmatpush3.bf16.msra.mxu1 %v6470_v53  ;;  %5408 = vmatprep.mubr.msk.f32.mxu1 %vm7275_vm14, %v7273_v3  ;;  %v7169_v4 = vadd.f32 %v2491_v38, %v1974_v15  ;;  %v3257_v53 = vld [vmem:[%s12860_s7 + $0x240] sm:$0xff]  ;;  %v3278_v38 = vld [vmem:[%s12860_s7 + $0x2e8] sm:$0xff]  ;;  %v3416_v15 = vld [vmem:[%s12860_s7 + $0x738] sm:$0xff] }
 0x361   :  { %6669 = vmatprep.subr.bf16.mxu1 %v6668_v27  ;;  %v3264_v27 = vld [vmem:[%s12860_s7 + $0x278] sm:$0xff]  ;;  %v6694_v44 = vpack.c.bf16 %v3278_v38, %v3271_v11 }
 0x362   :  { %v6690_v34 = vpack.c.bf16 %v3264_v27, %v3257_v53  ;;  %v3320_v53 = vld [vmem:[%s12860_s7 + $0x438] sm:$0xff] }
 0x363   :  { %5409 = vmatmul.mubr.msk.f32.vlgmr.msra.gmra.mrb[16].mxu1 %vm645_vm5, %v9794_v10  ;;  %v3222_v10 = vld [vmem:[%s12860_s7 + $0x128] sm:$0xff]  ;;  %v3444_v11 = vld [vmem:[%s12860_s7 + $0x818] sm:$0xff] }
 0x364   :  { %6671 = vmatpush1.bf16.msra.mxu1 %v6670_v39  ;;  %v6678_v58 = vpack.c.bf16 %v3222_v10, %v3215_v52  ;;  %v3286_v39 = vld [vmem:[%s12860_s7 + $0x328] sm:$0xff]  ;;  %v3409_v52 = vld [vmem:[%s12860_s7 + $0x700] sm:$0xff] }
 0x365   :  { %6673 = vmatprep.subr.bf16.mxu1 %v6672_v37  ;;  %v3293_v37 = vld [vmem:[%s12860_s7 + $0x360] sm:$0xff] }
 0x366   :  { %v2276_v54 = vpop.f32.mrb[10].mxu1 }
 0x367   :  { %v10907_v28 = vadd.f32 %v2276_v54, %v1962_v33  ;;  %v2278_v56 = vpop.f32.mrb[11].mxu1  ;;  %v3300_v54 = vld [vmem:[%s12860_s7 + $0x398] sm:$0xff] }
 0x368   :  { %6675 = vmatpush1.bf16.msra.mxu1 %v6674_v45  ;;  %v10909_v57 = vadd.f32 %v2278_v56, %v1966_v46  ;;  %v6696_v45 = vpack.c.bf16 %v3293_v37, %v3286_v39  ;;  %v3285_v46 = vld [vmem:[%s12860_s7 + $0x320] sm:$0xff]  ;;  %v3452_v39 = vld [vmem:[%s12860_s7 + $0x858] sm:$0xff]  ;;  %v3459_v37 = vld [vmem:[%s12860_s7 + $0x890] sm:$0xff] }
 0x369   :  { %v3129_v61 = vmin.f32 %v10907_v28, 0.0  ;;  %6677 = vmatprep.subr.bf16.mxu1 %v6676_v19  ;;  %vm3164_vm15 = vcmp.gt.f32.partialorder %v10907_v28, 0.0 }
 0x36a   :  { %v3130_v6 = vmin.f32 %v10909_v57, 0.0  ;;  %v2560_v9 = vpop.f32.mrb[12].mxu1  ;;  %vm3165_vm0 = vcmp.gt.f32.partialorder %v10909_v57, 0.0 }
 0x36b   :  { %v3136_v8 = vmul.f32 1.442695, %v3129_v61  ;;  %v10925_v59 = vadd.f32 %v7167_v60, %v2560_v9  ;;  %v2562_v13 = vpop.f32.mrb[13].mxu1  ;;  %v3424_v60 = vld [vmem:[%s12860_s7 + $0x778] sm:$0xff]  ;;  %v3431_v61 = vld [vmem:[%s12860_s7 + $0x7b0] sm:$0xff]  ;;  %v6700_v9 = vpack.c.bf16 %v3307_v55, %v3300_v54  ;;  %v3341_v55 = vld [vmem:[%s12860_s7 + $0x4e0] sm:$0xff] }
 0x36c   :  { %v3138_v12 = vmul.f32 1.442695, %v3130_v6  ;;  %6679 = vmatpush1.bf16.msra.mxu1 %v6678_v58  ;;  %v10927_v16 = vadd.f32 %v7169_v4, %v2562_v13  ;;  %v6698_v58 = vpack.c.bf16 %v3292_v48, %v3285_v46  ;;  %v6538_v6 = vpack.c.bf16 %v3416_v15, %v3409_v52  ;;  %v3451_v48 = vld [vmem:[%s12860_s7 + $0x850] sm:$0xff]  ;;  %v3473_v15 = vld [vmem:[%s12860_s7 + $0x900] sm:$0xff] }
 0x36d   :  { %7244 = vpow2.f32 %v3136_v8  ;;  %6681 = vmatprep.subr.bf16.mxu1 %v6680_v62  ;;  %v6548_v46 = vpack.c.bf16 %v3459_v37, %v3452_v39  ;;  %v3515_v39 = vld [vmem:[%s12860_s7 + $0xa50] sm:$0xff]  ;;  %vm3166_vm2 = vcmp.gt.f32.partialorder %v10925_v59, 0.0 }
 0x36e   :  { %7246 = vpow2.f32 %v3138_v12  ;;  %v3132_v2 = vmin.f32 %v10927_v16, 0.0  ;;  %vm3167_vm1 = vcmp.gt.f32.partialorder %v10927_v16, 0.0 }
 0x370   :  { %v3142_v26 = vmul.f32 1.442695, %v3132_v2  ;;  %6683 = vmatpush1.bf16.msra.mxu1 %v6682_v18  ;;  %v6540_v18 = vpack.c.bf16 %v3431_v61, %v3424_v60  ;;  %v3438_v2 = vld [vmem:[%s12860_s7 + $0x7e8] sm:$0xff]  ;;  %v3363_v60 = vld [vmem:[%s12860_s7 + $0x590] sm:$0xff] }
 0x371   :  { %6685 = vmatprep.subr.bf16.mxu1 %v6684_v20  ;;  %v3430_v20 = vld [vmem:[%s12860_s7 + $0x7a8] sm:$0xff] }
 0x372   :  { %7248 = vpow2.f32 %v3142_v26 }
 0x374   :  { %6687 = vmatpush1.bf16.msra.mxu1 %v6686_v7 }
 0x375   :  { %6689 = vmatprep.subr.bf16.mxu1 %v6688_v51  ;;  %v3313_v51 = vld [vmem:[%s12860_s7 + $0x400] sm:$0xff] }
 0x376   :  { %v6706_v38 = vpack.c.bf16 %v3320_v53, %v3313_v51  ;;  %v3376_v51 = vld [vmem:[%s12860_s7 + $0x5f8] sm:$0xff] }
 0x377   :  { %v7245_v5 = vpop.eup %7244 }
 0x378   :  { %v7247_v22 = vpop.eup %7246  ;;  %v5135_v42 = vadd.f32 -1.0, %v7245_v5  ;;  %6691 = vmatpush1.bf16.msra.mxu1 %v6690_v34  ;;  %v6544_v34 = vpack.c.bf16 %v3445_v24, %v3438_v2  ;;  %v6708_v5 = vpack.c.bf16 %v3335_v17, %v3328_v30  ;;  %v3494_v2 = vld [vmem:[%s12860_s7 + $0x9a8] sm:$0xff]  ;;  %v3501_v24 = vld [vmem:[%s12860_s7 + $0x9e0] sm:$0xff]  ;;  %v3391_v30 = vld [vmem:[%s12860_s7 + $0x670] sm:$0xff] }
 0x379   :  { %v5136_v33 = vadd.f32 -1.0, %v7247_v22  ;;  %6693 = vmatprep.subr.bf16.mxu1 %v6692_v36  ;;  %v3437_v36 = vld [vmem:[%s12860_s7 + $0x7e0] sm:$0xff]  ;;  %v3327_v22 = vld [vmem:[%s12860_s7 + $0x470] sm:$0xff]  ;;  %v6560_v17 = vpack.c.bf16 %v3501_v24, %v3494_v2 }
 0x37a   :  { %v3157_v19 = vmul.f32 1.6732632, %v5135_v42  ;;  %v3334_v42 = vld [vmem:[%s12860_s7 + $0x4a8] sm:$0xff] }
 0x37b   :  { %v3158_v10 = vmul.f32 1.6732632, %v5136_v33  ;;  %v3342_v33 = vld [vmem:[%s12860_s7 + $0x4e8] sm:$0xff]  ;;  %v6710_v52 = vpack.c.bf16 %v3334_v42, %v3327_v22 }
 0x37c   :  { %v7249_v14 = vpop.eup %7248  ;;  %v3171_v56 = vsel %vm3164_vm15, %v10907_v28, %v3157_v19  ;;  %6695 = vmatpush1.bf16.msra.mxu1 %v6694_v44  ;;  %v3299_v28 = vld [vmem:[%s12860_s7 + $0x390] sm:$0xff]  ;;  %v6546_v44 = vpack.c.bf16 %v3444_v11, %v3437_v36  ;;  %v3458_v19 = vld [vmem:[%s12860_s7 + $0x888] sm:$0xff]  ;;  %v3500_v36 = vld [vmem:[%s12860_s7 + $0x9d8] sm:$0xff] }
 0x37d   :  { %v3172_v62 = vsel %vm3165_vm0, %v10909_v57, %v3158_v10  ;;  %v5138_v0 = vadd.f32 -1.0, %v7249_v14  ;;  %6697 = vmatprep.subr.bf16.mxu1 %v6696_v45  ;;  %v3314_v57 = vld [vmem:[%s12860_s7 + $0x408] sm:$0xff]  ;;  %v11011_v8 = vmul.f32 1.050701, %v3171_v56  ;;  %v6702_v23 = vpack.c.bf16 %v3306_v1, %v3299_v28  ;;  %v3349_v45 = vld [vmem:[%s12860_s7 + $0x520] sm:$0xff]  ;;  %v3348_v14 = vld [vmem:[%s12860_s7 + $0x518] sm:$0xff] }
 0x37e   :  { %v11000_v4 = vmul.f32 1.050701, %v3172_v62  ;;  %v6704_v7 = vpack.c.bf16 %v3321_v40, %v3314_v57  ;;  %v3466_v10 = vld [vmem:[%s12860_s7 + $0x8c8] sm:$0xff]  ;;  %v6712_v54 = vpack.c.bf16 %v3349_v45, %v3342_v33  ;;  %v6550_v56 = vpack.c.bf16 %v3458_v19, %v3451_v48  ;;  %v3465_v62 = vld [vmem:[%s12860_s7 + $0x8c0] sm:$0xff]  ;;  %v3480_v1 = vld [vmem:[%s12860_s7 + $0x938] sm:$0xff] }
 0x37f   :  { %v3160_v13 = vmul.f32 1.6732632, %v5138_v0  ;;  %v5220_v12 = vpop.f32.mrb[6].mxu0  ;;  %v6552_v61 = vpack.c.bf16 %v3473_v15, %v3466_v10  ;;  %v3472_v0 = vld [vmem:[%s12860_s7 + $0x8f8] sm:$0xff]  ;;  %v6714_v28 = vpack.c.bf16 %v3348_v14, %v3341_v55  ;;  %v3362_v57 = vld [vmem:[%s12860_s7 + $0x588] sm:$0xff]  ;;  %v3405_v33 = vld [vmem:[%s12860_s7 + $0x6e0] sm:$0xff] }
 0x380   :  { %6699 = vmatpush1.bf16.msra.mxu1 %v6698_v58  ;;  %v5221_v21 = vpop.f32.mrb[7].mxu0  ;;  %3975 = vmatprep.mubr.f32.mxu0 %v11000_v4  ;;  %v3356_v58 = vld [vmem:[%s12860_s7 + $0x558] sm:$0xff]  ;;  %v6554_v40 = vpack.c.bf16 %v3472_v0, %v3465_v62  ;;  %v3390_v22 = vld [vmem:[%s12860_s7 + $0x668] sm:$0xff]  ;;  %v3529_v10 = vld [vmem:[%s12860_s7 + $0xac0] sm:$0xff] }
 0x381   :  { %v3174_v25 = vsel %vm3167_vm1, %v10927_v16, %v3160_v13  ;;  %v11025_v26 = vadd.f32 %v5221_v21, %v5220_v12  ;;  %4259 = vmatprep.mubr.f32.mxu1 %v11000_v4  ;;  %3976 = vmatmul.mubr.f32.vlgmr.msra.gmra.mrb[12].mxu0 %v11011_v8  ;;  %v6542_v16 = vpack.c.bf16 %v3430_v20, %v3423_v43  ;;  %v3355_v43 = vld [vmem:[%s12860_s7 + $0x550] sm:$0xff]  ;;  %v3370_v13 = vld [vmem:[%s12860_s7 + $0x5c8] sm:$0xff]  ;;  %v3377_v12 = vld [vmem:[%s12860_s7 + $0x600] sm:$0xff] }
 0x382   :  { %v11035_v27 = vmul.f32 1.050701, %v3174_v25  ;;  %6539 = vmatpush1.bf16.msra.mxu0 %v6538_v6  ;;  %6701 = vmatprep.subr.bf16.mxu1 %v6700_v9  ;;  %v3487_v6 = vld [vmem:[%s12860_s7 + $0x970] sm:$0xff]  ;;  %v6716_v9 = vpack.c.bf16 %v3363_v60, %v3356_v58  ;;  %v3486_v21 = vld [vmem:[%s12860_s7 + $0x968] sm:$0xff]  ;;  %v6720_v25 = vpack.c.bf16 %v3377_v12, %v3370_v13  ;;  %v3404_v55 = vld [vmem:[%s12860_s7 + $0x6d8] sm:$0xff]  ;;  %v3131_v12 = vmin.f32 %v10925_v59, 0.0 }
 0x383   :  { %6541 = vmatprep.subr.bf16.mxu0 %v6540_v18  ;;  %v6556_v18 = vpack.c.bf16 %v3487_v6, %v3480_v1  ;;  %v3479_v20 = vld [vmem:[%s12860_s7 + $0x930] sm:$0xff]  ;;  %v3514_v48 = vld [vmem:[%s12860_s7 + $0xa48] sm:$0xff]  ;;  %v3528_v62 = vld [vmem:[%s12860_s7 + $0xab8] sm:$0xff]  ;;  %v1986_v6 = vrot.slane %v10877_v41, %v9157_v32 }
 0x384   :  { %6703 = vmatpush1.bf16.msra.mxu1 %v6702_v23  ;;  %4046 = vmatprep.mubr.f32.mxu0 %v11035_v27  ;;  %v6718_v23 = vpack.c.bf16 %v3362_v57, %v3355_v43  ;;  %v6558_v53 = vpack.c.bf16 %v3486_v21, %v3479_v20  ;;  %v3419_v58 = vld [vmem:[%s12860_s7 + $0x750] sm:$0xff]  ;;  %v3418_v57 = vld [vmem:[%s12860_s7 + $0x748] sm:$0xff]  ;;  %v3433_v41 = vld [vmem:[%s12860_s7 + $0x7c0] sm:$0xff] }
 0x385   :  { %6705 = vmatprep.subr.bf16.mxu1 %v6704_v7  ;;  %v3369_v7 = vld [vmem:[%s12860_s7 + $0x5c0] sm:$0xff]  ;;  %v3543_v1 = vld [vmem:[%s12860_s7 + $0xb30] sm:$0xff]  ;;  %v3426_v13 = vld [vmem:[%s12860_s7 + $0x788] sm:$0xff] }
 0x386   :  { %6543 = vmatpush1.bf16.msra.mxu0 %v6542_v16  ;;  %v3384_v16 = vld [vmem:[%s12860_s7 + $0x638] sm:$0xff]  ;;  %v6722_v11 = vpack.c.bf16 %v3376_v51, %v3369_v7  ;;  %v3411_v43 = vld [vmem:[%s12860_s7 + $0x710] sm:$0xff]  ;;  %v3557_v7 = vld [vmem:[%s12860_s7 + $0xba0] sm:$0xff]  ;;  %v2916_v51 = vadd.f32 %v11025_v26, %v1986_v6 }
 0x387   :  { %6545 = vmatprep.subr.bf16.mxu0 %v6544_v34  ;;  %v3493_v34 = vld [vmem:[%s12860_s7 + $0x9a0] sm:$0xff]  ;;  %v6724_v37 = vpack.c.bf16 %v3391_v30, %v3384_v16  ;;  %v3535_v21 = vld [vmem:[%s12860_s7 + $0xaf0] sm:$0xff]  ;;  %v6734_v24 = vpack.c.bf16 %v3418_v57, %v3411_v43  ;;  %v6736_v16 = vpack.c.bf16 %v3433_v41, %v3426_v13  ;;  %v3592_v57 = vld [vmem:[%s12860_s7 + $0xcb8] sm:$0xff] }
 0x388   :  { %6707 = vmatpush1.bf16.msra.mxu1 %v6706_v38  ;;  %v3508_v38 = vld [vmem:[%s12860_s7 + $0xa18] sm:$0xff]  ;;  %v6562_v42 = vpack.c.bf16 %v3500_v36, %v3493_v34  ;;  %v3425_v30 = vld [vmem:[%s12860_s7 + $0x780] sm:$0xff]  ;;  %v3447_v26 = vld [vmem:[%s12860_s7 + $0x830] sm:$0xff] }
 0x389   :  { %6709 = vmatprep.subr.bf16.mxu1 %v6708_v5  ;;  %v3383_v5 = vld [vmem:[%s12860_s7 + $0x630] sm:$0xff]  ;;  %v6564_v45 = vpack.c.bf16 %v3515_v39, %v3508_v38  ;;  %v3440_v36 = vld [vmem:[%s12860_s7 + $0x7f8] sm:$0xff]  ;;  %v3577_v6 = vld [vmem:[%s12860_s7 + $0xc40] sm:$0xff] }
 0x38a   :  { %6547 = vmatpush1.bf16.msra.mxu0 %v6546_v44  ;;  %v3398_v44 = vld [vmem:[%s12860_s7 + $0x6a8] sm:$0xff]  ;;  %v6726_v19 = vpack.c.bf16 %v3390_v22, %v3383_v5  ;;  %v3556_v5 = vld [vmem:[%s12860_s7 + $0xb98] sm:$0xff]  ;;  %v3467_v41 = vld [vmem:[%s12860_s7 + $0x8d0] sm:$0xff] }
 0x38b   :  { %6549 = vmatprep.subr.bf16.mxu0 %v6548_v46  ;;  %v3507_v46 = vld [vmem:[%s12860_s7 + $0xa10] sm:$0xff]  ;;  %v6728_v15 = vpack.c.bf16 %v3405_v33, %v3398_v44  ;;  %v6740_v33 = vpack.c.bf16 %v3447_v26, %v3440_v36  ;;  %v3496_v36 = vld [vmem:[%s12860_s7 + $0x9b8] sm:$0xff] }
 0x38c   :  { %6711 = vmatpush1.bf16.msra.mxu1 %v6710_v52  ;;  %v3522_v52 = vld [vmem:[%s12860_s7 + $0xa88] sm:$0xff]  ;;  %v6566_v14 = vpack.c.bf16 %v3514_v48, %v3507_v46  ;;  %v3571_v44 = vld [vmem:[%s12860_s7 + $0xc10] sm:$0xff] }
 0x38d   :  { %6713 = vmatprep.subr.bf16.mxu1 %v6712_v54  ;;  %v3397_v54 = vld [vmem:[%s12860_s7 + $0x6a0] sm:$0xff]  ;;  %v6568_v60 = vpack.c.bf16 %v3529_v10, %v3522_v52  ;;  %v3446_v46 = vld [vmem:[%s12860_s7 + $0x828] sm:$0xff]  ;;  %v3503_v26 = vld [vmem:[%s12860_s7 + $0x9f0] sm:$0xff] }
 0x38e   :  { %6551 = vmatpush1.bf16.msra.mxu0 %v6550_v56  ;;  %v3412_v56 = vld [vmem:[%s12860_s7 + $0x718] sm:$0xff]  ;;  %v6730_v0 = vpack.c.bf16 %v3404_v55, %v3397_v54  ;;  %v3461_v52 = vld [vmem:[%s12860_s7 + $0x8a0] sm:$0xff]  ;;  %v3570_v54 = vld [vmem:[%s12860_s7 + $0xc08] sm:$0xff] }
 0x38f   :  { %6553 = vmatprep.subr.bf16.mxu0 %v6552_v61  ;;  %v3521_v61 = vld [vmem:[%s12860_s7 + $0xa80] sm:$0xff] }
 0x390   :  { %6715 = vmatpush1.bf16.msra.mxu1 %v6714_v28  ;;  %v3536_v28 = vld [vmem:[%s12860_s7 + $0xaf8] sm:$0xff] }
 0x391   :  { %6717 = vmatprep.subr.bf16.mxu1 %v6716_v9  ;;  %v6732_v9 = vpack.c.bf16 %v3419_v58, %v3412_v56  ;;  %v6572_v20 = vpack.c.bf16 %v3543_v1, %v3536_v28  ;;  %v3585_v56 = vld [vmem:[%s12860_s7 + $0xc80] sm:$0xff]  ;;  %v3475_v28 = vld [vmem:[%s12860_s7 + $0x910] sm:$0xff] }
 0x392   :  { %6555 = vmatpush1.bf16.msra.mxu0 %v6554_v40  ;;  %v6570_v40 = vpack.c.bf16 %v3528_v62, %v3521_v61  ;;  %v3460_v61 = vld [vmem:[%s12860_s7 + $0x898] sm:$0xff] }
 0x393   :  { %6557 = vmatprep.subr.bf16.mxu0 %v6556_v18 }
 0x394   :  { %6719 = vmatpush1.bf16.msra.mxu1 %v6718_v23  ;;  %v3542_v23 = vld [vmem:[%s12860_s7 + $0xb28] sm:$0xff] }
 0x395   :  { %6721 = vmatprep.subr.bf16.mxu1 %v6720_v25  ;;  %v3550_v25 = vld [vmem:[%s12860_s7 + $0xb68] sm:$0xff]  ;;  %v6574_v34 = vpack.c.bf16 %v3542_v23, %v3535_v21  ;;  %v3489_v21 = vld [vmem:[%s12860_s7 + $0x980] sm:$0xff] }
 0x396   :  { %6559 = vmatpush1.bf16.msra.mxu0 %v6558_v53  ;;  %v6576_v39 = vpack.c.bf16 %v3557_v7, %v3550_v25  ;;  %v3606_v7 = vld [vmem:[%s12860_s7 + $0xd28] sm:$0xff] }
 0x397   :  { %6561 = vmatprep.subr.bf16.mxu0 %v6560_v17  ;;  %v3432_v17 = vld [vmem:[%s12860_s7 + $0x7b8] sm:$0xff] }
 0x398   :  { %6723 = vmatpush1.bf16.msra.mxu1 %v6722_v11  ;;  %v3140_v11 = vmul.f32 1.442695, %v3131_v12  ;;  %v6738_v22 = vpack.c.bf16 %v3432_v17, %v3425_v30  ;;  %v3474_v12 = vld [vmem:[%s12860_s7 + $0x908] sm:$0xff]  ;;  %v3481_v30 = vld [vmem:[%s12860_s7 + $0x940] sm:$0xff]  ;;  %v3488_v17 = vld [vmem:[%s12860_s7 + $0x978] sm:$0xff] }
 0x399   :  { %6725 = vmatprep.subr.bf16.mxu1 %v6724_v37  ;;  %v3549_v37 = vld [vmem:[%s12860_s7 + $0xb60] sm:$0xff]  ;;  %v6750_v25 = vpack.c.bf16 %v3474_v12, %v3467_v41  ;;  %v3655_v41 = vld [vmem:[%s12860_s7 + $0xeb0] sm:$0xff] }
 0x39a   :  { %6563 = vmatpush1.bf16.msra.mxu0 %v6562_v42  ;;  %v3564_v42 = vld [vmem:[%s12860_s7 + $0xbd8] sm:$0xff]  ;;  %v6578_v48 = vpack.c.bf16 %v3556_v5, %v3549_v37  ;;  %7250 = vpow2.f32 %v3140_v11 }
 0x39b   :  { %6565 = vmatprep.subr.bf16.mxu0 %v6564_v45  ;;  %v3439_v45 = vld [vmem:[%s12860_s7 + $0x7f0] sm:$0xff]  ;;  %v6580_v10 = vpack.c.bf16 %v3571_v44, %v3564_v42  ;;  %v3612_v37 = vld [vmem:[%s12860_s7 + $0xd58] sm:$0xff] }
 0x39c   :  { %6727 = vmatpush1.bf16.msra.mxu1 %v6726_v19  ;;  %v3454_v19 = vld [vmem:[%s12860_s7 + $0x868] sm:$0xff]  ;;  %v6742_v55 = vpack.c.bf16 %v3446_v46, %v3439_v45  ;;  %v3620_v42 = vld [vmem:[%s12860_s7 + $0xd98] sm:$0xff]  ;;  %v3627_v44 = vld [vmem:[%s12860_s7 + $0xdd0] sm:$0xff] }
 0x39d   :  { %6729 = vmatprep.subr.bf16.mxu1 %v6728_v15  ;;  %v3563_v15 = vld [vmem:[%s12860_s7 + $0xbd0] sm:$0xff]  ;;  %v6744_v58 = vpack.c.bf16 %v3461_v52, %v3454_v19  ;;  %v3502_v46 = vld [vmem:[%s12860_s7 + $0x9e8] sm:$0xff]  ;;  %v3517_v52 = vld [vmem:[%s12860_s7 + $0xa60] sm:$0xff] }
 0x39e   :  { %6567 = vmatpush1.bf16.msra.mxu0 %v6566_v14  ;;  %v3578_v14 = vld [vmem:[%s12860_s7 + $0xc48] sm:$0xff]  ;;  %v6582_v62 = vpack.c.bf16 %v3570_v54, %v3563_v15  ;;  %v3495_v45 = vld [vmem:[%s12860_s7 + $0x9b0] sm:$0xff] }
 0x39f   :  { %v5255_v18 = vpop.f32.mrb[8].mxu0  ;;  %6569 = vmatprep.subr.bf16.mxu0 %v6568_v60  ;;  %v3453_v60 = vld [vmem:[%s12860_s7 + $0x860] sm:$0xff]  ;;  %v6584_v1 = vpack.c.bf16 %v3585_v56, %v3578_v14  ;;  %v3510_v19 = vld [vmem:[%s12860_s7 + $0xa28] sm:$0xff]  ;;  %v3619_v15 = vld [vmem:[%s12860_s7 + $0xd90] sm:$0xff]  ;;  %v6758_v14 = vpack.c.bf16 %v3502_v46, %v3495_v45 }
 0x3a0   :  { %6731 = vmatpush1.bf16.msra.mxu1 %v6730_v0  ;;  %v5256_v2 = vpop.f32.mrb[9].mxu0  ;;  %v3468_v0 = vld [vmem:[%s12860_s7 + $0x8d8] sm:$0xff]  ;;  %v6746_v43 = vpack.c.bf16 %v3460_v61, %v3453_v60  ;;  %v3626_v54 = vld [vmem:[%s12860_s7 + $0xdc8] sm:$0xff]  ;;  %v6760_v60 = vpack.c.bf16 %v3517_v52, %v3510_v19  ;;  %v3509_v61 = vld [vmem:[%s12860_s7 + $0xa20] sm:$0xff] }
 0x3a1   :  { %v5257_v53 = vadd.f32 %v5256_v2, %v5255_v18  ;;  %6733 = vmatprep.subr.bf16.mxu1 %v6732_v9  ;;  %v3584_v9 = vld [vmem:[%s12860_s7 + $0xc78] sm:$0xff]  ;;  %v6748_v13 = vpack.c.bf16 %v3475_v28, %v3468_v0  ;;  %v3591_v2 = vld [vmem:[%s12860_s7 + $0xcb0] sm:$0xff]  ;;  %v3634_v56 = vld [vmem:[%s12860_s7 + $0xe08] sm:$0xff]  ;;  %v6598_v0 = vpack.c.bf16 %v3626_v54, %v3619_v15 }
 0x3a2   :  { %6571 = vmatpush1.bf16.msra.mxu0 %v6570_v40  ;;  %v3599_v40 = vld [vmem:[%s12860_s7 + $0xcf0] sm:$0xff]  ;;  %v6586_v18 = vpack.c.bf16 %v3584_v9, %v3577_v6  ;;  %v3524_v28 = vld [vmem:[%s12860_s7 + $0xa98] sm:$0xff]  ;;  %v3633_v9 = vld [vmem:[%s12860_s7 + $0xe00] sm:$0xff] }
 0x3a3   :  { %v11240_v38 = vadd.f32 %v5257_v53, %v2916_v51  ;;  %4260 = vmatmul.mubr.f32.vlgmr.msra.gmra.mrb[18].mxu1 %v11011_v8  ;;  %6573 = vmatprep.subr.bf16.mxu0 %v6572_v20  ;;  %v3482_v20 = vld [vmem:[%s12860_s7 + $0x948] sm:$0xff]  ;;  %v6588_v23 = vpack.c.bf16 %v3599_v40, %v3592_v57  ;;  %v3613_v51 = vld [vmem:[%s12860_s7 + $0xd60] sm:$0xff]  ;;  %v3676_v46 = vld [vmem:[%s12860_s7 + $0xf58] sm:$0xff] }
 0x3a4   :  { %6735 = vmatpush1.bf16.msra.mxu1 %v6734_v24  ;;  %4330 = vmatprep.mubr.f32.mxu1 %v11035_v27  ;;  %v3598_v24 = vld [vmem:[%s12860_s7 + $0xce8] sm:$0xff]  ;;  %v7251_v53 = vpop.eup %7250  ;;  %v6592_v11 = vpack.c.bf16 %v3613_v51, %v3606_v7  ;;  %v3647_v7 = vld [vmem:[%s12860_s7 + $0xe70] sm:$0xff]  ;;  %v3573_v15 = vld [vmem:[%s12860_s7 + $0xc20] sm:$0xff] }
 0x3a5   :  { %6737 = vmatprep.subr.bf16.mxu1 %v6736_v16  ;;  %v6752_v16 = vpack.c.bf16 %v3489_v21, %v3482_v20  ;;  %v5137_v5 = vadd.f32 -1.0, %v7251_v53  ;;  %v3538_v20 = vld [vmem:[%s12860_s7 + $0xb08] sm:$0xff]  ;;  %v3545_v21 = vld [vmem:[%s12860_s7 + $0xb40] sm:$0xff]  ;;  %v3551_v52 = vld [vmem:[%s12860_s7 + $0xb70] sm:$0xff] }
 0x3a6   :  { %6575 = vmatpush1.bf16.msra.mxu0 %v6574_v34  ;;  %v6590_v34 = vpack.c.bf16 %v3598_v24, %v3591_v2  ;;  %v3654_v51 = vld [vmem:[%s12860_s7 + $0xea8] sm:$0xff] }
 0x3a7   :  { %6577 = vmatprep.subr.bf16.mxu0 %v6576_v39  ;;  %v3605_v39 = vld [vmem:[%s12860_s7 + $0xd20] sm:$0xff] }
 0x3a8   :  { %6739 = vmatpush1.bf16.msra.mxu1 %v6738_v22  ;;  %v6754_v22 = vpack.c.bf16 %v3488_v17, %v3481_v30  ;;  %v3662_v30 = vld [vmem:[%s12860_s7 + $0xee8] sm:$0xff]  ;;  %v3669_v17 = vld [vmem:[%s12860_s7 + $0xf20] sm:$0xff] }
 0x3a9   :  { %6741 = vmatprep.subr.bf16.mxu1 %v6740_v33  ;;  %v6756_v33 = vpack.c.bf16 %v3503_v26, %v3496_v36  ;;  %v6768_v36 = vpack.c.bf16 %v3545_v21, %v3538_v20  ;;  %v3537_v26 = vld [vmem:[%s12860_s7 + $0xb00] sm:$0xff]  ;;  %v3586_v20 = vld [vmem:[%s12860_s7 + $0xc88] sm:$0xff] }
 0x3aa   :  { %6579 = vmatpush1.bf16.msra.mxu0 %v6578_v48  ;;  %v6594_v48 = vpack.c.bf16 %v3612_v37, %v3605_v39  ;;  %v3552_v39 = vld [vmem:[%s12860_s7 + $0xb78] sm:$0xff]  ;;  %v3559_v37 = vld [vmem:[%s12860_s7 + $0xbb0] sm:$0xff]  ;;  %v3594_v21 = vld [vmem:[%s12860_s7 + $0xcc8] sm:$0xff] }
 0x3ab   :  { %6581 = vmatprep.subr.bf16.mxu0 %v6580_v10  ;;  %v6596_v10 = vpack.c.bf16 %v3627_v44, %v3620_v42  ;;  %v3661_v42 = vld [vmem:[%s12860_s7 + $0xee0] sm:$0xff]  ;;  %v3668_v44 = vld [vmem:[%s12860_s7 + $0xf18] sm:$0xff]  ;;  %v6772_v19 = vpack.c.bf16 %v3559_v37, %v3552_v39 }
 0x3ac   :  { %6743 = vmatpush1.bf16.msra.mxu1 %v6742_v55  ;;  %v3159_v55 = vmul.f32 1.6732632, %v5137_v5  ;;  %v6606_v5 = vpack.c.bf16 %v3654_v51, %v3647_v7  ;;  %v6610_v54 = vpack.c.bf16 %v3668_v44, %v3661_v42  ;;  %v3703_v7 = vld [vmem:[%s12860_s7 + $0x1030] sm:$0xff]  ;;  %v3710_v51 = vld [vmem:[%s12860_s7 + $0x1068] sm:$0xff]  ;;  %v3732_v44 = vld [vmem:[%s12860_s7 + $0x1118] sm:$0xff] }
 0x3ad   :  { %6745 = vmatprep.subr.bf16.mxu1 %v6744_v58  ;;  %v3641_v58 = vld [vmem:[%s12860_s7 + $0xe40] sm:$0xff]  ;;  %v6622_v39 = vpack.c.bf16 %v3710_v51, %v3703_v7  ;;  %v3774_v51 = vld [vmem:[%s12860_s7 + $0x1268] sm:$0xff] }
 0x3ae   :  { %6583 = vmatpush1.bf16.msra.mxu0 %v6582_v62  ;;  %v3516_v62 = vld [vmem:[%s12860_s7 + $0xa58] sm:$0xff]  ;;  %v6600_v6 = vpack.c.bf16 %v3641_v58, %v3634_v56  ;;  %v3173_v57 = vsel %vm3166_vm2, %v10925_v59, %v3159_v55  ;;  %v3530_v59 = vld [vmem:[%s12860_s7 + $0xac8] sm:$0xff] }
 0x3af   :  { %6585 = vmatprep.subr.bf16.mxu0 %v6584_v1  ;;  %v3531_v1 = vld [vmem:[%s12860_s7 + $0xad0] sm:$0xff]  ;;  %v6762_v40 = vpack.c.bf16 %v3516_v62, %v3509_v61  ;;  %v11414_v2 = vmul.f32 1.050701, %v3173_v57  ;;  %v3682_v56 = vld [vmem:[%s12860_s7 + $0xf88] sm:$0xff]  ;;  %v3697_v61 = vld [vmem:[%s12860_s7 + $0x1000] sm:$0xff] }
 0x3b0   :  { %6747 = vmatpush1.bf16.msra.mxu1 %v6746_v43  ;;  %v3640_v43 = vld [vmem:[%s12860_s7 + $0xe38] sm:$0xff]  ;;  %v6764_v12 = vpack.c.bf16 %v3531_v1, %v3524_v28  ;;  %v3689_v57 = vld [vmem:[%s12860_s7 + $0xfc0] sm:$0xff] }
 0x3b1   :  { %6749 = vmatprep.subr.bf16.mxu1 %v6748_v13  ;;  %v3648_v13 = vld [vmem:[%s12860_s7 + $0xe78] sm:$0xff] }
 0x3b2   :  { %6587 = vmatpush1.bf16.msra.mxu0 %v6586_v18  ;;  %v3523_v18 = vld [vmem:[%s12860_s7 + $0xa90] sm:$0xff]  ;;  %v3572_v28 = vld [vmem:[%s12860_s7 + $0xc18] sm:$0xff] }
 0x3b3   :  { %6589 = vmatprep.subr.bf16.mxu0 %v6588_v23  ;;  %v6602_v23 = vpack.c.bf16 %v3640_v43, %v3633_v9  ;;  %v3580_v1 = vld [vmem:[%s12860_s7 + $0xc58] sm:$0xff] }
 0x3b4   :  { %6751 = vmatpush1.bf16.msra.mxu1 %v6750_v25  ;;  %v6604_v25 = vpack.c.bf16 %v3655_v41, %v3648_v13  ;;  %v3704_v41 = vld [vmem:[%s12860_s7 + $0x1038] sm:$0xff] }
 0x3b5   :  { %6753 = vmatprep.subr.bf16.mxu1 %v6752_v16  ;;  %v6766_v16 = vpack.c.bf16 %v3530_v59, %v3523_v18  ;;  %v3579_v59 = vld [vmem:[%s12860_s7 + $0xc50] sm:$0xff] }
 0x3b6   :  { %6591 = vmatpush1.bf16.msra.mxu0 %v6590_v34 }
 0x3b7   :  { %6593 = vmatprep.subr.bf16.mxu0 %v6592_v11  ;;  %v3544_v11 = vld [vmem:[%s12860_s7 + $0xb38] sm:$0xff] }
 0x3b8   :  { %6755 = vmatpush1.bf16.msra.mxu1 %v6754_v22  ;;  %v6608_v22 = vpack.c.bf16 %v3669_v17, %v3662_v30  ;;  %v6770_v45 = vpack.c.bf16 %v3544_v11, %v3537_v26  ;;  %v3725_v30 = vld [vmem:[%s12860_s7 + $0x10e0] sm:$0xff]  ;;  %v3608_v26 = vld [vmem:[%s12860_s7 + $0xd38] sm:$0xff]  ;;  %v3615_v11 = vld [vmem:[%s12860_s7 + $0xd70] sm:$0xff] }
 0x3b9   :  { %6757 = vmatprep.subr.bf16.mxu1 %v6756_v33 }
 0x3ba   :  { %6595 = vmatpush1.bf16.msra.mxu0 %v6594_v48  ;;  %v3683_v48 = vld [vmem:[%s12860_s7 + $0xf90] sm:$0xff] }
 0x3bb   :  { %6597 = vmatprep.subr.bf16.mxu0 %v6596_v10  ;;  %v3566_v10 = vld [vmem:[%s12860_s7 + $0xbe8] sm:$0xff]  ;;  %v6612_v55 = vpack.c.bf16 %v3683_v48, %v3676_v46  ;;  %v6788_v46 = vpack.c.bf16 %v3615_v11, %v3608_v26  ;;  %v3607_v48 = vld [vmem:[%s12860_s7 + $0xd30] sm:$0xff] }
 0x3bc   :  { %6759 = vmatpush1.bf16.msra.mxu1 %v6758_v14  ;;  %v3675_v14 = vld [vmem:[%s12860_s7 + $0xf50] sm:$0xff]  ;;  %v6776_v62 = vpack.c.bf16 %v3573_v15, %v3566_v10 }
 0x3bd   :  { %6761 = vmatprep.subr.bf16.mxu1 %v6760_v60  ;;  %v3690_v60 = vld [vmem:[%s12860_s7 + $0xfc8] sm:$0xff]  ;;  %v6614_v9 = vpack.c.bf16 %v3682_v56, %v3675_v14 }
 0x3be   :  { %6599 = vmatpush1.bf16.msra.mxu0 %v6598_v0  ;;  %v3565_v0 = vld [vmem:[%s12860_s7 + $0xbe0] sm:$0xff]  ;;  %v6616_v43 = vpack.c.bf16 %v3697_v61, %v3690_v60  ;;  %v3746_v56 = vld [vmem:[%s12860_s7 + $0x1188] sm:$0xff] }
 0x3bf   :  { %v5290_v24 = vpop.f32.mrb[10].mxu0  ;;  %6601 = vmatprep.subr.bf16.mxu0 %v6600_v6  ;;  %v3587_v6 = vld [vmem:[%s12860_s7 + $0xc90] sm:$0xff]  ;;  %v6778_v13 = vpack.c.bf16 %v3572_v28, %v3565_v0  ;;  %v3621_v61 = vld [vmem:[%s12860_s7 + $0xda0] sm:$0xff]  ;;  %v3636_v0 = vld [vmem:[%s12860_s7 + $0xe18] sm:$0xff] }
 0x3c0   :  { %6763 = vmatpush1.bf16.msra.mxu1 %v6762_v40  ;;  %v5291_v53 = vpop.f32.mrb[11].mxu0  ;;  %v3696_v40 = vld [vmem:[%s12860_s7 + $0xff8] sm:$0xff]  ;;  %v6780_v18 = vpack.c.bf16 %v3587_v6, %v3580_v1  ;;  %v3643_v28 = vld [vmem:[%s12860_s7 + $0xe50] sm:$0xff] }
 0x3c1   :  { %v5292_v34 = vadd.f32 %v5291_v53, %v5290_v24  ;;  %4047 = vmatmul.mubr.f32.vlgmr.msra.gmra.mrb[12].mxu0 %v11414_v2  ;;  %6765 = vmatprep.subr.bf16.mxu1 %v6764_v12  ;;  %v3711_v12 = vld [vmem:[%s12860_s7 + $0x1070] sm:$0xff]  ;;  %v6618_v24 = vpack.c.bf16 %v3696_v40, %v3689_v57  ;;  %v6782_v53 = vpack.c.bf16 %v3586_v20, %v3579_v59  ;;  %v3760_v40 = vld [vmem:[%s12860_s7 + $0x11f8] sm:$0xff]  ;;  %v3650_v59 = vld [vmem:[%s12860_s7 + $0xe88] sm:$0xff] }
 0x3c2   :  { %6603 = vmatpush1.bf16.msra.mxu0 %v6602_v23  ;;  %v3601_v23 = vld [vmem:[%s12860_s7 + $0xd00] sm:$0xff] }
 0x3c3   :  { %6605 = vmatprep.subr.bf16.mxu0 %v6604_v25  ;;  %v11448_v33 = vadd.f32 %v5292_v34, %v11240_v38  ;;  %v3558_v38 = vld [vmem:[%s12860_s7 + $0xba8] sm:$0xff]  ;;  %v6620_v25 = vpack.c.bf16 %v3711_v12, %v3704_v41  ;;  %v6784_v17 = vpack.c.bf16 %v3601_v23, %v3594_v21  ;;  %v3593_v34 = vld [vmem:[%s12860_s7 + $0xcc0] sm:$0xff]  ;;  %v6796_v41 = vpack.c.bf16 %v3643_v28, %v3636_v0  ;;  %v3635_v12 = vld [vmem:[%s12860_s7 + $0xe10] sm:$0xff] }
 0x3c4   :  { %6767 = vmatpush1.bf16.msra.mxu1 %v6766_v16  ;;  %v6774_v58 = vpack.c.bf16 %v3558_v38, %v3551_v52  ;;  %v3718_v16 = vld [vmem:[%s12860_s7 + $0x10a8] sm:$0xff]  ;;  %v3629_v38 = vld [vmem:[%s12860_s7 + $0xde0] sm:$0xff] }
 0x3c5   :  { %6769 = vmatprep.subr.bf16.mxu1 %v6768_v36  ;;  %v3600_v36 = vld [vmem:[%s12860_s7 + $0xcf8] sm:$0xff]  ;;  %v6624_v37 = vpack.c.bf16 %v3725_v30, %v3718_v16  ;;  %v3622_v52 = vld [vmem:[%s12860_s7 + $0xda8] sm:$0xff]  ;;  %v3657_v20 = vld [vmem:[%s12860_s7 + $0xec0] sm:$0xff] }
 0x3c6   :  { %6607 = vmatpush1.bf16.msra.mxu0 %v6606_v5  ;;  %v3717_v5 = vld [vmem:[%s12860_s7 + $0x10a0] sm:$0xff]  ;;  %v6786_v42 = vpack.c.bf16 %v3600_v36, %v3593_v34  ;;  %v6792_v60 = vpack.c.bf16 %v3629_v38, %v3622_v52  ;;  %v6800_v16 = vpack.c.bf16 %v3657_v20, %v3650_v59  ;;  %v3664_v34 = vld [vmem:[%s12860_s7 + $0xef8] sm:$0xff]  ;;  %v3671_v36 = vld [vmem:[%s12860_s7 + $0xf30] sm:$0xff] }
 0x3c7   :  { %6609 = vmatprep.subr.bf16.mxu0 %v6608_v22  ;;  %v3724_v22 = vld [vmem:[%s12860_s7 + $0x10d8] sm:$0xff]  ;;  %v3649_v30 = vld [vmem:[%s12860_s7 + $0xe80] sm:$0xff] }
 0x3c8   :  { %6771 = vmatpush1.bf16.msra.mxu1 %v6770_v45  ;;  %v3739_v45 = vld [vmem:[%s12860_s7 + $0x1150] sm:$0xff]  ;;  %v6626_v10 = vpack.c.bf16 %v3724_v22, %v3717_v5  ;;  %v3788_v22 = vld [vmem:[%s12860_s7 + $0x12d8] sm:$0xff] }
 0x3c9   :  { %6773 = vmatprep.subr.bf16.mxu1 %v6772_v19  ;;  %v3614_v19 = vld [vmem:[%s12860_s7 + $0xd68] sm:$0xff]  ;;  %v6628_v15 = vpack.c.bf16 %v3739_v45, %v3732_v44  ;;  %v6804_v44 = vpack.c.bf16 %v3671_v36, %v3664_v34  ;;  %v3663_v45 = vld [vmem:[%s12860_s7 + $0xef0] sm:$0xff] }
 0x3ca   :  { %6611 = vmatpush1.bf16.msra.mxu0 %v6610_v54  ;;  %v3731_v54 = vld [vmem:[%s12860_s7 + $0x1110] sm:$0xff]  ;;  %v6790_v14 = vpack.c.bf16 %v3614_v19, %v3607_v48  ;;  %v3678_v48 = vld [vmem:[%s12860_s7 + $0xf68] sm:$0xff]  ;;  %v3685_v19 = vld [vmem:[%s12860_s7 + $0xfa0] sm:$0xff] }
 0x3cb   :  { %6613 = vmatprep.subr.bf16.mxu0 %v6612_v55  ;;  %v3738_v55 = vld [vmem:[%s12860_s7 + $0x1148] sm:$0xff] }
 0x3cc   :  { %6775 = vmatpush1.bf16.msra.mxu1 %v6774_v58  ;;  %v3753_v58 = vld [vmem:[%s12860_s7 + $0x11c0] sm:$0xff]  ;;  %v6630_v1 = vpack.c.bf16 %v3738_v55, %v3731_v54  ;;  %v3802_v55 = vld [vmem:[%s12860_s7 + $0x1348] sm:$0xff] }
 0x3cd   :  { %6777 = vmatprep.subr.bf16.mxu1 %v6776_v62  ;;  %v3628_v62 = vld [vmem:[%s12860_s7 + $0xdd8] sm:$0xff]  ;;  %v6632_v6 = vpack.c.bf16 %v3753_v58, %v3746_v56  ;;  %v6808_v56 = vpack.c.bf16 %v3685_v19, %v3678_v48  ;;  %v3677_v58 = vld [vmem:[%s12860_s7 + $0xf60] sm:$0xff] }
 0x3ce   :  { %6615 = vmatpush1.bf16.msra.mxu0 %v6614_v9  ;;  %v3745_v9 = vld [vmem:[%s12860_s7 + $0x1180] sm:$0xff]  ;;  %v6794_v57 = vpack.c.bf16 %v3628_v62, %v3621_v61  ;;  %v3692_v61 = vld [vmem:[%s12860_s7 + $0xfd8] sm:$0xff]  ;;  %v3699_v62 = vld [vmem:[%s12860_s7 + $0x1010] sm:$0xff] }
 0x3cf   :  { %6617 = vmatprep.subr.bf16.mxu0 %v6616_v43  ;;  %v3752_v43 = vld [vmem:[%s12860_s7 + $0x11b8] sm:$0xff] }
 0x3d0   :  { %6779 = vmatpush1.bf16.msra.mxu1 %v6778_v13  ;;  %v3767_v13 = vld [vmem:[%s12860_s7 + $0x1230] sm:$0xff]  ;;  %v6634_v21 = vpack.c.bf16 %v3752_v43, %v3745_v9  ;;  %v3816_v43 = vld [vmem:[%s12860_s7 + $0x13b8] sm:$0xff] }
 0x3d1   :  { %6781 = vmatprep.subr.bf16.mxu1 %v6780_v18  ;;  %v3642_v18 = vld [vmem:[%s12860_s7 + $0xe48] sm:$0xff]  ;;  %v6636_v23 = vpack.c.bf16 %v3767_v13, %v3760_v40  ;;  %v6812_v40 = vpack.c.bf16 %v3699_v62, %v3692_v61  ;;  %v3691_v13 = vld [vmem:[%s12860_s7 + $0xfd0] sm:$0xff] }
 0x3d2   :  { %6619 = vmatpush1.bf16.msra.mxu0 %v6618_v24  ;;  %v3759_v24 = vld [vmem:[%s12860_s7 + $0x11f0] sm:$0xff]  ;;  %v6798_v7 = vpack.c.bf16 %v3642_v18, %v3635_v12  ;;  %v3706_v12 = vld [vmem:[%s12860_s7 + $0x1048] sm:$0xff]  ;;  %v3713_v18 = vld [vmem:[%s12860_s7 + $0x1080] sm:$0xff] }
 0x3d3   :  { %6621 = vmatprep.subr.bf16.mxu0 %v6620_v25  ;;  %v3766_v25 = vld [vmem:[%s12860_s7 + $0x1228] sm:$0xff] }
 0x3d4   :  { %6783 = vmatpush1.bf16.msra.mxu1 %v6782_v53  ;;  %v3781_v53 = vld [vmem:[%s12860_s7 + $0x12a0] sm:$0xff]  ;;  %v6638_v26 = vpack.c.bf16 %v3766_v25, %v3759_v24  ;;  %v3830_v25 = vld [vmem:[%s12860_s7 + $0x1428] sm:$0xff] }
 0x3d5   :  { %6785 = vmatprep.subr.bf16.mxu1 %v6784_v17  ;;  %v3656_v17 = vld [vmem:[%s12860_s7 + $0xeb8] sm:$0xff]  ;;  %v6640_v11 = vpack.c.bf16 %v3781_v53, %v3774_v51  ;;  %v6816_v51 = vpack.c.bf16 %v3713_v18, %v3706_v12  ;;  %v3705_v53 = vld [vmem:[%s12860_s7 + $0x1040] sm:$0xff]  ;;  %v3783_v18 = vld [vmem:[%s12860_s7 + $0x12b0] sm:$0xff] }
 0x3d6   :  { %6623 = vmatpush1.bf16.msra.mxu0 %v6622_v39  ;;  %v3773_v39 = vld [vmem:[%s12860_s7 + $0x1260] sm:$0xff]  ;;  %v6802_v5 = vpack.c.bf16 %v3656_v17, %v3649_v30  ;;  %v3720_v30 = vld [vmem:[%s12860_s7 + $0x10b8] sm:$0xff]  ;;  %v3727_v17 = vld [vmem:[%s12860_s7 + $0x10f0] sm:$0xff] }
 0x3d7   :  { %6625 = vmatprep.subr.bf16.mxu0 %v6624_v37  ;;  %v3780_v37 = vld [vmem:[%s12860_s7 + $0x1298] sm:$0xff] }
 0x3d8   :  { %6787 = vmatpush1.bf16.msra.mxu1 %v6786_v42  ;;  %v3795_v42 = vld [vmem:[%s12860_s7 + $0x1310] sm:$0xff]  ;;  %v6642_v52 = vpack.c.bf16 %v3780_v37, %v3773_v39  ;;  %v3844_v37 = vld [vmem:[%s12860_s7 + $0x1498] sm:$0xff] }
 0x3d9   :  { %6789 = vmatprep.subr.bf16.mxu1 %v6788_v46  ;;  %v3670_v46 = vld [vmem:[%s12860_s7 + $0xf28] sm:$0xff]  ;;  %v6644_v38 = vpack.c.bf16 %v3795_v42, %v3788_v22  ;;  %v6820_v22 = vpack.c.bf16 %v3727_v17, %v3720_v30  ;;  %v3719_v42 = vld [vmem:[%s12860_s7 + $0x10b0] sm:$0xff]  ;;  %v3776_v12 = vld [vmem:[%s12860_s7 + $0x1278] sm:$0xff] }
 0x3da   :  { %6627 = vmatpush1.bf16.msra.mxu0 %v6626_v10  ;;  %v3787_v10 = vld [vmem:[%s12860_s7 + $0x12d0] sm:$0xff]  ;;  %v6806_v54 = vpack.c.bf16 %v3670_v46, %v3663_v45  ;;  %v3734_v45 = vld [vmem:[%s12860_s7 + $0x1128] sm:$0xff]  ;;  %v3741_v46 = vld [vmem:[%s12860_s7 + $0x1160] sm:$0xff] }
 0x3db   :  { %6629 = vmatprep.subr.bf16.mxu0 %v6628_v15  ;;  %v3794_v15 = vld [vmem:[%s12860_s7 + $0x1308] sm:$0xff]  ;;  %v3804_v30 = vld [vmem:[%s12860_s7 + $0x1358] sm:$0xff]  ;;  %v3811_v17 = vld [vmem:[%s12860_s7 + $0x1390] sm:$0xff] }
 0x3dc   :  { %6791 = vmatpush1.bf16.msra.mxu1 %v6790_v14  ;;  %v3809_v14 = vld [vmem:[%s12860_s7 + $0x1380] sm:$0xff]  ;;  %v6646_v0 = vpack.c.bf16 %v3794_v15, %v3787_v10  ;;  %v3858_v15 = vld [vmem:[%s12860_s7 + $0x1508] sm:$0xff] }
 0x3dd   :  { %6793 = vmatprep.subr.bf16.mxu1 %v6792_v60  ;;  %v3684_v60 = vld [vmem:[%s12860_s7 + $0xf98] sm:$0xff]  ;;  %v6648_v28 = vpack.c.bf16 %v3809_v14, %v3802_v55  ;;  %v6824_v55 = vpack.c.bf16 %v3741_v46, %v3734_v45  ;;  %v3733_v14 = vld [vmem:[%s12860_s7 + $0x1120] sm:$0xff]  ;;  %v3839_v46 = vld [vmem:[%s12860_s7 + $0x1470] sm:$0xff] }
 0x3de   :  { %6631 = vmatpush1.bf16.msra.mxu0 %v6630_v1  ;;  %v3801_v1 = vld [vmem:[%s12860_s7 + $0x1340] sm:$0xff]  ;;  %v6810_v9 = vpack.c.bf16 %v3684_v60, %v3677_v58  ;;  %v3748_v58 = vld [vmem:[%s12860_s7 + $0x1198] sm:$0xff]  ;;  %v3755_v60 = vld [vmem:[%s12860_s7 + $0x11d0] sm:$0xff] }
 0x3df   :  { %6633 = vmatprep.subr.bf16.mxu0 %v6632_v6  ;;  %v3808_v6 = vld [vmem:[%s12860_s7 + $0x1378] sm:$0xff] }
 0x3e0   :  { %6795 = vmatpush1.bf16.msra.mxu1 %v6794_v57  ;;  %v3823_v57 = vld [vmem:[%s12860_s7 + $0x13f0] sm:$0xff]  ;;  %v6650_v59 = vpack.c.bf16 %v3808_v6, %v3801_v1  ;;  %v3754_v6 = vld [vmem:[%s12860_s7 + $0x11c8] sm:$0xff]  ;;  %v3832_v45 = vld [vmem:[%s12860_s7 + $0x1438] sm:$0xff] }
 0x3e1   :  { %6797 = vmatprep.subr.bf16.mxu1 %v6796_v41  ;;  %v3698_v41 = vld [vmem:[%s12860_s7 + $0x1008] sm:$0xff]  ;;  %v6652_v20 = vpack.c.bf16 %v3823_v57, %v3816_v43  ;;  %v3747_v1 = vld [vmem:[%s12860_s7 + $0x1190] sm:$0xff]  ;;  %v3769_v43 = vld [vmem:[%s12860_s7 + $0x1240] sm:$0xff] }
 0x3e2   :  { %6635 = vmatpush1.bf16.msra.mxu0 %v6634_v21  ;;  %v3815_v21 = vld [vmem:[%s12860_s7 + $0x13b0] sm:$0xff]  ;;  %v6814_v24 = vpack.c.bf16 %v3698_v41, %v3691_v13  ;;  %v6830_v57 = vpack.c.bf16 %v3754_v6, %v3747_v1  ;;  %v3761_v13 = vld [vmem:[%s12860_s7 + $0x1200] sm:$0xff]  ;;  %v3768_v41 = vld [vmem:[%s12860_s7 + $0x1238] sm:$0xff] }
 0x3e3   :  { %4331 = vmatmul.mubr.f32.vlgmr.msra.gmra.mrb[18].mxu1 %v11414_v2  ;;  %6637 = vmatprep.subr.bf16.mxu0 %v6636_v23  ;;  %v3822_v23 = vld [vmem:[%s12860_s7 + $0x13e8] sm:$0xff] }
 0x3e4   :  { %6799 = vmatpush1.bf16.msra.mxu1 %v6798_v7  ;;  %v3837_v7 = vld [vmem:[%s12860_s7 + $0x1460] sm:$0xff]  ;;  %v6654_v34 = vpack.c.bf16 %v3822_v23, %v3815_v21  ;;  %v3775_v21 = vld [vmem:[%s12860_s7 + $0x1270] sm:$0xff]  ;;  %v3782_v23 = vld [vmem:[%s12860_s7 + $0x12a8] sm:$0xff] }
 0x3e5   :  { %6801 = vmatprep.subr.bf16.mxu1 %v6800_v16  ;;  %v3712_v16 = vld [vmem:[%s12860_s7 + $0x1078] sm:$0xff]  ;;  %v6656_v36 = vpack.c.bf16 %v3837_v7, %v3830_v25  ;;  %v3797_v25 = vld [vmem:[%s12860_s7 + $0x1320] sm:$0xff]  ;;  %v6838_v7 = vpack.c.bf16 %v3782_v23, %v3775_v21 }
 0x3e6   :  { %6639 = vmatpush1.bf16.msra.mxu0 %v6638_v26  ;;  %v3829_v26 = vld [vmem:[%s12860_s7 + $0x1420] sm:$0xff]  ;;  %v6818_v39 = vpack.c.bf16 %v3712_v16, %v3705_v53  ;;  %v3796_v16 = vld [vmem:[%s12860_s7 + $0x1318] sm:$0xff] }
 0x3e7   :  { %6641 = vmatprep.subr.bf16.mxu0 %v6640_v11  ;;  %v3836_v11 = vld [vmem:[%s12860_s7 + $0x1458] sm:$0xff]  ;;  %v3789_v53 = vld [vmem:[%s12860_s7 + $0x12e0] sm:$0xff] }
 0x3e8   :  { %6803 = vmatpush1.bf16.msra.mxu1 %v6802_v5  ;;  %v3851_v5 = vld [vmem:[%s12860_s7 + $0x14d0] sm:$0xff]  ;;  %v6658_v48 = vpack.c.bf16 %v3836_v11, %v3829_v26  ;;  %v3810_v11 = vld [vmem:[%s12860_s7 + $0x1388] sm:$0xff] }
 0x3e9   :  { %6805 = vmatprep.subr.bf16.mxu1 %v6804_v44  ;;  %v3726_v44 = vld [vmem:[%s12860_s7 + $0x10e8] sm:$0xff]  ;;  %v6660_v19 = vpack.c.bf16 %v3851_v5, %v3844_v37  ;;  %v3803_v26 = vld [vmem:[%s12860_s7 + $0x1350] sm:$0xff]  ;;  %v3825_v37 = vld [vmem:[%s12860_s7 + $0x1400] sm:$0xff] }
 0x3ea   :  { %6643 = vmatpush1.bf16.msra.mxu0 %v6642_v52  ;;  %v3843_v52 = vld [vmem:[%s12860_s7 + $0x1490] sm:$0xff]  ;;  %v6822_v10 = vpack.c.bf16 %v3726_v44, %v3719_v42  ;;  %v6846_v5 = vpack.c.bf16 %v3810_v11, %v3803_v26  ;;  %v3817_v42 = vld [vmem:[%s12860_s7 + $0x13c0] sm:$0xff]  ;;  %v3824_v44 = vld [vmem:[%s12860_s7 + $0x13f8] sm:$0xff] }
 0x3eb   :  { %6645 = vmatprep.subr.bf16.mxu0 %v6644_v38  ;;  %v3850_v38 = vld [vmem:[%s12860_s7 + $0x14c8] sm:$0xff] }
 0x3ec   :  { %6807 = vmatpush1.bf16.msra.mxu1 %v6806_v54  ;;  %v3865_v54 = vld [vmem:[%s12860_s7 + $0x1540] sm:$0xff]  ;;  %v6662_v61 = vpack.c.bf16 %v3850_v38, %v3843_v52  ;;  %v3831_v52 = vld [vmem:[%s12860_s7 + $0x1430] sm:$0xff]  ;;  %v3838_v38 = vld [vmem:[%s12860_s7 + $0x1468] sm:$0xff] }
 0x3ed   :  { %6809 = vmatprep.subr.bf16.mxu1 %v6808_v56  ;;  %v3740_v56 = vld [vmem:[%s12860_s7 + $0x1158] sm:$0xff]  ;;  %v6664_v62 = vpack.c.bf16 %v3865_v54, %v3858_v15  ;;  %v3853_v15 = vld [vmem:[%s12860_s7 + $0x14e0] sm:$0xff]  ;;  %v6854_v54 = vpack.c.bf16 %v3838_v38, %v3831_v52 }
 0x3ee   :  { %6647 = vmatpush1.bf16.msra.mxu0 %v6646_v0  ;;  %v6826_v0 = vpack.c.bf16 %v3740_v56, %v3733_v14  ;;  %v3845_v14 = vld [vmem:[%s12860_s7 + $0x14a0] sm:$0xff]  ;;  %v3852_v56 = vld [vmem:[%s12860_s7 + $0x14d8] sm:$0xff] }
 0x3ef   :  { %6649 = vmatprep.subr.bf16.mxu0 %v6648_v28  ;;  %v6828_v28 = vpack.c.bf16 %v3755_v60, %v3748_v58  ;;  %v3860_v58 = vld [vmem:[%s12860_s7 + $0x1518] sm:$0xff]  ;;  %v3867_v60 = vld [vmem:[%s12860_s7 + $0x1550] sm:$0xff] }
 0x3f0   :  { %6811 = vmatpush1.bf16.msra.mxu1 %v6810_v9  ;;  %v3762_v9 = vld [vmem:[%s12860_s7 + $0x1208] sm:$0xff] }
 0x3f1   :  { %6813 = vmatprep.subr.bf16.mxu1 %v6812_v40  ;;  %v6832_v40 = vpack.c.bf16 %v3769_v43, %v3762_v9 }
 0x3f2   :  { %6651 = vmatpush1.bf16.msra.mxu0 %v6650_v59  ;;  %v6834_v59 = vpack.c.bf16 %v3768_v41, %v3761_v13 }
 0x3f3   :  { %6653 = vmatprep.subr.bf16.mxu0 %v6652_v20  ;;  %v6836_v20 = vpack.c.bf16 %v3783_v18, %v3776_v12 }
 0x3f4   :  { %6815 = vmatpush1.bf16.msra.mxu1 %v6814_v24  ;;  %v3790_v24 = vld [vmem:[%s12860_s7 + $0x12e8] sm:$0xff] }
 0x3f5   :  { %6817 = vmatprep.subr.bf16.mxu1 %v6816_v51  ;;  %v6840_v51 = vpack.c.bf16 %v3797_v25, %v3790_v24 }
 0x3f6   :  { %6655 = vmatpush1.bf16.msra.mxu0 %v6654_v34  ;;  %v6842_v34 = vpack.c.bf16 %v3796_v16, %v3789_v53  ;;  %v3857_v16 = vld [vmem:[%s12860_s7 + $0x1500] sm:$0xff] }
 0x3f7   :  { %6657 = vmatprep.subr.bf16.mxu0 %v6656_v36  ;;  %v6844_v36 = vpack.c.bf16 %v3811_v17, %v3804_v30 }
 0x3f8   :  { %6819 = vmatpush1.bf16.msra.mxu1 %v6818_v39  ;;  %v3818_v39 = vld [vmem:[%s12860_s7 + $0x13c8] sm:$0xff] }
 0x3f9   :  { %6821 = vmatprep.subr.bf16.mxu1 %v6820_v22  ;;  %v6848_v22 = vpack.c.bf16 %v3825_v37, %v3818_v39  ;;  %v3190_v39 = vld [vmem:[%s12860_s7 + $0x28] sm:$0xff] }
 0x3fa   :  { %6659 = vmatpush1.bf16.msra.mxu0 %v6658_v48  ;;  %v6850_v48 = vpack.c.bf16 %v3824_v44, %v3817_v42  ;;  %v3310_v42 = vld [vmem:[%s12860_s7 + $0x3e8] sm:$0xff] }
 0x3fb   :  { %6661 = vmatprep.subr.bf16.mxu0 %v6660_v19  ;;  %v6852_v19 = vpack.c.bf16 %v3839_v46, %v3832_v45 }
 0x3fc   :  { %6823 = vmatpush1.bf16.msra.mxu1 %v6822_v10  ;;  %v3846_v10 = vld [vmem:[%s12860_s7 + $0x14a8] sm:$0xff] }
 0x3fd   :  { %6825 = vmatprep.subr.bf16.mxu1 %v6824_v55  ;;  %v6856_v55 = vpack.c.bf16 %v3853_v15, %v3846_v10  ;;  %v3189_v10 = vld [vmem:[%s12860_s7 + $0x20] sm:$0xff]  ;;  %v3196_v15 = vld [vmem:[%s12860_s7 + $0x58] sm:$0xff] }
 0x3fe   :  { %6663 = vmatpush1.bf16.msra.mxu0 %v6662_v61  ;;  %v6858_v61 = vpack.c.bf16 %v3852_v56, %v3845_v14  ;;  %v3204_v56 = vld [vmem:[%s12860_s7 + $0x98] sm:$0xff] }
 0x3ff   :  { %6665 = vmatprep.subr.bf16.mxu0 %v6664_v62  ;;  %v6860_v62 = vpack.c.bf16 %v3867_v60, %v3860_v58  ;;  %v3211_v58 = vld [vmem:[%s12860_s7 + $0xd0] sm:$0xff]  ;;  %v3317_v60 = vld [vmem:[%s12860_s7 + $0x420] sm:$0xff] }
 0x400   :  { %6827 = vmatpush1.bf16.msra.mxu1 %v6826_v0  ;;  %v7272_v0 = vld [vmem:[%s12861_s6] sm:$0x7f] }
 0x401   :  { %6829 = vmatprep.subr.bf16.mxu1 %v6828_v28  ;;  %v1978_v28 = vrot.slane %v7272_v0, %v9475_v49  ;;  %v1982_v1 = vrot.slane %v7272_v0, %v9375_v47 }
 0x404   :  { %6831 = vmatpush1.bf16.msra.mxu1 %v6830_v57 }
 0x405   :  { %6833 = vmatprep.subr.bf16.mxu1 %v6832_v40 }
 0x408   :  { %6835 = vmatpush1.bf16.msra.mxu1 %v6834_v59 }
 0x409   :  { %6837 = vmatprep.subr.bf16.mxu1 %v6836_v20 }
 0x40c   :  { %6839 = vmatpush1.bf16.msra.mxu1 %v6838_v7 }
 0x40d   :  { %6841 = vmatprep.subr.bf16.mxu1 %v6840_v51 }
 0x410   :  { %6843 = vmatpush1.bf16.msra.mxu1 %v6842_v34  ;;  %v3859_v34 = vld [vmem:[%s12860_s7 + $0x1510] sm:$0xff] }
 0x411   :  { %6845 = vmatprep.subr.bf16.mxu1 %v6844_v36  ;;  %v3866_v36 = vld [vmem:[%s12860_s7 + $0x1548] sm:$0xff] }
 0x412   :  { %v6862_v46 = vpack.c.bf16 %v3866_v36, %v3859_v34  ;;  %v3231_v34 = vld [vmem:[%s12860_s7 + $0x170] sm:$0xff]  ;;  %v3238_v36 = vld [vmem:[%s12860_s7 + $0x1a8] sm:$0xff] }
 0x414   :  { %6847 = vmatpush1.bf16.msra.mxu1 %v6846_v5  ;;  %v3197_v5 = vld [vmem:[%s12860_s7 + $0x60] sm:$0xff] }
 0x415   :  { %6849 = vmatprep.subr.bf16.mxu1 %v6848_v22  ;;  %v3303_v22 = vld [vmem:[%s12860_s7 + $0x3b0] sm:$0xff]  ;;  %v6864_v52 = vpack.c.bf16 %v3197_v5, %v3190_v39  ;;  %v3233_v39 = vld [vmem:[%s12860_s7 + $0x180] sm:$0xff]  ;;  %v3246_v5 = vld [vmem:[%s12860_s7 + $0x1e8] sm:$0xff] }
 0x416   :  { %v7060_v38 = vpack.c.bf16 %v3310_v42, %v3303_v22  ;;  %v3253_v22 = vld [vmem:[%s12860_s7 + $0x220] sm:$0xff]  ;;  %v3359_v42 = vld [vmem:[%s12860_s7 + $0x570] sm:$0xff] }
 0x418   :  { %6851 = vmatpush1.bf16.msra.mxu1 %v6850_v48 }
 0x419   :  { %6853 = vmatprep.subr.bf16.mxu1 %v6852_v19 }
 0x41c   :  { %6855 = vmatpush1.bf16.msra.mxu1 %v6854_v54  ;;  %v3191_v54 = vld [vmem:[%s12860_s7 + $0x30] sm:$0xff] }
 0x41d   :  { %6857 = vmatprep.subr.bf16.mxu1 %v6856_v55  ;;  %v3198_v55 = vld [vmem:[%s12860_s7 + $0x68] sm:$0xff] }
 0x41e   :  { %v7062_v0 = vpack.c.bf16 %v3198_v55, %v3191_v54  ;;  %v3247_v54 = vld [vmem:[%s12860_s7 + $0x1f0] sm:$0xff]  ;;  %v3254_v55 = vld [vmem:[%s12860_s7 + $0x228] sm:$0xff] }
 0x420   :  { %6859 = vmatpush1.bf16.msra.mxu1 %v6858_v61  ;;  %v3324_v61 = vld [vmem:[%s12860_s7 + $0x458] sm:$0xff] }
 0x421   :  { %6861 = vmatprep.subr.bf16.mxu1 %v6860_v62  ;;  %v6866_v62 = vpack.c.bf16 %v3196_v15, %v3189_v10  ;;  %v6880_v10 = vpack.c.bf16 %v3253_v22, %v3246_v5  ;;  %v3309_v5 = vld [vmem:[%s12860_s7 + $0x3e0] sm:$0xff]  ;;  %v3527_v22 = vld [vmem:[%s12860_s7 + $0xab0] sm:$0xff] }
 0x432   :  { %v2844_v6 = vpop.f32.mrb[14].mxu1 }
 0x433   :  { %v7171_v9 = vadd.f32 %v2844_v6, %v1978_v28  ;;  %v2846_v43 = vpop.f32.mrb[15].mxu1  ;;  %v3203_v28 = vld [vmem:[%s12860_s7 + $0x90] sm:$0xff] }
 0x434   :  { %v7172_v57 = vadd.f32 %v2846_v43, %v1982_v1  ;;  %v3210_v1 = vld [vmem:[%s12860_s7 + $0xc8] sm:$0xff]  ;;  %v3212_v43 = vld [vmem:[%s12860_s7 + $0xd8] sm:$0xff] }
 0x435   :  { %v3133_v40 = vmin.f32 %v7171_v9, 0.0  ;;  %vm3168_vm3 = vcmp.gt.f32.partialorder %v7171_v9, 0.0 }
 0x436   :  { %v3134_v13 = vmin.f32 %v7172_v57, 0.0  ;;  %v3125_v41 = vpop.f32.mrb[16].mxu1  ;;  %vm3169_vm4 = vcmp.gt.f32.partialorder %v7172_v57, 0.0 }
 0x437   :  { %v3144_v12 = vmul.f32 1.442695, %v3133_v40  ;;  %v3126_v18 = vadd.f32 %v3125_v41, %v11448_v33  ;;  %v5410_v59 = vpop.f32.mrb[17].mxu1  ;;  %v3864_v33 = vld [vmem:[%s12860_s7 + $0x1538] sm:$0xff]  ;;  %v6868_v40 = vpack.c.bf16 %v3211_v58, %v3204_v56  ;;  %v3225_v41 = vld [vmem:[%s12860_s7 + $0x140] sm:$0xff]  ;;  %v3267_v56 = vld [vmem:[%s12860_s7 + $0x290] sm:$0xff] }
 0x438   :  { %v3146_v20 = vmul.f32 1.442695, %v3134_v13  ;;  %v6666_v45 = vpack.c.bf16 %v3864_v33, %v3857_v16  ;;  %v7064_v13 = vpack.c.bf16 %v3324_v61, %v3317_v60  ;;  %v6870_v59 = vpack.c.bf16 %v3210_v1, %v3203_v28  ;;  %v3345_v16 = vld [vmem:[%s12860_s7 + $0x500] sm:$0xff]  ;;  %v3380_v60 = vld [vmem:[%s12860_s7 + $0x618] sm:$0xff]  ;;  %v3266_v28 = vld [vmem:[%s12860_s7 + $0x288] sm:$0xff] }
 0x439   :  { %7252 = vpow2.f32 %v3144_v12  ;;  %v3135_v21 = vmin.f32 %v3126_v18, 0.0  ;;  %vm3170_vm6 = vcmp.gt.f32.partialorder %v3126_v18, 0.0  ;;  %v3331_v12 = vld [vmem:[%s12860_s7 + $0x490] sm:$0xff]  ;;  %v3373_v58 = vld [vmem:[%s12860_s7 + $0x5e0] sm:$0xff] }
 0x43a   :  { %7254 = vpow2.f32 %v3146_v20 }
 0x43b   :  { %v3148_v23 = vmul.f32 1.442695, %v3135_v21  ;;  %v3217_v21 = vld [vmem:[%s12860_s7 + $0x100] sm:$0xff] }
 0x43d   :  { %7256 = vpow2.f32 %v3148_v23  ;;  %v3224_v23 = vld [vmem:[%s12860_s7 + $0x138] sm:$0xff] }
 0x443   :  { %v7253_v24 = vpop.eup %7252 }
 0x444   :  { %v7255_v25 = vpop.eup %7254  ;;  %v5139_v7 = vadd.f32 -1.0, %v7253_v24 }
 0x445   :  { %v5140_v51 = vadd.f32 -1.0, %v7255_v25 }
 0x446   :  { %v3161_v53 = vmul.f32 1.6732632, %v5139_v7  ;;  %v3219_v7 = vld [vmem:[%s12860_s7 + $0x110] sm:$0xff] }
 0x447   :  { %v7257_v30 = vpop.eup %7256  ;;  %v3162_v17 = vmul.f32 1.6732632, %v5140_v51  ;;  %v3226_v51 = vld [vmem:[%s12860_s7 + $0x148] sm:$0xff] }
 0x448   :  { %v3175_v26 = vsel %vm3168_vm3, %v7171_v9, %v3161_v53  ;;  %v5141_v11 = vadd.f32 -1.0, %v7257_v30  ;;  %v3205_v9 = vld [vmem:[%s12860_s7 + $0xa0] sm:$0xff]  ;;  %v3232_v53 = vld [vmem:[%s12860_s7 + $0x178] sm:$0xff]  ;;  %v7070_v33 = vpack.c.bf16 %v3226_v51, %v3219_v7  ;;  %v3282_v7 = vld [vmem:[%s12860_s7 + $0x308] sm:$0xff] }
 0x449   :  { %v3176_v37 = vsel %vm3169_vm4, %v7172_v57, %v3162_v17  ;;  %v11909_v48 = vmul.f32 1.050701, %v3175_v26  ;;  %v3218_v57 = vld [vmem:[%s12860_s7 + $0x108] sm:$0xff]  ;;  %v7066_v20 = vpack.c.bf16 %v3212_v43, %v3205_v9  ;;  %v3352_v30 = vld [vmem:[%s12860_s7 + $0x538] sm:$0xff]  ;;  %v6874_v17 = vpack.c.bf16 %v3224_v23, %v3217_v21  ;;  %v3261_v43 = vld [vmem:[%s12860_s7 + $0x260] sm:$0xff] }
 0x44a   :  { %v11907_v44 = vmul.f32 1.050701, %v3176_v37  ;;  %v3163_v19 = vmul.f32 1.6732632, %v5141_v11  ;;  %v6872_v24 = vpack.c.bf16 %v3225_v41, %v3218_v57  ;;  %v7072_v11 = vpack.c.bf16 %v3352_v30, %v3345_v16  ;;  %v3240_v37 = vld [vmem:[%s12860_s7 + $0x1b8] sm:$0xff]  ;;  %v3387_v41 = vld [vmem:[%s12860_s7 + $0x650] sm:$0xff] }
 0x44b   :  { %v7080_v9 = vpack.c.bf16 %v3380_v60, %v3373_v58  ;;  %v3268_v57 = vld [vmem:[%s12860_s7 + $0x298] sm:$0xff] }
 0x44c   :  { %4117 = vmatprep.mubr.f32.mxu0 %v11907_v44  ;;  %4401 = vmatprep.mubr.f32.mxu1 %v11907_v44  ;;  %v3177_v14 = vsel %vm3170_vm6, %v3126_v18, %v3163_v19  ;;  %v3338_v18 = vld [vmem:[%s12860_s7 + $0x4c8] sm:$0xff]  ;;  %v7074_v19 = vpack.c.bf16 %v3240_v37, %v3233_v39  ;;  %v3280_v21 = vld [vmem:[%s12860_s7 + $0x2f8] sm:$0xff] }
 0x44d   :  { %4118 = vmatmul.mubr.f32.vlgmr.msra.gmra.mrb[12].mxu0 %v11909_v48  ;;  %4402 = vmatmul.mubr.f32.vlgmr.msra.gmra.mrb[18].mxu1 %v11909_v48  ;;  %v11947_v6 = vmul.f32 1.050701, %v3177_v14  ;;  %v7068_v25 = vpack.c.bf16 %v3338_v18, %v3331_v12  ;;  %v3260_v14 = vld [vmem:[%s12860_s7 + $0x258] sm:$0xff]  ;;  %v3394_v12 = vld [vmem:[%s12860_s7 + $0x688] sm:$0xff] }
 0x44e   :  { %6667 = vmatpush1.bf16.msra.mxu0 %v6666_v45  ;;  %6863 = vmatpush1.bf16.msra.mxu1 %v6862_v46  ;;  %v3366_v45 = vld [vmem:[%s12860_s7 + $0x5a8] sm:$0xff]  ;;  %v6878_v46 = vpack.c.bf16 %v3238_v36, %v3231_v34  ;;  %v6884_v1 = vpack.c.bf16 %v3267_v56, %v3260_v14  ;;  %v3288_v51 = vld [vmem:[%s12860_s7 + $0x338] sm:$0xff]  ;;  %v3323_v14 = vld [vmem:[%s12860_s7 + $0x450] sm:$0xff] }
 0x44f   :  { %4188 = vmatprep.mubr.f32.mxu0 %v7273_v3  ;;  %4472 = vmatprep.mubr.f32.mxu1 %v7273_v3  ;;  %v7076_v15 = vpack.c.bf16 %v3366_v45, %v3359_v42  ;;  %v3408_v16 = vld [vmem:[%s12860_s7 + $0x6f8] sm:$0xff]  ;;  %v3294_v34 = vld [vmem:[%s12860_s7 + $0x368] sm:$0xff]  ;;  %v3541_v56 = vld [vmem:[%s12860_s7 + $0xb20] sm:$0xff] }
 0x450   :  { %6865 = vmatprep.subr.bf16.mxu0 %v6864_v52  ;;  %7061 = vmatprep.subr.bf16.mxu1 %v7060_v38  ;;  %v3245_v52 = vld [vmem:[%s12860_s7 + $0x1e0] sm:$0xff]  ;;  %v3252_v38 = vld [vmem:[%s12860_s7 + $0x218] sm:$0xff]  ;;  %v3302_v37 = vld [vmem:[%s12860_s7 + $0x3a8] sm:$0xff] }
 0x451   :  { %v6882_v61 = vpack.c.bf16 %v3252_v38, %v3245_v52  ;;  %v3296_v39 = vld [vmem:[%s12860_s7 + $0x378] sm:$0xff]  ;;  %v3534_v42 = vld [vmem:[%s12860_s7 + $0xae8] sm:$0xff]  ;;  %v6896_v52 = vpack.c.bf16 %v3309_v5, %v3302_v37  ;;  %v3365_v37 = vld [vmem:[%s12860_s7 + $0x5a0] sm:$0xff] }
 0x452   :  { %v7092_v38 = vpack.c.bf16 %v3534_v42, %v3527_v22  ;;  %v3548_v58 = vld [vmem:[%s12860_s7 + $0xb58] sm:$0xff]  ;;  %v3583_v5 = vld [vmem:[%s12860_s7 + $0xc70] sm:$0xff]  ;;  %v3590_v22 = vld [vmem:[%s12860_s7 + $0xca8] sm:$0xff] }
 0x455   :  { %5142 = vmatmul.mubr.msk.f32.vlgmr.msra.gmra.mrb[12].mxu0 %vm645_vm5, %v11947_v6  ;;  %5143 = vmatmul.mubr.msk.f32.vlgmr.msra.gmra.mrb[18].mxu1 %vm645_vm5, %v11947_v6 }
 0x456   :  { %6867 = vmatpush1.bf16.msra.mxu0 %v6866_v62  ;;  %7063 = vmatpush3.bf16.msra.mxu1 %v7062_v0  ;;  %v7078_v62 = vpack.c.bf16 %v3254_v55, %v3247_v54  ;;  %v3259_v0 = vld [vmem:[%s12860_s7 + $0x250] sm:$0xff]  ;;  %v3422_v54 = vld [vmem:[%s12860_s7 + $0x768] sm:$0xff]  ;;  %v3316_v55 = vld [vmem:[%s12860_s7 + $0x418] sm:$0xff] }
 0x457   :  { %4543 = vmatprep.mubr.f32.mxu0 %v11000_v4  ;;  %4827 = vmatprep.mubr.f32.mxu1 %v11000_v4  ;;  %v3239_v4 = vld [vmem:[%s12860_s7 + $0x1b0] sm:$0xff]  ;;  %v6886_v18 = vpack.c.bf16 %v3266_v28, %v3259_v0  ;;  %v3322_v0 = vld [vmem:[%s12860_s7 + $0x448] sm:$0xff]  ;;  %v6900_v28 = vpack.c.bf16 %v3323_v14, %v3316_v55  ;;  %v3597_v14 = vld [vmem:[%s12860_s7 + $0xce0] sm:$0xff] }
 0x458   :  { %6869 = vmatprep.subr.bf16.mxu0 %v6868_v40  ;;  %7065 = vmatprep.subr.bf16.mxu1 %v7064_v13  ;;  %v6876_v26 = vpack.c.bf16 %v3239_v4, %v3232_v53  ;;  %v3274_v40 = vld [vmem:[%s12860_s7 + $0x2c8] sm:$0xff]  ;;  %v3281_v13 = vld [vmem:[%s12860_s7 + $0x300] sm:$0xff]  ;;  %v3295_v53 = vld [vmem:[%s12860_s7 + $0x370] sm:$0xff] }
 0x459   :  { %v6888_v23 = vpack.c.bf16 %v3281_v13, %v3274_v40  ;;  %v3401_v4 = vld [vmem:[%s12860_s7 + $0x6c0] sm:$0xff]  ;;  %v6892_v36 = vpack.c.bf16 %v3295_v53, %v3288_v51  ;;  %v3555_v13 = vld [vmem:[%s12860_s7 + $0xb90] sm:$0xff] }
 0x45a   :  { %6871 = vmatpush1.bf16.msra.mxu0 %v6870_v59  ;;  %7067 = vmatpush3.bf16.msra.mxu1 %v7066_v20  ;;  %v7082_v59 = vpack.c.bf16 %v3268_v57, %v3261_v43  ;;  %v3273_v20 = vld [vmem:[%s12860_s7 + $0x2c0] sm:$0xff]  ;;  %v3330_v43 = vld [vmem:[%s12860_s7 + $0x488] sm:$0xff]  ;;  %v7096_v57 = vpack.c.bf16 %v3548_v58, %v3541_v56  ;;  %v3351_v51 = vld [vmem:[%s12860_s7 + $0x530] sm:$0xff] }
 0x45b   :  { %6873 = vmatprep.subr.bf16.mxu0 %v6872_v24  ;;  %7069 = vmatprep.subr.bf16.mxu1 %v7068_v25  ;;  %v7084_v24 = vpack.c.bf16 %v3394_v12, %v3387_v41  ;;  %v3275_v25 = vld [vmem:[%s12860_s7 + $0x2d0] sm:$0xff]  ;;  %v6890_v30 = vpack.c.bf16 %v3280_v21, %v3273_v20  ;;  %v3337_v40 = vld [vmem:[%s12860_s7 + $0x4c0] sm:$0xff]  ;;  %v3562_v41 = vld [vmem:[%s12860_s7 + $0xbc8] sm:$0xff] }
 0x45c   :  { %v3336_v20 = vld [vmem:[%s12860_s7 + $0x4b8] sm:$0xff]  ;;  %v6904_v21 = vpack.c.bf16 %v3337_v40, %v3330_v43  ;;  %v3569_v53 = vld [vmem:[%s12860_s7 + $0xc00] sm:$0xff]  ;;  %v3379_v55 = vld [vmem:[%s12860_s7 + $0x610] sm:$0xff] }
 0x45d   :  { %v3604_v56 = vld [vmem:[%s12860_s7 + $0xd18] sm:$0xff]  ;;  %v3386_v43 = vld [vmem:[%s12860_s7 + $0x648] sm:$0xff]  ;;  %v3611_v40 = vld [vmem:[%s12860_s7 + $0xd50] sm:$0xff] }
 0x45e   :  { %6875 = vmatpush1.bf16.msra.mxu0 %v6874_v17  ;;  %7071 = vmatpush3.bf16.msra.mxu1 %v7070_v33  ;;  %v7086_v17 = vpack.c.bf16 %v3282_v7, %v3275_v25  ;;  %v3287_v33 = vld [vmem:[%s12860_s7 + $0x330] sm:$0xff]  ;;  %v3450_v25 = vld [vmem:[%s12860_s7 + $0x848] sm:$0xff]  ;;  %v3344_v7 = vld [vmem:[%s12860_s7 + $0x4f8] sm:$0xff] }
 0x45f   :  { %6877 = vmatprep.subr.bf16.mxu0 %v6876_v26  ;;  %7073 = vmatprep.subr.bf16.mxu1 %v7072_v11  ;;  %v7088_v26 = vpack.c.bf16 %v3408_v16, %v3401_v4  ;;  %v3289_v11 = vld [vmem:[%s12860_s7 + $0x340] sm:$0xff]  ;;  %v6894_v45 = vpack.c.bf16 %v3294_v34, %v3287_v33  ;;  %v3576_v4 = vld [vmem:[%s12860_s7 + $0xc38] sm:$0xff]  ;;  %v3350_v33 = vld [vmem:[%s12860_s7 + $0x528] sm:$0xff]  ;;  %v6908_v34 = vpack.c.bf16 %v3351_v51, %v3344_v7 }
 0x460   :  { %v3407_v7 = vld [vmem:[%s12860_s7 + $0x6f0] sm:$0xff]  ;;  %v3625_v51 = vld [vmem:[%s12860_s7 + $0xdc0] sm:$0xff] }
 0x462   :  { %6879 = vmatpush1.bf16.msra.mxu0 %v6878_v46  ;;  %7075 = vmatpush3.bf16.msra.mxu1 %v7074_v19  ;;  %v7090_v46 = vpack.c.bf16 %v3296_v39, %v3289_v11  ;;  %v3301_v19 = vld [vmem:[%s12860_s7 + $0x3a0] sm:$0xff]  ;;  %v3464_v11 = vld [vmem:[%s12860_s7 + $0x8b8] sm:$0xff]  ;;  %v3358_v39 = vld [vmem:[%s12860_s7 + $0x568] sm:$0xff] }
 0x463   :  { %6881 = vmatprep.subr.bf16.mxu0 %v6880_v10  ;;  %7077 = vmatprep.subr.bf16.mxu1 %v7076_v15  ;;  %v3308_v10 = vld [vmem:[%s12860_s7 + $0x3d8] sm:$0xff]  ;;  %v3415_v15 = vld [vmem:[%s12860_s7 + $0x730] sm:$0xff] }
 0x464   :  { %v6898_v60 = vpack.c.bf16 %v3308_v10, %v3301_v19  ;;  %v3364_v19 = vld [vmem:[%s12860_s7 + $0x598] sm:$0xff]  ;;  %v3471_v10 = vld [vmem:[%s12860_s7 + $0x8f0] sm:$0xff] }
 0x466   :  { %6883 = vmatpush1.bf16.msra.mxu0 %v6882_v61  ;;  %7079 = vmatpush3.bf16.msra.mxu1 %v7078_v62  ;;  %v7094_v61 = vpack.c.bf16 %v3422_v54, %v3415_v15  ;;  %v3315_v62 = vld [vmem:[%s12860_s7 + $0x410] sm:$0xff]  ;;  %v3478_v15 = vld [vmem:[%s12860_s7 + $0x928] sm:$0xff]  ;;  %v3372_v54 = vld [vmem:[%s12860_s7 + $0x5d8] sm:$0xff] }
 0x467   :  { %6885 = vmatprep.subr.bf16.mxu0 %v6884_v1  ;;  %7081 = vmatprep.subr.bf16.mxu1 %v7080_v9  ;;  %v3429_v1 = vld [vmem:[%s12860_s7 + $0x7a0] sm:$0xff]  ;;  %v3436_v9 = vld [vmem:[%s12860_s7 + $0x7d8] sm:$0xff]  ;;  %v6902_v12 = vpack.c.bf16 %v3322_v0, %v3315_v62  ;;  %v3378_v62 = vld [vmem:[%s12860_s7 + $0x608] sm:$0xff]  ;;  %v6916_v0 = vpack.c.bf16 %v3379_v55, %v3372_v54 }
 0x468   :  { %v3435_v54 = vld [vmem:[%s12860_s7 + $0x7d0] sm:$0xff]  ;;  %v3765_v55 = vld [vmem:[%s12860_s7 + $0x1220] sm:$0xff] }
 0x46a   :  { %6887 = vmatpush1.bf16.msra.mxu0 %v6886_v18  ;;  %7083 = vmatpush3.bf16.msra.mxu1 %v7082_v59  ;;  %v7098_v18 = vpack.c.bf16 %v3436_v9, %v3429_v1  ;;  %v3329_v59 = vld [vmem:[%s12860_s7 + $0x480] sm:$0xff]  ;;  %v3492_v9 = vld [vmem:[%s12860_s7 + $0x998] sm:$0xff] }
 0x46b   :  { %6889 = vmatprep.subr.bf16.mxu0 %v6888_v23  ;;  %7085 = vmatprep.subr.bf16.mxu1 %v7084_v24  ;;  %v7100_v23 = vpack.c.bf16 %v3562_v41, %v3555_v13  ;;  %v3443_v24 = vld [vmem:[%s12860_s7 + $0x810] sm:$0xff]  ;;  %v6906_v16 = vpack.c.bf16 %v3336_v20, %v3329_v59  ;;  %v3485_v1 = vld [vmem:[%s12860_s7 + $0x960] sm:$0xff]  ;;  %v3618_v13 = vld [vmem:[%s12860_s7 + $0xd88] sm:$0xff] }
 0x46c   :  { %v3392_v59 = vld [vmem:[%s12860_s7 + $0x678] sm:$0xff] }
 0x46e   :  { %6891 = vmatpush1.bf16.msra.mxu0 %v6890_v30  ;;  %7087 = vmatpush3.bf16.msra.mxu1 %v7086_v17  ;;  %v7102_v30 = vpack.c.bf16 %v3450_v25, %v3443_v24  ;;  %v3343_v17 = vld [vmem:[%s12860_s7 + $0x4f0] sm:$0xff]  ;;  %v3506_v24 = vld [vmem:[%s12860_s7 + $0xa08] sm:$0xff]  ;;  %v3400_v25 = vld [vmem:[%s12860_s7 + $0x6b8] sm:$0xff] }
 0x46f   :  { %6893 = vmatprep.subr.bf16.mxu0 %v6892_v36  ;;  %7089 = vmatprep.subr.bf16.mxu1 %v7088_v26  ;;  %v7104_v36 = vpack.c.bf16 %v3576_v4, %v3569_v53  ;;  %v3457_v26 = vld [vmem:[%s12860_s7 + $0x880] sm:$0xff]  ;;  %v6910_v42 = vpack.c.bf16 %v3350_v33, %v3343_v17  ;;  %v3632_v53 = vld [vmem:[%s12860_s7 + $0xdf8] sm:$0xff]  ;;  %v3406_v17 = vld [vmem:[%s12860_s7 + $0x6e8] sm:$0xff]  ;;  %v6924_v33 = vpack.c.bf16 %v3407_v7, %v3400_v25 }
 0x470   :  { %v3800_v25 = vld [vmem:[%s12860_s7 + $0x1338] sm:$0xff] }
 0x472   :  { %6895 = vmatpush1.bf16.msra.mxu0 %v6894_v45  ;;  %7091 = vmatpush3.bf16.msra.mxu1 %v7090_v46  ;;  %v7106_v45 = vpack.c.bf16 %v3464_v11, %v3457_v26  ;;  %v3357_v46 = vld [vmem:[%s12860_s7 + $0x560] sm:$0xff]  ;;  %v3520_v26 = vld [vmem:[%s12860_s7 + $0xa78] sm:$0xff]  ;;  %v3414_v11 = vld [vmem:[%s12860_s7 + $0x728] sm:$0xff] }
 0x473   :  { %6897 = vmatprep.subr.bf16.mxu0 %v6896_v52  ;;  %7093 = vmatprep.subr.bf16.mxu1 %v7092_v38  ;;  %v6912_v52 = vpack.c.bf16 %v3365_v37, %v3358_v39  ;;  %v7108_v38 = vpack.c.bf16 %v3590_v22, %v3583_v5  ;;  %v6914_v58 = vpack.c.bf16 %v3364_v19, %v3357_v46  ;;  %v3421_v39 = vld [vmem:[%s12860_s7 + $0x760] sm:$0xff]  ;;  %v3751_v37 = vld [vmem:[%s12860_s7 + $0x11b0] sm:$0xff]  ;;  %v3758_v5 = vld [vmem:[%s12860_s7 + $0x11e8] sm:$0xff] }
 0x474   :  { %v7124_v46 = vpack.c.bf16 %v3758_v5, %v3751_v37  ;;  %v3413_v19 = vld [vmem:[%s12860_s7 + $0x720] sm:$0xff] }
 0x475   :  { %4828 = vmatmul.mubr.f32.vlgmr.msra.gmra.mrb[20].mxu1 %v11011_v8 }
 0x476   :  { %6899 = vmatpush1.bf16.msra.mxu0 %v6898_v60  ;;  %7095 = vmatpush3.bf16.msra.mxu1 %v7094_v61  ;;  %v7110_v60 = vpack.c.bf16 %v3478_v15, %v3471_v10  ;;  %v3371_v61 = vld [vmem:[%s12860_s7 + $0x5d0] sm:$0xff]  ;;  %v3646_v10 = vld [vmem:[%s12860_s7 + $0xe68] sm:$0xff]  ;;  %v3428_v15 = vld [vmem:[%s12860_s7 + $0x798] sm:$0xff] }
 0x477   :  { %4897 = vmatprep.mubr.f32.mxu1 %v11035_v27  ;;  %6901 = vmatprep.subr.bf16.mxu0 %v6900_v28  ;;  %v7112_v28 = vpack.c.bf16 %v3604_v56, %v3597_v14  ;;  %v6918_v41 = vpack.c.bf16 %v3378_v62, %v3371_v61  ;;  %v3772_v14 = vld [vmem:[%s12860_s7 + $0x1258] sm:$0xff]  ;;  %v3434_v61 = vld [vmem:[%s12860_s7 + $0x7c8] sm:$0xff]  ;;  %v3653_v62 = vld [vmem:[%s12860_s7 + $0xea0] sm:$0xff] }
 0x478   :  { %7097 = vmatprep.subr.bf16.mxu1 %v7096_v57  ;;  %v3393_v57 = vld [vmem:[%s12860_s7 + $0x680] sm:$0xff] }
 0x479   :  { %v6920_v20 = vpack.c.bf16 %v3393_v57, %v3386_v43  ;;  %v3449_v43 = vld [vmem:[%s12860_s7 + $0x840] sm:$0xff]  ;;  %v3779_v57 = vld [vmem:[%s12860_s7 + $0x1290] sm:$0xff] }
 0x47a   :  { %6903 = vmatpush1.bf16.msra.mxu0 %v6902_v12  ;;  %7099 = vmatpush3.bf16.msra.mxu1 %v7098_v18  ;;  %v7114_v12 = vpack.c.bf16 %v3492_v9, %v3485_v1  ;;  %v3385_v18 = vld [vmem:[%s12860_s7 + $0x640] sm:$0xff]  ;;  %v3660_v1 = vld [vmem:[%s12860_s7 + $0xed8] sm:$0xff]  ;;  %v3442_v9 = vld [vmem:[%s12860_s7 + $0x808] sm:$0xff] }
 0x47b   :  { %6905 = vmatprep.subr.bf16.mxu0 %v6904_v21  ;;  %7101 = vmatprep.subr.bf16.mxu1 %v7100_v23  ;;  %v7116_v21 = vpack.c.bf16 %v3618_v13, %v3611_v40  ;;  %v3499_v23 = vld [vmem:[%s12860_s7 + $0x9d0] sm:$0xff]  ;;  %v6922_v4 = vpack.c.bf16 %v3392_v59, %v3385_v18  ;;  %v3786_v40 = vld [vmem:[%s12860_s7 + $0x12c8] sm:$0xff]  ;;  %v3448_v18 = vld [vmem:[%s12860_s7 + $0x838] sm:$0xff] }
 0x47c   :  { %v3667_v59 = vld [vmem:[%s12860_s7 + $0xf10] sm:$0xff] }
 0x47e   :  { %6907 = vmatpush1.bf16.msra.mxu0 %v6906_v16  ;;  %7103 = vmatpush3.bf16.msra.mxu1 %v7102_v30  ;;  %v7118_v16 = vpack.c.bf16 %v3506_v24, %v3499_v23  ;;  %v3399_v30 = vld [vmem:[%s12860_s7 + $0x6b0] sm:$0xff]  ;;  %v3793_v24 = vld [vmem:[%s12860_s7 + $0x1300] sm:$0xff] }
 0x47f   :  { %6909 = vmatprep.subr.bf16.mxu0 %v6908_v34  ;;  %7105 = vmatprep.subr.bf16.mxu1 %v7104_v36  ;;  %v7120_v34 = vpack.c.bf16 %v3632_v53, %v3625_v51  ;;  %v3513_v36 = vld [vmem:[%s12860_s7 + $0xa40] sm:$0xff]  ;;  %v6926_v22 = vpack.c.bf16 %v3406_v17, %v3399_v30  ;;  %v3463_v23 = vld [vmem:[%s12860_s7 + $0x8b0] sm:$0xff]  ;;  %v7136_v17 = vpack.c.bf16 %v3800_v25, %v3793_v24 }
 0x480   :  { %v3681_v30 = vld [vmem:[%s12860_s7 + $0xf80] sm:$0xff] }
 0x482   :  { %6911 = vmatpush1.bf16.msra.mxu0 %v6910_v42  ;;  %7107 = vmatpush3.bf16.msra.mxu1 %v7106_v45  ;;  %v7122_v42 = vpack.c.bf16 %v3520_v26, %v3513_v36  ;;  %v6928_v45 = vpack.c.bf16 %v3421_v39, %v3414_v11  ;;  %v3477_v36 = vld [vmem:[%s12860_s7 + $0x920] sm:$0xff]  ;;  %v3807_v26 = vld [vmem:[%s12860_s7 + $0x1370] sm:$0xff]  ;;  %v3814_v11 = vld [vmem:[%s12860_s7 + $0x13a8] sm:$0xff] }
 0x483   :  { %6913 = vmatprep.subr.bf16.mxu0 %v6912_v52  ;;  %7109 = vmatprep.subr.bf16.mxu1 %v7108_v38  ;;  %v3420_v52 = vld [vmem:[%s12860_s7 + $0x758] sm:$0xff]  ;;  %v3639_v38 = vld [vmem:[%s12860_s7 + $0xe30] sm:$0xff] }
 0x484   :  { %v6930_v56 = vpack.c.bf16 %v3420_v52, %v3413_v19  ;;  %v3702_v19 = vld [vmem:[%s12860_s7 + $0x1028] sm:$0xff]  ;;  %v3484_v52 = vld [vmem:[%s12860_s7 + $0x958] sm:$0xff] }
 0x486   :  { %6915 = vmatpush1.bf16.msra.mxu0 %v6914_v58  ;;  %7111 = vmatpush3.bf16.msra.mxu1 %v7110_v60  ;;  %v7126_v58 = vpack.c.bf16 %v3646_v10, %v3639_v38  ;;  %v3427_v60 = vld [vmem:[%s12860_s7 + $0x790] sm:$0xff]  ;;  %v3821_v10 = vld [vmem:[%s12860_s7 + $0x13e0] sm:$0xff] }
 0x487   :  { %6917 = vmatprep.subr.bf16.mxu0 %v6916_v0  ;;  %7113 = vmatprep.subr.bf16.mxu1 %v7112_v28  ;;  %v6932_v0 = vpack.c.bf16 %v3435_v54, %v3428_v15  ;;  %v7128_v28 = vpack.c.bf16 %v3772_v14, %v3765_v55  ;;  %v6934_v13 = vpack.c.bf16 %v3434_v61, %v3427_v60  ;;  %v3491_v38 = vld [vmem:[%s12860_s7 + $0x990] sm:$0xff]  ;;  %v3828_v15 = vld [vmem:[%s12860_s7 + $0x1418] sm:$0xff]  ;;  %v3709_v60 = vld [vmem:[%s12860_s7 + $0x1060] sm:$0xff] }
 0x488   :  { %v6948_v14 = vpack.c.bf16 %v3491_v38, %v3484_v52  ;;  %v7144_v61 = vpack.c.bf16 %v3828_v15, %v3821_v10  ;;  %v3554_v38 = vld [vmem:[%s12860_s7 + $0xb88] sm:$0xff]  ;;  %v3561_v10 = vld [vmem:[%s12860_s7 + $0xbc0] sm:$0xff] }
 0x48a   :  { %6919 = vmatpush1.bf16.msra.mxu0 %v6918_v41  ;;  %7115 = vmatpush3.bf16.msra.mxu1 %v7114_v12  ;;  %v7130_v41 = vpack.c.bf16 %v3660_v1, %v3653_v62  ;;  %v6936_v12 = vpack.c.bf16 %v3449_v43, %v3442_v9  ;;  %v3716_v62 = vld [vmem:[%s12860_s7 + $0x1098] sm:$0xff]  ;;  %v3835_v1 = vld [vmem:[%s12860_s7 + $0x1450] sm:$0xff]  ;;  %v3842_v9 = vld [vmem:[%s12860_s7 + $0x1488] sm:$0xff] }
 0x48b   :  { %6921 = vmatprep.subr.bf16.mxu0 %v6920_v20  ;;  %7117 = vmatprep.subr.bf16.mxu1 %v7116_v21  ;;  %v3674_v20 = vld [vmem:[%s12860_s7 + $0xf48] sm:$0xff]  ;;  %v3456_v21 = vld [vmem:[%s12860_s7 + $0x878] sm:$0xff] }
 0x48c   :  { %v7134_v51 = vpack.c.bf16 %v3674_v20, %v3667_v59  ;;  %v6940_v53 = vpack.c.bf16 %v3463_v23, %v3456_v21  ;;  %v3512_v59 = vld [vmem:[%s12860_s7 + $0xa38] sm:$0xff]  ;;  %v3849_v20 = vld [vmem:[%s12860_s7 + $0x14c0] sm:$0xff] }
 0x48d   :  { %v3856_v21 = vld [vmem:[%s12860_s7 + $0x14f8] sm:$0xff] }
 0x48e   :  { %6923 = vmatpush1.bf16.msra.mxu0 %v6922_v4  ;;  %7119 = vmatpush3.bf16.msra.mxu1 %v7118_v16  ;;  %v3455_v4 = vld [vmem:[%s12860_s7 + $0x870] sm:$0xff]  ;;  %v3462_v16 = vld [vmem:[%s12860_s7 + $0x8a8] sm:$0xff] }
 0x48f   :  { %6925 = vmatprep.subr.bf16.mxu0 %v6924_v33  ;;  %7121 = vmatprep.subr.bf16.mxu1 %v7120_v34  ;;  %v3688_v33 = vld [vmem:[%s12860_s7 + $0xfb8] sm:$0xff]  ;;  %v3470_v34 = vld [vmem:[%s12860_s7 + $0x8e8] sm:$0xff]  ;;  %v6942_v39 = vpack.c.bf16 %v3462_v16, %v3455_v4  ;;  %v7152_v4 = vpack.c.bf16 %v3856_v21, %v3849_v20 }
 0x490   :  { %v7138_v37 = vpack.c.bf16 %v3688_v33, %v3681_v30  ;;  %v6944_v5 = vpack.c.bf16 %v3477_v36, %v3470_v34  ;;  %v3744_v16 = vld [vmem:[%s12860_s7 + $0x1178] sm:$0xff]  ;;  %v3526_v30 = vld [vmem:[%s12860_s7 + $0xaa8] sm:$0xff] }
 0x492   :  { %6927 = vmatpush1.bf16.msra.mxu0 %v6926_v22  ;;  %7123 = vmatpush3.bf16.msra.mxu1 %v7122_v42  ;;  %v3469_v22 = vld [vmem:[%s12860_s7 + $0x8e0] sm:$0xff]  ;;  %v3476_v42 = vld [vmem:[%s12860_s7 + $0x918] sm:$0xff] }
 0x493   :  { %6929 = vmatprep.subr.bf16.mxu0 %v6928_v45  ;;  %7125 = vmatprep.subr.bf16.mxu1 %v7124_v46  ;;  %v3695_v45 = vld [vmem:[%s12860_s7 + $0xff0] sm:$0xff]  ;;  %v7140_v46 = vpack.c.bf16 %v3814_v11, %v3807_v26  ;;  %v6946_v54 = vpack.c.bf16 %v3476_v42, %v3469_v22  ;;  %v3525_v26 = vld [vmem:[%s12860_s7 + $0xaa0] sm:$0xff]  ;;  %v3532_v11 = vld [vmem:[%s12860_s7 + $0xad8] sm:$0xff] }
 0x494   :  { %v7142_v55 = vpack.c.bf16 %v3702_v19, %v3695_v45  ;;  %v3547_v22 = vld [vmem:[%s12860_s7 + $0xb50] sm:$0xff]  ;;  %v6962_v42 = vpack.c.bf16 %v3532_v11, %v3525_v26  ;;  %v3546_v19 = vld [vmem:[%s12860_s7 + $0xb48] sm:$0xff]  ;;  %v3644_v26 = vld [vmem:[%s12860_s7 + $0xe58] sm:$0xff] }
 0x495   :  { %4544 = vmatmul.mubr.f32.vlgmr.msra.gmra.mrb[14].mxu0 %v11011_v8  ;;  %4898 = vmatmul.mubr.f32.vlgmr.msra.gmra.mrb[22].mxu1 %v11414_v2  ;;  %v3441_v8 = vld [vmem:[%s12860_s7 + $0x800] sm:$0xff]  ;;  %v3652_v11 = vld [vmem:[%s12860_s7 + $0xe98] sm:$0xff] }
 0x496   :  { %6931 = vmatpush1.bf16.msra.mxu0 %v6930_v56  ;;  %4614 = vmatprep.mubr.f32.mxu0 %v11035_v27  ;;  %v7132_v27 = vpack.c.bf16 %v3786_v40, %v3779_v57  ;;  %v6938_v7 = vpack.c.bf16 %v3448_v18, %v3441_v8  ;;  %v3483_v56 = vld [vmem:[%s12860_s7 + $0x950] sm:$0xff]  ;;  %v7146_v57 = vpack.c.bf16 %v3716_v62, %v3709_v60  ;;  %v3730_v18 = vld [vmem:[%s12860_s7 + $0x1108] sm:$0xff] }
 0x497   :  { %7127 = vmatpush3.bf16.msra.mxu1 %v7126_v58  ;;  %4967 = vmatprep.mubr.f32.mxu1 %v11907_v44  ;;  %v3490_v58 = vld [vmem:[%s12860_s7 + $0x988] sm:$0xff]  ;;  %v7148_v8 = vpack.c.bf16 %v3842_v9, %v3835_v1 }
 0x498   :  { %6933 = vmatprep.subr.bf16.mxu0 %v6932_v0  ;;  %7129 = vmatprep.subr.bf16.mxu1 %v7128_v28  ;;  %v3498_v0 = vld [vmem:[%s12860_s7 + $0x9c8] sm:$0xff]  ;;  %v3505_v28 = vld [vmem:[%s12860_s7 + $0xa00] sm:$0xff]  ;;  %v6950_v43 = vpack.c.bf16 %v3490_v58, %v3483_v56  ;;  %v3575_v56 = vld [vmem:[%s12860_s7 + $0xc30] sm:$0xff] }
 0x499   :  { %v6952_v40 = vpack.c.bf16 %v3505_v28, %v3498_v0  ;;  %v3574_v62 = vld [vmem:[%s12860_s7 + $0xc28] sm:$0xff]  ;;  %v3589_v28 = vld [vmem:[%s12860_s7 + $0xca0] sm:$0xff] }
 0x49a   :  { %6935 = vmatpush1.bf16.msra.mxu0 %v6934_v13  ;;  %v3497_v13 = vld [vmem:[%s12860_s7 + $0x9c0] sm:$0xff]  ;;  %v3582_v0 = vld [vmem:[%s12860_s7 + $0xc68] sm:$0xff] }
 0x49b   :  { %7131 = vmatpush3.bf16.msra.mxu1 %v7130_v41  ;;  %6937 = vmatprep.subr.bf16.mxu0 %v6936_v12  ;;  %v3504_v41 = vld [vmem:[%s12860_s7 + $0x9f8] sm:$0xff]  ;;  %v3723_v12 = vld [vmem:[%s12860_s7 + $0x10d0] sm:$0xff]  ;;  %v6976_v9 = vpack.c.bf16 %v3589_v28, %v3582_v0 }
 0x49c   :  { %7133 = vmatprep.subr.bf16.mxu1 %v7132_v27  ;;  %v3519_v27 = vld [vmem:[%s12860_s7 + $0xa70] sm:$0xff]  ;;  %v6954_v23 = vpack.c.bf16 %v3504_v41, %v3497_v13  ;;  %v7150_v24 = vpack.c.bf16 %v3730_v18, %v3723_v12  ;;  %v3602_v18 = vld [vmem:[%s12860_s7 + $0xd08] sm:$0xff]  ;;  %v3708_v0 = vld [vmem:[%s12860_s7 + $0x1058] sm:$0xff] }
 0x49d   :  { %v6956_v25 = vpack.c.bf16 %v3519_v27, %v3512_v59  ;;  %v3603_v13 = vld [vmem:[%s12860_s7 + $0xd10] sm:$0xff]  ;;  %v3610_v59 = vld [vmem:[%s12860_s7 + $0xd48] sm:$0xff]  ;;  %v3617_v27 = vld [vmem:[%s12860_s7 + $0xd80] sm:$0xff] }
 0x49e   :  { %6939 = vmatpush1.bf16.msra.mxu0 %v6938_v7  ;;  %v3511_v7 = vld [vmem:[%s12860_s7 + $0xa30] sm:$0xff]  ;;  %v6984_v21 = vpack.c.bf16 %v3617_v27, %v3610_v59  ;;  %v3736_v59 = vld [vmem:[%s12860_s7 + $0x1138] sm:$0xff] }
 0x49f   :  { %7135 = vmatpush3.bf16.msra.mxu1 %v7134_v51  ;;  %6941 = vmatprep.subr.bf16.mxu0 %v6940_v53  ;;  %v3518_v51 = vld [vmem:[%s12860_s7 + $0xa68] sm:$0xff]  ;;  %v3737_v53 = vld [vmem:[%s12860_s7 + $0x1140] sm:$0xff]  ;;  %v3715_v28 = vld [vmem:[%s12860_s7 + $0x1090] sm:$0xff] }
 0x4a0   :  { %7137 = vmatprep.subr.bf16.mxu1 %v7136_v17  ;;  %v3533_v17 = vld [vmem:[%s12860_s7 + $0xae0] sm:$0xff]  ;;  %v6958_v33 = vpack.c.bf16 %v3518_v51, %v3511_v7  ;;  %v7154_v34 = vpack.c.bf16 %v3744_v16, %v3737_v53  ;;  %v3631_v7 = vld [vmem:[%s12860_s7 + $0xdf0] sm:$0xff]  ;;  %v3630_v16 = vld [vmem:[%s12860_s7 + $0xde8] sm:$0xff] }
 0x4a1   :  { %v6960_v36 = vpack.c.bf16 %v3533_v17, %v3526_v30  ;;  %v3638_v30 = vld [vmem:[%s12860_s7 + $0xe28] sm:$0xff]  ;;  %v3645_v17 = vld [vmem:[%s12860_s7 + $0xe60] sm:$0xff]  ;;  %v3743_v27 = vld [vmem:[%s12860_s7 + $0x1170] sm:$0xff] }
 0x4a2   :  { %6943 = vmatpush1.bf16.msra.mxu0 %v6942_v39  ;;  %v3863_v39 = vld [vmem:[%s12860_s7 + $0x1530] sm:$0xff] }
 0x4a3   :  { %7139 = vmatpush3.bf16.msra.mxu1 %v7138_v37  ;;  %6945 = vmatprep.subr.bf16.mxu0 %v6944_v5  ;;  %v3870_v37 = vld [vmem:[%s12860_s7 + $0x1568] sm:$0xff]  ;;  %v3540_v5 = vld [vmem:[%s12860_s7 + $0xb18] sm:$0xff] }
 0x4a4   :  { %7141 = vmatprep.subr.bf16.mxu1 %v7140_v46  ;;  %v7157_v45 = vpack.c.bf16 %v3870_v37, %v3863_v39  ;;  %v3539_v46 = vld [vmem:[%s12860_s7 + $0xb10] sm:$0xff]  ;;  %v6964_v52 = vpack.c.bf16 %v3547_v22, %v3540_v5 }
 0x4a5   :  { %v6966_v15 = vpack.c.bf16 %v3546_v19, %v3539_v46  ;;  %v3659_v39 = vld [vmem:[%s12860_s7 + $0xed0] sm:$0xff]  ;;  %v3673_v46 = vld [vmem:[%s12860_s7 + $0xf40] sm:$0xff] }
 0x4a6   :  { %6947 = vmatpush1.bf16.msra.mxu0 %v6946_v54  ;;  %v6968_v54 = vpack.c.bf16 %v3561_v10, %v3554_v38  ;;  %v6996_v5 = vpack.c.bf16 %v3659_v39, %v3652_v11  ;;  %v3651_v22 = vld [vmem:[%s12860_s7 + $0xe90] sm:$0xff]  ;;  %v3665_v38 = vld [vmem:[%s12860_s7 + $0xf00] sm:$0xff]  ;;  %v3672_v10 = vld [vmem:[%s12860_s7 + $0xf38] sm:$0xff] }
 0x4a7   :  { %7143 = vmatpush3.bf16.msra.mxu1 %v7142_v55  ;;  %6949 = vmatprep.subr.bf16.mxu0 %v6948_v14  ;;  %v3560_v55 = vld [vmem:[%s12860_s7 + $0xbb8] sm:$0xff]  ;;  %v3778_v11 = vld [vmem:[%s12860_s7 + $0x1288] sm:$0xff]  ;;  %v3785_v39 = vld [vmem:[%s12860_s7 + $0x12c0] sm:$0xff] }
 0x4a8   :  { %7145 = vmatprep.subr.bf16.mxu1 %v7144_v61  ;;  %v3568_v14 = vld [vmem:[%s12860_s7 + $0xbf8] sm:$0xff]  ;;  %v3567_v61 = vld [vmem:[%s12860_s7 + $0xbf0] sm:$0xff] }
 0x4a9   :  { %v6972_v60 = vpack.c.bf16 %v3575_v56, %v3568_v14  ;;  %v6974_v1 = vpack.c.bf16 %v3574_v62, %v3567_v61  ;;  %v3694_v14 = vld [vmem:[%s12860_s7 + $0xfe8] sm:$0xff]  ;;  %v3701_v56 = vld [vmem:[%s12860_s7 + $0x1020] sm:$0xff]  ;;  %v3700_v62 = vld [vmem:[%s12860_s7 + $0x1018] sm:$0xff] }
 0x4aa   :  { %6951 = vmatpush1.bf16.msra.mxu0 %v6950_v43  ;;  %v3581_v43 = vld [vmem:[%s12860_s7 + $0xc60] sm:$0xff] }
 0x4ab   :  { %7147 = vmatpush3.bf16.msra.mxu1 %v7146_v57  ;;  %6953 = vmatprep.subr.bf16.mxu0 %v6952_v40  ;;  %v3588_v57 = vld [vmem:[%s12860_s7 + $0xc98] sm:$0xff]  ;;  %v3693_v61 = vld [vmem:[%s12860_s7 + $0xfe0] sm:$0xff] }
 0x4ac   :  { %7149 = vmatprep.subr.bf16.mxu1 %v7148_v8  ;;  %v3596_v40 = vld [vmem:[%s12860_s7 + $0xcd8] sm:$0xff]  ;;  %v6978_v41 = vpack.c.bf16 %v3588_v57, %v3581_v43  ;;  %v3595_v8 = vld [vmem:[%s12860_s7 + $0xcd0] sm:$0xff]  ;;  %v3714_v57 = vld [vmem:[%s12860_s7 + $0x1088] sm:$0xff] }
 0x4ad   :  { %v6980_v12 = vpack.c.bf16 %v3603_v13, %v3596_v40  ;;  %v6982_v20 = vpack.c.bf16 %v3602_v18, %v3595_v8  ;;  %v3707_v43 = vld [vmem:[%s12860_s7 + $0x1050] sm:$0xff]  ;;  %v3722_v40 = vld [vmem:[%s12860_s7 + $0x10c8] sm:$0xff]  ;;  %v3729_v13 = vld [vmem:[%s12860_s7 + $0x1100] sm:$0xff] }
 0x4ae   :  { %6955 = vmatpush1.bf16.msra.mxu0 %v6954_v23  ;;  %v3609_v23 = vld [vmem:[%s12860_s7 + $0xd40] sm:$0xff]  ;;  %v3728_v18 = vld [vmem:[%s12860_s7 + $0x10f8] sm:$0xff] }
 0x4af   :  { %7151 = vmatpush3.bf16.msra.mxu1 %v7150_v24  ;;  %6957 = vmatprep.subr.bf16.mxu0 %v6956_v25  ;;  %v3616_v24 = vld [vmem:[%s12860_s7 + $0xd78] sm:$0xff]  ;;  %v3721_v8 = vld [vmem:[%s12860_s7 + $0x10c0] sm:$0xff] }
 0x4b0   :  { %7153 = vmatprep.subr.bf16.mxu1 %v7152_v4  ;;  %v3624_v25 = vld [vmem:[%s12860_s7 + $0xdb8] sm:$0xff]  ;;  %v6986_v51 = vpack.c.bf16 %v3616_v24, %v3609_v23  ;;  %v3623_v4 = vld [vmem:[%s12860_s7 + $0xdb0] sm:$0xff]  ;;  %v3742_v24 = vld [vmem:[%s12860_s7 + $0x1168] sm:$0xff] }
 0x4b1   :  { %v6988_v53 = vpack.c.bf16 %v3631_v7, %v3624_v25  ;;  %v3735_v23 = vld [vmem:[%s12860_s7 + $0x1130] sm:$0xff]  ;;  %v3750_v25 = vld [vmem:[%s12860_s7 + $0x11a8] sm:$0xff]  ;;  %v3757_v7 = vld [vmem:[%s12860_s7 + $0x11e0] sm:$0xff] }
 0x4b2   :  { %6959 = vmatpush1.bf16.msra.mxu0 %v6958_v33  ;;  %v6990_v33 = vpack.c.bf16 %v3630_v16, %v3623_v4  ;;  %v3749_v4 = vld [vmem:[%s12860_s7 + $0x11a0] sm:$0xff]  ;;  %v3756_v16 = vld [vmem:[%s12860_s7 + $0x11d8] sm:$0xff] }
 0x4b3   :  { %7155 = vmatpush3.bf16.msra.mxu1 %v7154_v34  ;;  %6961 = vmatprep.subr.bf16.mxu0 %v6960_v36  ;;  %v6992_v34 = vpack.c.bf16 %v3645_v17, %v3638_v30  ;;  %v3637_v36 = vld [vmem:[%s12860_s7 + $0xe20] sm:$0xff]  ;;  %v3764_v30 = vld [vmem:[%s12860_s7 + $0x1218] sm:$0xff]  ;;  %v3771_v17 = vld [vmem:[%s12860_s7 + $0x1250] sm:$0xff] }
 0x4b4   :  { %7156 = vmatprep.subr.bf16.mxu1 %v7274_v63  ;;  %v3553_v63 = vld [vmem:[%s12860_s7 + $0xb80] sm:$0xff]  ;;  %v6994_v37 = vpack.c.bf16 %v3644_v26, %v3637_v36  ;;  %v3763_v36 = vld [vmem:[%s12860_s7 + $0x1210] sm:$0xff]  ;;  %v3770_v26 = vld [vmem:[%s12860_s7 + $0x1248] sm:$0xff] }
 0x4b5   :  { %v6970_v58 = vpack.c.bf16 %v3560_v55, %v3553_v63  ;;  %v3679_v63 = vld [vmem:[%s12860_s7 + $0xf70] sm:$0xff]  ;;  %v3686_v55 = vld [vmem:[%s12860_s7 + $0xfa8] sm:$0xff] }
 0x4b6   :  { %4968 = vmatmul.mubr.f32.vlgmr.msra.gmra.mrb[24].mxu1 %v11909_v48  ;;  %6963 = vmatpush1.bf16.msra.mxu0 %v6962_v42  ;;  %v3658_v42 = vld [vmem:[%s12860_s7 + $0xec8] sm:$0xff] }
 0x4b7   :  { %7158 = vmatpush3.bf16.msra.mxu1 %v7157_v45  ;;  %5415 = vmatprep.mubr.msk.f32.mxu1 %vm7275_vm14, %v7273_v3  ;;  %v3666_v45 = vld [vmem:[%s12860_s7 + $0xf08] sm:$0xff]  ;;  %v6998_v19 = vpack.c.bf16 %v3658_v42, %v3651_v22  ;;  %v3777_v22 = vld [vmem:[%s12860_s7 + $0x1280] sm:$0xff]  ;;  %v3784_v42 = vld [vmem:[%s12860_s7 + $0x12b8] sm:$0xff] }
 0x4b8   :  { %6965 = vmatprep.subr.bf16.mxu0 %v6964_v52  ;;  %v7000_v52 = vpack.c.bf16 %v3673_v46, %v3666_v45  ;;  %v3792_v45 = vld [vmem:[%s12860_s7 + $0x12f8] sm:$0xff]  ;;  %v3799_v46 = vld [vmem:[%s12860_s7 + $0x1330] sm:$0xff] }
 0x4ba   :  { %5416 = vmatmul.mubr.msk.f32.vlgmr.msra.gmra.mrb[26].mxu1 %vm645_vm5, %v11947_v6  ;;  %6967 = vmatpush1.bf16.msra.mxu0 %v6966_v15  ;;  %v3680_v15 = vld [vmem:[%s12860_s7 + $0xf78] sm:$0xff] }
 0x4bb   :  { %6969 = vmatprep.subr.bf16.mxu0 %v6968_v54 }
 0x4be   :  { %6971 = vmatpush1.bf16.msra.mxu0 %v6970_v58  ;;  %v7006_v58 = vpack.c.bf16 %v3686_v55, %v3679_v63  ;;  %v3805_v63 = vld [vmem:[%s12860_s7 + $0x1360] sm:$0xff]  ;;  %v3812_v55 = vld [vmem:[%s12860_s7 + $0x1398] sm:$0xff] }
 0x4bf   :  { %6973 = vmatprep.subr.bf16.mxu0 %v6972_v60  ;;  %v7008_v60 = vpack.c.bf16 %v3701_v56, %v3694_v14  ;;  %v3820_v14 = vld [vmem:[%s12860_s7 + $0x13d8] sm:$0xff]  ;;  %v3827_v56 = vld [vmem:[%s12860_s7 + $0x1410] sm:$0xff] }
 0x4c2   :  { %6975 = vmatpush1.bf16.msra.mxu0 %v6974_v1  ;;  %v7010_v1 = vpack.c.bf16 %v3700_v62, %v3693_v61  ;;  %v3819_v61 = vld [vmem:[%s12860_s7 + $0x13d0] sm:$0xff]  ;;  %v3826_v62 = vld [vmem:[%s12860_s7 + $0x1408] sm:$0xff] }
 0x4c3   :  { %6977 = vmatprep.subr.bf16.mxu0 %v6976_v9  ;;  %v7012_v9 = vpack.c.bf16 %v3715_v28, %v3708_v0  ;;  %v3834_v0 = vld [vmem:[%s12860_s7 + $0x1448] sm:$0xff]  ;;  %v3841_v28 = vld [vmem:[%s12860_s7 + $0x1480] sm:$0xff] }
 0x4c6   :  { %6979 = vmatpush1.bf16.msra.mxu0 %v6978_v41  ;;  %v7014_v41 = vpack.c.bf16 %v3714_v57, %v3707_v43  ;;  %v3833_v43 = vld [vmem:[%s12860_s7 + $0x1440] sm:$0xff]  ;;  %v3840_v57 = vld [vmem:[%s12860_s7 + $0x1478] sm:$0xff] }
 0x4c7   :  { %6981 = vmatprep.subr.bf16.mxu0 %v6980_v12  ;;  %v7016_v12 = vpack.c.bf16 %v3729_v13, %v3722_v40  ;;  %v3848_v40 = vld [vmem:[%s12860_s7 + $0x14b8] sm:$0xff]  ;;  %v3855_v13 = vld [vmem:[%s12860_s7 + $0x14f0] sm:$0xff] }
 0x4ca   :  { %6983 = vmatpush1.bf16.msra.mxu0 %v6982_v20  ;;  %v7018_v20 = vpack.c.bf16 %v3728_v18, %v3721_v8  ;;  %v3847_v8 = vld [vmem:[%s12860_s7 + $0x14b0] sm:$0xff]  ;;  %v3854_v18 = vld [vmem:[%s12860_s7 + $0x14e8] sm:$0xff] }
 0x4cb   :  { %6985 = vmatprep.subr.bf16.mxu0 %v6984_v21  ;;  %v7020_v21 = vpack.c.bf16 %v3743_v27, %v3736_v59  ;;  %v3862_v59 = vld [vmem:[%s12860_s7 + $0x1528] sm:$0xff]  ;;  %v3869_v27 = vld [vmem:[%s12860_s7 + $0x1560] sm:$0xff] }
 0x4ce   :  { %6987 = vmatpush1.bf16.msra.mxu0 %v6986_v51  ;;  %v7022_v51 = vpack.c.bf16 %v3742_v24, %v3735_v23  ;;  %v3861_v23 = vld [vmem:[%s12860_s7 + $0x1520] sm:$0xff]  ;;  %v3868_v24 = vld [vmem:[%s12860_s7 + $0x1558] sm:$0xff] }
 0x4cf   :  { %6989 = vmatprep.subr.bf16.mxu0 %v6988_v53  ;;  %v7024_v53 = vpack.c.bf16 %v3757_v7, %v3750_v25  ;;  %v7058_v25 = vpack.c.bf16 %v3868_v24, %v3861_v23  ;;  %v12816_v7 = vld [vmem:[%s12862_s8] sm:$0x7f] }
 0x4d2   :  { %6991 = vmatpush1.bf16.msra.mxu0 %v6990_v33  ;;  %v7026_v33 = vpack.c.bf16 %v3756_v16, %v3749_v4 }
 0x4d3   :  { %6993 = vmatprep.subr.bf16.mxu0 %v6992_v34  ;;  %v7028_v34 = vpack.c.bf16 %v3771_v17, %v3764_v30 }
 0x4d5   :  { %4615 = vmatmul.mubr.f32.vlgmr.msra.gmra.mrb[14].mxu0 %v11414_v2  ;;  %v3687_v2 = vld [vmem:[%s12860_s7 + $0xfb0] sm:$0xff] }
 0x4d6   :  { %6995 = vmatpush1.bf16.msra.mxu0 %v6994_v37  ;;  %4685 = vmatprep.mubr.f32.mxu0 %v11907_v44  ;;  %v7002_v44 = vpack.c.bf16 %v3672_v10, %v3665_v38  ;;  %v7004_v54 = vpack.c.bf16 %v3687_v2, %v3680_v15  ;;  %v7030_v37 = vpack.c.bf16 %v3770_v26, %v3763_v36  ;;  %v3791_v38 = vld [vmem:[%s12860_s7 + $0x12f0] sm:$0xff]  ;;  %v3798_v10 = vld [vmem:[%s12860_s7 + $0x1328] sm:$0xff]  ;;  %v3813_v2 = vld [vmem:[%s12860_s7 + $0x13a0] sm:$0xff] }
 0x4d7   :  { %6997 = vmatprep.subr.bf16.mxu0 %v6996_v5  ;;  %v7032_v5 = vpack.c.bf16 %v3785_v39, %v3778_v11  ;;  %v3806_v15 = vld [vmem:[%s12860_s7 + $0x1368] sm:$0xff] }
 0x4da   :  { %6999 = vmatpush1.bf16.msra.mxu0 %v6998_v19  ;;  %v7034_v19 = vpack.c.bf16 %v3784_v42, %v3777_v22 }
 0x4db   :  { %7001 = vmatprep.subr.bf16.mxu0 %v7000_v52  ;;  %v7036_v52 = vpack.c.bf16 %v3799_v46, %v3792_v45 }
 0x4de   :  { %7003 = vmatpush1.bf16.msra.mxu0 %v7002_v44  ;;  %v7038_v44 = vpack.c.bf16 %v3798_v10, %v3791_v38 }
 0x4df   :  { %7005 = vmatprep.subr.bf16.mxu0 %v7004_v54  ;;  %v7040_v54 = vpack.c.bf16 %v3813_v2, %v3806_v15 }
 0x4e2   :  { %7007 = vmatpush1.bf16.msra.mxu0 %v7006_v58  ;;  %v7042_v58 = vpack.c.bf16 %v3812_v55, %v3805_v63 }
 0x4e3   :  { %7009 = vmatprep.subr.bf16.mxu0 %v7008_v60  ;;  %v7044_v60 = vpack.c.bf16 %v3827_v56, %v3820_v14 }
 0x4e6   :  { %7011 = vmatpush1.bf16.msra.mxu0 %v7010_v1  ;;  %v7046_v1 = vpack.c.bf16 %v3826_v62, %v3819_v61 }
 0x4e7   :  { %7013 = vmatprep.subr.bf16.mxu0 %v7012_v9  ;;  %v7048_v9 = vpack.c.bf16 %v3841_v28, %v3834_v0 }
 0x4ea   :  { %7015 = vmatpush1.bf16.msra.mxu0 %v7014_v41  ;;  %v7050_v41 = vpack.c.bf16 %v3840_v57, %v3833_v43 }
 0x4eb   :  { %7017 = vmatprep.subr.bf16.mxu0 %v7016_v12  ;;  %v7052_v12 = vpack.c.bf16 %v3855_v13, %v3848_v40 }
 0x4ee   :  { %7019 = vmatpush1.bf16.msra.mxu0 %v7018_v20  ;;  %v7054_v20 = vpack.c.bf16 %v3854_v18, %v3847_v8 }
 0x4ef   :  { %7021 = vmatprep.subr.bf16.mxu0 %v7020_v21  ;;  %v7056_v21 = vpack.c.bf16 %v3869_v27, %v3862_v59 }
 0x4f2   :  { %7023 = vmatpush1.bf16.msra.mxu0 %v7022_v51  ;;  %v3876_v51 = vrot.slane %v12816_v7, %v7772_v29 }
 0x4f3   :  { %7025 = vmatprep.subr.bf16.mxu0 %v7024_v53  ;;  %v3884_v53 = vrot.slane %v12816_v7, %v7787_v50 }
 0x4f6   :  { %7027 = vmatpush1.bf16.msra.mxu0 %v7026_v33 }
 0x4f7   :  { %7029 = vmatprep.subr.bf16.mxu0 %v7028_v34 }
 0x4fa   :  { %7031 = vmatpush1.bf16.msra.mxu0 %v7030_v37 }
 0x4fb   :  { %7033 = vmatprep.subr.bf16.mxu0 %v7032_v5 }
 0x4fe   :  { %7035 = vmatpush1.bf16.msra.mxu0 %v7034_v19 }
 0x4ff   :  { %7037 = vmatprep.subr.bf16.mxu0 %v7036_v52 }
 0x502   :  { %7039 = vmatpush1.bf16.msra.mxu0 %v7038_v44 }
 0x503   :  { %7041 = vmatprep.subr.bf16.mxu0 %v7040_v54 }
 0x506   :  { %7043 = vmatpush1.bf16.msra.mxu0 %v7042_v58 }
 0x507   :  { %7045 = vmatprep.subr.bf16.mxu0 %v7044_v60 }
 0x50a   :  { %7047 = vmatpush1.bf16.msra.mxu0 %v7046_v1  ;;  %v3900_v1 = vrot.slane %v12816_v7, %v9157_v32 }
 0x50b   :  { %7049 = vmatprep.subr.bf16.mxu0 %v7048_v9 }
 0x50e   :  { %7051 = vmatpush1.bf16.msra.mxu0 %v7050_v41 }
 0x50f   :  { %7053 = vmatprep.subr.bf16.mxu0 %v7052_v12 }
 0x512   :  { %7055 = vmatpush1.bf16.msra.mxu0 %v7054_v20 }
 0x513   :  { %7057 = vmatprep.subr.bf16.mxu0 %v7056_v21 }
 0x515   :  { %4686 = vmatmul.mubr.f32.vlgmr.msra.gmra.mrb[14].mxu0 %v11909_v48  ;;  %v3880_v48 = vrot.slane %v12816_v7, %v7778_v31 }
 0x516   :  { %7059 = vmatpush1.bf16.msra.mxu0 %v7058_v25  ;;  %4756 = vmatprep.mubr.f32.mxu0 %v7273_v3  ;;  %v3888_v3 = vrot.slane %v12816_v7, %v7783_v35 }
 0x51d   :  { %5144 = vmatmul.mubr.msk.f32.vlgmr.msra.gmra.mrb[14].mxu0 %vm645_vm5, %v11947_v6 }
 0x528   :  { %v4190_v4 = vpop.f32.mrb[12].mxu0  ;;  %v4474_v16 = vpop.f32.mrb[18].mxu1 }
 0x529   :  { %v7173_v6 = vadd.f32 %v4190_v4, %v3876_v51  ;;  %v7175_v30 = vadd.f32 %v4474_v16, %v3884_v53  ;;  %v4192_v17 = vpop.f32.mrb[13].mxu0  ;;  %v4476_v33 = vpop.f32.mrb[19].mxu1 }
 0x52a   :  { %v7174_v34 = vadd.f32 %v4192_v17, %v3880_v48  ;;  %v7176_v36 = vadd.f32 %v4476_v33, %v3888_v3  ;;  %v3892_v48 = vrot.slane %v12816_v7, %v9475_v49  ;;  %v3896_v3 = vrot.slane %v12816_v7, %v9375_v47 }
 0x52b   :  { %v5043_v26 = vmin.f32 %v7173_v6, 0.0  ;;  %v5045_v11 = vmin.f32 %v7175_v30, 0.0  ;;  %vm5078_vm7 = vcmp.gt.f32.partialorder %v7173_v6, 0.0  ;;  %vm5080_vm8 = vcmp.gt.f32.partialorder %v7175_v30, 0.0 }
 0x52c   :  { %v5044_v29 = vmin.f32 %v7174_v34, 0.0  ;;  %v5046_v39 = vmin.f32 %v7176_v36, 0.0  ;;  %vm5079_vm9 = vcmp.gt.f32.partialorder %v7174_v34, 0.0  ;;  %vm5081_vm10 = vcmp.gt.f32.partialorder %v7176_v36, 0.0 }
 0x52d   :  { %v5050_v37 = vmul.f32 1.442695, %v5043_v26  ;;  %v5054_v50 = vmul.f32 1.442695, %v5045_v11 }
 0x52e   :  { %v5052_v5 = vmul.f32 1.442695, %v5044_v29  ;;  %v5056_v22 = vmul.f32 1.442695, %v5046_v39 }
 0x52f   :  { %7258 = vpow2.f32 %v5050_v37 }
 0x530   :  { %7260 = vpow2.f32 %v5054_v50 }
 0x531   :  { %7262 = vpow2.f32 %v5052_v5 }
 0x532   :  { %7264 = vpow2.f32 %v5056_v22 }
 0x539   :  { %v7259_v31 = vpop.eup %7258 }
 0x53a   :  { %v7261_v35 = vpop.eup %7260  ;;  %v5146_v42 = vadd.f32 -1.0, %v7259_v31 }
 0x53b   :  { %v7263_v45 = vpop.eup %7262  ;;  %v5148_v46 = vadd.f32 -1.0, %v7261_v35 }
 0x53c   :  { %v7265_v19 = vpop.eup %7264  ;;  %v5071_v52 = vmul.f32 1.6732632, %v5146_v42  ;;  %v5147_v38 = vadd.f32 -1.0, %v7263_v45 }
 0x53d   :  { %v5073_v10 = vmul.f32 1.6732632, %v5148_v46  ;;  %v5149_v15 = vadd.f32 -1.0, %v7265_v19 }
 0x53e   :  { %v5085_v2 = vsel %vm5078_vm7, %v7173_v6, %v5071_v52  ;;  %v5072_v44 = vmul.f32 1.6732632, %v5147_v38 }
 0x53f   :  { %v5092_v54 = vmul.f32 1.050701, %v5085_v2  ;;  %v5087_v63 = vsel %vm5080_vm8, %v7175_v30, %v5073_v10  ;;  %v5074_v55 = vmul.f32 1.6732632, %v5149_v15 }
 0x540   :  { %v5094_v14 = vmul.f32 1.050701, %v5087_v63  ;;  %v5086_v56 = vsel %vm5079_vm9, %v7174_v34, %v5072_v44 }
 0x541   :  { %5099 = vst [vmem:[%s12863_s9] sm:$0xff] %v5092_v54  ;;  %v5093_v58 = vmul.f32 1.050701, %v5086_v56  ;;  %v5088_v60 = vsel %vm5081_vm10, %v7176_v36, %v5074_v55 }
 0x542   :  { %5101 = vst [vmem:[%s12863_s9 + $0x10] sm:$0xff] %v5094_v14  ;;  %v5095_v61 = vmul.f32 1.050701, %v5088_v60 }
 0x543   :  { %5100 = vst [vmem:[%s12863_s9 + $0x8] sm:$0xff] %v5093_v58 }
 0x544   :  { %5102 = vst [vmem:[%s12863_s9 + $0x18] sm:$0xff] %v5095_v61 }
 0x548   :  { %v5328_v62 = vpop.f32.mrb[20].mxu1 }
 0x549   :  { %v5329_v0 = vpop.f32.mrb[21].mxu1 }
 0x54a   :  { %v5330_v28 = vadd.f32 %v5329_v0, %v5328_v62 }
 0x54c   :  { %v4830_v57 = vadd.f32 %v5330_v28, %v3900_v1 }
 0x568   :  { %v5363_v9 = vpop.f32.mrb[22].mxu1 }
 0x569   :  { %v5364_v43 = vpop.f32.mrb[23].mxu1 }
 0x56a   :  { %v5365_v40 = vadd.f32 %v5364_v43, %v5363_v9 }
 0x56c   :  { %v4900_v13 = vadd.f32 %v5365_v40, %v4830_v57 }
 0x589   :  { %v5398_v41 = vpop.f32.mrb[24].mxu1 }
 0x58a   :  { %v5399_v12 = vpop.f32.mrb[25].mxu1 }
 0x58b   :  { %v5400_v8 = vadd.f32 %v5399_v12, %v5398_v41 }
 0x58d   :  { %v4970_v18 = vadd.f32 %v5400_v8, %v4900_v13  ;;  %v5039_v59 = vpop.f32.mrb[26].mxu1 }
 0x58e   :  { %v5417_v27 = vpop.f32.mrb[27].mxu1 }
 0x58f   :  { %v5040_v20 = vadd.f32 %v5039_v59, %v4970_v18 }
 0x591   :  { %v5049_v21 = vmin.f32 %v5040_v20, 0.0  ;;  %vm5084_vm11 = vcmp.gt.f32.partialorder %v5040_v20, 0.0 }
 0x593   :  { %v5062_v23 = vmul.f32 1.442695, %v5049_v21 }
 0x595   :  { %7266 = vpow2.f32 %v5062_v23 }
 0x59f   :  { %v7267_v24 = vpop.eup %7266 }
 0x5a0   :  { %v5152_v25 = vadd.f32 -1.0, %v7267_v24 }
 0x5a2   :  { %v5077_v51 = vmul.f32 1.6732632, %v5152_v25 }
 0x5a4   :  { %v5091_v32 = vsel %vm5084_vm11, %v5040_v20, %v5077_v51 }
 0x5a5   :  { %v5098_v53 = vmul.f32 1.050701, %v5091_v32 }
 0x5a7   :  { %5105 = vst.msk [vmem:[%s12863_s9 + $0x30] sm:$0xff] %vm645_vm5, %v5098_v53 }
 0x5f0   :  { %v4758_v4 = vpop.f32.mrb[14].mxu0 }
 0x5f1   :  { %v7177_v16 = vadd.f32 %v4758_v4, %v3892_v48  ;;  %v4760_v6 = vpop.f32.mrb[15].mxu0 }
 0x5f2   :  { %v7178_v30 = vadd.f32 %v4760_v6, %v3896_v3 }
 0x5f3   :  { %v5047_v17 = vmin.f32 %v7177_v16, 0.0  ;;  %vm5082_vm5 = vcmp.gt.f32.partialorder %v7177_v16, 0.0 }
 0x5f4   :  { %v5048_v33 = vmin.f32 %v7178_v30, 0.0  ;;  %vm5083_vm12 = vcmp.gt.f32.partialorder %v7178_v30, 0.0 }
 0x5f5   :  { %v5058_v34 = vmul.f32 1.442695, %v5047_v17 }
 0x5f6   :  { %v5060_v36 = vmul.f32 1.442695, %v5048_v33 }
 0x5f7   :  { %7268 = vpow2.f32 %v5058_v34 }
 0x5f8   :  { %7270 = vpow2.f32 %v5060_v36 }
 0x601   :  { %v7269_v26 = vpop.eup %7268 }
 0x602   :  { %v7271_v11 = vpop.eup %7270  ;;  %v5150_v29 = vadd.f32 -1.0, %v7269_v26 }
 0x603   :  { %v5151_v39 = vadd.f32 -1.0, %v7271_v11 }
 0x604   :  { %v5075_v37 = vmul.f32 1.6732632, %v5150_v29 }
 0x605   :  { %v5076_v49 = vmul.f32 1.6732632, %v5151_v39 }
 0x606   :  { %v5089_v50 = vsel %vm5082_vm5, %v7177_v16, %v5075_v37 }
 0x607   :  { %v5096_v47 = vmul.f32 1.050701, %v5089_v50  ;;  %v5090_v7 = vsel %vm5083_vm12, %v7178_v30, %v5076_v49 }
 0x608   :  { %v5097_v5 = vmul.f32 1.050701, %v5090_v7 }
 0x609   :  { %5103 = vst [vmem:[%s12863_s9 + $0x20] sm:$0xff] %v5096_v47 }
 0x60a   :  { %5104 = vst [vmem:[%s12863_s9 + $0x28] sm:$0xff] %v5097_v5 }

</bundles_post_ra>
